<compile_context>
chip_gen: v7x
topology: tpu7x:2x2x1
jax: 0.10.0
libtpu: 0.0.40
codegen_flags: <defaults>
</compile_context>

<pallas_src>
import functools

import jax
import jax.numpy as jnp
from jax.experimental import pallas as pl
from jax.experimental.pallas import tpu as pltpu


def _round_up(x: int, m: int) -> int:
    return ((x + m - 1) // m) * m


def update_size(size, kernel_size, stride, dilation):
    """Same formula PyTorch uses for Conv2d 'valid' output size."""
    return tuple((s - dilation * (kernel_size - 1) - 1) // stride + 1 for s in size)


def _num_m_blocks_conv1() -> int:
    """2 M-blocks on v7x (one per TensorCore), 1 elsewhere (v5e / v6e)."""
    try:
        kind = jax.devices()[0].device_kind.lower()
    except Exception:
        return 1
    return 2 if ("v7" in kind or "7x" in kind) else 1


def _sigmoid(x):
    # exp + approx reciprocal -> EUP slots (cheap epilogue; ~1e-3 rel error,
    # well inside the test tolerance).
    return pl.reciprocal(1.0 + jnp.exp(-x), approx=True)


# ---------------------------------------------------------------------------
# Pallas kernel: transposed GEMM + bias (+ optional fused sigmoid)
#   o (Cout, M) = w (Cout, K) @ a (K, M) + b (Cout, 1)
# Output lane dim = M -> dense, unmasked vector stores.
# ---------------------------------------------------------------------------
def _gemm_ct_kernel(w_ref, a_ref, b_ref, o_ref, *, apply_sigmoid):
    acc = jnp.dot(w_ref[...], a_ref[...], preferred_element_type=jnp.float32)
    acc = acc + b_ref[...]                       # (Cout, TM) + (Cout, 1), f32
    if apply_sigmoid:
        acc = _sigmoid(acc)
    o_ref[...] = acc.astype(o_ref.dtype)


def gemm_ct(w, a, b_col, *, out_dtype=jnp.bfloat16, apply_sigmoid=False,
            num_m_blocks=1):
    """w: (Cout, K) bf16, a: (K, M) bf16, b_col: (Cout, 1) f32 -> (Cout, M).

    No operand padding: K / Cout blocks span the full array dims; the M grid is
    ragged (pl.cdiv).  NOTE: the last (ragged) M block reads out-of-range A
    columns (garbage) before the writeback is masked -- harmless because every
    output column is independent and the epilogue is elementwise.
    """
    Cout, K = w.shape
    K2, M = a.shape
    assert K == K2 and b_col.shape == (Cout, 1)

    if num_m_blocks > 1 and M > 256:
        tile_m = _round_up(-(-M // num_m_blocks), 128)
    else:
        tile_m = M                                # single full-extent block
    grid = (pl.cdiv(M, tile_m),)

    return pl.pallas_call(
        functools.partial(_gemm_ct_kernel, apply_sigmoid=apply_sigmoid),
        out_shape=jax.ShapeDtypeStruct((Cout, M), out_dtype),
        grid_spec=pltpu.PrefetchScalarGridSpec(
            num_scalar_prefetch=0,
            grid=grid,
            in_specs=[
                pl.BlockSpec((Cout, K), lambda i: (0, 0)),     # resident weights
                pl.BlockSpec((K, tile_m), lambda i: (0, i)),
                pl.BlockSpec((Cout, 1), lambda i: (0, 0)),
            ],
            out_specs=pl.BlockSpec((Cout, tile_m), lambda i: (0, i)),
        ),
        compiler_params=pltpu.CompilerParams(
            dimension_semantics=("parallel",)),
    )(w, a, b_col)


# ---------------------------------------------------------------------------
# Pallas kernel: fused conv2(+subset) + conv3 + Linear + Sigmoid
# ---------------------------------------------------------------------------
def _tail_kernel(p2_ref, w2_ref, b2_ref, w3_ref, b3_ref, wc_ref, bc_ref,
                 o_ref, x2_ref, p3_ref, *, batch, n_taps, c2):
    # conv2, evaluated only at the n_taps output positions conv3 actually reads.
    x2 = jnp.dot(p2_ref[...], w2_ref[...], preferred_element_type=jnp.float32)
    x2_ref[...] = (x2 + b2_ref[...]).astype(x2_ref.dtype)       # (n_taps*B, 32) bf16

    # Assemble conv3 patches (B, n_taps*c2): x2 row-group t -> lane block t.
    for t in range(n_taps):
        p3_ref[:, t * c2:(t + 1) * c2] = x2_ref[t * batch:(t + 1) * batch, :]

    feat = jnp.dot(p3_ref[...], w3_ref[...],
                   preferred_element_type=jnp.float32) + b3_ref[...]   # (B, 32) f32

    # Linear(32 -> 1) as VPU multiply + lane reduce (cheaper than a 1-wide MXU op).
    logits = jnp.sum(feat * wc_ref[...], axis=-1, keepdims=True) + bc_ref[...]
    o_ref[...] = _sigmoid(logits).astype(o_ref.dtype)


def tail_fused(p2, w2, b2, w3, b3, wc_row, bc, *, batch):
    """p2: (n_taps*batch, K2) bf16 conv2 patches; returns sigmoid logits (batch, 1)."""
    Mp, K2 = p2.shape
    c2 = w2.shape[1]
    K3, c3 = w3.shape
    n_taps = K3 // c2
    assert Mp == n_taps * batch and wc_row.shape == (1, c3) and bc.shape == (1, 1)

    return pl.pallas_call(
        functools.partial(_tail_kernel, batch=batch, n_taps=n_taps, c2=c2),
        out_shape=jax.ShapeDtypeStruct((batch, 1), jnp.float32),
        grid_spec=pltpu.PrefetchScalarGridSpec(
            num_scalar_prefetch=0,
            grid=(1,),
            in_specs=[
                pl.BlockSpec((Mp, K2), lambda i: (0, 0)),
                pl.BlockSpec((K2, c2), lambda i: (0, 0)),
                pl.BlockSpec((1, c2), lambda i: (0, 0)),
                pl.BlockSpec((K3, c3), lambda i: (0, 0)),
                pl.BlockSpec((1, c3), lambda i: (0, 0)),
                pl.BlockSpec((1, c3), lambda i: (0, 0)),
                pl.BlockSpec((1, 1), lambda i: (0, 0)),
            ],
            out_specs=pl.BlockSpec((batch, 1), lambda i: (0, 0)),
            scratch_shapes=[
                pltpu.VMEM((Mp, c2), jnp.bfloat16),      # x2 (conv2 output)
                pltpu.VMEM((batch, K3), jnp.bfloat16),   # conv3 patches
            ],
        ),
        compiler_params=pltpu.CompilerParams(
            dimension_semantics=("arbitrary",)),
    )(p2, w2, b2, w3, b3, wc_row, bc)


# ---------------------------------------------------------------------------
# XLA glue: transposed im2col (K, M) and conv2-subset patches
# ---------------------------------------------------------------------------
def _im2col_t(x_nhwc, kernel_size, stride, dilation):
    """(N,H,W,C) -> (k*k*C, N*OH*OW) transposed patches, K ordered (ky, kx, ci)."""
    N, H, W, C = x_nhwc.shape
    OH, OW = update_size((H, W), kernel_size, stride, dilation)
    rows = []
    for ky in range(kernel_size):
        for kx in range(kernel_size):
            ys, xs = ky * dilation, kx * dilation
            sl = jax.lax.slice(
                x_nhwc,
                (0, ys, xs, 0),
                (N, ys + (OH - 1) * stride + 1, xs + (OW - 1) * stride + 1, C),
                (1, stride, stride, 1),
            )                                               # (N, OH, OW, C)
            rows.append(jnp.moveaxis(sl, -1, 0).reshape(C, N * OH * OW))
    return jnp.concatenate(rows, axis=0), OH, OW            # (k*k*C, M)


def _conv2_even_patches(x1_cnhw, kernel_size=7, dilation=2):
    """conv2 patches at the 7x7 even output positions that a 1x1 conv3 reads.

    x1_cnhw: (C, N, H1, W1).  Rows ordered (oy, ox, n); columns (ky, kx, ci).
    conv2 output position 2*o reads x1 rows starting at 8*o -> stride-8 taps.
    """
    C, N, H, W = x1_cnhw.shape
    npos, sub_stride = 7, 8
    cols = []
    for ky in range(kernel_size):
        for kx in range(kernel_size):
            ys, xs = ky * dilation, kx * dilation
            sl = jax.lax.slice(
                x1_cnhw,
                (0, 0, ys, xs),
                (C, N, ys + (npos - 1) * sub_stride + 1,
                 xs + (npos - 1) * sub_stride + 1),
                (1, 1, sub_stride, sub_stride),
            )                                               # (C, N, 7, 7)
            cols.append(jnp.transpose(sl, (2, 3, 1, 0)).reshape(npos * npos * N, C))
    return jnp.concatenate(cols, axis=1)                    # (49*N, 49*C)


def _conv2d_fallback(x_nhwc, w_kc, b_row, *, kernel_size, stride, dilation):
    """Generic dilated/strided valid conv: XLA im2col + Pallas transposed GEMM."""
    N = x_nhwc.shape[0]
    cout = w_kc.shape[1]
    p, OH, OW = _im2col_t(x_nhwc, kernel_size, stride, dilation)
    yt = gemm_ct(jnp.transpose(w_kc), p, jnp.transpose(b_row))      # (cout, M)
    return jnp.transpose(yt.reshape(cout, N, OH, OW), (1, 2, 3, 0))


_M_BLOCKS_CONV1 = _num_m_blocks_conv1()


# ---------------------------------------------------------------------------
# Discriminator forward
# ---------------------------------------------------------------------------
def discriminator_forward(params, x_nchw):
    # NCHW (PyTorch) in; bf16 internally (accum / bias / sigmoid stay f32).
    x = jnp.transpose(x_nchw, (0, 2, 3, 1)).astype(jnp.bfloat16)
    N = x.shape[0]
    c1 = params["w1t"].shape[0]

    # conv1: transposed im2col (XLA glue) + lane-dense transposed GEMM (Pallas).
    p1, OH1, OW1 = _im2col_t(x, 7, 4, 4)                    # (147, N*OH1*OW1) bf16
    x1t = gemm_ct(params["w1t"], p1, params["b1"],
                  num_m_blocks=_M_BLOCKS_CONV1)             # (32, N*OH1*OW1) bf16

    OH2, OW2 = update_size((OH1, OW1), 7, 4, 2)
    OH3, OW3 = update_size((OH2, OW2), 7, 4, 2)

    if (OH3, OW3) == (1, 1):
        # conv3's 1x1 output only reads x2 at even spatial positions, so conv2
        # is evaluated only there; conv2 + conv3 + Linear + Sigmoid run in ONE
        # Pallas call, fully resident in VMEM (no intermediate HBM traffic).
        x1c = x1t.reshape(c1, N, OH1, OW1)
        p2 = _conv2_even_patches(x1c)                       # (49*N, 1568) bf16
        return tail_fused(p2, params["w2"], params["b2"], params["w3"],
                          params["b3"], params["w_cls"].reshape(1, -1),
                          params["b_cls"], batch=N)

    # Generic fallback (conv3 spatial != 1x1): unfused per-layer kernels.
    x1 = jnp.transpose(x1t.reshape(c1, N, OH1, OW1), (1, 2, 3, 0))      # NHWC
    x2 = _conv2d_fallback(x1, params["w2"], params["b2"],
                          kernel_size=7, stride=4, dilation=2)
    x3 = _conv2d_fallback(x2, params["w3"], params["b3"],
                          kernel_size=7, stride=4, dilation=2)
    n, oh, ow, c = x3.shape
    feat = jnp.transpose(x3, (0, 3, 1, 2)).reshape(n, c * oh * ow)      # NCHW flatten
    logits_t = gemm_ct(jnp.transpose(params["w_cls"]).astype(jnp.bfloat16),
                       jnp.transpose(feat), params["b_cls"],
                       out_dtype=jnp.float32, apply_sigmoid=True)
    return jnp.transpose(logits_t)


# Pure-JAX f32 reference (XLA conv) to validate the Pallas path.
def reference_forward(params, x_nchw):
    def conv(x, w_hwio, b2d, stride, dilation):
        w = jnp.transpose(w_hwio, (3, 2, 0, 1))  # HWIO -> OIHW
        y = jax.lax.conv_general_dilated(
            x, w, window_strides=(stride, stride), padding="VALID",
            rhs_dilation=(dilation, dilation),
            dimension_numbers=("NCHW", "OIHW", "NCHW"))
        return y + b2d.reshape(-1)[None, :, None, None]

    x1 = conv(x_nchw, params["w1_hwio"], params["b1"], 4, 4)
    x2 = conv(x1, params["w2_hwio"], params["b2"], 4, 2)
    x3 = conv(x2, params["w3_hwio"], params["b3"], 4, 2)
    feat = x3.reshape(x3.shape[0], -1)
    return jax.nn.sigmoid(feat @ params["w_cls"] + params["b_cls"])


def init_params(key, in_channels, img_size):
    ks = jax.random.split(key, 7)

    def conv_w(k, ksize, cin, cout):
        scale = 1.0 / jnp.sqrt(float(cin * ksize * ksize))
        return scale * jax.random.normal(k, (ksize, ksize, cin, cout), jnp.float32)

    w1 = conv_w(ks[0], 7, in_channels, 32)
    w2 = conv_w(ks[2], 7, 32, 32)
    w3 = conv_w(ks[4], 7, 32, 32)

    s = update_size(img_size, 7, 4, 4)
    s = update_size(s, 7, 4, 2)
    s = update_size(s, 7, 4, 2)
    f = s[0] * s[1] * 32
    w_cls = (1.0 / jnp.sqrt(float(f))) * jax.random.normal(
        ks[6], (f, 1), jnp.float32)

    return {
        # GEMM-form weights, reshaped + cast to bf16 ONCE (K order = (ky, kx, ci)).
        "w1t": jnp.transpose(w1.reshape(-1, 32)).astype(jnp.bfloat16),   # (32, 147)
        "b1": (0.01 * jax.random.normal(ks[1], (32,), jnp.float32)).reshape(32, 1),
        "w2": w2.reshape(-1, 32).astype(jnp.bfloat16),                   # (1568, 32)
        "b2": (0.01 * jax.random.normal(ks[3], (32,), jnp.float32)).reshape(1, 32),
        "w3": w3.reshape(-1, 32).astype(jnp.bfloat16),                   # (1568, 32)
        "b3": (0.01 * jax.random.normal(ks[5], (32,), jnp.float32)).reshape(1, 32),
        "w_cls": w_cls,                            # f32 (f, 1); fused path uses f32
        "b_cls": jnp.zeros((1, 1), jnp.float32),
        # f32 HWIO copies for the XLA reference path only.
        "w1_hwio": w1, "w2_hwio": w2, "w3_hwio": w3,
    }


if __name__ == "__main__":
    in_channels = 3
    # Smallest spatial size for which all three dilated/strided convs still
    # produce a >=1 spatial output (effective kernels 25, 13, 13; strides 4).
    img_size = (265, 265)
    batch = 2

    key = jax.random.PRNGKey(0)
    kp, kx = jax.random.split(key)
    params = init_params(kp, in_channels, img_size)
    x = jax.random.normal(kx, (batch, in_channels, *img_size), jnp.float32)

    fwd = jax.jit(discriminator_forward)
    y = jax.block_until_ready(fwd(params, x))
    y_ref = jax.block_until_ready(jax.jit(reference_forward)(params, x))

    assert y.shape == (batch, 1), y.shape
    # bf16 GEMM operands / bf16 intermediates vs. an all-f32 XLA reference.
    assert jnp.allclose(y, y_ref, rtol=2e-2, atol=2e-2), (y, y_ref)
    print("KERNEL_OK")
</pallas_src>

<mosaic_0001>
module attributes {stable_mosaic.version = 11 : i64} {
  func.func @_gemm_ct_kernel(%arg0: i32, %arg1: memref<32x147xbf16, #tpu.memory_space<vmem>>, %arg2: memref<147x7442xbf16, #tpu.memory_space<vmem>>, %arg3: memref<32x1xf32, #tpu.memory_space<vmem>>, %arg4: memref<32x7442xbf16, #tpu.memory_space<vmem>>) attributes {dimension_semantics = [#tpu.dimension_semantics<parallel>], iteration_bounds = array<i64: 1>, scalar_prefetch = 0 : i64, scratch_operands = 0 : i64, tpu.core_type = #tpu.core_type<tc>, window_params = [{pipeline_mode = #tpu.pipeline_mode<synchronous>, transform_indices = @transform_0, window_bounds = array<i64: 32, 147>}, {transform_indices = @transform_1, window_bounds = array<i64: 147, 7442>}, {pipeline_mode = #tpu.pipeline_mode<synchronous>, transform_indices = @transform_2, window_bounds = array<i64: 32, 1>}, {transform_indices = @transform_3, window_bounds = array<i64: 32, 7442>}]} {
    %c0 = arith.constant 0 : index
    %c0_0 = arith.constant 0 : index
    %0 = vector.load %arg1[%c0, %c0_0] : memref<32x147xbf16, #tpu.memory_space<vmem>>, vector<32x147xbf16>
    %c0_1 = arith.constant 0 : index
    %c0_2 = arith.constant 0 : index
    %1 = vector.load %arg2[%c0_1, %c0_2] : memref<147x7442xbf16, #tpu.memory_space<vmem>>, vector<147x7442xbf16>
    %cst = arith.constant dense<0.000000e+00> : vector<32x7442xf32>
    %2 = tpu.matmul %0, %1, %cst {dimension_numbers = #tpu.dot_dimension_numbers<[1], [0], [0], [1], [0, 0, 1, 1], [], []>} : vector<32x147xbf16>, vector<147x7442xbf16>, vector<32x7442xf32> -> vector<32x7442xf32>
    %c0_3 = arith.constant 0 : index
    %c0_4 = arith.constant 0 : index
    %3 = vector.load %arg3[%c0_3, %c0_4] : memref<32x1xf32, #tpu.memory_space<vmem>>, vector<32x1xf32>
    %4 = vector.broadcast %3 : vector<32x1xf32> to vector<32x7442xf32>
    %5 = arith.addf %2, %4 : vector<32x7442xf32>
    %6 = arith.truncf %5 : vector<32x7442xf32> to vector<32x7442xbf16>
    %c0_5 = arith.constant 0 : index
    %c0_6 = arith.constant 0 : index
    %7 = vector.load %arg4[%c0_5, %c0_6] : memref<32x7442xbf16, #tpu.memory_space<vmem>>, vector<32x7442xbf16>
    tpu.vector_store %arg4[%c0_5, %c0_6], %6 {strides = array<i32>} : memref<32x7442xbf16, #tpu.memory_space<vmem>>, vector<32x7442xbf16>,
    return
  }
  func.func @transform_0(%arg0: i32) -> (i32, i32) {
    %c0_i32 = arith.constant 0 : i32
    %c0_i32_0 = arith.constant 0 : i32
    %c0_i32_1 = arith.constant 0 : i32
    return %c0_i32, %c0_i32_0 : i32, i32
  }
  func.func @transform_1(%arg0: i32) -> (i32, i32) {
    %c0_i32 = arith.constant 0 : i32
    %c0_i32_0 = arith.constant 0 : i32
    return %c0_i32, %arg0 : i32, i32
  }
  func.func @transform_2(%arg0: i32) -> (i32, i32) {
    %c0_i32 = arith.constant 0 : i32
    %c0_i32_0 = arith.constant 0 : i32
    %c0_i32_1 = arith.constant 0 : i32
    return %c0_i32, %c0_i32_0 : i32, i32
  }
  func.func @transform_3(%arg0: i32) -> (i32, i32) {
    %c0_i32 = arith.constant 0 : i32
    %c0_i32_0 = arith.constant 0 : i32
    return %c0_i32, %arg0 : i32, i32
  }
}

module attributes {stable_mosaic.version = 11 : i64} {
  func.func @_tail_kernel(%arg0: i32, %arg1: memref<98x1568xbf16, #tpu.memory_space<vmem>>, %arg2: memref<1568x32xbf16, #tpu.memory_space<vmem>>, %arg3: memref<1x32xf32, #tpu.memory_space<vmem>>, %arg4: memref<1568x32xbf16, #tpu.memory_space<vmem>>, %arg5: memref<1x32xf32, #tpu.memory_space<vmem>>, %arg6: memref<1x32xf32, #tpu.memory_space<vmem>>, %arg7: memref<1x1xf32, #tpu.memory_space<vmem>>, %arg8: memref<2x1xf32, #tpu.memory_space<vmem>>, %arg9: memref<98x32xbf16, #tpu.memory_space<vmem>>, %arg10: memref<2x1568xbf16, #tpu.memory_space<vmem>>) attributes {dimension_semantics = [#tpu.dimension_semantics<arbitrary>], iteration_bounds = array<i64: 1>, scalar_prefetch = 0 : i64, scratch_operands = 2 : i64, tpu.core_type = #tpu.core_type<tc>, window_params = [{pipeline_mode = #tpu.pipeline_mode<synchronous>, transform_indices = @transform_0, window_bounds = array<i64: 98, 1568>}, {pipeline_mode = #tpu.pipeline_mode<synchronous>, transform_indices = @transform_1, window_bounds = array<i64: 1568, 32>}, {pipeline_mode = #tpu.pipeline_mode<synchronous>, transform_indices = @transform_2, window_bounds = array<i64: 1, 32>}, {pipeline_mode = #tpu.pipeline_mode<synchronous>, transform_indices = @transform_3, window_bounds = array<i64: 1568, 32>}, {pipeline_mode = #tpu.pipeline_mode<synchronous>, transform_indices = @transform_4, window_bounds = array<i64: 1, 32>}, {pipeline_mode = #tpu.pipeline_mode<synchronous>, transform_indices = @transform_5, window_bounds = array<i64: 1, 32>}, {pipeline_mode = #tpu.pipeline_mode<synchronous>, transform_indices = @transform_6, window_bounds = array<i64: 1, 1>}, {pipeline_mode = #tpu.pipeline_mode<synchronous>, transform_indices = @transform_7, window_bounds = array<i64: 2, 1>}]} {
    %c0 = arith.constant 0 : index
    %c0_0 = arith.constant 0 : index
    %0 = vector.load %arg1[%c0, %c0_0] : memref<98x1568xbf16, #tpu.memory_space<vmem>>, vector<98x1568xbf16>
    %c0_1 = arith.constant 0 : index
    %c0_2 = arith.constant 0 : index
    %1 = vector.load %arg2[%c0_1, %c0_2] : memref<1568x32xbf16, #tpu.memory_space<vmem>>, vector<1568x32xbf16>
    %cst = arith.constant dense<0.000000e+00> : vector<98x32xf32>
    %2 = tpu.matmul %0, %1, %cst {dimension_numbers = #tpu.dot_dimension_numbers<[1], [0], [0], [1], [0, 0, 1, 1], [], []>} : vector<98x1568xbf16>, vector<1568x32xbf16>, vector<98x32xf32> -> vector<98x32xf32>
    %c0_3 = arith.constant 0 : index
    %c0_4 = arith.constant 0 : index
    %3 = vector.load %arg3[%c0_3, %c0_4] : memref<1x32xf32, #tpu.memory_space<vmem>>, vector<1x32xf32>
    %4 = vector.broadcast %3 : vector<1x32xf32> to vector<98x32xf32>
    %5 = arith.addf %2, %4 : vector<98x32xf32>
    %6 = arith.truncf %5 : vector<98x32xf32> to vector<98x32xbf16>
    %c0_5 = arith.constant 0 : index
    %c0_6 = arith.constant 0 : index
    %7 = vector.load %arg9[%c0_5, %c0_6] : memref<98x32xbf16, #tpu.memory_space<vmem>>, vector<98x32xbf16>
    tpu.vector_store %arg9[%c0_5, %c0_6], %6 {strides = array<i32>} : memref<98x32xbf16, #tpu.memory_space<vmem>>, vector<98x32xbf16>,
    %c0_7 = arith.constant 0 : index
    %c0_8 = arith.constant 0 : index
    %8 = vector.load %arg9[%c0_7, %c0_8] : memref<98x32xbf16, #tpu.memory_space<vmem>>, vector<2x32xbf16>
    %c0_9 = arith.constant 0 : index
    %c0_10 = arith.constant 0 : index
    %9 = vector.load %arg10[%c0_9, %c0_10] : memref<2x1568xbf16, #tpu.memory_space<vmem>>, vector<2x32xbf16>
    tpu.vector_store %arg10[%c0_9, %c0_10], %8 {strides = array<i32>} : memref<2x1568xbf16, #tpu.memory_space<vmem>>, vector<2x32xbf16>,
    %c2 = arith.constant 2 : index
    %c0_11 = arith.constant 0 : index
    %10 = vector.load %arg9[%c2, %c0_11] : memref<98x32xbf16, #tpu.memory_space<vmem>>, vector<2x32xbf16>
    %c0_12 = arith.constant 0 : index
    %c32 = arith.constant 32 : index
    %11 = vector.load %arg10[%c0_12, %c32] : memref<2x1568xbf16, #tpu.memory_space<vmem>>, vector<2x32xbf16>
    tpu.vector_store %arg10[%c0_12, %c32], %10 {strides = array<i32>} : memref<2x1568xbf16, #tpu.memory_space<vmem>>, vector<2x32xbf16>,
    %c4 = arith.constant 4 : index
    %c0_13 = arith.constant 0 : index
    %12 = vector.load %arg9[%c4, %c0_13] : memref<98x32xbf16, #tpu.memory_space<vmem>>, vector<2x32xbf16>
    %c0_14 = arith.constant 0 : index
    %c64 = arith.constant 64 : index
    %13 = vector.load %arg10[%c0_14, %c64] : memref<2x1568xbf16, #tpu.memory_space<vmem>>, vector<2x32xbf16>
    tpu.vector_store %arg10[%c0_14, %c64], %12 {strides = array<i32>} : memref<2x1568xbf16, #tpu.memory_space<vmem>>, vector<2x32xbf16>,
    %c6 = arith.constant 6 : index
    %c0_15 = arith.constant 0 : index
    %14 = vector.load %arg9[%c6, %c0_15] : memref<98x32xbf16, #tpu.memory_space<vmem>>, vector<2x32xbf16>
    %c0_16 = arith.constant 0 : index
    %c96 = arith.constant 96 : index
    %15 = vector.load %arg10[%c0_16, %c96] : memref<2x1568xbf16, #tpu.memory_space<vmem>>, vector<2x32xbf16>
    tpu.vector_store %arg10[%c0_16, %c96], %14 {strides = array<i32>} : memref<2x1568xbf16, #tpu.memory_space<vmem>>, vector<2x32xbf16>,
    %c8 = arith.constant 8 : index
    %c0_17 = arith.constant 0 : index
    %16 = vector.load %arg9[%c8, %c0_17] : memref<98x32xbf16, #tpu.memory_space<vmem>>, vector<2x32xbf16>
    %c0_18 = arith.constant 0 : index
    %c128 = arith.constant 128 : index
    %17 = vector.load %arg10[%c0_18, %c128] : memref<2x1568xbf16, #tpu.memory_space<vmem>>, vector<2x32xbf16>
    tpu.vector_store %arg10[%c0_18, %c128], %16 {strides = array<i32>} : memref<2x1568xbf16, #tpu.memory_space<vmem>>, vector<2x32xbf16>,
    %c10 = arith.constant 10 : index
    %c0_19 = arith.constant 0 : index
    %18 = vector.load %arg9[%c10, %c0_19] : memref<98x32xbf16, #tpu.memory_space<vmem>>, vector<2x32xbf16>
    %c0_20 = arith.constant 0 : index
    %c160 = arith.constant 160 : index
    %19 = vector.load %arg10[%c0_20, %c160] : memref<2x1568xbf16, #tpu.memory_space<vmem>>, vector<2x32xbf16>
    tpu.vector_store %arg10[%c0_20, %c160], %18 {strides = array<i32>} : memref<2x1568xbf16, #tpu.memory_space<vmem>>, vector<2x32xbf16>,
    %c12 = arith.constant 12 : index
    %c0_21 = arith.constant 0 : index
    %20 = vector.load %arg9[%c12, %c0_21] : memref<98x32xbf16, #tpu.memory_space<vmem>>, vector<2x32xbf16>
    %c0_22 = arith.constant 0 : index
    %c192 = arith.constant 192 : index
    %21 = vector.load %arg10[%c0_22, %c192] : memref<2x1568xbf16, #tpu.memory_space<vmem>>, vector<2x32xbf16>
    tpu.vector_store %arg10[%c0_22, %c192], %20 {strides = array<i32>} : memref<2x1568xbf16, #tpu.memory_space<vmem>>, vector<2x32xbf16>,
    %c14 = arith.constant 14 : index
    %c0_23 = arith.constant 0 : index
    %22 = vector.load %arg9[%c14, %c0_23] : memref<98x32xbf16, #tpu.memory_space<vmem>>, vector<2x32xbf16>
    %c0_24 = arith.constant 0 : index
    %c224 = arith.constant 224 : index
    %23 = vector.load %arg10[%c0_24, %c224] : memref<2x1568xbf16, #tpu.memory_space<vmem>>, vector<2x32xbf16>
    tpu.vector_store %arg10[%c0_24, %c224], %22 {strides = array<i32>} : memref<2x1568xbf16, #tpu.memory_space<vmem>>, vector<2x32xbf16>,
    %c16 = arith.constant 16 : index
    %c0_25 = arith.constant 0 : index
    %24 = vector.load %arg9[%c16, %c0_25] : memref<98x32xbf16, #tpu.memory_space<vmem>>, vector<2x32xbf16>
    %c0_26 = arith.constant 0 : index
    %c256 = arith.constant 256 : index
    %25 = vector.load %arg10[%c0_26, %c256] : memref<2x1568xbf16, #tpu.memory_space<vmem>>, vector<2x32xbf16>
    tpu.vector_store %arg10[%c0_26, %c256], %24 {strides = array<i32>} : memref<2x1568xbf16, #tpu.memory_space<vmem>>, vector<2x32xbf16>,
    %c18 = arith.constant 18 : index
    %c0_27 = arith.constant 0 : index
    %26 = vector.load %arg9[%c18, %c0_27] : memref<98x32xbf16, #tpu.memory_space<vmem>>, vector<2x32xbf16>
    %c0_28 = arith.constant 0 : index
    %c288 = arith.constant 288 : index
    %27 = vector.load %arg10[%c0_28, %c288] : memref<2x1568xbf16, #tpu.memory_space<vmem>>, vector<2x32xbf16>
    tpu.vector_store %arg10[%c0_28, %c288], %26 {strides = array<i32>} : memref<2x1568xbf16, #tpu.memory_space<vmem>>, vector<2x32xbf16>,
    %c20 = arith.constant 20 : index
    %c0_29 = arith.constant 0 : index
    %28 = vector.load %arg9[%c20, %c0_29] : memref<98x32xbf16, #tpu.memory_space<vmem>>, vector<2x32xbf16>
    %c0_30 = arith.constant 0 : index
    %c320 = arith.constant 320 : index
    %29 = vector.load %arg10[%c0_30, %c320] : memref<2x1568xbf16, #tpu.memory_space<vmem>>, vector<2x32xbf16>
    tpu.vector_store %arg10[%c0_30, %c320], %28 {strides = array<i32>} : memref<2x1568xbf16, #tpu.memory_space<vmem>>, vector<2x32xbf16>,
    %c22 = arith.constant 22 : index
    %c0_31 = arith.constant 0 : index
    %30 = vector.load %arg9[%c22, %c0_31] : memref<98x32xbf16, #tpu.memory_space<vmem>>, vector<2x32xbf16>
    %c0_32 = arith.constant 0 : index
    %c352 = arith.constant 352 : index
    %31 = vector.load %arg10[%c0_32, %c352] : memref<2x1568xbf16, #tpu.memory_space<vmem>>, vector<2x32xbf16>
    tpu.vector_store %arg10[%c0_32, %c352], %30 {strides = array<i32>} : memref<2x1568xbf16, #tpu.memory_space<vmem>>, vector<2x32xbf16>,
    %c24 = arith.constant 24 : index
    %c0_33 = arith.constant 0 : index
    %32 = vector.load %arg9[%c24, %c0_33] : memref<98x32xbf16, #tpu.memory_space<vmem>>, vector<2x32xbf16>
    %c0_34 = arith.constant 0 : index
    %c384 = arith.constant 384 : index
    %33 = vector.load %arg10[%c0_34, %c384] : memref<2x1568xbf16, #tpu.memory_space<vmem>>, vector<2x32xbf16>
    tpu.vector_store %arg10[%c0_34, %c384], %32 {strides = array<i32>} : memref<2x1568xbf16, #tpu.memory_space<vmem>>, vector<2x32xbf16>,
    %c26 = arith.constant 26 : index
    %c0_35 = arith.constant 0 : index
    %34 = vector.load %arg9[%c26, %c0_35] : memref<98x32xbf16, #tpu.memory_space<vmem>>, vector<2x32xbf16>
    %c0_36 = arith.constant 0 : index
    %c416 = arith.constant 416 : index
    %35 = vector.load %arg10[%c0_36, %c416] : memref<2x1568xbf16, #tpu.memory_space<vmem>>, vector<2x32xbf16>
    tpu.vector_store %arg10[%c0_36, %c416], %34 {strides = array<i32>} : memref<2x1568xbf16, #tpu.memory_space<vmem>>, vector<2x32xbf16>,
    %c28 = arith.constant 28 : index
    %c0_37 = arith.constant 0 : index
    %36 = vector.load %arg9[%c28, %c0_37] : memref<98x32xbf16, #tpu.memory_space<vmem>>, vector<2x32xbf16>
    %c0_38 = arith.constant 0 : index
    %c448 = arith.constant 448 : index
    %37 = vector.load %arg10[%c0_38, %c448] : memref<2x1568xbf16, #tpu.memory_space<vmem>>, vector<2x32xbf16>
    tpu.vector_store %arg10[%c0_38, %c448], %36 {strides = array<i32>} : memref<2x1568xbf16, #tpu.memory_space<vmem>>, vector<2x32xbf16>,
    %c30 = arith.constant 30 : index
    %c0_39 = arith.constant 0 : index
    %38 = vector.load %arg9[%c30, %c0_39] : memref<98x32xbf16, #tpu.memory_space<vmem>>, vector<2x32xbf16>
    %c0_40 = arith.constant 0 : index
    %c480 = arith.constant 480 : index
    %39 = vector.load %arg10[%c0_40, %c480] : memref<2x1568xbf16, #tpu.memory_space<vmem>>, vector<2x32xbf16>
    tpu.vector_store %arg10[%c0_40, %c480], %38 {strides = array<i32>} : memref<2x1568xbf16, #tpu.memory_space<vmem>>, vector<2x32xbf16>,
    %c32_41 = arith.constant 32 : index
    %c0_42 = arith.constant 0 : index
    %40 = vector.load %arg9[%c32_41, %c0_42] : memref<98x32xbf16, #tpu.memory_space<vmem>>, vector<2x32xbf16>
    %c0_43 = arith.constant 0 : index
    %c512 = arith.constant 512 : index
    %41 = vector.load %arg10[%c0_43, %c512] : memref<2x1568xbf16, #tpu.memory_space<vmem>>, vector<2x32xbf16>
    tpu.vector_store %arg10[%c0_43, %c512], %40 {strides = array<i32>} : memref<2x1568xbf16, #tpu.memory_space<vmem>>, vector<2x32xbf16>,
    %c34 = arith.constant 34 : index
    %c0_44 = arith.constant 0 : index
    %42 = vector.load %arg9[%c34, %c0_44] : memref<98x32xbf16, #tpu.memory_space<vmem>>, vector<2x32xbf16>
    %c0_45 = arith.constant 0 : index
    %c544 = arith.constant 544 : index
    %43 = vector.load %arg10[%c0_45, %c544] : memref<2x1568xbf16, #tpu.memory_space<vmem>>, vector<2x32xbf16>
    tpu.vector_store %arg10[%c0_45, %c544], %42 {strides = array<i32>} : memref<2x1568xbf16, #tpu.memory_space<vmem>>, vector<2x32xbf16>,
    %c36 = arith.constant 36 : index
    %c0_46 = arith.constant 0 : index
    %44 = vector.load %arg9[%c36, %c0_46] : memref<98x32xbf16, #tpu.memory_space<vmem>>, vector<2x32xbf16>
    %c0_47 = arith.constant 0 : index
    %c576 = arith.constant 576 : index
    %45 = vector.load %arg10[%c0_47, %c576] : memref<2x1568xbf16, #tpu.memory_space<vmem>>, vector<2x32xbf16>
    tpu.vector_store %arg10[%c0_47, %c576], %44 {strides = array<i32>} : memref<2x1568xbf16, #tpu.memory_space<vmem>>, vector<2x32xbf16>,
    %c38 = arith.constant 38 : index
    %c0_48 = arith.constant 0 : index
    %46 = vector.load %arg9[%c38, %c0_48] : memref<98x32xbf16, #tpu.memory_space<vmem>>, vector<2x32xbf16>
    %c0_49 = arith.constant 0 : index
    %c608 = arith.constant 608 : index
    %47 = vector.load %arg10[%c0_49, %c608] : memref<2x1568xbf16, #tpu.memory_space<vmem>>, vector<2x32xbf16>
    tpu.vector_store %arg10[%c0_49, %c608], %46 {strides = array<i32>} : memref<2x1568xbf16, #tpu.memory_space<vmem>>, vector<2x32xbf16>,
    %c40 = arith.constant 40 : index
    %c0_50 = arith.constant 0 : index
    %48 = vector.load %arg9[%c40, %c0_50] : memref<98x32xbf16, #tpu.memory_space<vmem>>, vector<2x32xbf16>
    %c0_51 = arith.constant 0 : index
    %c640 = arith.constant 640 : index
    %49 = vector.load %arg10[%c0_51, %c640] : memref<2x1568xbf16, #tpu.memory_space<vmem>>, vector<2x32xbf16>
    tpu.vector_store %arg10[%c0_51, %c640], %48 {strides = array<i32>} : memref<2x1568xbf16, #tpu.memory_space<vmem>>, vector<2x32xbf16>,
    %c42 = arith.constant 42 : index
    %c0_52 = arith.constant 0 : index
    %50 = vector.load %arg9[%c42, %c0_52] : memref<98x32xbf16, #tpu.memory_space<vmem>>, vector<2x32xbf16>
    %c0_53 = arith.constant 0 : index
    %c672 = arith.constant 672 : index
    %51 = vector.load %arg10[%c0_53, %c672] : memref<2x1568xbf16, #tpu.memory_space<vmem>>, vector<2x32xbf16>
    tpu.vector_store %arg10[%c0_53, %c672], %50 {strides = array<i32>} : memref<2x1568xbf16, #tpu.memory_space<vmem>>, vector<2x32xbf16>,
    %c44 = arith.constant 44 : index
    %c0_54 = arith.constant 0 : index
    %52 = vector.load %arg9[%c44, %c0_54] : memref<98x32xbf16, #tpu.memory_space<vmem>>, vector<2x32xbf16>
    %c0_55 = arith.constant 0 : index
    %c704 = arith.constant 704 : index
    %53 = vector.load %arg10[%c0_55, %c704] : memref<2x1568xbf16, #tpu.memory_space<vmem>>, vector<2x32xbf16>
    tpu.vector_store %arg10[%c0_55, %c704], %52 {strides = array<i32>} : memref<2x1568xbf16, #tpu.memory_space<vmem>>, vector<2x32xbf16>,
    %c46 = arith.constant 46 : index
    %c0_56 = arith.constant 0 : index
    %54 = vector.load %arg9[%c46, %c0_56] : memref<98x32xbf16, #tpu.memory_space<vmem>>, vector<2x32xbf16>
    %c0_57 = arith.constant 0 : index
    %c736 = arith.constant 736 : index
    %55 = vector.load %arg10[%c0_57, %c736] : memref<2x1568xbf16, #tpu.memory_space<vmem>>, vector<2x32xbf16>
    tpu.vector_store %arg10[%c0_57, %c736], %54 {strides = array<i32>} : memref<2x1568xbf16, #tpu.memory_space<vmem>>, vector<2x32xbf16>,
    %c48 = arith.constant 48 : index
    %c0_58 = arith.constant 0 : index
    %56 = vector.load %arg9[%c48, %c0_58] : memref<98x32xbf16, #tpu.memory_space<vmem>>, vector<2x32xbf16>
    %c0_59 = arith.constant 0 : index
    %c768 = arith.constant 768 : index
    %57 = vector.load %arg10[%c0_59, %c768] : memref<2x1568xbf16, #tpu.memory_space<vmem>>, vector<2x32xbf16>
    tpu.vector_store %arg10[%c0_59, %c768], %56 {strides = array<i32>} : memref<2x1568xbf16, #tpu.memory_space<vmem>>, vector<2x32xbf16>,
    %c50 = arith.constant 50 : index
    %c0_60 = arith.constant 0 : index
    %58 = vector.load %arg9[%c50, %c0_60] : memref<98x32xbf16, #tpu.memory_space<vmem>>, vector<2x32xbf16>
    %c0_61 = arith.constant 0 : index
    %c800 = arith.constant 800 : index
    %59 = vector.load %arg10[%c0_61, %c800] : memref<2x1568xbf16, #tpu.memory_space<vmem>>, vector<2x32xbf16>
    tpu.vector_store %arg10[%c0_61, %c800], %58 {strides = array<i32>} : memref<2x1568xbf16, #tpu.memory_space<vmem>>, vector<2x32xbf16>,
    %c52 = arith.constant 52 : index
    %c0_62 = arith.constant 0 : index
    %60 = vector.load %arg9[%c52, %c0_62] : memref<98x32xbf16, #tpu.memory_space<vmem>>, vector<2x32xbf16>
    %c0_63 = arith.constant 0 : index
    %c832 = arith.constant 832 : index
    %61 = vector.load %arg10[%c0_63, %c832] : memref<2x1568xbf16, #tpu.memory_space<vmem>>, vector<2x32xbf16>
    tpu.vector_store %arg10[%c0_63, %c832], %60 {strides = array<i32>} : memref<2x1568xbf16, #tpu.memory_space<vmem>>, vector<2x32xbf16>,
    %c54 = arith.constant 54 : index
    %c0_64 = arith.constant 0 : index
    %62 = vector.load %arg9[%c54, %c0_64] : memref<98x32xbf16, #tpu.memory_space<vmem>>, vector<2x32xbf16>
    %c0_65 = arith.constant 0 : index
    %c864 = arith.constant 864 : index
    %63 = vector.load %arg10[%c0_65, %c864] : memref<2x1568xbf16, #tpu.memory_space<vmem>>, vector<2x32xbf16>
    tpu.vector_store %arg10[%c0_65, %c864], %62 {strides = array<i32>} : memref<2x1568xbf16, #tpu.memory_space<vmem>>, vector<2x32xbf16>,
    %c56 = arith.constant 56 : index
    %c0_66 = arith.constant 0 : index
    %64 = vector.load %arg9[%c56, %c0_66] : memref<98x32xbf16, #tpu.memory_space<vmem>>, vector<2x32xbf16>
    %c0_67 = arith.constant 0 : index
    %c896 = arith.constant 896 : index
    %65 = vector.load %arg10[%c0_67, %c896] : memref<2x1568xbf16, #tpu.memory_space<vmem>>, vector<2x32xbf16>
    tpu.vector_store %arg10[%c0_67, %c896], %64 {strides = array<i32>} : memref<2x1568xbf16, #tpu.memory_space<vmem>>, vector<2x32xbf16>,
    %c58 = arith.constant 58 : index
    %c0_68 = arith.constant 0 : index
    %66 = vector.load %arg9[%c58, %c0_68] : memref<98x32xbf16, #tpu.memory_space<vmem>>, vector<2x32xbf16>
    %c0_69 = arith.constant 0 : index
    %c928 = arith.constant 928 : index
    %67 = vector.load %arg10[%c0_69, %c928] : memref<2x1568xbf16, #tpu.memory_space<vmem>>, vector<2x32xbf16>
    tpu.vector_store %arg10[%c0_69, %c928], %66 {strides = array<i32>} : memref<2x1568xbf16, #tpu.memory_space<vmem>>, vector<2x32xbf16>,
    %c60 = arith.constant 60 : index
    %c0_70 = arith.constant 0 : index
    %68 = vector.load %arg9[%c60, %c0_70] : memref<98x32xbf16, #tpu.memory_space<vmem>>, vector<2x32xbf16>
    %c0_71 = arith.constant 0 : index
    %c960 = arith.constant 960 : index
    %69 = vector.load %arg10[%c0_71, %c960] : memref<2x1568xbf16, #tpu.memory_space<vmem>>, vector<2x32xbf16>
    tpu.vector_store %arg10[%c0_71, %c960], %68 {strides = array<i32>} : memref<2x1568xbf16, #tpu.memory_space<vmem>>, vector<2x32xbf16>,
    %c62 = arith.constant 62 : index
    %c0_72 = arith.constant 0 : index
    %70 = vector.load %arg9[%c62, %c0_72] : memref<98x32xbf16, #tpu.memory_space<vmem>>, vector<2x32xbf16>
    %c0_73 = arith.constant 0 : index
    %c992 = arith.constant 992 : index
    %71 = vector.load %arg10[%c0_73, %c992] : memref<2x1568xbf16, #tpu.memory_space<vmem>>, vector<2x32xbf16>
    tpu.vector_store %arg10[%c0_73, %c992], %70 {strides = array<i32>} : memref<2x1568xbf16, #tpu.memory_space<vmem>>, vector<2x32xbf16>,
    %c64_74 = arith.constant 64 : index
    %c0_75 = arith.constant 0 : index
    %72 = vector.load %arg9[%c64_74, %c0_75] : memref<98x32xbf16, #tpu.memory_space<vmem>>, vector<2x32xbf16>
    %c0_76 = arith.constant 0 : index
    %c1024 = arith.constant 1024 : index
    %73 = vector.load %arg10[%c0_76, %c1024] : memref<2x1568xbf16, #tpu.memory_space<vmem>>, vector<2x32xbf16>
    tpu.vector_store %arg10[%c0_76, %c1024], %72 {strides = array<i32>} : memref<2x1568xbf16, #tpu.memory_space<vmem>>, vector<2x32xbf16>,
    %c66 = arith.constant 66 : index
    %c0_77 = arith.constant 0 : index
    %74 = vector.load %arg9[%c66, %c0_77] : memref<98x32xbf16, #tpu.memory_space<vmem>>, vector<2x32xbf16>
    %c0_78 = arith.constant 0 : index
    %c1056 = arith.constant 1056 : index
    %75 = vector.load %arg10[%c0_78, %c1056] : memref<2x1568xbf16, #tpu.memory_space<vmem>>, vector<2x32xbf16>
    tpu.vector_store %arg10[%c0_78, %c1056], %74 {strides = array<i32>} : memref<2x1568xbf16, #tpu.memory_space<vmem>>, vector<2x32xbf16>,
    %c68 = arith.constant 68 : index
    %c0_79 = arith.constant 0 : index
    %76 = vector.load %arg9[%c68, %c0_79] : memref<98x32xbf16, #tpu.memory_space<vmem>>, vector<2x32xbf16>
    %c0_80 = arith.constant 0 : index
    %c1088 = arith.constant 1088 : index
    %77 = vector.load %arg10[%c0_80, %c1088] : memref<2x1568xbf16, #tpu.memory_space<vmem>>, vector<2x32xbf16>
    tpu.vector_store %arg10[%c0_80, %c1088], %76 {strides = array<i32>} : memref<2x1568xbf16, #tpu.memory_space<vmem>>, vector<2x32xbf16>,
    %c70 = arith.constant 70 : index
    %c0_81 = arith.constant 0 : index
    %78 = vector.load %arg9[%c70, %c0_81] : memref<98x32xbf16, #tpu.memory_space<vmem>>, vector<2x32xbf16>
    %c0_82 = arith.constant 0 : index
    %c1120 = arith.constant 1120 : index
    %79 = vector.load %arg10[%c0_82, %c1120] : memref<2x1568xbf16, #tpu.memory_space<vmem>>, vector<2x32xbf16>
    tpu.vector_store %arg10[%c0_82, %c1120], %78 {strides = array<i32>} : memref<2x1568xbf16, #tpu.memory_space<vmem>>, vector<2x32xbf16>,
    %c72 = arith.constant 72 : index
    %c0_83 = arith.constant 0 : index
    %80 = vector.load %arg9[%c72, %c0_83] : memref<98x32xbf16, #tpu.memory_space<vmem>>, vector<2x32xbf16>
    %c0_84 = arith.constant 0 : index
    %c1152 = arith.constant 1152 : index
    %81 = vector.load %arg10[%c0_84, %c1152] : memref<2x1568xbf16, #tpu.memory_space<vmem>>, vector<2x32xbf16>
    tpu.vector_store %arg10[%c0_84, %c1152], %80 {strides = array<i32>} : memref<2x1568xbf16, #tpu.memory_space<vmem>>, vector<2x32xbf16>,
    %c74 = arith.constant 74 : index
    %c0_85 = arith.constant 0 : index
    %82 = vector.load %arg9[%c74, %c0_85] : memref<98x32xbf16, #tpu.memory_space<vmem>>, vector<2x32xbf16>
    %c0_86 = arith.constant 0 : index
    %c1184 = arith.constant 1184 : index
    %83 = vector.load %arg10[%c0_86, %c1184] : memref<2x1568xbf16, #tpu.memory_space<vmem>>, vector<2x32xbf16>
    tpu.vector_store %arg10[%c0_86, %c1184], %82 {strides = array<i32>} : memref<2x1568xbf16, #tpu.memory_space<vmem>>, vector<2x32xbf16>,
    %c76 = arith.constant 76 : index
    %c0_87 = arith.constant 0 : index
    %84 = vector.load %arg9[%c76, %c0_87] : memref<98x32xbf16, #tpu.memory_space<vmem>>, vector<2x32xbf16>
    %c0_88 = arith.constant 0 : index
    %c1216 = arith.constant 1216 : index
    %85 = vector.load %arg10[%c0_88, %c1216] : memref<2x1568xbf16, #tpu.memory_space<vmem>>, vector<2x32xbf16>
    tpu.vector_store %arg10[%c0_88, %c1216], %84 {strides = array<i32>} : memref<2x1568xbf16, #tpu.memory_space<vmem>>, vector<2x32xbf16>,
    %c78 = arith.constant 78 : index
    %c0_89 = arith.constant 0 : index
    %86 = vector.load %arg9[%c78, %c0_89] : memref<98x32xbf16, #tpu.memory_space<vmem>>, vector<2x32xbf16>
    %c0_90 = arith.constant 0 : index
    %c1248 = arith.constant 1248 : index
    %87 = vector.load %arg10[%c0_90, %c1248] : memref<2x1568xbf16, #tpu.memory_space<vmem>>, vector<2x32xbf16>
    tpu.vector_store %arg10[%c0_90, %c1248], %86 {strides = array<i32>} : memref<2x1568xbf16, #tpu.memory_space<vmem>>, vector<2x32xbf16>,
    %c80 = arith.constant 80 : index
    %c0_91 = arith.constant 0 : index
    %88 = vector.load %arg9[%c80, %c0_91] : memref<98x32xbf16, #tpu.memory_space<vmem>>, vector<2x32xbf16>
    %c0_92 = arith.constant 0 : index
    %c1280 = arith.constant 1280 : index
    %89 = vector.load %arg10[%c0_92, %c1280] : memref<2x1568xbf16, #tpu.memory_space<vmem>>, vector<2x32xbf16>
    tpu.vector_store %arg10[%c0_92, %c1280], %88 {strides = array<i32>} : memref<2x1568xbf16, #tpu.memory_space<vmem>>, vector<2x32xbf16>,
    %c82 = arith.constant 82 : index
    %c0_93 = arith.constant 0 : index
    %90 = vector.load %arg9[%c82, %c0_93] : memref<98x32xbf16, #tpu.memory_space<vmem>>, vector<2x32xbf16>
    %c0_94 = arith.constant 0 : index
    %c1312 = arith.constant 1312 : index
    %91 = vector.load %arg10[%c0_94, %c1312] : memref<2x1568xbf16, #tpu.memory_space<vmem>>, vector<2x32xbf16>
    tpu.vector_store %arg10[%c0_94, %c1312], %90 {strides = array<i32>} : memref<2x1568xbf16, #tpu.memory_space<vmem>>, vector<2x32xbf16>,
    %c84 = arith.constant 84 : index
    %c0_95 = arith.constant 0 : index
    %92 = vector.load %arg9[%c84, %c0_95] : memref<98x32xbf16, #tpu.memory_space<vmem>>, vector<2x32xbf16>
    %c0_96 = arith.constant 0 : index
    %c1344 = arith.constant 1344 : index
    %93 = vector.load %arg10[%c0_96, %c1344] : memref<2x1568xbf16, #tpu.memory_space<vmem>>, vector<2x32xbf16>
    tpu.vector_store %arg10[%c0_96, %c1344], %92 {strides = array<i32>} : memref<2x1568xbf16, #tpu.memory_space<vmem>>, vector<2x32xbf16>,
    %c86 = arith.constant 86 : index
    %c0_97 = arith.constant 0 : index
    %94 = vector.load %arg9[%c86, %c0_97] : memref<98x32xbf16, #tpu.memory_space<vmem>>, vector<2x32xbf16>
    %c0_98 = arith.constant 0 : index
    %c1376 = arith.constant 1376 : index
    %95 = vector.load %arg10[%c0_98, %c1376] : memref<2x1568xbf16, #tpu.memory_space<vmem>>, vector<2x32xbf16>
    tpu.vector_store %arg10[%c0_98, %c1376], %94 {strides = array<i32>} : memref<2x1568xbf16, #tpu.memory_space<vmem>>, vector<2x32xbf16>,
    %c88 = arith.constant 88 : index
    %c0_99 = arith.constant 0 : index
    %96 = vector.load %arg9[%c88, %c0_99] : memref<98x32xbf16, #tpu.memory_space<vmem>>, vector<2x32xbf16>
    %c0_100 = arith.constant 0 : index
    %c1408 = arith.constant 1408 : index
    %97 = vector.load %arg10[%c0_100, %c1408] : memref<2x1568xbf16, #tpu.memory_space<vmem>>, vector<2x32xbf16>
    tpu.vector_store %arg10[%c0_100, %c1408], %96 {strides = array<i32>} : memref<2x1568xbf16, #tpu.memory_space<vmem>>, vector<2x32xbf16>,
    %c90 = arith.constant 90 : index
    %c0_101 = arith.constant 0 : index
    %98 = vector.load %arg9[%c90, %c0_101] : memref<98x32xbf16, #tpu.memory_space<vmem>>, vector<2x32xbf16>
    %c0_102 = arith.constant 0 : index
    %c1440 = arith.constant 1440 : index
    %99 = vector.load %arg10[%c0_102, %c1440] : memref<2x1568xbf16, #tpu.memory_space<vmem>>, vector<2x32xbf16>
    tpu.vector_store %arg10[%c0_102, %c1440], %98 {strides = array<i32>} : memref<2x1568xbf16, #tpu.memory_space<vmem>>, vector<2x32xbf16>,
    %c92 = arith.constant 92 : index
    %c0_103 = arith.constant 0 : index
    %100 = vector.load %arg9[%c92, %c0_103] : memref<98x32xbf16, #tpu.memory_space<vmem>>, vector<2x32xbf16>
    %c0_104 = arith.constant 0 : index
    %c1472 = arith.constant 1472 : index
    %101 = vector.load %arg10[%c0_104, %c1472] : memref<2x1568xbf16, #tpu.memory_space<vmem>>, vector<2x32xbf16>
    tpu.vector_store %arg10[%c0_104, %c1472], %100 {strides = array<i32>} : memref<2x1568xbf16, #tpu.memory_space<vmem>>, vector<2x32xbf16>,
    %c94 = arith.constant 94 : index
    %c0_105 = arith.constant 0 : index
    %102 = vector.load %arg9[%c94, %c0_105] : memref<98x32xbf16, #tpu.memory_space<vmem>>, vector<2x32xbf16>
    %c0_106 = arith.constant 0 : index
    %c1504 = arith.constant 1504 : index
    %103 = vector.load %arg10[%c0_106, %c1504] : memref<2x1568xbf16, #tpu.memory_space<vmem>>, vector<2x32xbf16>
    tpu.vector_store %arg10[%c0_106, %c1504], %102 {strides = array<i32>} : memref<2x1568xbf16, #tpu.memory_space<vmem>>, vector<2x32xbf16>,
    %c96_107 = arith.constant 96 : index
    %c0_108 = arith.constant 0 : index
    %104 = vector.load %arg9[%c96_107, %c0_108] : memref<98x32xbf16, #tpu.memory_space<vmem>>, vector<2x32xbf16>
    %c0_109 = arith.constant 0 : index
    %c1536 = arith.constant 1536 : index
    %105 = vector.load %arg10[%c0_109, %c1536] : memref<2x1568xbf16, #tpu.memory_space<vmem>>, vector<2x32xbf16>
    tpu.vector_store %arg10[%c0_109, %c1536], %104 {strides = array<i32>} : memref<2x1568xbf16, #tpu.memory_space<vmem>>, vector<2x32xbf16>,
    %c0_110 = arith.constant 0 : index
    %c0_111 = arith.constant 0 : index
    %106 = vector.load %arg10[%c0_110, %c0_111] : memref<2x1568xbf16, #tpu.memory_space<vmem>>, vector<2x1568xbf16>
    %c0_112 = arith.constant 0 : index
    %c0_113 = arith.constant 0 : index
    %107 = vector.load %arg4[%c0_112, %c0_113] : memref<1568x32xbf16, #tpu.memory_space<vmem>>, vector<1568x32xbf16>
    %cst_114 = arith.constant dense<0.000000e+00> : vector<2x32xf32>
    %108 = tpu.matmul %106, %107, %cst_114 {dimension_numbers = #tpu.dot_dimension_numbers<[1], [0], [0], [1], [0, 0, 1, 1], [], []>} : vector<2x1568xbf16>, vector<1568x32xbf16>, vector<2x32xf32> -> vector<2x32xf32>
    %c0_115 = arith.constant 0 : index
    %c0_116 = arith.constant 0 : index
    %109 = vector.load %arg5[%c0_115, %c0_116] : memref<1x32xf32, #tpu.memory_space<vmem>>, vector<1x32xf32>
    %110 = vector.broadcast %109 : vector<1x32xf32> to vector<2x32xf32>
    %111 = arith.addf %108, %110 : vector<2x32xf32>
    %c0_117 = arith.constant 0 : index
    %c0_118 = arith.constant 0 : index
    %112 = vector.load %arg6[%c0_117, %c0_118] : memref<1x32xf32, #tpu.memory_space<vmem>>, vector<1x32xf32>
    %113 = vector.broadcast %112 : vector<1x32xf32> to vector<2x32xf32>
    %114 = arith.mulf %111, %113 : vector<2x32xf32>
    %cst_119 = arith.constant dense<0.000000e+00> : vector<2xf32>
    %115 = vector.multi_reduction <add>, %114, %cst_119 [1] : vector<2x32xf32> to vector<2xf32>
    %116 = vector.shape_cast %115 : vector<2xf32> to vector<2x1xf32>
    %c0_120 = arith.constant 0 : index
    %c0_121 = arith.constant 0 : index
    %117 = vector.load %arg7[%c0_120, %c0_121] : memref<1x1xf32, #tpu.memory_space<vmem>>, vector<1x1xf32>
    %118 = vector.broadcast %117 : vector<1x1xf32> to vector<2x1xf32>
    %119 = arith.addf %116, %118 : vector<2x1xf32>
    %cst_122 = arith.constant 0.000000e+00 : f32
    %120 = vector.broadcast %cst_122 : f32 to vector<2x1xf32>
    %121 = arith.subf %120, %119 : vector<2x1xf32>
    %122 = math.exp %121 : vector<2x1xf32>
    %cst_123 = arith.constant 1.000000e+00 : f32
    %123 = vector.broadcast %cst_123 : f32 to vector<2x1xf32>
    %124 = arith.addf %123, %122 : vector<2x1xf32>
    %125 = tpu.reciprocal %124 {approx = true} : vector<2x1xf32> -> vector<2x1xf32>
    %c0_124 = arith.constant 0 : index
    %c0_125 = arith.constant 0 : index
    %126 = vector.load %arg8[%c0_124, %c0_125] : memref<2x1xf32, #tpu.memory_space<vmem>>, vector<2x1xf32>
    tpu.vector_store %arg8[%c0_124, %c0_125], %125 {strides = array<i32>} : memref<2x1xf32, #tpu.memory_space<vmem>>, vector<2x1xf32>,
    return
  }
  func.func @transform_0(%arg0: i32) -> (i32, i32) {
    %c0_i32 = arith.constant 0 : i32
    %c0_i32_0 = arith.constant 0 : i32
    %c0_i32_1 = arith.constant 0 : i32
    return %c0_i32, %c0_i32_0 : i32, i32
  }
  func.func @transform_1(%arg0: i32) -> (i32, i32) {
    %c0_i32 = arith.constant 0 : i32
    %c0_i32_0 = arith.constant 0 : i32
    %c0_i32_1 = arith.constant 0 : i32
    return %c0_i32, %c0_i32_0 : i32, i32
  }
  func.func @transform_2(%arg0: i32) -> (i32, i32) {
    %c0_i32 = arith.constant 0 : i32
    %c0_i32_0 = arith.constant 0 : i32
    %c0_i32_1 = arith.constant 0 : i32
    return %c0_i32, %c0_i32_0 : i32, i32
  }
  func.func @transform_3(%arg0: i32) -> (i32, i32) {
    %c0_i32 = arith.constant 0 : i32
    %c0_i32_0 = arith.constant 0 : i32
    %c0_i32_1 = arith.constant 0 : i32
    return %c0_i32, %c0_i32_0 : i32, i32
  }
  func.func @transform_4(%arg0: i32) -> (i32, i32) {
    %c0_i32 = arith.constant 0 : i32
    %c0_i32_0 = arith.constant 0 : i32
    %c0_i32_1 = arith.constant 0 : i32
    return %c0_i32, %c0_i32_0 : i32, i32
  }
  func.func @transform_5(%arg0: i32) -> (i32, i32) {
    %c0_i32 = arith.constant 0 : i32
    %c0_i32_0 = arith.constant 0 : i32
    %c0_i32_1 = arith.constant 0 : i32
    return %c0_i32, %c0_i32_0 : i32, i32
  }
  func.func @transform_6(%arg0: i32) -> (i32, i32) {
    %c0_i32 = arith.constant 0 : i32
    %c0_i32_0 = arith.constant 0 : i32
    %c0_i32_1 = arith.constant 0 : i32
    return %c0_i32, %c0_i32_0 : i32, i32
  }
  func.func @transform_7(%arg0: i32) -> (i32, i32) {
    %c0_i32 = arith.constant 0 : i32
    %c0_i32_0 = arith.constant 0 : i32
    %c0_i32_1 = arith.constant 0 : i32
    return %c0_i32, %c0_i32_0 : i32, i32
  }
}

</mosaic_0001>

<bundles_post_ra>
// kernel: discriminator_forward.2
= control target key start
LH: loop header
LB: loop body
LE: loop exit
PB: predicated region body
PF: predicated region fallthrough
CT: control target
= control target key end

     0   :  { %v7821_v2 = vmov 0   ;;  %vm3450_vm0 = vcmask 1040384   ;;  %vm3443_vm1 = vcmask 154624   ;;  %vm3451_vm2 = vcmask 1041408   ;;  %s10479_s1 = inlined_call_operand.vmem [shape: bf16[147,7442], index: 1, kind: input, shape index: {}]   ;;  %s10480_s0 = inlined_call_operand.vmem [shape: bf16[32,147], index: 0, kind: input, shape index: {}]   ;;  %s10481_s2 = inlined_call_operand.vmem [shape: f32[32,1], index: 2, kind: input, shape index: {}]   ;;  %s10482_s3 = inlined_call_operand.vmem [shape: bf16[32,7442], index: 3, kind: output, shape index: {}]  }
   0x1   :  { %v6952_v0 = vld [vmem:[%s10479_s1 + $0x4] ss:$236 sps:$4 sm:$0xff]   ;;  %v6954_v1 = vld [vmem:[%s10479_s1 + $0xc] ss:$236 sps:$4 sm:$0xff]   ;;  %6950 = vset.pattern.permute.xlu0 %v7821_v2  ;;  %6951 = vset.pattern.permute.xlu1 %v7821_v2  ;;  %v6957_v4 = vld [vmem:[%s10479_s1 + $0x8] ss:$236 sps:$4 sm:$0xff]  }
   0x2   :  { %3631 = vmatprep.subr.bf16.mxu0 %v6952_v0  ;;  %v6956_v3 = vld [vmem:[%s10479_s1] ss:$236 sps:$4 sm:$0xff]   ;;  %3684 = vmatprep.subr.bf16.mxu1 %v6954_v1  ;;  %v6958_v5 = vld [vmem:[%s10479_s1 + $0x1dc] ss:$236 sps:$4 sm:$0xff]   ;;  %v6960_v6 = vld [vmem:[%s10479_s1 + $0x1e4] ss:$236 sps:$4 sm:$0xff]  }
   0x3   :  { %3632 = vmatpush1.bf16.msra.mxu0 %v6956_v3  ;;  %3685 = vmatpush1.bf16.msra.mxu1 %v6957_v4  ;;  %v6962_v7 = vld [vmem:[%s10479_s1 + $0x1d8] ss:$236 sps:$4 sm:$0xff]   ;;  %v6963_v8 = vld [vmem:[%s10479_s1 + $0x1e0] ss:$236 sps:$4 sm:$0xff]   ;;  %v6966_v10 = vld [vmem:[%s10479_s1 + $0x3bc] ss:$236 sps:$4 sm:$0xff]  }
   0x4   :  { %3633 = vmatprep.subr.bf16.mxu0 %v6958_v5  ;;  %3686 = vmatprep.subr.bf16.mxu1 %v6960_v6  ;;  %v6964_v9 = vld [vmem:[%s10479_s1 + $0x3b4] ss:$236 sps:$4 sm:$0xff]   ;;  %v6968_v11 = vld [vmem:[%s10479_s1 + $0x3b0] ss:$236 sps:$4 sm:$0xff]   ;;  %v6969_v12 = vld [vmem:[%s10479_s1 + $0x3b8] ss:$236 sps:$4 sm:$0xff]  }
   0x5   :  { %v6970_v13 = vld [vmem:[%s10479_s1 + $0x58c] ss:$236 sps:$4 sm:$0xff]   ;;  %v6972_v14 = vld [vmem:[%s10479_s1 + $0x594] ss:$236 sps:$4 sm:$0xff]   ;;  %v6975_v16 = vld [vmem:[%s10479_s1 + $0x590] ss:$236 sps:$4 sm:$0xff]  }
   0x6   :  { %v6974_v15 = vld [vmem:[%s10479_s1 + $0x588] ss:$236 sps:$4 sm:$0xff]   ;;  %v6976_v17 = vld [vmem:[%s10479_s1 + $0x764] ss:$236 sps:$4 sm:$0xff]   ;;  %v6978_v18 = vld [vmem:[%s10479_s1 + $0x76c] ss:$236 sps:$4 sm:$0xff]  }
   0x7   :  { %3634 = vmatpush1.bf16.msra.mxu0 %v6962_v7  ;;  %3687 = vmatpush1.bf16.msra.mxu1 %v6963_v8  ;;  %v6980_v19 = vld [vmem:[%s10479_s1 + $0x760] ss:$236 sps:$4 sm:$0xff]   ;;  %v6981_v20 = vld [vmem:[%s10479_s1 + $0x768] ss:$236 sps:$4 sm:$0xff]   ;;  %v6984_v22 = vld [vmem:[%s10479_s1 + $0x944] ss:$236 sps:$4 sm:$0xff]  }
   0x8   :  { %3635 = vmatprep.subr.bf16.mxu0 %v6964_v9  ;;  %3688 = vmatprep.subr.bf16.mxu1 %v6966_v10  ;;  %v6982_v21 = vld [vmem:[%s10479_s1 + $0x93c] ss:$236 sps:$4 sm:$0xff]   ;;  %v6986_v23 = vld [vmem:[%s10479_s1 + $0x938] ss:$236 sps:$4 sm:$0xff]   ;;  %v6987_v24 = vld [vmem:[%s10479_s1 + $0x940] ss:$236 sps:$4 sm:$0xff]  }
   0x9   :  { %v6988_v25 = vld [vmem:[%s10479_s1 + $0xb14] ss:$236 sps:$4 sm:$0xff]   ;;  %v6990_v26 = vld [vmem:[%s10479_s1 + $0xb1c] ss:$236 sps:$4 sm:$0xff]   ;;  %v6993_v28 = vld [vmem:[%s10479_s1 + $0xb18] ss:$236 sps:$4 sm:$0xff]  }
   0xa   :  { %v6992_v27 = vld [vmem:[%s10479_s1 + $0xb10] ss:$236 sps:$4 sm:$0xff]   ;;  %v6994_v29 = vld [vmem:[%s10479_s1 + $0xcec] ss:$236 sps:$4 sm:$0xff]   ;;  %v6996_v30 = vld [vmem:[%s10479_s1 + $0xcf4] ss:$236 sps:$4 sm:$0xff]  }
   0xb   :  { %3636 = vmatpush1.bf16.msra.mxu0 %v6968_v11  ;;  %3689 = vmatpush1.bf16.msra.mxu1 %v6969_v12  ;;  %v559_v31 = vld [vmem:[%s10479_s1 + $0x1098] sm:$0x33]  ;;  %v7941_v32 = vld [vmem:[%s10480_s0 + $0x4] ss:$8 sps:$4 sm:$0xff]   ;;  %v7822_v34 = vmov 65535   ;;  %vm5958_vm3 = vcmask 142336  }
   0xc   :  { %3637 = vmatprep.subr.bf16.mxu0 %v6970_v13  ;;  %3690 = vmatprep.subr.bf16.mxu1 %v6972_v14  ;;  %v560_v33 = vld [vmem:[%s10479_s1 + $0x10a0] sm:$0x33]  ;;  %v3452_v35 = vsel %vm3450_vm0, 4294967295, %v7822_v34  ;;  %v6998_v36 = vld [vmem:[%s10479_s1 + $0xce8] ss:$236 sps:$4 sm:$0xff]   ;;  %v6590_v40 = vcombine.high %v559_v31, %v559_v31  ;;  %v6589_v45 = vcombine.low %v559_v31, %v559_v31 }
   0xd   :  { %6648 = vmatprep.mubr.msk.bf16.mxu0 %vm3443_vm1, %v7941_v32  ;;  %6650 = vmatprep.mubr.msk.bf16.mxu1 %vm3443_vm1, %v7941_v32  ;;  %v6999_v37 = vld [vmem:[%s10479_s1 + $0xcf0] ss:$236 sps:$4 sm:$0xff]   ;;  %v7002_v39 = vld [vmem:[%s10479_s1 + $0xecc] ss:$236 sps:$4 sm:$0xff]   ;;  %v6592_v41 = vcombine.high %v560_v33, %v560_v33  ;;  %v7962_v42 = vsel %vm3451_vm2, %v3452_v35, 0  ;;  %v6591_v46 = vcombine.low %v560_v33, %v560_v33 }
   0xe   :  { %v7000_v38 = vld [vmem:[%s10479_s1 + $0xec4] ss:$236 sps:$4 sm:$0xff]   ;;  %v7004_v43 = vld [vmem:[%s10479_s1 + $0xec0] ss:$236 sps:$4 sm:$0xff]   ;;  %v7005_v44 = vld [vmem:[%s10479_s1 + $0xec8] ss:$236 sps:$4 sm:$0xff]   ;;  %v3458_v47 = vand.u32 %v6590_v40, %v7962_v42  ;;  %v3455_v49 = vand.u32 %v6589_v45, %v7962_v42 }
   0xf   :  { %3638 = vmatpush1.bf16.msra.mxu0 %v6974_v15  ;;  %3691 = vmatpush1.bf16.msra.mxu1 %v6975_v16  ;;  %v3464_v48 = vand.u32 %v6592_v41, %v7962_v42  ;;  %v3461_v50 = vand.u32 %v6591_v46, %v7962_v42  ;;  %v7015_v51 = vld [vmem:[%s10479_s1 + $0x14] ss:$236 sps:$4 sm:$0xff]   ;;  %v7018_v52 = vld [vmem:[%s10479_s1 + $0x1c] ss:$236 sps:$4 sm:$0xff]   ;;  %v7016_v55 = vld [vmem:[%s10479_s1 + $0x18] ss:$236 sps:$4 sm:$0xff]  }
  0x10   :  { %3639 = vmatprep.subr.bf16.mxu0 %v6976_v17  ;;  %3692 = vmatprep.subr.bf16.mxu1 %v6978_v18  ;;  %v7983_v53 = vld [vmem:[%s10480_s0] ss:$8 sps:$4 sm:$0xff]   ;;  %v7013_v54 = vld [vmem:[%s10479_s1 + $0x10] ss:$236 sps:$4 sm:$0xff]   ;;  %v7021_v56 = vld [vmem:[%s10479_s1 + $0x1ec] ss:$236 sps:$4 sm:$0xff]  }
  0x11   :  { %v7024_v57 = vld [vmem:[%s10479_s1 + $0x1f4] ss:$236 sps:$4 sm:$0xff]   ;;  %v7022_v59 = vld [vmem:[%s10479_s1 + $0x1f0] ss:$236 sps:$4 sm:$0xff]   ;;  %v7030_v61 = vld [vmem:[%s10479_s1 + $0x3cc] ss:$236 sps:$4 sm:$0xff]  }
  0x12   :  { %v7019_v58 = vld [vmem:[%s10479_s1 + $0x1e8] ss:$236 sps:$4 sm:$0xff]   ;;  %v7027_v60 = vld [vmem:[%s10479_s1 + $0x3c4] ss:$236 sps:$4 sm:$0xff]   ;;  %v7025_v62 = vld [vmem:[%s10479_s1 + $0x3c0] ss:$236 sps:$4 sm:$0xff]  }
  0x13   :  { %3640 = vmatpush1.bf16.msra.mxu0 %v6980_v19  ;;  %3693 = vmatpush1.bf16.msra.mxu1 %v6981_v20  ;;  %v7028_v63 = vld [vmem:[%s10479_s1 + $0x3c8] ss:$236 sps:$4 sm:$0xff]   ;;  %v8025_v1 = vld [vmem:[%s10480_s0 + $0x10] ss:$8 sps:$4 sm:$0xff]   ;;  %v7034_v6 = vld [vmem:[%s10479_s1 + $0x5a0] ss:$236 sps:$4 sm:$0xff]  }
  0x14   :  { %3641 = vmatprep.subr.bf16.mxu0 %v6982_v21  ;;  %3694 = vmatprep.subr.bf16.mxu1 %v6984_v22  ;;  %v8020_v0 = vld [vmem:[%s10480_s0 + $0x14] ss:$8 sps:$4 sm:$0xff]   ;;  %v7036_v4 = vld [vmem:[%s10479_s1 + $0x5a4] ss:$236 sps:$4 sm:$0xff]   ;;  %v7045_v11 = vld [vmem:[%s10479_s1 + $0x94c] ss:$236 sps:$4 sm:$0xff]  }
  0x15   :  { %v7033_v3 = vld [vmem:[%s10479_s1 + $0x59c] ss:$236 sps:$4 sm:$0xff]   ;;  %v7031_v5 = vld [vmem:[%s10479_s1 + $0x598] ss:$236 sps:$4 sm:$0xff]   ;;  %v7039_v7 = vld [vmem:[%s10479_s1 + $0x774] ss:$236 sps:$4 sm:$0xff]  }
  0x16   :  { %v7042_v8 = vld [vmem:[%s10479_s1 + $0x77c] ss:$236 sps:$4 sm:$0xff]   ;;  %v7040_v10 = vld [vmem:[%s10479_s1 + $0x778] ss:$236 sps:$4 sm:$0xff]   ;;  %v7048_v12 = vld [vmem:[%s10479_s1 + $0x954] ss:$236 sps:$4 sm:$0xff]  }
  0x17   :  { %3642 = vmatpush1.bf16.msra.mxu0 %v6986_v23  ;;  %3695 = vmatpush1.bf16.msra.mxu1 %v6987_v24  ;;  %v7037_v9 = vld [vmem:[%s10479_s1 + $0x770] ss:$236 sps:$4 sm:$0xff]   ;;  %v7043_v13 = vld [vmem:[%s10479_s1 + $0x948] ss:$236 sps:$4 sm:$0xff]   ;;  %v7054_v16 = vld [vmem:[%s10479_s1 + $0xb2c] ss:$236 sps:$4 sm:$0xff]  }
  0x18   :  { %3643 = vmatprep.subr.bf16.mxu0 %v6988_v25  ;;  %3696 = vmatprep.subr.bf16.mxu1 %v6990_v26  ;;  %v7046_v14 = vld [vmem:[%s10479_s1 + $0x950] ss:$236 sps:$4 sm:$0xff]   ;;  %v7049_v17 = vld [vmem:[%s10479_s1 + $0xb20] ss:$236 sps:$4 sm:$0xff]   ;;  %v7052_v18 = vld [vmem:[%s10479_s1 + $0xb28] ss:$236 sps:$4 sm:$0xff]  }
  0x19   :  { %v7051_v15 = vld [vmem:[%s10479_s1 + $0xb24] ss:$236 sps:$4 sm:$0xff]   ;;  %v7057_v19 = vld [vmem:[%s10479_s1 + $0xcfc] ss:$236 sps:$4 sm:$0xff]   ;;  %v7058_v24 = vld [vmem:[%s10479_s1 + $0xd00] ss:$236 sps:$4 sm:$0xff]  }
  0x1a   :  { %v7060_v20 = vld [vmem:[%s10479_s1 + $0xd04] ss:$236 sps:$4 sm:$0xff]   ;;  %v561_v21 = vld [vmem:[%s10479_s1 + $0x10a8] sm:$0x33]  ;;  %v7066_v25 = vld [vmem:[%s10479_s1 + $0xed4] ss:$236 sps:$4 sm:$0xff]  }
  0x1b   :  { %3644 = vmatpush1.bf16.msra.mxu0 %v6992_v27  ;;  %3697 = vmatpush1.bf16.msra.mxu1 %v6993_v28  ;;  %v562_v22 = vld [vmem:[%s10479_s1 + $0x10b0] sm:$0x33]  ;;  %v7055_v23 = vld [vmem:[%s10479_s1 + $0xcf8] ss:$236 sps:$4 sm:$0xff]   ;;  %v7069_v26 = vld [vmem:[%s10479_s1 + $0xedc] ss:$236 sps:$4 sm:$0xff]   ;;  %v6594_v27 = vcombine.high %v561_v21, %v561_v21  ;;  %v6593_v31 = vcombine.low %v561_v21, %v561_v21 }
  0x1c   :  { %3645 = vmatprep.subr.bf16.mxu0 %v6994_v29  ;;  %3698 = vmatprep.subr.bf16.mxu1 %v6996_v30  ;;  %v6596_v28 = vcombine.high %v562_v22, %v562_v22  ;;  %v7064_v29 = vld [vmem:[%s10479_s1 + $0xed0] ss:$236 sps:$4 sm:$0xff]   ;;  %v7067_v30 = vld [vmem:[%s10479_s1 + $0xed8] ss:$236 sps:$4 sm:$0xff]   ;;  %v6595_v33 = vcombine.low %v562_v22, %v562_v22  ;;  %v7074_v40 = vld [vmem:[%s10479_s1 + $0x20] ss:$236 sps:$4 sm:$0xff]  }
  0x1d   :  { %v3470_v34 = vand.u32 %v6594_v27, %v7962_v42  ;;  %v589_v41 = vld [vmem:[%s10481_s2] sm:$0xff]  ;;  %v7125_v22 = vld [vmem:[%s10479_s1 + $0xee8] ss:$236 sps:$4 sm:$0xff]  }
  0x1e   :  { %v3476_v35 = vand.u32 %v6596_v28, %v7962_v42  ;;  %v7085_v45 = vld [vmem:[%s10479_s1 + $0x204] ss:$236 sps:$4 sm:$0xff]   ;;  %595 = vperm.xlu0 %6950, %v589_v41   ;;  %v7122_v21 = vld [vmem:[%s10479_s1 + $0xee0] ss:$236 sps:$4 sm:$0xff]   ;;  %v7147_v41 = vld [vmem:[%s10479_s1 + $0x3e8] ss:$236 sps:$4 sm:$0xff]  }
  0x1f   :  { %3646 = vmatpush1.bf16.msra.mxu0 %v6998_v36  ;;  %3699 = vmatpush1.bf16.msra.mxu1 %v6999_v37  ;;  %v3467_v36 = vand.u32 %v6593_v31, %v7962_v42  ;;  %v3473_v37 = vand.u32 %v6595_v33, %v7962_v42  ;;  %v7080_v46 = vld [vmem:[%s10479_s1 + $0x1f8] ss:$236 sps:$4 sm:$0xff]   ;;  %v7132_v31 = vld [vmem:[%s10479_s1 + $0x30] ss:$236 sps:$4 sm:$0xff]  }
  0x20   :  { %3647 = vmatprep.subr.bf16.mxu0 %v7000_v38  ;;  %3700 = vmatprep.subr.bf16.mxu1 %v7002_v39  ;;  %v7076_v38 = vld [vmem:[%s10479_s1 + $0x24] ss:$236 sps:$4 sm:$0xff]   ;;  %v7079_v39 = vld [vmem:[%s10479_s1 + $0x2c] ss:$236 sps:$4 sm:$0xff]  }
  0x21   :  { %v7135_v33 = vld [vmem:[%s10479_s1 + $0x38] ss:$236 sps:$4 sm:$0xff]  }
  0x23   :  { %3648 = vmatpush1.bf16.msra.mxu0 %v7004_v43  ;;  %3701 = vmatpush1.bf16.msra.mxu1 %v7005_v44  ;;  %v7077_v43 = vld [vmem:[%s10479_s1 + $0x28] ss:$236 sps:$4 sm:$0xff]  }
  0x24   :  { %3649 = vmatprep.subr.bf16.mxu0 %v3458_v47  ;;  %3702 = vmatprep.subr.bf16.mxu1 %v3464_v48  ;;  %v7082_v44 = vld [vmem:[%s10479_s1 + $0x1fc] ss:$236 sps:$4 sm:$0xff]   ;;  %v7083_v47 = vld [vmem:[%s10479_s1 + $0x200] ss:$236 sps:$4 sm:$0xff]  }
  0x25   :  { %v7088_v48 = vld [vmem:[%s10479_s1 + $0x3d4] ss:$236 sps:$4 sm:$0xff]  }
  0x27   :  { %3650 = vmatpush1.bf16.msra.mxu0 %v3455_v49  ;;  %3703 = vmatpush1.bf16.msra.mxu1 %v3461_v50  ;;  %v590_v49 = vld [vmem:[%s10481_s2 + $0x8] sm:$0xff] }
  0x28   :  { %3737 = vmatprep.subr.bf16.mxu0 %v7015_v51  ;;  %3790 = vmatprep.subr.bf16.mxu1 %v7018_v52  ;;  %v7091_v50 = vld [vmem:[%s10479_s1 + $0x3dc] ss:$236 sps:$4 sm:$0xff]   ;;  %v7089_v52 = vld [vmem:[%s10479_s1 + $0x3d8] ss:$236 sps:$4 sm:$0xff]  }
  0x29   :  { %v7086_v51 = vld [vmem:[%s10479_s1 + $0x3d0] ss:$236 sps:$4 sm:$0xff]   ;;  %600 = vperm.xlu0 %6950, %v590_v49  }
  0x2a   :  { %3664 = vmatmul.mubr.bf16.vlgmr.msra.gmra.mrb[0].mxu0 %v7983_v53  ;;  %3717 = vmatmul.mubr.bf16.vlgmr.msra.gmra.mrb[0].mxu1 %v7983_v53  ;;  %v7156_v49 = vld [vmem:[%s10479_s1 + $0x790] ss:$236 sps:$4 sm:$0xff]  }
  0x2b   :  { %3738 = vmatpush1.bf16.msra.mxu0 %v7013_v54  ;;  %3791 = vmatpush1.bf16.msra.mxu1 %v7016_v55  ;;  %v7094_v54 = vld [vmem:[%s10479_s1 + $0x5ac] ss:$236 sps:$4 sm:$0xff]   ;;  %v7097_v55 = vld [vmem:[%s10479_s1 + $0x5b4] ss:$236 sps:$4 sm:$0xff]  }
  0x2c   :  { %3739 = vmatprep.subr.bf16.mxu0 %v7021_v56  ;;  %3792 = vmatprep.subr.bf16.mxu1 %v7024_v57  ;;  %v7092_v56 = vld [vmem:[%s10479_s1 + $0x5a8] ss:$236 sps:$4 sm:$0xff]   ;;  %v7095_v57 = vld [vmem:[%s10479_s1 + $0x5b0] ss:$236 sps:$4 sm:$0xff]  }
  0x2d   :  { %6649 = vmatprep.mubr.msk.bf16.mxu0 %vm3443_vm1, %v8020_v0  ;;  %6651 = vmatprep.mubr.msk.bf16.mxu1 %vm3443_vm1, %v8020_v0 }
  0x2f   :  { %3740 = vmatpush1.bf16.msra.mxu0 %v7019_v58  ;;  %3793 = vmatpush1.bf16.msra.mxu1 %v7022_v59  ;;  %v7100_v58 = vld [vmem:[%s10479_s1 + $0x784] ss:$236 sps:$4 sm:$0xff]   ;;  %v7103_v59 = vld [vmem:[%s10479_s1 + $0x78c] ss:$236 sps:$4 sm:$0xff]  }
  0x30   :  { %3741 = vmatprep.subr.bf16.mxu0 %v7027_v60  ;;  %3794 = vmatprep.subr.bf16.mxu1 %v7030_v61  ;;  %v7098_v60 = vld [vmem:[%s10479_s1 + $0x780] ss:$236 sps:$4 sm:$0xff]   ;;  %v7101_v61 = vld [vmem:[%s10479_s1 + $0x788] ss:$236 sps:$4 sm:$0xff]  }
  0x32   :  { %3674 = vmatmul.mubr.bf16.gmra.mrb[4].mxu0 %v8025_v1  ;;  %3727 = vmatmul.mubr.bf16.gmra.mrb[4].mxu1 %v8025_v1 }
  0x33   :  { %3742 = vmatpush1.bf16.msra.mxu0 %v7025_v62  ;;  %3795 = vmatpush1.bf16.msra.mxu1 %v7028_v63  ;;  %v7106_v62 = vld [vmem:[%s10479_s1 + $0x95c] ss:$236 sps:$4 sm:$0xff]   ;;  %v7109_v63 = vld [vmem:[%s10479_s1 + $0x964] ss:$236 sps:$4 sm:$0xff]  }
  0x34   :  { %3743 = vmatprep.subr.bf16.mxu0 %v7033_v3  ;;  %3796 = vmatprep.subr.bf16.mxu1 %v7036_v4  ;;  %v7104_v3 = vld [vmem:[%s10479_s1 + $0x958] ss:$236 sps:$4 sm:$0xff]   ;;  %v7107_v4 = vld [vmem:[%s10479_s1 + $0x960] ss:$236 sps:$4 sm:$0xff]  }
  0x35   :  { %6652 = vmatprep.mubr.msk.bf16.mxu0 %vm3443_vm1, %v7941_v32  ;;  %6654 = vmatprep.mubr.msk.bf16.mxu1 %vm3443_vm1, %v7941_v32 }
  0x37   :  { %3744 = vmatpush1.bf16.msra.mxu0 %v7031_v5  ;;  %3797 = vmatpush1.bf16.msra.mxu1 %v7034_v6  ;;  %v7112_v5 = vld [vmem:[%s10479_s1 + $0xb34] ss:$236 sps:$4 sm:$0xff]   ;;  %v7115_v6 = vld [vmem:[%s10479_s1 + $0xb3c] ss:$236 sps:$4 sm:$0xff]  }
  0x38   :  { %3745 = vmatprep.subr.bf16.mxu0 %v7039_v7  ;;  %3798 = vmatprep.subr.bf16.mxu1 %v7042_v8  ;;  %v591_v7 = vld [vmem:[%s10481_s2 + $0x10] sm:$0xff] }
  0x39   :  { %v7110_v8 = vld [vmem:[%s10479_s1 + $0xb30] ss:$236 sps:$4 sm:$0xff]   ;;  %605 = vperm.xlu1 %6951, %v591_v7  }
  0x3b   :  { %3746 = vmatpush1.bf16.msra.mxu0 %v7037_v9  ;;  %3799 = vmatpush1.bf16.msra.mxu1 %v7040_v10  ;;  %v7113_v9 = vld [vmem:[%s10479_s1 + $0xb38] ss:$236 sps:$4 sm:$0xff]  }
  0x3c   :  { %3747 = vmatprep.subr.bf16.mxu0 %v7045_v11  ;;  %3800 = vmatprep.subr.bf16.mxu1 %v7048_v12  ;;  %v592_v10 = vld [vmem:[%s10481_s2 + $0x18] sm:$0xff]  ;;  %v7121_v12 = vld [vmem:[%s10479_s1 + $0xd14] ss:$236 sps:$4 sm:$0xff]  }
  0x3d   :  { %v7118_v11 = vld [vmem:[%s10479_s1 + $0xd0c] ss:$236 sps:$4 sm:$0xff]   ;;  %610 = vperm.xlu1 %6951, %v592_v10  }
  0x3f   :  { %3748 = vmatpush1.bf16.msra.mxu0 %v7043_v13  ;;  %3801 = vmatpush1.bf16.msra.mxu1 %v7046_v14  ;;  %v563_v13 = vld [vmem:[%s10479_s1 + $0x10b8] sm:$0x33]  ;;  %v564_v14 = vld [vmem:[%s10479_s1 + $0x10c0] sm:$0x33] }
  0x40   :  { %3749 = vmatprep.subr.bf16.mxu0 %v7051_v15  ;;  %3802 = vmatprep.subr.bf16.mxu1 %v7054_v16  ;;  %v7116_v15 = vld [vmem:[%s10479_s1 + $0xd08] ss:$236 sps:$4 sm:$0xff]   ;;  %v7119_v16 = vld [vmem:[%s10479_s1 + $0xd10] ss:$236 sps:$4 sm:$0xff]  }
  0x43   :  { %3750 = vmatpush1.bf16.msra.mxu0 %v7049_v17  ;;  %3803 = vmatpush1.bf16.msra.mxu1 %v7052_v18  ;;  %v7124_v17 = vld [vmem:[%s10479_s1 + $0xee4] ss:$236 sps:$4 sm:$0xff]   ;;  %v7127_v18 = vld [vmem:[%s10479_s1 + $0xeec] ss:$236 sps:$4 sm:$0xff]  }
  0x44   :  { %3751 = vmatprep.subr.bf16.mxu0 %v7057_v19  ;;  %3804 = vmatprep.subr.bf16.mxu1 %v7060_v20  ;;  %v6598_v19 = vcombine.high %v563_v13, %v563_v13  ;;  %v6600_v20 = vcombine.high %v564_v14, %v564_v14 }
  0x47   :  { %3752 = vmatpush1.bf16.msra.mxu0 %v7055_v23  ;;  %3805 = vmatpush1.bf16.msra.mxu1 %v7058_v24  ;;  %v6597_v23 = vcombine.low %v563_v13, %v563_v13  ;;  %v6599_v24 = vcombine.low %v564_v14, %v564_v14 }
  0x48   :  { %3753 = vmatprep.subr.bf16.mxu0 %v7066_v25  ;;  %3806 = vmatprep.subr.bf16.mxu1 %v7069_v26  ;;  %v3482_v25 = vand.u32 %v6598_v19, %v7962_v42  ;;  %v3488_v26 = vand.u32 %v6600_v20, %v7962_v42  ;;  %v7193_v19 = vld [vmem:[%s10479_s1 + $0x48] ss:$236 sps:$4 sm:$0xff]  }
  0x49   :  { %v3479_v27 = vand.u32 %v6597_v23, %v7962_v42  ;;  %v3485_v28 = vand.u32 %v6599_v24, %v7962_v42  ;;  %v7198_v20 = vld [vmem:[%s10479_s1 + $0x21c] ss:$236 sps:$4 sm:$0xff]   ;;  %v7199_v23 = vld [vmem:[%s10479_s1 + $0x220] ss:$236 sps:$4 sm:$0xff]  }
  0x4a   :  { %v7204_v24 = vld [vmem:[%s10479_s1 + $0x3f4] ss:$236 sps:$4 sm:$0xff]  }
  0x4b   :  { %3754 = vmatpush1.bf16.msra.mxu0 %v7064_v29  ;;  %3807 = vmatpush1.bf16.msra.mxu1 %v7067_v30  ;;  %v7134_v29 = vld [vmem:[%s10479_s1 + $0x34] ss:$236 sps:$4 sm:$0xff]   ;;  %v7137_v30 = vld [vmem:[%s10479_s1 + $0x3c] ss:$236 sps:$4 sm:$0xff]  }
  0x4c   :  { %3755 = vmatprep.subr.bf16.mxu0 %v3470_v34  ;;  %3808 = vmatprep.subr.bf16.mxu1 %v3476_v35  ;;  %v7140_v34 = vld [vmem:[%s10479_s1 + $0x20c] ss:$236 sps:$4 sm:$0xff]   ;;  %v7143_v35 = vld [vmem:[%s10479_s1 + $0x214] ss:$236 sps:$4 sm:$0xff]  }
  0x4f   :  { %3756 = vmatpush1.bf16.msra.mxu0 %v3467_v36  ;;  %3809 = vmatpush1.bf16.msra.mxu1 %v3473_v37  ;;  %v7138_v36 = vld [vmem:[%s10479_s1 + $0x208] ss:$236 sps:$4 sm:$0xff]   ;;  %v7141_v37 = vld [vmem:[%s10479_s1 + $0x210] ss:$236 sps:$4 sm:$0xff]  }
  0x50   :  { %3843 = vmatprep.subr.bf16.mxu0 %v7076_v38  ;;  %3896 = vmatprep.subr.bf16.mxu1 %v7079_v39  ;;  %v7146_v38 = vld [vmem:[%s10479_s1 + $0x3e4] ss:$236 sps:$4 sm:$0xff]   ;;  %v7149_v39 = vld [vmem:[%s10479_s1 + $0x3ec] ss:$236 sps:$4 sm:$0xff]  }
  0x52   :  { %3770 = vmatmul.mubr.bf16.vlgmr.msra.gmra.mrb[8].mxu0 %v7983_v53  ;;  %3823 = vmatmul.mubr.bf16.vlgmr.msra.gmra.mrb[8].mxu1 %v7983_v53 }
  0x53   :  { %3844 = vmatpush1.bf16.msra.mxu0 %v7074_v40  ;;  %3897 = vmatpush1.bf16.msra.mxu1 %v7077_v43  ;;  %v7144_v40 = vld [vmem:[%s10479_s1 + $0x3e0] ss:$236 sps:$4 sm:$0xff]   ;;  %v7152_v43 = vld [vmem:[%s10479_s1 + $0x5bc] ss:$236 sps:$4 sm:$0xff]  }
  0x54   :  { %3845 = vmatprep.subr.bf16.mxu0 %v7082_v44  ;;  %3898 = vmatprep.subr.bf16.mxu1 %v7085_v45  ;;  %v7155_v44 = vld [vmem:[%s10479_s1 + $0x5c4] ss:$236 sps:$4 sm:$0xff]  }
  0x55   :  { %6653 = vmatprep.mubr.msk.bf16.mxu0 %vm3443_vm1, %v8020_v0  ;;  %6655 = vmatprep.mubr.msk.bf16.mxu1 %vm3443_vm1, %v8020_v0  ;;  %v7150_v45 = vld [vmem:[%s10479_s1 + $0x5b8] ss:$236 sps:$4 sm:$0xff]  }
  0x57   :  { %3846 = vmatpush1.bf16.msra.mxu0 %v7080_v46  ;;  %3899 = vmatpush1.bf16.msra.mxu1 %v7083_v47  ;;  %v7153_v46 = vld [vmem:[%s10479_s1 + $0x5c0] ss:$236 sps:$4 sm:$0xff]  }
  0x58   :  { %3847 = vmatprep.subr.bf16.mxu0 %v7088_v48  ;;  %3900 = vmatprep.subr.bf16.mxu1 %v7091_v50  ;;  %v7158_v47 = vld [vmem:[%s10479_s1 + $0x794] ss:$236 sps:$4 sm:$0xff]   ;;  %v7161_v48 = vld [vmem:[%s10479_s1 + $0x79c] ss:$236 sps:$4 sm:$0xff]   ;;  %v7159_v50 = vld [vmem:[%s10479_s1 + $0x798] ss:$236 sps:$4 sm:$0xff]  }
  0x5a   :  { %3780 = vmatmul.mubr.bf16.gmra.mrb[12].mxu0 %v8025_v1  ;;  %3833 = vmatmul.mubr.bf16.gmra.mrb[12].mxu1 %v8025_v1 }
  0x5b   :  { %3848 = vmatpush1.bf16.msra.mxu0 %v7086_v51  ;;  %3901 = vmatpush1.bf16.msra.mxu1 %v7089_v52  ;;  %v7164_v51 = vld [vmem:[%s10479_s1 + $0x96c] ss:$236 sps:$4 sm:$0xff]   ;;  %v7162_v52 = vld [vmem:[%s10479_s1 + $0x968] ss:$236 sps:$4 sm:$0xff]  }
  0x5c   :  { %3849 = vmatprep.subr.bf16.mxu0 %v7094_v54  ;;  %3902 = vmatprep.subr.bf16.mxu1 %v7097_v55  ;;  %v7165_v54 = vld [vmem:[%s10479_s1 + $0x970] ss:$236 sps:$4 sm:$0xff]  }
  0x5d   :  { %6656 = vmatprep.mubr.msk.bf16.mxu0 %vm3443_vm1, %v7941_v32  ;;  %6658 = vmatprep.mubr.msk.bf16.mxu1 %vm3443_vm1, %v7941_v32  ;;  %v7170_v55 = vld [vmem:[%s10479_s1 + $0xb44] ss:$236 sps:$4 sm:$0xff]  }
  0x5f   :  { %3850 = vmatpush1.bf16.msra.mxu0 %v7092_v56  ;;  %3903 = vmatpush1.bf16.msra.mxu1 %v7095_v57  ;;  %v7173_v56 = vld [vmem:[%s10479_s1 + $0xb4c] ss:$236 sps:$4 sm:$0xff]  }
  0x60   :  { %3851 = vmatprep.subr.bf16.mxu0 %v7100_v58  ;;  %3904 = vmatprep.subr.bf16.mxu1 %v7103_v59  ;;  %v7168_v57 = vld [vmem:[%s10479_s1 + $0xb40] ss:$236 sps:$4 sm:$0xff]   ;;  %v7171_v58 = vld [vmem:[%s10479_s1 + $0xb48] ss:$236 sps:$4 sm:$0xff]  }
  0x61   :  { %v7176_v59 = vld [vmem:[%s10479_s1 + $0xd1c] ss:$236 sps:$4 sm:$0xff]  }
  0x63   :  { %3852 = vmatpush1.bf16.msra.mxu0 %v7098_v60  ;;  %3905 = vmatpush1.bf16.msra.mxu1 %v7101_v61  ;;  %v7179_v60 = vld [vmem:[%s10479_s1 + $0xd24] ss:$236 sps:$4 sm:$0xff]   ;;  %v565_v61 = vld [vmem:[%s10479_s1 + $0x10c8] sm:$0x33] }
  0x64   :  { %3853 = vmatprep.subr.bf16.mxu0 %v7106_v62  ;;  %3906 = vmatprep.subr.bf16.mxu1 %v7109_v63  ;;  %v566_v62 = vld [vmem:[%s10479_s1 + $0x10d0] sm:$0x33]  ;;  %v7174_v63 = vld [vmem:[%s10479_s1 + $0xd18] ss:$236 sps:$4 sm:$0xff]   ;;  %v6601_v10 = vcombine.low %v565_v61, %v565_v61 }
  0x65   :  { %v6604_v7 = vcombine.high %v566_v62, %v566_v62 }
  0x66   :  { %v3491_v14 = vand.u32 %v6601_v10, %v7962_v42  ;;  %v7262_v10 = vld [vmem:[%s10479_s1 + $0x404] ss:$236 sps:$4 sm:$0xff]  }
  0x67   :  { %3854 = vmatpush1.bf16.msra.mxu0 %v7104_v3  ;;  %3907 = vmatpush1.bf16.msra.mxu1 %v7107_v4  ;;  %v7177_v3 = vld [vmem:[%s10479_s1 + $0xd20] ss:$236 sps:$4 sm:$0xff]   ;;  %v3500_v13 = vand.u32 %v6604_v7, %v7962_v42 }
  0x68   :  { %3855 = vmatprep.subr.bf16.mxu0 %v7112_v5  ;;  %3908 = vmatprep.subr.bf16.mxu1 %v7115_v6  ;;  %v7182_v4 = vld [vmem:[%s10479_s1 + $0xef4] ss:$236 sps:$4 sm:$0xff]   ;;  %v7185_v5 = vld [vmem:[%s10479_s1 + $0xefc] ss:$236 sps:$4 sm:$0xff]   ;;  %v6602_v6 = vcombine.high %v565_v61, %v565_v61 }
  0x69   :  { %v8547_v7 = vld [vmem:[%s10480_s0] ss:$8 sps:$4 sm:$0xff]  }
  0x6b   :  { %3856 = vmatpush1.bf16.msra.mxu0 %v7110_v8  ;;  %3909 = vmatpush1.bf16.msra.mxu1 %v7113_v9  ;;  %v7180_v8 = vld [vmem:[%s10479_s1 + $0xef0] ss:$236 sps:$4 sm:$0xff]   ;;  %v7183_v9 = vld [vmem:[%s10479_s1 + $0xef8] ss:$236 sps:$4 sm:$0xff]  }
  0x6c   :  { %3857 = vmatprep.subr.bf16.mxu0 %v7118_v11  ;;  %3910 = vmatprep.subr.bf16.mxu1 %v7121_v12  ;;  %v6603_v11 = vcombine.low %v566_v62, %v566_v62  ;;  %v3494_v12 = vand.u32 %v6602_v6, %v7962_v42  ;;  %v7250_v62 = vld [vmem:[%s10479_s1 + $0x54] ss:$236 sps:$4 sm:$0xff]  }
  0x6d   :  { %v7259_v6 = vld [vmem:[%s10479_s1 + $0x234] ss:$236 sps:$4 sm:$0xff]  }
  0x6f   :  { %3858 = vmatpush1.bf16.msra.mxu0 %v7116_v15  ;;  %3911 = vmatpush1.bf16.msra.mxu1 %v7119_v16  ;;  %v3497_v15 = vand.u32 %v6603_v11, %v7962_v42  ;;  %v7192_v16 = vld [vmem:[%s10479_s1 + $0x44] ss:$236 sps:$4 sm:$0xff]   ;;  %v7265_v11 = vld [vmem:[%s10479_s1 + $0x40c] ss:$236 sps:$4 sm:$0xff]  }
  0x70   :  { %3859 = vmatprep.subr.bf16.mxu0 %v7124_v17  ;;  %3912 = vmatprep.subr.bf16.mxu1 %v7127_v18  ;;  %v7195_v17 = vld [vmem:[%s10479_s1 + $0x4c] ss:$236 sps:$4 sm:$0xff]  }
  0x71   :  { %v7190_v18 = vld [vmem:[%s10479_s1 + $0x40] ss:$236 sps:$4 sm:$0xff]  }
  0x73   :  { %3860 = vmatpush1.bf16.msra.mxu0 %v7122_v21  ;;  %3913 = vmatpush1.bf16.msra.mxu1 %v7125_v22  ;;  %v7201_v21 = vld [vmem:[%s10479_s1 + $0x224] ss:$236 sps:$4 sm:$0xff]  }
  0x74   :  { %3861 = vmatprep.subr.bf16.mxu0 %v3482_v25  ;;  %3914 = vmatprep.subr.bf16.mxu1 %v3488_v26  ;;  %v7196_v22 = vld [vmem:[%s10479_s1 + $0x218] ss:$236 sps:$4 sm:$0xff]   ;;  %v7202_v25 = vld [vmem:[%s10479_s1 + $0x3f0] ss:$236 sps:$4 sm:$0xff]  }
  0x75   :  { %v7205_v26 = vld [vmem:[%s10479_s1 + $0x3f8] ss:$236 sps:$4 sm:$0xff]  }
  0x77   :  { %3862 = vmatpush1.bf16.msra.mxu0 %v3479_v27  ;;  %3915 = vmatpush1.bf16.msra.mxu1 %v3485_v28  ;;  %v7210_v27 = vld [vmem:[%s10479_s1 + $0x5cc] ss:$236 sps:$4 sm:$0xff]   ;;  %v7208_v28 = vld [vmem:[%s10479_s1 + $0x5c8] ss:$236 sps:$4 sm:$0xff]  }
  0x78   :  { %3949 = vmatprep.subr.bf16.mxu0 %v7134_v29  ;;  %4002 = vmatprep.subr.bf16.mxu1 %v7137_v30  ;;  %v7211_v29 = vld [vmem:[%s10479_s1 + $0x5d0] ss:$236 sps:$4 sm:$0xff]  }
  0x79   :  { %v7216_v30 = vld [vmem:[%s10479_s1 + $0x7a4] ss:$236 sps:$4 sm:$0xff]  }
  0x7a   :  { %3876 = vmatmul.mubr.bf16.vlgmr.msra.gmra.mrb[16].mxu0 %v7983_v53  ;;  %3929 = vmatmul.mubr.bf16.vlgmr.msra.gmra.mrb[16].mxu1 %v7983_v53 }
  0x7b   :  { %3950 = vmatpush1.bf16.msra.mxu0 %v7132_v31  ;;  %4003 = vmatpush1.bf16.msra.mxu1 %v7135_v33  ;;  %v7219_v31 = vld [vmem:[%s10479_s1 + $0x7ac] ss:$236 sps:$4 sm:$0xff]  }
  0x7c   :  { %3951 = vmatprep.subr.bf16.mxu0 %v7140_v34  ;;  %4004 = vmatprep.subr.bf16.mxu1 %v7143_v35  ;;  %v8456_v33 = vld [vmem:[%s10480_s0 + $0x4] ss:$8 sps:$4 sm:$0xff]   ;;  %v7217_v34 = vld [vmem:[%s10479_s1 + $0x7a8] ss:$236 sps:$4 sm:$0xff]  }
  0x7d   :  { %6657 = vmatprep.mubr.msk.bf16.mxu0 %vm3443_vm1, %v8020_v0  ;;  %6659 = vmatprep.mubr.msk.bf16.mxu1 %vm3443_vm1, %v8020_v0  ;;  %v7222_v35 = vld [vmem:[%s10479_s1 + $0x97c] ss:$236 sps:$4 sm:$0xff]  }
  0x7f   :  { %3952 = vmatpush1.bf16.msra.mxu0 %v7138_v36  ;;  %4005 = vmatpush1.bf16.msra.mxu1 %v7141_v37  ;;  %v7225_v36 = vld [vmem:[%s10479_s1 + $0x984] ss:$236 sps:$4 sm:$0xff]  }
  0x80   :  { %3953 = vmatprep.subr.bf16.mxu0 %v7146_v38  ;;  %4006 = vmatprep.subr.bf16.mxu1 %v7149_v39  ;;  %v7220_v37 = vld [vmem:[%s10479_s1 + $0x978] ss:$236 sps:$4 sm:$0xff]   ;;  %v7223_v38 = vld [vmem:[%s10479_s1 + $0x980] ss:$236 sps:$4 sm:$0xff]  }
  0x81   :  { %v7228_v39 = vld [vmem:[%s10479_s1 + $0xb54] ss:$236 sps:$4 sm:$0xff]  }
  0x82   :  { %3886 = vmatmul.mubr.bf16.gmra.mrb[20].mxu0 %v8025_v1  ;;  %3939 = vmatmul.mubr.bf16.gmra.mrb[20].mxu1 %v8025_v1 }
  0x83   :  { %3954 = vmatpush1.bf16.msra.mxu0 %v7144_v40  ;;  %4007 = vmatpush1.bf16.msra.mxu1 %v7147_v41  ;;  %v7231_v40 = vld [vmem:[%s10479_s1 + $0xb5c] ss:$236 sps:$4 sm:$0xff]  }
  0x84   :  { %3955 = vmatprep.subr.bf16.mxu0 %v7152_v43  ;;  %4008 = vmatprep.subr.bf16.mxu1 %v7155_v44  ;;  %v7226_v41 = vld [vmem:[%s10479_s1 + $0xb50] ss:$236 sps:$4 sm:$0xff]   ;;  %v7229_v43 = vld [vmem:[%s10479_s1 + $0xb58] ss:$236 sps:$4 sm:$0xff]  }
  0x85   :  { %6660 = vmatprep.mubr.msk.bf16.mxu0 %vm3443_vm1, %v7941_v32  ;;  %6662 = vmatprep.mubr.msk.bf16.mxu1 %vm3443_vm1, %v7941_v32  ;;  %v7167_v32 = vld [vmem:[%s10479_s1 + $0x974] ss:$236 sps:$4 sm:$0xff]   ;;  %v7234_v44 = vld [vmem:[%s10479_s1 + $0xd2c] ss:$236 sps:$4 sm:$0xff]  }
  0x87   :  { %3956 = vmatpush1.bf16.msra.mxu0 %v7150_v45  ;;  %4009 = vmatpush1.bf16.msra.mxu1 %v7153_v46  ;;  %v7237_v45 = vld [vmem:[%s10479_s1 + $0xd34] ss:$236 sps:$4 sm:$0xff]   ;;  %v567_v46 = vld [vmem:[%s10479_s1 + $0x10d8] sm:$0x33] }
  0x88   :  { %3957 = vmatprep.subr.bf16.mxu0 %v7158_v47  ;;  %4010 = vmatprep.subr.bf16.mxu1 %v7161_v48  ;;  %v568_v47 = vld [vmem:[%s10479_s1 + $0x10e0] sm:$0x33]  ;;  %v7232_v48 = vld [vmem:[%s10479_s1 + $0xd28] ss:$236 sps:$4 sm:$0xff]  }
  0x8b   :  { %3958 = vmatpush1.bf16.msra.mxu0 %v7156_v49  ;;  %4011 = vmatpush1.bf16.msra.mxu1 %v7159_v50  ;;  %v7235_v49 = vld [vmem:[%s10479_s1 + $0xd30] ss:$236 sps:$4 sm:$0xff]  }
  0x8c   :  { %3959 = vmatprep.subr.bf16.mxu0 %v7164_v51  ;;  %4012 = vmatprep.subr.bf16.mxu1 %v7167_v32  ;;  %v7240_v50 = vld [vmem:[%s10479_s1 + $0xf04] ss:$236 sps:$4 sm:$0xff]   ;;  %v7243_v51 = vld [vmem:[%s10479_s1 + $0xf0c] ss:$236 sps:$4 sm:$0xff]   ;;  %v6606_v32 = vcombine.high %v567_v46, %v567_v46 }
  0x8f   :  { %3960 = vmatpush1.bf16.msra.mxu0 %v7162_v52  ;;  %4013 = vmatpush1.bf16.msra.mxu1 %v7165_v54  ;;  %v6608_v52 = vcombine.high %v568_v47, %v568_v47  ;;  %v7238_v54 = vld [vmem:[%s10479_s1 + $0xf00] ss:$236 sps:$4 sm:$0xff]  }
  0x90   :  { %3961 = vmatprep.subr.bf16.mxu0 %v7170_v55  ;;  %4014 = vmatprep.subr.bf16.mxu1 %v7173_v56  ;;  %v7241_v55 = vld [vmem:[%s10479_s1 + $0xf08] ss:$236 sps:$4 sm:$0xff]   ;;  %v6605_v56 = vcombine.low %v567_v46, %v567_v46 }
  0x93   :  { %3962 = vmatpush1.bf16.msra.mxu0 %v7168_v57  ;;  %4015 = vmatpush1.bf16.msra.mxu1 %v7171_v58  ;;  %v6607_v57 = vcombine.low %v568_v47, %v568_v47  ;;  %v3506_v58 = vand.u32 %v6606_v32, %v7962_v42  ;;  %v7306_v32 = vld [vmem:[%s10479_s1 + $0x60] ss:$236 sps:$4 sm:$0xff]  }
  0x94   :  { %3963 = vmatprep.subr.bf16.mxu0 %v7176_v59  ;;  %4016 = vmatprep.subr.bf16.mxu1 %v7179_v60  ;;  %v3512_v59 = vand.u32 %v6608_v52, %v7962_v42  ;;  %v3503_v60 = vand.u32 %v6605_v56, %v7962_v42  ;;  %v7309_v52 = vld [vmem:[%s10479_s1 + $0x68] ss:$236 sps:$4 sm:$0xff]   ;;  %v7312_v56 = vld [vmem:[%s10479_s1 + $0x238] ss:$236 sps:$4 sm:$0xff]  }
  0x95   :  { %v3509_v61 = vand.u32 %v6607_v57, %v7962_v42  ;;  %v7315_v57 = vld [vmem:[%s10479_s1 + $0x240] ss:$236 sps:$4 sm:$0xff]  }
  0x97   :  { %3964 = vmatpush1.bf16.msra.mxu0 %v7174_v63  ;;  %4017 = vmatpush1.bf16.msra.mxu1 %v7177_v3  ;;  %v7253_v63 = vld [vmem:[%s10479_s1 + $0x5c] ss:$236 sps:$4 sm:$0xff]  }
  0x98   :  { %3965 = vmatprep.subr.bf16.mxu0 %v7182_v4  ;;  %4018 = vmatprep.subr.bf16.mxu1 %v7185_v5  ;;  %v7248_v3 = vld [vmem:[%s10479_s1 + $0x50] ss:$236 sps:$4 sm:$0xff]   ;;  %v7251_v4 = vld [vmem:[%s10479_s1 + $0x58] ss:$236 sps:$4 sm:$0xff]  }
  0x99   :  { %v7256_v5 = vld [vmem:[%s10479_s1 + $0x22c] ss:$236 sps:$4 sm:$0xff]  }
  0x9b   :  { %3966 = vmatpush1.bf16.msra.mxu0 %v7180_v8  ;;  %4019 = vmatpush1.bf16.msra.mxu1 %v7183_v9  ;;  %v7254_v8 = vld [vmem:[%s10479_s1 + $0x228] ss:$236 sps:$4 sm:$0xff]   ;;  %v7257_v9 = vld [vmem:[%s10479_s1 + $0x230] ss:$236 sps:$4 sm:$0xff]  }
  0x9c   :  { %3967 = vmatprep.subr.bf16.mxu0 %v3494_v12  ;;  %4020 = vmatprep.subr.bf16.mxu1 %v3500_v13  ;;  %v8566_v12 = vld [vmem:[%s10480_s0 + $0x14] ss:$8 sps:$4 sm:$0xff]   ;;  %v7260_v13 = vld [vmem:[%s10479_s1 + $0x400] ss:$236 sps:$4 sm:$0xff]  }
  0x9f   :  { %3968 = vmatpush1.bf16.msra.mxu0 %v3491_v14  ;;  %4021 = vmatpush1.bf16.msra.mxu1 %v3497_v15  ;;  %v7263_v14 = vld [vmem:[%s10479_s1 + $0x408] ss:$236 sps:$4 sm:$0xff]  }
  0xa0   :  { %4055 = vmatprep.subr.bf16.mxu0 %v7192_v16  ;;  %4108 = vmatprep.subr.bf16.mxu1 %v7195_v17  ;;  %v7268_v15 = vld [vmem:[%s10479_s1 + $0x5dc] ss:$236 sps:$4 sm:$0xff]   ;;  %v7271_v16 = vld [vmem:[%s10479_s1 + $0x5e4] ss:$236 sps:$4 sm:$0xff]  }
  0xa1   :  { %v7266_v17 = vld [vmem:[%s10479_s1 + $0x5d8] ss:$236 sps:$4 sm:$0xff]  }
  0xa2   :  { %3982 = vmatmul.mubr.bf16.vlgmr.msra.gmra.mrb[24].mxu0 %v7983_v53  ;;  %4035 = vmatmul.mubr.bf16.vlgmr.msra.gmra.mrb[24].mxu1 %v7983_v53  ;;  %v7207_v53 = vld [vmem:[%s10479_s1 + $0x3fc] ss:$236 sps:$4 sm:$0xff]  }
  0xa3   :  { %4056 = vmatpush1.bf16.msra.mxu0 %v7190_v18  ;;  %4109 = vmatpush1.bf16.msra.mxu1 %v7193_v19  ;;  %v7269_v18 = vld [vmem:[%s10479_s1 + $0x5e0] ss:$236 sps:$4 sm:$0xff]   ;;  %v8593_v19 = vld [vmem:[%s10480_s0 + $0x10] ss:$8 sps:$4 sm:$0xff]  }
  0xa4   :  { %4057 = vmatprep.subr.bf16.mxu0 %v7198_v20  ;;  %4110 = vmatprep.subr.bf16.mxu1 %v7201_v21  ;;  %v7274_v20 = vld [vmem:[%s10479_s1 + $0x7b4] ss:$236 sps:$4 sm:$0xff]   ;;  %v7277_v21 = vld [vmem:[%s10479_s1 + $0x7bc] ss:$236 sps:$4 sm:$0xff]  }
  0xa5   :  { %6661 = vmatprep.mubr.msk.bf16.mxu0 %vm3443_vm1, %v8020_v0  ;;  %6663 = vmatprep.mubr.msk.bf16.mxu1 %vm3443_vm1, %v8020_v0  ;;  %v7213_v0 = vld [vmem:[%s10479_s1 + $0x5d4] ss:$236 sps:$4 sm:$0xff]  }
  0xa7   :  { %4058 = vmatpush1.bf16.msra.mxu0 %v7196_v22  ;;  %4111 = vmatpush1.bf16.msra.mxu1 %v7199_v23  ;;  %v7272_v22 = vld [vmem:[%s10479_s1 + $0x7b0] ss:$236 sps:$4 sm:$0xff]   ;;  %v7275_v23 = vld [vmem:[%s10479_s1 + $0x7b8] ss:$236 sps:$4 sm:$0xff]  }
  0xa8   :  { %4059 = vmatprep.subr.bf16.mxu0 %v7204_v24  ;;  %4112 = vmatprep.subr.bf16.mxu1 %v7207_v53  ;;  %v7280_v24 = vld [vmem:[%s10479_s1 + $0x98c] ss:$236 sps:$4 sm:$0xff]   ;;  %v7283_v53 = vld [vmem:[%s10479_s1 + $0x994] ss:$236 sps:$4 sm:$0xff]  }
  0xaa   :  { %3992 = vmatmul.mubr.bf16.gmra.mrb[28].mxu0 %v8025_v1  ;;  %4045 = vmatmul.mubr.bf16.gmra.mrb[28].mxu1 %v8025_v1  ;;  %v7214_v1 = vld [vmem:[%s10479_s1 + $0x7a0] ss:$236 sps:$4 sm:$0xff]  }
  0xab   :  { %4060 = vmatpush1.bf16.msra.mxu0 %v7202_v25  ;;  %4113 = vmatpush1.bf16.msra.mxu1 %v7205_v26  ;;  %v7278_v25 = vld [vmem:[%s10479_s1 + $0x988] ss:$236 sps:$4 sm:$0xff]   ;;  %v7281_v26 = vld [vmem:[%s10479_s1 + $0x990] ss:$236 sps:$4 sm:$0xff]  }
  0xac   :  { %4061 = vmatprep.subr.bf16.mxu0 %v7210_v27  ;;  %4114 = vmatprep.subr.bf16.mxu1 %v7213_v0  ;;  %v7286_v27 = vld [vmem:[%s10479_s1 + $0xb64] ss:$236 sps:$4 sm:$0xff]   ;;  %v7289_v0 = vld [vmem:[%s10479_s1 + $0xb6c] ss:$236 sps:$4 sm:$0xff]  }
  0xad   :  { %6664 = vmatprep.mubr.msk.bf16.mxu0 %vm3443_vm1, %v8456_v33  ;;  %6666 = vmatprep.mubr.msk.bf16.mxu1 %vm3443_vm1, %v8456_v33 }
  0xaf   :  { %4062 = vmatpush1.bf16.msra.mxu0 %v7208_v28  ;;  %4115 = vmatpush1.bf16.msra.mxu1 %v7211_v29  ;;  %v7284_v28 = vld [vmem:[%s10479_s1 + $0xb60] ss:$236 sps:$4 sm:$0xff]   ;;  %v7287_v29 = vld [vmem:[%s10479_s1 + $0xb68] ss:$236 sps:$4 sm:$0xff]  }
  0xb0   :  { %4063 = vmatprep.subr.bf16.mxu0 %v7216_v30  ;;  %4116 = vmatprep.subr.bf16.mxu1 %v7219_v31  ;;  %v7292_v30 = vld [vmem:[%s10479_s1 + $0xd3c] ss:$236 sps:$4 sm:$0xff]   ;;  %v7295_v31 = vld [vmem:[%s10479_s1 + $0xd44] ss:$236 sps:$4 sm:$0xff]  }
  0xb3   :  { %4064 = vmatpush1.bf16.msra.mxu0 %v7214_v1  ;;  %4117 = vmatpush1.bf16.msra.mxu1 %v7217_v34  ;;  %v7290_v1 = vld [vmem:[%s10479_s1 + $0xd38] ss:$236 sps:$4 sm:$0xff]   ;;  %v7293_v34 = vld [vmem:[%s10479_s1 + $0xd40] ss:$236 sps:$4 sm:$0xff]  }
  0xb4   :  { %4065 = vmatprep.subr.bf16.mxu0 %v7222_v35  ;;  %4118 = vmatprep.subr.bf16.mxu1 %v7225_v36  ;;  %v569_v35 = vld [vmem:[%s10479_s1 + $0x10e8] sm:$0x33]  ;;  %v570_v36 = vld [vmem:[%s10479_s1 + $0x10f0] sm:$0x33] }
  0xb7   :  { %4066 = vmatpush1.bf16.msra.mxu0 %v7220_v37  ;;  %4119 = vmatpush1.bf16.msra.mxu1 %v7223_v38  ;;  %v7298_v37 = vld [vmem:[%s10479_s1 + $0xf14] ss:$236 sps:$4 sm:$0xff]   ;;  %v7301_v38 = vld [vmem:[%s10479_s1 + $0xf1c] ss:$236 sps:$4 sm:$0xff]  }
  0xb8   :  { %4067 = vmatprep.subr.bf16.mxu0 %v7228_v39  ;;  %4120 = vmatprep.subr.bf16.mxu1 %v7231_v40  ;;  %v6610_v39 = vcombine.high %v569_v35, %v569_v35  ;;  %v6612_v40 = vcombine.high %v570_v36, %v570_v36 }
  0xba   :  { %v3518_v46 = vand.u32 %v6610_v39, %v7962_v42  ;;  %v3524_v47 = vand.u32 %v6612_v40, %v7962_v42 }
  0xbb   :  { %4068 = vmatpush1.bf16.msra.mxu0 %v7226_v41  ;;  %4121 = vmatpush1.bf16.msra.mxu1 %v7229_v43  ;;  %v7296_v41 = vld [vmem:[%s10479_s1 + $0xf10] ss:$236 sps:$4 sm:$0xff]   ;;  %v7299_v43 = vld [vmem:[%s10479_s1 + $0xf18] ss:$236 sps:$4 sm:$0xff]  }
  0xbc   :  { %4069 = vmatprep.subr.bf16.mxu0 %v7234_v44  ;;  %4122 = vmatprep.subr.bf16.mxu1 %v7237_v45  ;;  %v6609_v44 = vcombine.low %v569_v35, %v569_v35  ;;  %v6611_v45 = vcombine.low %v570_v36, %v570_v36  ;;  %v7336_v35 = vld [vmem:[%s10479_s1 + $0x998] ss:$236 sps:$4 sm:$0xff]   ;;  %v7339_v36 = vld [vmem:[%s10479_s1 + $0x9a0] ss:$236 sps:$4 sm:$0xff]  }
  0xbf   :  { %4070 = vmatpush1.bf16.msra.mxu0 %v7232_v48  ;;  %4123 = vmatpush1.bf16.msra.mxu1 %v7235_v49  ;;  %v3515_v48 = vand.u32 %v6609_v44, %v7962_v42  ;;  %v3521_v49 = vand.u32 %v6611_v45, %v7962_v42 }
  0xc0   :  { %4071 = vmatprep.subr.bf16.mxu0 %v7240_v50  ;;  %4124 = vmatprep.subr.bf16.mxu1 %v7243_v51  ;;  %v7308_v50 = vld [vmem:[%s10479_s1 + $0x64] ss:$236 sps:$4 sm:$0xff]   ;;  %v7311_v51 = vld [vmem:[%s10479_s1 + $0x6c] ss:$236 sps:$4 sm:$0xff]  }
  0xc3   :  { %4072 = vmatpush1.bf16.msra.mxu0 %v7238_v54  ;;  %4125 = vmatpush1.bf16.msra.mxu1 %v7241_v55  ;;  %v7314_v54 = vld [vmem:[%s10479_s1 + $0x23c] ss:$236 sps:$4 sm:$0xff]   ;;  %v7317_v55 = vld [vmem:[%s10479_s1 + $0x244] ss:$236 sps:$4 sm:$0xff]  }
  0xc4   :  { %4073 = vmatprep.subr.bf16.mxu0 %v3506_v58  ;;  %4126 = vmatprep.subr.bf16.mxu1 %v3512_v59  ;;  %v7320_v58 = vld [vmem:[%s10479_s1 + $0x414] ss:$236 sps:$4 sm:$0xff]   ;;  %v7323_v59 = vld [vmem:[%s10479_s1 + $0x41c] ss:$236 sps:$4 sm:$0xff]  }
  0xc7   :  { %4074 = vmatpush1.bf16.msra.mxu0 %v3503_v60  ;;  %4127 = vmatpush1.bf16.msra.mxu1 %v3509_v61  ;;  %v7318_v60 = vld [vmem:[%s10479_s1 + $0x410] ss:$236 sps:$4 sm:$0xff]   ;;  %v7321_v61 = vld [vmem:[%s10479_s1 + $0x418] ss:$236 sps:$4 sm:$0xff]  }
  0xc8   :  { %4161 = vmatprep.subr.bf16.mxu0 %v7250_v62  ;;  %4214 = vmatprep.subr.bf16.mxu1 %v7253_v63  ;;  %v8713_v62 = vpop.permute.xlu0 %595  ;;  %v7326_v63 = vld [vmem:[%s10479_s1 + $0x5ec] ss:$236 sps:$4 sm:$0xff]  }
  0xca   :  { %4088 = vmatmul.mubr.bf16.vlgmr.msra.gmra.mrb[32].mxu0 %v8547_v7  ;;  %4141 = vmatmul.mubr.bf16.vlgmr.msra.gmra.mrb[32].mxu1 %v8547_v7 }
  0xcb   :  { %4162 = vmatpush1.bf16.msra.mxu0 %v7248_v3  ;;  %4215 = vmatpush1.bf16.msra.mxu1 %v7251_v4  ;;  %v7329_v3 = vld [vmem:[%s10479_s1 + $0x5f4] ss:$236 sps:$4 sm:$0xff]  }
  0xcc   :  { %4163 = vmatprep.subr.bf16.mxu0 %v7256_v5  ;;  %4216 = vmatprep.subr.bf16.mxu1 %v7259_v6  ;;  %v7324_v4 = vld [vmem:[%s10479_s1 + $0x5e8] ss:$236 sps:$4 sm:$0xff]   ;;  %v7327_v5 = vld [vmem:[%s10479_s1 + $0x5f0] ss:$236 sps:$4 sm:$0xff]   ;;  %v8729_v6 = vpop.permute.xlu0 %600 }
  0xcd   :  { %6665 = vmatprep.mubr.msk.bf16.mxu0 %vm3443_vm1, %v8566_v12  ;;  %6667 = vmatprep.mubr.msk.bf16.mxu1 %vm3443_vm1, %v8566_v12 }
  0xcf   :  { %4164 = vmatpush1.bf16.msra.mxu0 %v7254_v8  ;;  %4217 = vmatpush1.bf16.msra.mxu1 %v7257_v9  ;;  %v7332_v8 = vld [vmem:[%s10479_s1 + $0x7c4] ss:$236 sps:$4 sm:$0xff]   ;;  %v7335_v9 = vld [vmem:[%s10479_s1 + $0x7cc] ss:$236 sps:$4 sm:$0xff]  }
  0xd0   :  { %4165 = vmatprep.subr.bf16.mxu0 %v7262_v10  ;;  %4218 = vmatprep.subr.bf16.mxu1 %v7265_v11  ;;  %v8737_v10 = vpop.permute.xlu1 %605 }
  0xd2   :  { %4098 = vmatmul.mubr.bf16.gmra.mrb[36].mxu0 %v8593_v19  ;;  %4151 = vmatmul.mubr.bf16.gmra.mrb[36].mxu1 %v8593_v19 }
  0xd3   :  { %4166 = vmatpush1.bf16.msra.mxu0 %v7260_v13  ;;  %4219 = vmatpush1.bf16.msra.mxu1 %v7263_v14 }
  0xd4   :  { %4167 = vmatprep.subr.bf16.mxu0 %v7268_v15  ;;  %4220 = vmatprep.subr.bf16.mxu1 %v7271_v16  ;;  %v8781_v39 = vpop.permute.xlu1 %610 }
  0xd5   :  { %6668 = vmatprep.mubr.msk.bf16.mxu0 %vm3443_vm1, %v8456_v33  ;;  %6670 = vmatprep.mubr.msk.bf16.mxu1 %vm3443_vm1, %v8456_v33 }
  0xd7   :  { %4168 = vmatpush1.bf16.msra.mxu0 %v7266_v17  ;;  %4221 = vmatpush1.bf16.msra.mxu1 %v7269_v18 }
  0xd8   :  { %4169 = vmatprep.subr.bf16.mxu0 %v7274_v20  ;;  %4222 = vmatprep.subr.bf16.mxu1 %v7277_v21 }
  0xdb   :  { %4170 = vmatpush1.bf16.msra.mxu0 %v7272_v22  ;;  %4223 = vmatpush1.bf16.msra.mxu1 %v7275_v23  ;;  %v7330_v23 = vld [vmem:[%s10479_s1 + $0x7c0] ss:$236 sps:$4 sm:$0xff]  }
  0xdc   :  { %4171 = vmatprep.subr.bf16.mxu0 %v7280_v24  ;;  %4224 = vmatprep.subr.bf16.mxu1 %v7283_v53 }
  0xdf   :  { %4172 = vmatpush1.bf16.msra.mxu0 %v7278_v25  ;;  %4225 = vmatpush1.bf16.msra.mxu1 %v7281_v26 }
  0xe0   :  { %4173 = vmatprep.subr.bf16.mxu0 %v7286_v27  ;;  %4226 = vmatprep.subr.bf16.mxu1 %v7289_v0  ;;  %v7338_v27 = vld [vmem:[%s10479_s1 + $0x99c] ss:$236 sps:$4 sm:$0xff]   ;;  %v7341_v0 = vld [vmem:[%s10479_s1 + $0x9a4] ss:$236 sps:$4 sm:$0xff]  }
  0xe3   :  { %4174 = vmatpush1.bf16.msra.mxu0 %v7284_v28  ;;  %4227 = vmatpush1.bf16.msra.mxu1 %v7287_v29 }
  0xe4   :  { %4175 = vmatprep.subr.bf16.mxu0 %v7292_v30  ;;  %4228 = vmatprep.subr.bf16.mxu1 %v7295_v31 }
  0xe7   :  { %4176 = vmatpush1.bf16.msra.mxu0 %v7290_v1  ;;  %4229 = vmatpush1.bf16.msra.mxu1 %v7293_v34 }
  0xe8   :  { %4177 = vmatprep.subr.bf16.mxu0 %v7298_v37  ;;  %4230 = vmatprep.subr.bf16.mxu1 %v7301_v38  ;;  %v7344_v37 = vld [vmem:[%s10479_s1 + $0xb74] ss:$236 sps:$4 sm:$0xff]   ;;  %v7347_v38 = vld [vmem:[%s10479_s1 + $0xb7c] ss:$236 sps:$4 sm:$0xff]  }
  0xeb   :  { %4178 = vmatpush1.bf16.msra.mxu0 %v7296_v41  ;;  %4231 = vmatpush1.bf16.msra.mxu1 %v7299_v43 }
  0xec   :  { %4179 = vmatprep.subr.bf16.mxu0 %v3518_v46  ;;  %4232 = vmatprep.subr.bf16.mxu1 %v3524_v47  ;;  %v7342_v47 = vld [vmem:[%s10479_s1 + $0xb70] ss:$236 sps:$4 sm:$0xff]  }
  0xef   :  { %4180 = vmatpush1.bf16.msra.mxu0 %v3515_v48  ;;  %4233 = vmatpush1.bf16.msra.mxu1 %v3521_v49  ;;  %v7345_v48 = vld [vmem:[%s10479_s1 + $0xb78] ss:$236 sps:$4 sm:$0xff]  }
  0xf0   :  { %4267 = vmatprep.subr.bf16.mxu0 %v7308_v50  ;;  %4320 = vmatprep.subr.bf16.mxu1 %v7311_v51 }
  0xf2   :  { %4194 = vmatmul.mubr.bf16.vlgmr.msra.gmra.mrb[40].mxu0 %v8547_v7  ;;  %4247 = vmatmul.mubr.bf16.vlgmr.msra.gmra.mrb[40].mxu1 %v8547_v7 }
  0xf3   :  { %4268 = vmatpush1.bf16.msra.mxu0 %v7306_v32  ;;  %4321 = vmatpush1.bf16.msra.mxu1 %v7309_v52  ;;  %v7350_v52 = vld [vmem:[%s10479_s1 + $0xd4c] ss:$236 sps:$4 sm:$0xff]  }
  0xf4   :  { %4269 = vmatprep.subr.bf16.mxu0 %v7314_v54  ;;  %4322 = vmatprep.subr.bf16.mxu1 %v7317_v55  ;;  %v7353_v54 = vld [vmem:[%s10479_s1 + $0xd54] ss:$236 sps:$4 sm:$0xff]  }
  0xf5   :  { %6669 = vmatprep.mubr.msk.bf16.mxu0 %vm3443_vm1, %v8566_v12  ;;  %6671 = vmatprep.mubr.msk.bf16.mxu1 %vm3443_vm1, %v8566_v12 }
  0xf7   :  { %4270 = vmatpush1.bf16.msra.mxu0 %v7312_v56  ;;  %4323 = vmatpush1.bf16.msra.mxu1 %v7315_v57 }
  0xf8   :  { %4271 = vmatprep.subr.bf16.mxu0 %v7320_v58  ;;  %4324 = vmatprep.subr.bf16.mxu1 %v7323_v59  ;;  %v7348_v59 = vld [vmem:[%s10479_s1 + $0xd48] ss:$236 sps:$4 sm:$0xff]  }
  0xfa   :  { %4204 = vmatmul.mubr.bf16.gmra.mrb[44].mxu0 %v8593_v19  ;;  %4257 = vmatmul.mubr.bf16.gmra.mrb[44].mxu1 %v8593_v19 }
  0xfb   :  { %4272 = vmatpush1.bf16.msra.mxu0 %v7318_v60  ;;  %4325 = vmatpush1.bf16.msra.mxu1 %v7321_v61  ;;  %v7351_v60 = vld [vmem:[%s10479_s1 + $0xd50] ss:$236 sps:$4 sm:$0xff]  }
  0xfc   :  { %4273 = vmatprep.subr.bf16.mxu0 %v7326_v63  ;;  %4326 = vmatprep.subr.bf16.mxu1 %v7329_v3  ;;  %v571_v61 = vld [vmem:[%s10479_s1 + $0x10f8] sm:$0x33]  ;;  %v572_v63 = vld [vmem:[%s10479_s1 + $0x1100] sm:$0x33] }
  0xfd   :  { %v3665_v11 = vpop.f32.mrb[0].mxu0  ;;  %v3718_v13 = vpop.f32.mrb[0].mxu1  ;;  %6672 = vmatprep.mubr.msk.bf16.mxu0 %vm3443_vm1, %v8456_v33  ;;  %6674 = vmatprep.mubr.msk.bf16.mxu1 %vm3443_vm1, %v8456_v33  ;;  %v7333_v33 = vld [vmem:[%s10479_s1 + $0x7c8] ss:$236 sps:$4 sm:$0xff]  }
  0xfe   :  { %v3666_v14 = vadd.f32 %v3665_v11, %v8713_v62  ;;  %v3719_v15 = vadd.f32 %v3718_v13, %v8713_v62  ;;  %v3667_v16 = vpop.f32.mrb[1].mxu0  ;;  %v3720_v17 = vpop.f32.mrb[1].mxu1  ;;  %v7359_v11 = vld [vmem:[%s10479_s1 + $0xf2c] ss:$236 sps:$4 sm:$0xff]  }
  0xff   :  { %v3668_v18 = vadd.f32 %v3667_v16, %v8713_v62  ;;  %v3721_v20 = vadd.f32 %v3720_v17, %v8713_v62  ;;  %v3669_v21 = vpop.f32.mrb[2].mxu0  ;;  %v3722_v22 = vpop.f32.mrb[2].mxu1  ;;  %4274 = vmatpush1.bf16.msra.mxu0 %v7324_v4  ;;  %4327 = vmatpush1.bf16.msra.mxu1 %v7327_v5  ;;  %v6616_v16 = vcombine.high %v572_v63, %v572_v63  ;;  %v7354_v17 = vld [vmem:[%s10479_s1 + $0xf20] ss:$236 sps:$4 sm:$0xff]  }
 0x100   :  { %v3670_v24 = vadd.f32 %v3669_v21, %v8729_v6  ;;  %v3723_v53 = vadd.f32 %v3722_v22, %v8729_v6  ;;  %v3671_v25 = vpop.f32.mrb[3].mxu0  ;;  %v3724_v26 = vpop.f32.mrb[3].mxu1  ;;  %4275 = vmatprep.subr.bf16.mxu0 %v7332_v8  ;;  %4328 = vmatprep.subr.bf16.mxu1 %v7335_v9  ;;  %v7356_v9 = vld [vmem:[%s10479_s1 + $0xf24] ss:$236 sps:$4 sm:$0xff]   ;;  %v6615_v21 = vcombine.low %v572_v63, %v572_v63 }
 0x101   :  { %v6828_v28 = vpack.c.bf16 %v3668_v18, %v3666_v14  ;;  %v6829_v29 = vpack.c.bf16 %v3721_v20, %v3719_v15  ;;  %v3672_v30 = vadd.f32 %v3671_v25, %v8729_v6  ;;  %v3725_v31 = vadd.f32 %v3724_v26, %v8729_v6  ;;  %v7357_v18 = vld [vmem:[%s10479_s1 + $0xf28] ss:$236 sps:$4 sm:$0xff]   ;;  %v7364_v26 = vld [vmem:[%s10479_s1 + $0x70] ss:$236 sps:$4 sm:$0xff]  }
 0x102   :  { %v6614_v15 = vcombine.high %v571_v61, %v571_v61  ;;  %v6613_v20 = vcombine.low %v571_v61, %v571_v61  ;;  %v7369_v25 = vld [vmem:[%s10479_s1 + $0x7c] ss:$236 sps:$4 sm:$0xff]  }
 0x103   :  { %5929 = vst [vmem:[%s10482_s3] sm:$0xff] %v6828_v28  ;;  %5930 = vst [vmem:[%s10482_s3 + $0x8] sm:$0xff] %v6829_v29  ;;  %v6858_v1 = vpack.c.bf16 %v3672_v30, %v3670_v24  ;;  %v6859_v34 = vpack.c.bf16 %v3725_v31, %v3723_v53  ;;  %4276 = vmatpush1.bf16.msra.mxu0 %v7330_v23  ;;  %4329 = vmatpush1.bf16.msra.mxu1 %v7333_v33  ;;  %v7366_v53 = vld [vmem:[%s10479_s1 + $0x74] ss:$236 sps:$4 sm:$0xff]   ;;  %v7373_v30 = vld [vmem:[%s10479_s1 + $0x250] ss:$236 sps:$4 sm:$0xff]  }
 0x104   :  { %4277 = vmatprep.subr.bf16.mxu0 %v7338_v27  ;;  %4330 = vmatprep.subr.bf16.mxu1 %v7341_v0  ;;  %v3530_v22 = vand.u32 %v6614_v15, %v7962_v42  ;;  %v3536_v23 = vand.u32 %v6616_v16, %v7962_v42  ;;  %v3527_v33 = vand.u32 %v6613_v20, %v7962_v42  ;;  %v7367_v27 = vld [vmem:[%s10479_s1 + $0x78] ss:$236 sps:$4 sm:$0xff]   ;;  %v7375_v28 = vld [vmem:[%s10479_s1 + $0x254] ss:$236 sps:$4 sm:$0xff]  }
 0x105   :  { %5960 = vst [vmem:[%s10482_s3 + $0xec] sm:$0xff] %v6858_v1  ;;  %5961 = vst [vmem:[%s10482_s3 + $0xf4] sm:$0xff] %v6859_v34  ;;  %v3675_v40 = vpop.f32.mrb[4].mxu0  ;;  %v3728_v41 = vpop.f32.mrb[4].mxu1  ;;  %v3533_v24 = vand.u32 %v6615_v21, %v7962_v42  ;;  %v7372_v0 = vld [vmem:[%s10479_s1 + $0x24c] ss:$236 sps:$4 sm:$0xff]  }
 0x106   :  { %v3676_v43 = vadd.f32 %v3675_v40, %v8737_v10  ;;  %v3677_v44 = vpop.f32.mrb[5].mxu0  ;;  %v3729_v45 = vadd.f32 %v3728_v41, %v8737_v10  ;;  %v3730_v46 = vpop.f32.mrb[5].mxu1  ;;  %v7370_v29 = vld [vmem:[%s10479_s1 + $0x248] ss:$236 sps:$4 sm:$0xff]   ;;  %v7378_v31 = vld [vmem:[%s10479_s1 + $0x424] ss:$236 sps:$4 sm:$0xff]  }
 0x107   :  { %4278 = vmatpush1.bf16.msra.mxu0 %v7336_v35  ;;  %4331 = vmatpush1.bf16.msra.mxu1 %v7339_v36  ;;  %v3678_v49 = vadd.f32 %v3677_v44, %v8737_v10  ;;  %v3679_v50 = vpop.f32.mrb[6].mxu0  ;;  %v3731_v51 = vadd.f32 %v3730_v46, %v8737_v10  ;;  %v3732_v32 = vpop.f32.mrb[6].mxu1  ;;  %v7381_v1 = vld [vmem:[%s10479_s1 + $0x42c] ss:$236 sps:$4 sm:$0xff]   ;;  %v7384_v35 = vld [vmem:[%s10479_s1 + $0x5fc] ss:$236 sps:$4 sm:$0xff]  }
 0x108   :  { %4279 = vmatprep.subr.bf16.mxu0 %v7344_v37  ;;  %4332 = vmatprep.subr.bf16.mxu1 %v7347_v38  ;;  %v3680_v55 = vadd.f32 %v3679_v50, %v8781_v39  ;;  %v3681_v56 = vpop.f32.mrb[7].mxu0  ;;  %v3733_v57 = vadd.f32 %v3732_v32, %v8781_v39  ;;  %v3734_v58 = vpop.f32.mrb[7].mxu1  ;;  %v7376_v34 = vld [vmem:[%s10479_s1 + $0x420] ss:$236 sps:$4 sm:$0xff]   ;;  %v7387_v36 = vld [vmem:[%s10479_s1 + $0x604] ss:$236 sps:$4 sm:$0xff]  }
 0x109   :  { %v6888_v3 = vpack.c.bf16 %v3678_v49, %v3676_v43  ;;  %v6889_v4 = vpack.c.bf16 %v3731_v51, %v3729_v45  ;;  %v3682_v5 = vadd.f32 %v3681_v56, %v8781_v39  ;;  %v3735_v8 = vadd.f32 %v3734_v58, %v8781_v39  ;;  %v7382_v37 = vld [vmem:[%s10479_s1 + $0x5f8] ss:$236 sps:$4 sm:$0xff]   ;;  %v7390_v38 = vld [vmem:[%s10479_s1 + $0x7d4] ss:$236 sps:$4 sm:$0xff]   ;;  %v7393_v40 = vld [vmem:[%s10479_s1 + $0x7dc] ss:$236 sps:$4 sm:$0xff]  }
 0x10a   :  { %v8914_v44 = vld [vmem:[%s10480_s0 + $0x4] ss:$8 sps:$4 sm:$0xff]   ;;  %v7388_v32 = vld [vmem:[%s10479_s1 + $0x7d0] ss:$236 sps:$4 sm:$0xff]  }
 0x10b   :  { %4280 = vmatpush1.bf16.msra.mxu0 %v7342_v47  ;;  %4333 = vmatpush1.bf16.msra.mxu1 %v7345_v48  ;;  %5990 = vst [vmem:[%s10482_s3 + $0x1d8] sm:$0xff] %v6888_v3  ;;  %5991 = vst [vmem:[%s10482_s3 + $0x1e0] sm:$0xff] %v6889_v4  ;;  %v6918_v13 = vpack.c.bf16 %v3682_v5, %v3680_v55  ;;  %v6919_v14 = vpack.c.bf16 %v3735_v8, %v3733_v57  ;;  %v7396_v58 = vld [vmem:[%s10479_s1 + $0x9ac] ss:$236 sps:$4 sm:$0xff]   ;;  %v7394_v8 = vld [vmem:[%s10479_s1 + $0x9a8] ss:$236 sps:$4 sm:$0xff]  }
 0x10c   :  { %4281 = vmatprep.subr.bf16.mxu0 %v7350_v52  ;;  %4334 = vmatprep.subr.bf16.mxu1 %v7353_v54  ;;  %v7391_v52 = vld [vmem:[%s10479_s1 + $0x7d8] ss:$236 sps:$4 sm:$0xff]   ;;  %v7400_v21 = vld [vmem:[%s10479_s1 + $0xb80] ss:$236 sps:$4 sm:$0xff]  }
 0x10d   :  { %6020 = vst [vmem:[%s10482_s3 + $0x2c4] sm:$0xff] %v6918_v13  ;;  %6021 = vst [vmem:[%s10482_s3 + $0x2cc] sm:$0xff] %v6919_v14  ;;  %v7405_v13 = vld [vmem:[%s10479_s1 + $0xb8c] ss:$236 sps:$4 sm:$0xff]  }
 0x10f   :  { %4282 = vmatpush1.bf16.msra.mxu0 %v7348_v59  ;;  %4335 = vmatpush1.bf16.msra.mxu1 %v7351_v60  ;;  %v7399_v59 = vld [vmem:[%s10479_s1 + $0x9b4] ss:$236 sps:$4 sm:$0xff]  }
 0x110   :  { %4283 = vmatprep.subr.bf16.mxu0 %v7356_v9  ;;  %4336 = vmatprep.subr.bf16.mxu1 %v7359_v11  ;;  %v7397_v9 = vld [vmem:[%s10479_s1 + $0x9b0] ss:$236 sps:$4 sm:$0xff]  }
 0x111   :  { %v7402_v11 = vld [vmem:[%s10479_s1 + $0xb84] ss:$236 sps:$4 sm:$0xff]  }
 0x113   :  { %4284 = vmatpush1.bf16.msra.mxu0 %v7354_v17  ;;  %4337 = vmatpush1.bf16.msra.mxu1 %v7357_v18 }
 0x114   :  { %4285 = vmatprep.subr.bf16.mxu0 %v3530_v22  ;;  %4338 = vmatprep.subr.bf16.mxu1 %v3536_v23  ;;  %v7403_v22 = vld [vmem:[%s10479_s1 + $0xb88] ss:$236 sps:$4 sm:$0xff]  }
 0x117   :  { %4286 = vmatpush1.bf16.msra.mxu0 %v3527_v33  ;;  %4339 = vmatpush1.bf16.msra.mxu1 %v3533_v24 }
 0x118   :  { %4373 = vmatprep.subr.bf16.mxu0 %v7366_v53  ;;  %4426 = vmatprep.subr.bf16.mxu1 %v7369_v25  ;;  %v7408_v25 = vld [vmem:[%s10479_s1 + $0xd5c] ss:$236 sps:$4 sm:$0xff]  }
 0x11a   :  { %4300 = vmatmul.mubr.bf16.vlgmr.msra.gmra.mrb[48].mxu0 %v8547_v7  ;;  %4353 = vmatmul.mubr.bf16.vlgmr.msra.gmra.mrb[48].mxu1 %v8547_v7  ;;  %v7379_v7 = vld [vmem:[%s10479_s1 + $0x428] ss:$236 sps:$4 sm:$0xff]  }
 0x11b   :  { %4374 = vmatpush1.bf16.msra.mxu0 %v7364_v26  ;;  %4427 = vmatpush1.bf16.msra.mxu1 %v7367_v27  ;;  %v7411_v26 = vld [vmem:[%s10479_s1 + $0xd64] ss:$236 sps:$4 sm:$0xff]  }
 0x11c   :  { %4375 = vmatprep.subr.bf16.mxu0 %v7372_v0  ;;  %4428 = vmatprep.subr.bf16.mxu1 %v7375_v28 }
 0x11d   :  { %6673 = vmatprep.mubr.msk.bf16.mxu0 %vm3443_vm1, %v8566_v12  ;;  %6675 = vmatprep.mubr.msk.bf16.mxu1 %vm3443_vm1, %v8566_v12  ;;  %v7385_v12 = vld [vmem:[%s10479_s1 + $0x600] ss:$236 sps:$4 sm:$0xff]  }
 0x11f   :  { %4376 = vmatpush1.bf16.msra.mxu0 %v7370_v29  ;;  %4429 = vmatpush1.bf16.msra.mxu1 %v7373_v30  ;;  %v7406_v30 = vld [vmem:[%s10479_s1 + $0xd58] ss:$236 sps:$4 sm:$0xff]  }
 0x120   :  { %4377 = vmatprep.subr.bf16.mxu0 %v7378_v31  ;;  %4430 = vmatprep.subr.bf16.mxu1 %v7381_v1  ;;  %v7409_v31 = vld [vmem:[%s10479_s1 + $0xd60] ss:$236 sps:$4 sm:$0xff]  }
 0x121   :  { %v573_v1 = vld [vmem:[%s10479_s1 + $0x1108] sm:$0x33] }
 0x122   :  { %4310 = vmatmul.mubr.bf16.gmra.mrb[52].mxu0 %v8593_v19  ;;  %4363 = vmatmul.mubr.bf16.gmra.mrb[52].mxu1 %v8593_v19 }
 0x123   :  { %4378 = vmatpush1.bf16.msra.mxu0 %v7376_v34  ;;  %4431 = vmatpush1.bf16.msra.mxu1 %v7379_v7  ;;  %v574_v34 = vld [vmem:[%s10479_s1 + $0x1110] sm:$0x33] }
 0x124   :  { %4379 = vmatprep.subr.bf16.mxu0 %v7384_v35  ;;  %4432 = vmatprep.subr.bf16.mxu1 %v7387_v36 }
 0x125   :  { %v3771_v41 = vpop.f32.mrb[8].mxu0  ;;  %v3824_v43 = vpop.f32.mrb[8].mxu1  ;;  %6676 = vmatprep.mubr.msk.bf16.mxu0 %vm3443_vm1, %v8914_v44  ;;  %6678 = vmatprep.mubr.msk.bf16.mxu1 %vm3443_vm1, %v8914_v44 }
 0x126   :  { %v3772_v19 = vadd.f32 %v3771_v41, %v8713_v62  ;;  %v3825_v45 = vadd.f32 %v3824_v43, %v8713_v62  ;;  %v3773_v46 = vpop.f32.mrb[9].mxu0  ;;  %v3826_v47 = vpop.f32.mrb[9].mxu1  ;;  %v6618_v43 = vcombine.high %v573_v1, %v573_v1 }
 0x127   :  { %v3774_v48 = vadd.f32 %v3773_v46, %v8713_v62  ;;  %v3827_v49 = vadd.f32 %v3826_v47, %v8713_v62  ;;  %v3775_v50 = vpop.f32.mrb[10].mxu0  ;;  %v3828_v51 = vpop.f32.mrb[10].mxu1  ;;  %4380 = vmatpush1.bf16.msra.mxu0 %v7382_v37  ;;  %4433 = vmatpush1.bf16.msra.mxu1 %v7385_v12  ;;  %v7414_v12 = vld [vmem:[%s10479_s1 + $0xf34] ss:$236 sps:$4 sm:$0xff]   ;;  %v7415_v46 = vld [vmem:[%s10479_s1 + $0xf38] ss:$236 sps:$4 sm:$0xff]   ;;  %v6617_v47 = vcombine.low %v573_v1, %v573_v1 }
 0x128   :  { %v3776_v54 = vadd.f32 %v3775_v50, %v8729_v6  ;;  %v3829_v55 = vadd.f32 %v3828_v51, %v8729_v6  ;;  %v3777_v56 = vpop.f32.mrb[11].mxu0  ;;  %v3830_v57 = vpop.f32.mrb[11].mxu1  ;;  %4381 = vmatprep.subr.bf16.mxu0 %v7390_v38  ;;  %4434 = vmatprep.subr.bf16.mxu1 %v7393_v40  ;;  %v7417_v38 = vld [vmem:[%s10479_s1 + $0xf3c] ss:$236 sps:$4 sm:$0xff]  }
 0x129   :  { %v6830_v60 = vpack.c.bf16 %v3774_v48, %v3772_v19  ;;  %v6831_v61 = vpack.c.bf16 %v3827_v49, %v3825_v45  ;;  %v3778_v63 = vadd.f32 %v3777_v56, %v8729_v6  ;;  %v3831_v3 = vadd.f32 %v3830_v57, %v8729_v6  ;;  %v7412_v45 = vld [vmem:[%s10479_s1 + $0xf30] ss:$236 sps:$4 sm:$0xff]   ;;  %v7425_v56 = vld [vmem:[%s10479_s1 + $0x88] ss:$236 sps:$4 sm:$0xff]  }
 0x12a   :  { %v6620_v19 = vcombine.high %v574_v34, %v574_v34  ;;  %v6619_v48 = vcombine.low %v574_v34, %v574_v34  ;;  %v3542_v49 = vand.u32 %v6618_v43, %v7962_v42  ;;  %v3539_v51 = vand.u32 %v6617_v47, %v7962_v42  ;;  %v7430_v57 = vld [vmem:[%s10479_s1 + $0x25c] ss:$236 sps:$4 sm:$0xff]   ;;  %v7457_v34 = vld [vmem:[%s10479_s1 + $0x9c4] ss:$236 sps:$4 sm:$0xff]   ;;  %v7460_v43 = vld [vmem:[%s10479_s1 + $0xb94] ss:$236 sps:$4 sm:$0xff]  }
 0x12b   :  { %5931 = vst [vmem:[%s10482_s3 + $0x10] sm:$0xff] %v6830_v60  ;;  %5932 = vst [vmem:[%s10482_s3 + $0x18] sm:$0xff] %v6831_v61  ;;  %v6860_v4 = vpack.c.bf16 %v3778_v63, %v3776_v54  ;;  %v6861_v5 = vpack.c.bf16 %v3831_v3, %v3829_v55  ;;  %4382 = vmatpush1.bf16.msra.mxu0 %v7388_v32  ;;  %4435 = vmatpush1.bf16.msra.mxu1 %v7391_v52  ;;  %v7424_v52 = vld [vmem:[%s10479_s1 + $0x84] ss:$236 sps:$4 sm:$0xff]   ;;  %v7427_v54 = vld [vmem:[%s10479_s1 + $0x8c] ss:$236 sps:$4 sm:$0xff]  }
 0x12c   :  { %4383 = vmatprep.subr.bf16.mxu0 %v7396_v58  ;;  %4436 = vmatprep.subr.bf16.mxu1 %v7399_v59  ;;  %v3548_v50 = vand.u32 %v6620_v19, %v7962_v42  ;;  %v3545_v32 = vand.u32 %v6619_v48, %v7962_v42  ;;  %v7422_v55 = vld [vmem:[%s10479_s1 + $0x80] ss:$236 sps:$4 sm:$0xff]   ;;  %v7433_v58 = vld [vmem:[%s10479_s1 + $0x264] ss:$236 sps:$4 sm:$0xff]   ;;  %v7439_v3 = vld [vmem:[%s10479_s1 + $0x43c] ss:$236 sps:$4 sm:$0xff]  }
 0x12d   :  { %5962 = vst [vmem:[%s10482_s3 + $0xfc] sm:$0xff] %v6860_v4  ;;  %5963 = vst [vmem:[%s10482_s3 + $0x104] sm:$0xff] %v6861_v5  ;;  %v3781_v14 = vpop.f32.mrb[12].mxu0  ;;  %v3834_v15 = vpop.f32.mrb[12].mxu1  ;;  %v7428_v59 = vld [vmem:[%s10479_s1 + $0x258] ss:$236 sps:$4 sm:$0xff]  }
 0x12e   :  { %v3782_v16 = vadd.f32 %v3781_v14, %v8737_v10  ;;  %v3783_v17 = vpop.f32.mrb[13].mxu0  ;;  %v3835_v18 = vadd.f32 %v3834_v15, %v8737_v10  ;;  %v3836_v20 = vpop.f32.mrb[13].mxu1  ;;  %v7431_v60 = vld [vmem:[%s10479_s1 + $0x260] ss:$236 sps:$4 sm:$0xff]   ;;  %v7434_v4 = vld [vmem:[%s10479_s1 + $0x430] ss:$236 sps:$4 sm:$0xff]  }
 0x12f   :  { %4384 = vmatpush1.bf16.msra.mxu0 %v7394_v8  ;;  %4437 = vmatpush1.bf16.msra.mxu1 %v7397_v9  ;;  %v3784_v23 = vadd.f32 %v3783_v17, %v8737_v10  ;;  %v3785_v33 = vpop.f32.mrb[14].mxu0  ;;  %v3837_v24 = vadd.f32 %v3836_v20, %v8737_v10  ;;  %v3838_v53 = vpop.f32.mrb[14].mxu1  ;;  %v9051_v61 = vld [vmem:[%s10480_s0] ss:$8 sps:$4 sm:$0xff]   ;;  %v7437_v5 = vld [vmem:[%s10479_s1 + $0x438] ss:$236 sps:$4 sm:$0xff]  }
 0x130   :  { %4385 = vmatprep.subr.bf16.mxu0 %v7402_v11  ;;  %4438 = vmatprep.subr.bf16.mxu1 %v7405_v13  ;;  %v3786_v27 = vadd.f32 %v3785_v33, %v8781_v39  ;;  %v3787_v0 = vpop.f32.mrb[15].mxu0  ;;  %v3839_v28 = vadd.f32 %v3838_v53, %v8781_v39  ;;  %v3840_v29 = vpop.f32.mrb[15].mxu1  ;;  %v7436_v63 = vld [vmem:[%s10479_s1 + $0x434] ss:$236 sps:$4 sm:$0xff]   ;;  %v7442_v9 = vld [vmem:[%s10479_s1 + $0x60c] ss:$236 sps:$4 sm:$0xff]  }
 0x131   :  { %v6890_v7 = vpack.c.bf16 %v3784_v23, %v3782_v16  ;;  %v6891_v35 = vpack.c.bf16 %v3837_v24, %v3835_v18  ;;  %v3788_v36 = vadd.f32 %v3787_v0, %v8781_v39  ;;  %v3841_v37 = vadd.f32 %v3840_v29, %v8781_v39  ;;  %v9070_v8 = vld [vmem:[%s10480_s0 + $0x14] ss:$8 sps:$4 sm:$0xff]   ;;  %v9091_v15 = vld [vmem:[%s10480_s0 + $0x10] ss:$8 sps:$4 sm:$0xff]  }
 0x132   :  { %v7445_v11 = vld [vmem:[%s10479_s1 + $0x614] ss:$236 sps:$4 sm:$0xff]   ;;  %v7443_v14 = vld [vmem:[%s10479_s1 + $0x610] ss:$236 sps:$4 sm:$0xff]   ;;  %v7451_v17 = vld [vmem:[%s10479_s1 + $0x7ec] ss:$236 sps:$4 sm:$0xff]  }
 0x133   :  { %4386 = vmatpush1.bf16.msra.mxu0 %v7400_v21  ;;  %4439 = vmatpush1.bf16.msra.mxu1 %v7403_v22  ;;  %5992 = vst [vmem:[%s10482_s3 + $0x1e8] sm:$0xff] %v6890_v7  ;;  %5993 = vst [vmem:[%s10482_s3 + $0x1f0] sm:$0xff] %v6891_v35  ;;  %v6920_v40 = vpack.c.bf16 %v3788_v36, %v3786_v27  ;;  %v6921_v41 = vpack.c.bf16 %v3841_v37, %v3839_v28  ;;  %v7440_v13 = vld [vmem:[%s10479_s1 + $0x608] ss:$236 sps:$4 sm:$0xff]   ;;  %v7448_v16 = vld [vmem:[%s10479_s1 + $0x7e4] ss:$236 sps:$4 sm:$0xff]  }
 0x134   :  { %4387 = vmatprep.subr.bf16.mxu0 %v7408_v25  ;;  %4440 = vmatprep.subr.bf16.mxu1 %v7411_v26  ;;  %v7446_v27 = vld [vmem:[%s10479_s1 + $0x7e0] ss:$236 sps:$4 sm:$0xff]   ;;  %v7449_v0 = vld [vmem:[%s10479_s1 + $0x7e8] ss:$236 sps:$4 sm:$0xff]  }
 0x135   :  { %6022 = vst [vmem:[%s10482_s3 + $0x2d4] sm:$0xff] %v6920_v40  ;;  %6023 = vst [vmem:[%s10482_s3 + $0x2dc] sm:$0xff] %v6921_v41  ;;  %v7454_v1 = vld [vmem:[%s10479_s1 + $0x9bc] ss:$236 sps:$4 sm:$0xff]   ;;  %v7452_v40 = vld [vmem:[%s10479_s1 + $0x9b8] ss:$236 sps:$4 sm:$0xff]  }
 0x136   :  { %v7455_v41 = vld [vmem:[%s10479_s1 + $0x9c0] ss:$236 sps:$4 sm:$0xff]   ;;  %v7463_v19 = vld [vmem:[%s10479_s1 + $0xb9c] ss:$236 sps:$4 sm:$0xff]  }
 0x137   :  { %4388 = vmatpush1.bf16.msra.mxu0 %v7406_v30  ;;  %4441 = vmatpush1.bf16.msra.mxu1 %v7409_v31 }
 0x138   :  { %4389 = vmatprep.subr.bf16.mxu0 %v7414_v12  ;;  %4442 = vmatprep.subr.bf16.mxu1 %v7417_v38 }
 0x13b   :  { %4390 = vmatpush1.bf16.msra.mxu0 %v7412_v45  ;;  %4443 = vmatpush1.bf16.msra.mxu1 %v7415_v46 }
 0x13c   :  { %4391 = vmatprep.subr.bf16.mxu0 %v3542_v49  ;;  %4444 = vmatprep.subr.bf16.mxu1 %v3548_v50 }
 0x13f   :  { %4392 = vmatpush1.bf16.msra.mxu0 %v3539_v51  ;;  %4445 = vmatpush1.bf16.msra.mxu1 %v3545_v32  ;;  %v7458_v51 = vld [vmem:[%s10479_s1 + $0xb90] ss:$236 sps:$4 sm:$0xff]   ;;  %v7461_v32 = vld [vmem:[%s10479_s1 + $0xb98] ss:$236 sps:$4 sm:$0xff]  }
 0x140   :  { %4479 = vmatprep.subr.bf16.mxu0 %v7424_v52  ;;  %4532 = vmatprep.subr.bf16.mxu1 %v7427_v54 }
 0x142   :  { %4406 = vmatmul.mubr.bf16.vlgmr.msra.gmra.mrb[56].mxu0 %v9051_v61  ;;  %4459 = vmatmul.mubr.bf16.vlgmr.msra.gmra.mrb[56].mxu1 %v9051_v61 }
 0x143   :  { %4480 = vmatpush1.bf16.msra.mxu0 %v7422_v55  ;;  %4533 = vmatpush1.bf16.msra.mxu1 %v7425_v56 }
 0x144   :  { %4481 = vmatprep.subr.bf16.mxu0 %v7430_v57  ;;  %4534 = vmatprep.subr.bf16.mxu1 %v7433_v58  ;;  %v7466_v57 = vld [vmem:[%s10479_s1 + $0xd6c] ss:$236 sps:$4 sm:$0xff]   ;;  %v7469_v58 = vld [vmem:[%s10479_s1 + $0xd74] ss:$236 sps:$4 sm:$0xff]  }
 0x145   :  { %6677 = vmatprep.mubr.msk.bf16.mxu0 %vm3443_vm1, %v9070_v8  ;;  %6679 = vmatprep.mubr.msk.bf16.mxu1 %vm3443_vm1, %v9070_v8 }
 0x147   :  { %4482 = vmatpush1.bf16.msra.mxu0 %v7428_v59  ;;  %4535 = vmatpush1.bf16.msra.mxu1 %v7431_v60 }
 0x148   :  { %4483 = vmatprep.subr.bf16.mxu0 %v7436_v63  ;;  %4536 = vmatprep.subr.bf16.mxu1 %v7439_v3 }
 0x14a   :  { %4416 = vmatmul.mubr.bf16.gmra.mrb[60].mxu0 %v9091_v15  ;;  %4469 = vmatmul.mubr.bf16.gmra.mrb[60].mxu1 %v9091_v15 }
 0x14b   :  { %4484 = vmatpush1.bf16.msra.mxu0 %v7434_v4  ;;  %4537 = vmatpush1.bf16.msra.mxu1 %v7437_v5  ;;  %v575_v4 = vld [vmem:[%s10479_s1 + $0x1118] sm:$0x33]  ;;  %v576_v5 = vld [vmem:[%s10479_s1 + $0x1120] sm:$0x33] }
 0x14c   :  { %4485 = vmatprep.subr.bf16.mxu0 %v7442_v9  ;;  %4538 = vmatprep.subr.bf16.mxu1 %v7445_v11 }
 0x14d   :  { %v3877_v18 = vpop.f32.mrb[16].mxu0  ;;  %v3930_v20 = vpop.f32.mrb[16].mxu1  ;;  %6680 = vmatprep.mubr.msk.bf16.mxu0 %vm3443_vm1, %v8914_v44  ;;  %6682 = vmatprep.mubr.msk.bf16.mxu1 %vm3443_vm1, %v8914_v44 }
 0x14e   :  { %v3878_v21 = vadd.f32 %v3877_v18, %v8713_v62  ;;  %v3931_v22 = vadd.f32 %v3930_v20, %v8713_v62  ;;  %v3879_v23 = vpop.f32.mrb[17].mxu0  ;;  %v3932_v33 = vpop.f32.mrb[17].mxu1 }
 0x14f   :  { %v3880_v24 = vadd.f32 %v3879_v23, %v8713_v62  ;;  %v3933_v53 = vadd.f32 %v3932_v33, %v8713_v62  ;;  %v3881_v25 = vpop.f32.mrb[18].mxu0  ;;  %v3934_v26 = vpop.f32.mrb[18].mxu1  ;;  %4486 = vmatpush1.bf16.msra.mxu0 %v7440_v13  ;;  %4539 = vmatpush1.bf16.msra.mxu1 %v7443_v14  ;;  %v6622_v23 = vcombine.high %v575_v4, %v575_v4 }
 0x150   :  { %v3882_v28 = vadd.f32 %v3881_v25, %v8729_v6  ;;  %v3935_v29 = vadd.f32 %v3934_v26, %v8729_v6  ;;  %v3883_v30 = vpop.f32.mrb[19].mxu0  ;;  %v3936_v31 = vpop.f32.mrb[19].mxu1  ;;  %4487 = vmatprep.subr.bf16.mxu0 %v7448_v16  ;;  %4540 = vmatprep.subr.bf16.mxu1 %v7451_v17  ;;  %v7464_v16 = vld [vmem:[%s10479_s1 + $0xd68] ss:$236 sps:$4 sm:$0xff]   ;;  %v7467_v17 = vld [vmem:[%s10479_s1 + $0xd70] ss:$236 sps:$4 sm:$0xff]   ;;  %v6624_v33 = vcombine.high %v576_v5, %v576_v5 }
 0x151   :  { %v6832_v7 = vpack.c.bf16 %v3880_v24, %v3878_v21  ;;  %v6833_v35 = vpack.c.bf16 %v3933_v53, %v3931_v22  ;;  %v3884_v36 = vadd.f32 %v3883_v30, %v8729_v6  ;;  %v3937_v37 = vadd.f32 %v3936_v31, %v8729_v6  ;;  %v7472_v21 = vld [vmem:[%s10479_s1 + $0xf44] ss:$236 sps:$4 sm:$0xff]   ;;  %v7475_v22 = vld [vmem:[%s10479_s1 + $0xf4c] ss:$236 sps:$4 sm:$0xff]   ;;  %v7473_v53 = vld [vmem:[%s10479_s1 + $0xf48] ss:$236 sps:$4 sm:$0xff]  }
 0x152   :  { %v7470_v24 = vld [vmem:[%s10479_s1 + $0xf40] ss:$236 sps:$4 sm:$0xff]   ;;  %v6621_v25 = vcombine.low %v575_v4, %v575_v4  ;;  %v6623_v26 = vcombine.low %v576_v5, %v576_v5  ;;  %v7485_v31 = vld [vmem:[%s10479_s1 + $0x9c] ss:$236 sps:$4 sm:$0xff]  }
 0x153   :  { %5933 = vst [vmem:[%s10482_s3 + $0x20] sm:$0xff] %v6832_v7  ;;  %5934 = vst [vmem:[%s10482_s3 + $0x28] sm:$0xff] %v6833_v35  ;;  %v6862_v12 = vpack.c.bf16 %v3884_v36, %v3882_v28  ;;  %v6863_v38 = vpack.c.bf16 %v3937_v37, %v3935_v29  ;;  %4488 = vmatpush1.bf16.msra.mxu0 %v7446_v27  ;;  %4541 = vmatpush1.bf16.msra.mxu1 %v7449_v0  ;;  %v7482_v30 = vld [vmem:[%s10479_s1 + $0x94] ss:$236 sps:$4 sm:$0xff]   ;;  %v7488_v7 = vld [vmem:[%s10479_s1 + $0x26c] ss:$236 sps:$4 sm:$0xff]  }
 0x154   :  { %4489 = vmatprep.subr.bf16.mxu0 %v7454_v1  ;;  %4542 = vmatprep.subr.bf16.mxu1 %v7457_v34  ;;  %v3554_v27 = vand.u32 %v6622_v23, %v7962_v42  ;;  %v3560_v0 = vand.u32 %v6624_v33, %v7962_v42  ;;  %v3551_v28 = vand.u32 %v6621_v25, %v7962_v42  ;;  %v7480_v1 = vld [vmem:[%s10479_s1 + $0x90] ss:$236 sps:$4 sm:$0xff]   ;;  %v7483_v34 = vld [vmem:[%s10479_s1 + $0x98] ss:$236 sps:$4 sm:$0xff]   ;;  %v7491_v35 = vld [vmem:[%s10479_s1 + $0x274] ss:$236 sps:$4 sm:$0xff]  }
 0x155   :  { %5964 = vst [vmem:[%s10482_s3 + $0x10c] sm:$0xff] %v6862_v12  ;;  %5965 = vst [vmem:[%s10482_s3 + $0x114] sm:$0xff] %v6863_v38  ;;  %v3887_v45 = vpop.f32.mrb[20].mxu0  ;;  %v3940_v46 = vpop.f32.mrb[20].mxu1  ;;  %v3557_v29 = vand.u32 %v6623_v26, %v7962_v42  ;;  %v7486_v36 = vld [vmem:[%s10479_s1 + $0x268] ss:$236 sps:$4 sm:$0xff]  }
 0x156   :  { %v3888_v47 = vadd.f32 %v3887_v45, %v8737_v10  ;;  %v3889_v48 = vpop.f32.mrb[21].mxu0  ;;  %v3941_v49 = vadd.f32 %v3940_v46, %v8737_v10  ;;  %v3942_v50 = vpop.f32.mrb[21].mxu1  ;;  %v7489_v37 = vld [vmem:[%s10479_s1 + $0x270] ss:$236 sps:$4 sm:$0xff]   ;;  %v7497_v38 = vld [vmem:[%s10479_s1 + $0x44c] ss:$236 sps:$4 sm:$0xff]  }
 0x157   :  { %4490 = vmatpush1.bf16.msra.mxu0 %v7452_v40  ;;  %4543 = vmatpush1.bf16.msra.mxu1 %v7455_v41  ;;  %v3890_v52 = vadd.f32 %v3889_v48, %v8737_v10  ;;  %v3891_v54 = vpop.f32.mrb[22].mxu0  ;;  %v3943_v55 = vadd.f32 %v3942_v50, %v8737_v10  ;;  %v3944_v56 = vpop.f32.mrb[22].mxu1  ;;  %v7494_v12 = vld [vmem:[%s10479_s1 + $0x444] ss:$236 sps:$4 sm:$0xff]   ;;  %v7492_v40 = vld [vmem:[%s10479_s1 + $0x440] ss:$236 sps:$4 sm:$0xff]  }
 0x158   :  { %4491 = vmatprep.subr.bf16.mxu0 %v7460_v43  ;;  %4544 = vmatprep.subr.bf16.mxu1 %v7463_v19  ;;  %v3892_v59 = vadd.f32 %v3891_v54, %v8781_v39  ;;  %v3893_v60 = vpop.f32.mrb[23].mxu0  ;;  %v3945_v63 = vadd.f32 %v3944_v56, %v8781_v39  ;;  %v3946_v3 = vpop.f32.mrb[23].mxu1  ;;  %v7495_v41 = vld [vmem:[%s10479_s1 + $0x448] ss:$236 sps:$4 sm:$0xff]   ;;  %v7503_v19 = vld [vmem:[%s10479_s1 + $0x624] ss:$236 sps:$4 sm:$0xff]  }
 0x159   :  { %v6892_v9 = vpack.c.bf16 %v3890_v52, %v3888_v47  ;;  %v6893_v11 = vpack.c.bf16 %v3943_v55, %v3941_v49  ;;  %v3894_v13 = vadd.f32 %v3893_v60, %v8781_v39  ;;  %v3947_v14 = vadd.f32 %v3946_v3, %v8781_v39  ;;  %v7500_v43 = vld [vmem:[%s10479_s1 + $0x61c] ss:$236 sps:$4 sm:$0xff]   ;;  %v7498_v45 = vld [vmem:[%s10479_s1 + $0x618] ss:$236 sps:$4 sm:$0xff]   ;;  %v7501_v46 = vld [vmem:[%s10479_s1 + $0x620] ss:$236 sps:$4 sm:$0xff]  }
 0x15a   :  { %v7506_v47 = vld [vmem:[%s10479_s1 + $0x7f4] ss:$236 sps:$4 sm:$0xff]   ;;  %v7509_v48 = vld [vmem:[%s10479_s1 + $0x7fc] ss:$236 sps:$4 sm:$0xff]   ;;  %v7507_v60 = vld [vmem:[%s10479_s1 + $0x7f8] ss:$236 sps:$4 sm:$0xff]  }
 0x15b   :  { %4492 = vmatpush1.bf16.msra.mxu0 %v7458_v51  ;;  %4545 = vmatpush1.bf16.msra.mxu1 %v7461_v32  ;;  %5994 = vst [vmem:[%s10482_s3 + $0x1f8] sm:$0xff] %v6892_v9  ;;  %5995 = vst [vmem:[%s10482_s3 + $0x200] sm:$0xff] %v6893_v11  ;;  %v6922_v18 = vpack.c.bf16 %v3894_v13, %v3892_v59  ;;  %v6923_v20 = vpack.c.bf16 %v3947_v14, %v3945_v63  ;;  %v7504_v59 = vld [vmem:[%s10479_s1 + $0x7f0] ss:$236 sps:$4 sm:$0xff]   ;;  %v7512_v9 = vld [vmem:[%s10479_s1 + $0x9cc] ss:$236 sps:$4 sm:$0xff]  }
 0x15c   :  { %4493 = vmatprep.subr.bf16.mxu0 %v7466_v57  ;;  %4546 = vmatprep.subr.bf16.mxu1 %v7469_v58  ;;  %v7515_v11 = vld [vmem:[%s10479_s1 + $0x9d4] ss:$236 sps:$4 sm:$0xff]   ;;  %v7518_v23 = vld [vmem:[%s10479_s1 + $0xba4] ss:$236 sps:$4 sm:$0xff]   ;;  %v7521_v33 = vld [vmem:[%s10479_s1 + $0xbac] ss:$236 sps:$4 sm:$0xff]  }
 0x15d   :  { %6024 = vst [vmem:[%s10482_s3 + $0x2e4] sm:$0xff] %v6922_v18  ;;  %6025 = vst [vmem:[%s10482_s3 + $0x2ec] sm:$0xff] %v6923_v20 }
 0x15f   :  { %4494 = vmatpush1.bf16.msra.mxu0 %v7464_v16  ;;  %4547 = vmatpush1.bf16.msra.mxu1 %v7467_v17 }
 0x160   :  { %4495 = vmatprep.subr.bf16.mxu0 %v7472_v21  ;;  %4548 = vmatprep.subr.bf16.mxu1 %v7475_v22  ;;  %v7510_v21 = vld [vmem:[%s10479_s1 + $0x9c8] ss:$236 sps:$4 sm:$0xff]   ;;  %v7513_v22 = vld [vmem:[%s10479_s1 + $0x9d0] ss:$236 sps:$4 sm:$0xff]  }
 0x163   :  { %4496 = vmatpush1.bf16.msra.mxu0 %v7470_v24  ;;  %4549 = vmatpush1.bf16.msra.mxu1 %v7473_v53 }
 0x164   :  { %4497 = vmatprep.subr.bf16.mxu0 %v3554_v27  ;;  %4550 = vmatprep.subr.bf16.mxu1 %v3560_v0 }
 0x167   :  { %4498 = vmatpush1.bf16.msra.mxu0 %v3551_v28  ;;  %4551 = vmatpush1.bf16.msra.mxu1 %v3557_v29  ;;  %v7516_v28 = vld [vmem:[%s10479_s1 + $0xba0] ss:$236 sps:$4 sm:$0xff]   ;;  %v7519_v29 = vld [vmem:[%s10479_s1 + $0xba8] ss:$236 sps:$4 sm:$0xff]  }
 0x168   :  { %4585 = vmatprep.subr.bf16.mxu0 %v7482_v30  ;;  %4638 = vmatprep.subr.bf16.mxu1 %v7485_v31 }
 0x16a   :  { %4512 = vmatmul.mubr.bf16.vlgmr.msra.gmra.mrb[64].mxu0 %v9051_v61  ;;  %4565 = vmatmul.mubr.bf16.vlgmr.msra.gmra.mrb[64].mxu1 %v9051_v61 }
 0x16b   :  { %4586 = vmatpush1.bf16.msra.mxu0 %v7480_v1  ;;  %4639 = vmatpush1.bf16.msra.mxu1 %v7483_v34 }
 0x16c   :  { %4587 = vmatprep.subr.bf16.mxu0 %v7488_v7  ;;  %4640 = vmatprep.subr.bf16.mxu1 %v7491_v35  ;;  %v7524_v7 = vld [vmem:[%s10479_s1 + $0xd7c] ss:$236 sps:$4 sm:$0xff]   ;;  %v7527_v35 = vld [vmem:[%s10479_s1 + $0xd84] ss:$236 sps:$4 sm:$0xff]  }
 0x16d   :  { %6681 = vmatprep.mubr.msk.bf16.mxu0 %vm3443_vm1, %v9070_v8  ;;  %6683 = vmatprep.mubr.msk.bf16.mxu1 %vm3443_vm1, %v9070_v8 }
 0x16f   :  { %4588 = vmatpush1.bf16.msra.mxu0 %v7486_v36  ;;  %4641 = vmatpush1.bf16.msra.mxu1 %v7489_v37 }
 0x170   :  { %4589 = vmatprep.subr.bf16.mxu0 %v7494_v12  ;;  %4642 = vmatprep.subr.bf16.mxu1 %v7497_v38 }
 0x172   :  { %4522 = vmatmul.mubr.bf16.gmra.mrb[68].mxu0 %v9091_v15  ;;  %4575 = vmatmul.mubr.bf16.gmra.mrb[68].mxu1 %v9091_v15 }
 0x173   :  { %4590 = vmatpush1.bf16.msra.mxu0 %v7492_v40  ;;  %4643 = vmatpush1.bf16.msra.mxu1 %v7495_v41  ;;  %v577_v40 = vld [vmem:[%s10479_s1 + $0x1128] sm:$0x33]  ;;  %v578_v41 = vld [vmem:[%s10479_s1 + $0x1130] sm:$0x33] }
 0x174   :  { %4591 = vmatprep.subr.bf16.mxu0 %v7500_v43  ;;  %4644 = vmatprep.subr.bf16.mxu1 %v7503_v19 }
 0x175   :  { %v3983_v49 = vpop.f32.mrb[24].mxu0  ;;  %v4036_v50 = vpop.f32.mrb[24].mxu1  ;;  %6684 = vmatprep.mubr.msk.bf16.mxu0 %vm3443_vm1, %v8914_v44  ;;  %6686 = vmatprep.mubr.msk.bf16.mxu1 %vm3443_vm1, %v8914_v44 }
 0x176   :  { %v3984_v51 = vadd.f32 %v3983_v49, %v8713_v62  ;;  %v4037_v32 = vadd.f32 %v4036_v50, %v8713_v62  ;;  %v3985_v52 = vpop.f32.mrb[25].mxu0  ;;  %v4038_v54 = vpop.f32.mrb[25].mxu1 }
 0x177   :  { %v3986_v55 = vadd.f32 %v3985_v52, %v8713_v62  ;;  %v4039_v56 = vadd.f32 %v4038_v54, %v8713_v62  ;;  %v3987_v57 = vpop.f32.mrb[26].mxu0  ;;  %v4040_v58 = vpop.f32.mrb[26].mxu1  ;;  %4592 = vmatpush1.bf16.msra.mxu0 %v7498_v45  ;;  %4645 = vmatpush1.bf16.msra.mxu1 %v7501_v46  ;;  %v6626_v52 = vcombine.high %v577_v40, %v577_v40 }
 0x178   :  { %v3988_v63 = vadd.f32 %v3987_v57, %v8729_v6  ;;  %v4041_v3 = vadd.f32 %v4040_v58, %v8729_v6  ;;  %v3989_v4 = vpop.f32.mrb[27].mxu0  ;;  %v4042_v5 = vpop.f32.mrb[27].mxu1  ;;  %4593 = vmatprep.subr.bf16.mxu0 %v7506_v47  ;;  %4646 = vmatprep.subr.bf16.mxu1 %v7509_v48  ;;  %v7522_v47 = vld [vmem:[%s10479_s1 + $0xd78] ss:$236 sps:$4 sm:$0xff]   ;;  %v7525_v48 = vld [vmem:[%s10479_s1 + $0xd80] ss:$236 sps:$4 sm:$0xff]   ;;  %v6628_v54 = vcombine.high %v578_v41, %v578_v41 }
 0x179   :  { %v6834_v13 = vpack.c.bf16 %v3986_v55, %v3984_v51  ;;  %v6835_v14 = vpack.c.bf16 %v4039_v56, %v4037_v32  ;;  %v3990_v16 = vadd.f32 %v3989_v4, %v8729_v6  ;;  %v4043_v17 = vadd.f32 %v4042_v5, %v8729_v6  ;;  %v7530_v51 = vld [vmem:[%s10479_s1 + $0xf54] ss:$236 sps:$4 sm:$0xff]   ;;  %v7533_v32 = vld [vmem:[%s10479_s1 + $0xf5c] ss:$236 sps:$4 sm:$0xff]   ;;  %v7531_v56 = vld [vmem:[%s10479_s1 + $0xf58] ss:$236 sps:$4 sm:$0xff]  }
 0x17a   :  { %v7528_v55 = vld [vmem:[%s10479_s1 + $0xf50] ss:$236 sps:$4 sm:$0xff]   ;;  %v6625_v57 = vcombine.low %v577_v40, %v577_v40  ;;  %v6627_v58 = vcombine.low %v578_v41, %v578_v41  ;;  %v7543_v5 = vld [vmem:[%s10479_s1 + $0xac] ss:$236 sps:$4 sm:$0xff]  }
 0x17b   :  { %5935 = vst [vmem:[%s10482_s3 + $0x30] sm:$0xff] %v6834_v13  ;;  %5936 = vst [vmem:[%s10482_s3 + $0x38] sm:$0xff] %v6835_v14  ;;  %v6864_v18 = vpack.c.bf16 %v3990_v16, %v3988_v63  ;;  %v6865_v20 = vpack.c.bf16 %v4043_v17, %v4041_v3  ;;  %4594 = vmatpush1.bf16.msra.mxu0 %v7504_v59  ;;  %4647 = vmatpush1.bf16.msra.mxu1 %v7507_v60  ;;  %v7540_v4 = vld [vmem:[%s10479_s1 + $0xa4] ss:$236 sps:$4 sm:$0xff]   ;;  %v7546_v13 = vld [vmem:[%s10479_s1 + $0x27c] ss:$236 sps:$4 sm:$0xff]  }
 0x17c   :  { %4595 = vmatprep.subr.bf16.mxu0 %v7512_v9  ;;  %4648 = vmatprep.subr.bf16.mxu1 %v7515_v11  ;;  %v3566_v59 = vand.u32 %v6626_v52, %v7962_v42  ;;  %v3572_v60 = vand.u32 %v6628_v54, %v7962_v42  ;;  %v3563_v63 = vand.u32 %v6625_v57, %v7962_v42  ;;  %v7538_v9 = vld [vmem:[%s10479_s1 + $0xa0] ss:$236 sps:$4 sm:$0xff]   ;;  %v7541_v11 = vld [vmem:[%s10479_s1 + $0xa8] ss:$236 sps:$4 sm:$0xff]   ;;  %v7549_v14 = vld [vmem:[%s10479_s1 + $0x284] ss:$236 sps:$4 sm:$0xff]  }
 0x17d   :  { %5966 = vst [vmem:[%s10482_s3 + $0x11c] sm:$0xff] %v6864_v18  ;;  %5967 = vst [vmem:[%s10482_s3 + $0x124] sm:$0xff] %v6865_v20  ;;  %v3993_v24 = vpop.f32.mrb[28].mxu0  ;;  %v4046_v53 = vpop.f32.mrb[28].mxu1  ;;  %v3569_v3 = vand.u32 %v6627_v58, %v7962_v42  ;;  %v7544_v16 = vld [vmem:[%s10479_s1 + $0x278] ss:$236 sps:$4 sm:$0xff]  }
 0x17e   :  { %v3994_v25 = vadd.f32 %v3993_v24, %v8737_v10  ;;  %v3995_v26 = vpop.f32.mrb[29].mxu0  ;;  %v4047_v27 = vadd.f32 %v4046_v53, %v8737_v10  ;;  %v4048_v0 = vpop.f32.mrb[29].mxu1  ;;  %v7547_v17 = vld [vmem:[%s10479_s1 + $0x280] ss:$236 sps:$4 sm:$0xff]   ;;  %v7555_v20 = vld [vmem:[%s10479_s1 + $0x45c] ss:$236 sps:$4 sm:$0xff]  }
 0x17f   :  { %4596 = vmatpush1.bf16.msra.mxu0 %v7510_v21  ;;  %4649 = vmatpush1.bf16.msra.mxu1 %v7513_v22  ;;  %v3996_v30 = vadd.f32 %v3995_v26, %v8737_v10  ;;  %v3997_v31 = vpop.f32.mrb[30].mxu0  ;;  %v4049_v1 = vadd.f32 %v4048_v0, %v8737_v10  ;;  %v4050_v34 = vpop.f32.mrb[30].mxu1  ;;  %v7552_v18 = vld [vmem:[%s10479_s1 + $0x454] ss:$236 sps:$4 sm:$0xff]   ;;  %v7550_v21 = vld [vmem:[%s10479_s1 + $0x450] ss:$236 sps:$4 sm:$0xff]  }
 0x180   :  { %4597 = vmatprep.subr.bf16.mxu0 %v7518_v23  ;;  %4650 = vmatprep.subr.bf16.mxu1 %v7521_v33  ;;  %v3998_v36 = vadd.f32 %v3997_v31, %v8781_v39  ;;  %v3999_v37 = vpop.f32.mrb[31].mxu0  ;;  %v4051_v12 = vadd.f32 %v4050_v34, %v8781_v39  ;;  %v4052_v38 = vpop.f32.mrb[31].mxu1  ;;  %v7553_v22 = vld [vmem:[%s10479_s1 + $0x458] ss:$236 sps:$4 sm:$0xff]   ;;  %v7561_v33 = vld [vmem:[%s10479_s1 + $0x634] ss:$236 sps:$4 sm:$0xff]  }
 0x181   :  { %v6894_v43 = vpack.c.bf16 %v3996_v30, %v3994_v25  ;;  %v6895_v19 = vpack.c.bf16 %v4049_v1, %v4047_v27  ;;  %v4000_v45 = vadd.f32 %v3999_v37, %v8781_v39  ;;  %v4053_v46 = vadd.f32 %v4052_v38, %v8781_v39  ;;  %v7558_v23 = vld [vmem:[%s10479_s1 + $0x62c] ss:$236 sps:$4 sm:$0xff]   ;;  %v7556_v24 = vld [vmem:[%s10479_s1 + $0x628] ss:$236 sps:$4 sm:$0xff]   ;;  %v7559_v53 = vld [vmem:[%s10479_s1 + $0x630] ss:$236 sps:$4 sm:$0xff]  }
 0x182   :  { %v7564_v25 = vld [vmem:[%s10479_s1 + $0x804] ss:$236 sps:$4 sm:$0xff]   ;;  %v7567_v26 = vld [vmem:[%s10479_s1 + $0x80c] ss:$236 sps:$4 sm:$0xff]   ;;  %v7570_v41 = vld [vmem:[%s10479_s1 + $0x9dc] ss:$236 sps:$4 sm:$0xff]  }
 0x183   :  { %4598 = vmatpush1.bf16.msra.mxu0 %v7516_v28  ;;  %4651 = vmatpush1.bf16.msra.mxu1 %v7519_v29  ;;  %5996 = vst [vmem:[%s10482_s3 + $0x208] sm:$0xff] %v6894_v43  ;;  %5997 = vst [vmem:[%s10482_s3 + $0x210] sm:$0xff] %v6895_v19  ;;  %v6924_v49 = vpack.c.bf16 %v4000_v45, %v3998_v36  ;;  %v6925_v50 = vpack.c.bf16 %v4053_v46, %v4051_v12  ;;  %v7562_v36 = vld [vmem:[%s10479_s1 + $0x800] ss:$236 sps:$4 sm:$0xff]   ;;  %v7573_v43 = vld [vmem:[%s10479_s1 + $0x9e4] ss:$236 sps:$4 sm:$0xff]  }
 0x184   :  { %4599 = vmatprep.subr.bf16.mxu0 %v7524_v7  ;;  %4652 = vmatprep.subr.bf16.mxu1 %v7527_v35  ;;  %v7579_v52 = vld [vmem:[%s10479_s1 + $0xbbc] ss:$236 sps:$4 sm:$0xff]  }
 0x185   :  { %6026 = vst [vmem:[%s10482_s3 + $0x2f4] sm:$0xff] %v6924_v49  ;;  %6027 = vst [vmem:[%s10482_s3 + $0x2fc] sm:$0xff] %v6925_v50  ;;  %v7568_v50 = vld [vmem:[%s10479_s1 + $0x9d8] ss:$236 sps:$4 sm:$0xff]  }
 0x187   :  { %4600 = vmatpush1.bf16.msra.mxu0 %v7522_v47  ;;  %4653 = vmatpush1.bf16.msra.mxu1 %v7525_v48 }
 0x188   :  { %4601 = vmatprep.subr.bf16.mxu0 %v7530_v51  ;;  %4654 = vmatprep.subr.bf16.mxu1 %v7533_v32  ;;  %v7571_v51 = vld [vmem:[%s10479_s1 + $0x9e0] ss:$236 sps:$4 sm:$0xff]  }
 0x189   :  { %v7576_v32 = vld [vmem:[%s10479_s1 + $0xbb4] ss:$236 sps:$4 sm:$0xff]  }
 0x18b   :  { %4602 = vmatpush1.bf16.msra.mxu0 %v7528_v55  ;;  %4655 = vmatpush1.bf16.msra.mxu1 %v7531_v56 }
 0x18c   :  { %4603 = vmatprep.subr.bf16.mxu0 %v3566_v59  ;;  %4656 = vmatprep.subr.bf16.mxu1 %v3572_v60  ;;  %v7574_v60 = vld [vmem:[%s10479_s1 + $0xbb0] ss:$236 sps:$4 sm:$0xff]  }
 0x18f   :  { %4604 = vmatpush1.bf16.msra.mxu0 %v3563_v63  ;;  %4657 = vmatpush1.bf16.msra.mxu1 %v3569_v3  ;;  %v7577_v63 = vld [vmem:[%s10479_s1 + $0xbb8] ss:$236 sps:$4 sm:$0xff]  }
 0x190   :  { %4691 = vmatprep.subr.bf16.mxu0 %v7540_v4  ;;  %4744 = vmatprep.subr.bf16.mxu1 %v7543_v5 }
 0x192   :  { %4618 = vmatmul.mubr.bf16.vlgmr.msra.gmra.mrb[72].mxu0 %v9051_v61  ;;  %4671 = vmatmul.mubr.bf16.vlgmr.msra.gmra.mrb[72].mxu1 %v9051_v61 }
 0x193   :  { %4692 = vmatpush1.bf16.msra.mxu0 %v7538_v9  ;;  %4745 = vmatpush1.bf16.msra.mxu1 %v7541_v11  ;;  %v7582_v11 = vld [vmem:[%s10479_s1 + $0xd8c] ss:$236 sps:$4 sm:$0xff]  }
 0x194   :  { %4693 = vmatprep.subr.bf16.mxu0 %v7546_v13  ;;  %4746 = vmatprep.subr.bf16.mxu1 %v7549_v14  ;;  %v7585_v13 = vld [vmem:[%s10479_s1 + $0xd94] ss:$236 sps:$4 sm:$0xff]  }
 0x195   :  { %6685 = vmatprep.mubr.msk.bf16.mxu0 %vm3443_vm1, %v9070_v8  ;;  %6687 = vmatprep.mubr.msk.bf16.mxu1 %vm3443_vm1, %v9070_v8 }
 0x197   :  { %4694 = vmatpush1.bf16.msra.mxu0 %v7544_v16  ;;  %4747 = vmatpush1.bf16.msra.mxu1 %v7547_v17 }
 0x198   :  { %4695 = vmatprep.subr.bf16.mxu0 %v7552_v18  ;;  %4748 = vmatprep.subr.bf16.mxu1 %v7555_v20  ;;  %v579_v20 = vld [vmem:[%s10479_s1 + $0x1138] sm:$0x33] }
 0x19a   :  { %4628 = vmatmul.mubr.bf16.gmra.mrb[76].mxu0 %v9091_v15  ;;  %4681 = vmatmul.mubr.bf16.gmra.mrb[76].mxu1 %v9091_v15 }
 0x19b   :  { %4696 = vmatpush1.bf16.msra.mxu0 %v7550_v21  ;;  %4749 = vmatpush1.bf16.msra.mxu1 %v7553_v22  ;;  %v580_v21 = vld [vmem:[%s10479_s1 + $0x1140] sm:$0x33] }
 0x19c   :  { %4697 = vmatprep.subr.bf16.mxu0 %v7558_v23  ;;  %4750 = vmatprep.subr.bf16.mxu1 %v7561_v33 }
 0x19d   :  { %v4089_v27 = vpop.f32.mrb[32].mxu0  ;;  %v4142_v0 = vpop.f32.mrb[32].mxu1  ;;  %6688 = vmatprep.mubr.msk.bf16.mxu0 %vm3443_vm1, %v8914_v44  ;;  %6690 = vmatprep.mubr.msk.bf16.mxu1 %vm3443_vm1, %v8914_v44  ;;  %v7565_v44 = vld [vmem:[%s10479_s1 + $0x808] ss:$236 sps:$4 sm:$0xff]  }
 0x19e   :  { %v4090_v28 = vadd.f32 %v4089_v27, %v8713_v62  ;;  %v4143_v29 = vadd.f32 %v4142_v0, %v8713_v62  ;;  %v4091_v30 = vpop.f32.mrb[33].mxu0  ;;  %v4144_v31 = vpop.f32.mrb[33].mxu1  ;;  %v7588_v0 = vld [vmem:[%s10479_s1 + $0xf64] ss:$236 sps:$4 sm:$0xff]  }
 0x19f   :  { %v4092_v1 = vadd.f32 %v4091_v30, %v8713_v62  ;;  %v4145_v34 = vadd.f32 %v4144_v31, %v8713_v62  ;;  %v4093_v7 = vpop.f32.mrb[34].mxu0  ;;  %v4146_v35 = vpop.f32.mrb[34].mxu1  ;;  %4698 = vmatpush1.bf16.msra.mxu0 %v7556_v24  ;;  %4751 = vmatpush1.bf16.msra.mxu1 %v7559_v53  ;;  %v7580_v53 = vld [vmem:[%s10479_s1 + $0xd88] ss:$236 sps:$4 sm:$0xff]   ;;  %v6632_v30 = vcombine.high %v580_v21, %v580_v21  ;;  %v7586_v31 = vld [vmem:[%s10479_s1 + $0xf60] ss:$236 sps:$4 sm:$0xff]  }
 0x1a0   :  { %v4094_v37 = vadd.f32 %v4093_v7, %v8729_v6  ;;  %v4147_v12 = vadd.f32 %v4146_v35, %v8729_v6  ;;  %v4095_v38 = vpop.f32.mrb[35].mxu0  ;;  %v4148_v40 = vpop.f32.mrb[35].mxu1  ;;  %4699 = vmatprep.subr.bf16.mxu0 %v7564_v25  ;;  %4752 = vmatprep.subr.bf16.mxu1 %v7567_v26  ;;  %v7583_v25 = vld [vmem:[%s10479_s1 + $0xd90] ss:$236 sps:$4 sm:$0xff]   ;;  %v6631_v7 = vcombine.low %v580_v21, %v580_v21 }
 0x1a1   :  { %v6836_v19 = vpack.c.bf16 %v4092_v1, %v4090_v28  ;;  %v6837_v45 = vpack.c.bf16 %v4145_v34, %v4143_v29  ;;  %v4096_v46 = vadd.f32 %v4095_v38, %v8729_v6  ;;  %v4149_v47 = vadd.f32 %v4148_v40, %v8729_v6  ;;  %v7591_v28 = vld [vmem:[%s10479_s1 + $0xf6c] ss:$236 sps:$4 sm:$0xff]   ;;  %v7589_v1 = vld [vmem:[%s10479_s1 + $0xf68] ss:$236 sps:$4 sm:$0xff]   ;;  %v7596_v40 = vld [vmem:[%s10479_s1 + $0xb0] ss:$236 sps:$4 sm:$0xff]  }
 0x1a2   :  { %v6630_v29 = vcombine.high %v579_v20, %v579_v20  ;;  %v6629_v34 = vcombine.low %v579_v20, %v579_v20  ;;  %v7601_v38 = vld [vmem:[%s10479_s1 + $0xbc] ss:$236 sps:$4 sm:$0xff]   ;;  %v7631_v20 = vld [vmem:[%s10479_s1 + $0x9f4] ss:$236 sps:$4 sm:$0xff]  }
 0x1a3   :  { %5937 = vst [vmem:[%s10482_s3 + $0x40] sm:$0xff] %v6836_v19  ;;  %5938 = vst [vmem:[%s10482_s3 + $0x48] sm:$0xff] %v6837_v45  ;;  %v6866_v48 = vpack.c.bf16 %v4096_v46, %v4094_v37  ;;  %v6867_v49 = vpack.c.bf16 %v4149_v47, %v4147_v12  ;;  %4700 = vmatpush1.bf16.msra.mxu0 %v7562_v36  ;;  %4753 = vmatpush1.bf16.msra.mxu1 %v7565_v44  ;;  %v7598_v12 = vld [vmem:[%s10479_s1 + $0xb4] ss:$236 sps:$4 sm:$0xff]   ;;  %v7605_v46 = vld [vmem:[%s10479_s1 + $0x290] ss:$236 sps:$4 sm:$0xff]  }
 0x1a4   :  { %4701 = vmatprep.subr.bf16.mxu0 %v7570_v41  ;;  %4754 = vmatprep.subr.bf16.mxu1 %v7573_v43  ;;  %v3578_v35 = vand.u32 %v6630_v29, %v7962_v42  ;;  %v3584_v36 = vand.u32 %v6632_v30, %v7962_v42  ;;  %v3575_v44 = vand.u32 %v6629_v34, %v7962_v42  ;;  %v7599_v41 = vld [vmem:[%s10479_s1 + $0xb8] ss:$236 sps:$4 sm:$0xff]   ;;  %v7607_v19 = vld [vmem:[%s10479_s1 + $0x294] ss:$236 sps:$4 sm:$0xff]  }
 0x1a5   :  { %5968 = vst [vmem:[%s10482_s3 + $0x12c] sm:$0xff] %v6866_v48  ;;  %5969 = vst [vmem:[%s10482_s3 + $0x134] sm:$0xff] %v6867_v49  ;;  %v4099_v54 = vpop.f32.mrb[36].mxu0  ;;  %v4152_v55 = vpop.f32.mrb[36].mxu1  ;;  %v3581_v37 = vand.u32 %v6631_v7, %v7962_v42  ;;  %v7604_v43 = vld [vmem:[%s10479_s1 + $0x28c] ss:$236 sps:$4 sm:$0xff]  }
 0x1a6   :  { %v4100_v56 = vadd.f32 %v4099_v54, %v8737_v10  ;;  %v4101_v57 = vpop.f32.mrb[37].mxu0  ;;  %v4153_v58 = vadd.f32 %v4152_v55, %v8737_v10  ;;  %v4154_v59 = vpop.f32.mrb[37].mxu1  ;;  %v7602_v45 = vld [vmem:[%s10479_s1 + $0x288] ss:$236 sps:$4 sm:$0xff]   ;;  %v7610_v47 = vld [vmem:[%s10479_s1 + $0x464] ss:$236 sps:$4 sm:$0xff]  }
 0x1a7   :  { %4702 = vmatpush1.bf16.msra.mxu0 %v7568_v50  ;;  %4755 = vmatpush1.bf16.msra.mxu1 %v7571_v51  ;;  %v4102_v3 = vadd.f32 %v4101_v57, %v8737_v10  ;;  %v4103_v4 = vpop.f32.mrb[38].mxu0  ;;  %v4155_v5 = vadd.f32 %v4154_v59, %v8737_v10  ;;  %v4156_v9 = vpop.f32.mrb[38].mxu1  ;;  %v7608_v48 = vld [vmem:[%s10479_s1 + $0x460] ss:$236 sps:$4 sm:$0xff]   ;;  %v7611_v49 = vld [vmem:[%s10479_s1 + $0x468] ss:$236 sps:$4 sm:$0xff]  }
 0x1a8   :  { %4703 = vmatprep.subr.bf16.mxu0 %v7576_v32  ;;  %4756 = vmatprep.subr.bf16.mxu1 %v7579_v52  ;;  %v4104_v14 = vadd.f32 %v4103_v4, %v8781_v39  ;;  %v4105_v16 = vpop.f32.mrb[39].mxu0  ;;  %v4157_v17 = vadd.f32 %v4156_v9, %v8781_v39  ;;  %v4158_v18 = vpop.f32.mrb[39].mxu1  ;;  %v7616_v50 = vld [vmem:[%s10479_s1 + $0x63c] ss:$236 sps:$4 sm:$0xff]   ;;  %v7614_v51 = vld [vmem:[%s10479_s1 + $0x638] ss:$236 sps:$4 sm:$0xff]  }
 0x1a9   :  { %v6896_v22 = vpack.c.bf16 %v4102_v3, %v4100_v56  ;;  %v6897_v23 = vpack.c.bf16 %v4155_v5, %v4153_v58  ;;  %v4106_v33 = vadd.f32 %v4105_v16, %v8781_v39  ;;  %v4159_v24 = vadd.f32 %v4158_v18, %v8781_v39  ;;  %v7617_v32 = vld [vmem:[%s10479_s1 + $0x640] ss:$236 sps:$4 sm:$0xff]   ;;  %v7620_v9 = vld [vmem:[%s10479_s1 + $0x810] ss:$236 sps:$4 sm:$0xff]  }
 0x1aa   :  { %v7622_v52 = vld [vmem:[%s10479_s1 + $0x814] ss:$236 sps:$4 sm:$0xff]   ;;  %v9614_v56 = vld [vmem:[%s10480_s0 + $0x4] ss:$8 sps:$4 sm:$0xff]  }
 0x1ab   :  { %4704 = vmatpush1.bf16.msra.mxu0 %v7574_v60  ;;  %4757 = vmatpush1.bf16.msra.mxu1 %v7577_v63  ;;  %5998 = vst [vmem:[%s10482_s3 + $0x218] sm:$0xff] %v6896_v22  ;;  %5999 = vst [vmem:[%s10482_s3 + $0x220] sm:$0xff] %v6897_v23  ;;  %v6926_v26 = vpack.c.bf16 %v4106_v33, %v4104_v14  ;;  %v6927_v27 = vpack.c.bf16 %v4159_v24, %v4157_v17  ;;  %v7628_v18 = vld [vmem:[%s10479_s1 + $0x9ec] ss:$236 sps:$4 sm:$0xff]  }
 0x1ac   :  { %4705 = vmatprep.subr.bf16.mxu0 %v7582_v11  ;;  %4758 = vmatprep.subr.bf16.mxu1 %v7585_v13  ;;  %v7623_v11 = vld [vmem:[%s10479_s1 + $0x818] ss:$236 sps:$4 sm:$0xff]   ;;  %v7632_v7 = vld [vmem:[%s10479_s1 + $0xbc0] ss:$236 sps:$4 sm:$0xff]  }
 0x1ad   :  { %6028 = vst [vmem:[%s10482_s3 + $0x304] sm:$0xff] %v6926_v26  ;;  %6029 = vst [vmem:[%s10482_s3 + $0x30c] sm:$0xff] %v6927_v27  ;;  %v7629_v26 = vld [vmem:[%s10479_s1 + $0x9f0] ss:$236 sps:$4 sm:$0xff]  }
 0x1ae   :  { %v7634_v27 = vld [vmem:[%s10479_s1 + $0xbc4] ss:$236 sps:$4 sm:$0xff]  }
 0x1af   :  { %4706 = vmatpush1.bf16.msra.mxu0 %v7580_v53  ;;  %4759 = vmatpush1.bf16.msra.mxu1 %v7583_v25  ;;  %v7626_v25 = vld [vmem:[%s10479_s1 + $0x9e8] ss:$236 sps:$4 sm:$0xff]  }
 0x1b0   :  { %4707 = vmatprep.subr.bf16.mxu0 %v7588_v0  ;;  %4760 = vmatprep.subr.bf16.mxu1 %v7591_v28  ;;  %v7637_v0 = vld [vmem:[%s10479_s1 + $0xbcc] ss:$236 sps:$4 sm:$0xff]  }
 0x1b3   :  { %4708 = vmatpush1.bf16.msra.mxu0 %v7586_v31  ;;  %4761 = vmatpush1.bf16.msra.mxu1 %v7589_v1 }
 0x1b4   :  { %4709 = vmatprep.subr.bf16.mxu0 %v3578_v35  ;;  %4762 = vmatprep.subr.bf16.mxu1 %v3584_v36  ;;  %v7635_v35 = vld [vmem:[%s10479_s1 + $0xbc8] ss:$236 sps:$4 sm:$0xff]  }
 0x1b7   :  { %4710 = vmatpush1.bf16.msra.mxu0 %v3575_v44  ;;  %4763 = vmatpush1.bf16.msra.mxu1 %v3581_v37 }
 0x1b8   :  { %4797 = vmatprep.subr.bf16.mxu0 %v7598_v12  ;;  %4850 = vmatprep.subr.bf16.mxu1 %v7601_v38  ;;  %v7640_v38 = vld [vmem:[%s10479_s1 + $0xd9c] ss:$236 sps:$4 sm:$0xff]  }
 0x1ba   :  { %4724 = vmatmul.mubr.bf16.vlgmr.msra.gmra.mrb[80].mxu0 %v9051_v61  ;;  %4777 = vmatmul.mubr.bf16.vlgmr.msra.gmra.mrb[80].mxu1 %v9051_v61  ;;  %v7613_v61 = vld [vmem:[%s10479_s1 + $0x46c] ss:$236 sps:$4 sm:$0xff]  }
 0x1bb   :  { %4798 = vmatpush1.bf16.msra.mxu0 %v7596_v40  ;;  %4851 = vmatpush1.bf16.msra.mxu1 %v7599_v41  ;;  %v7643_v40 = vld [vmem:[%s10479_s1 + $0xda4] ss:$236 sps:$4 sm:$0xff]  }
 0x1bc   :  { %4799 = vmatprep.subr.bf16.mxu0 %v7604_v43  ;;  %4852 = vmatprep.subr.bf16.mxu1 %v7607_v19 }
 0x1bd   :  { %6689 = vmatprep.mubr.msk.bf16.mxu0 %vm3443_vm1, %v9070_v8  ;;  %6691 = vmatprep.mubr.msk.bf16.mxu1 %vm3443_vm1, %v9070_v8  ;;  %v7619_v8 = vld [vmem:[%s10479_s1 + $0x644] ss:$236 sps:$4 sm:$0xff]  }
 0x1bf   :  { %4800 = vmatpush1.bf16.msra.mxu0 %v7602_v45  ;;  %4853 = vmatpush1.bf16.msra.mxu1 %v7605_v46  ;;  %v581_v46 = vld [vmem:[%s10479_s1 + $0x1148] sm:$0x33] }
 0x1c0   :  { %4801 = vmatprep.subr.bf16.mxu0 %v7610_v47  ;;  %4854 = vmatprep.subr.bf16.mxu1 %v7613_v61  ;;  %v582_v47 = vld [vmem:[%s10479_s1 + $0x1150] sm:$0x33] }
 0x1c2   :  { %4734 = vmatmul.mubr.bf16.gmra.mrb[84].mxu0 %v9091_v15  ;;  %4787 = vmatmul.mubr.bf16.gmra.mrb[84].mxu1 %v9091_v15  ;;  %v7625_v15 = vld [vmem:[%s10479_s1 + $0x81c] ss:$236 sps:$4 sm:$0xff]  }
 0x1c3   :  { %4802 = vmatpush1.bf16.msra.mxu0 %v7608_v48  ;;  %4855 = vmatpush1.bf16.msra.mxu1 %v7611_v49 }
 0x1c4   :  { %4803 = vmatprep.subr.bf16.mxu0 %v7616_v50  ;;  %4856 = vmatprep.subr.bf16.mxu1 %v7619_v8  ;;  %v7638_v8 = vld [vmem:[%s10479_s1 + $0xd98] ss:$236 sps:$4 sm:$0xff]  }
 0x1c5   :  { %v4195_v54 = vpop.f32.mrb[40].mxu0  ;;  %v4248_v55 = vpop.f32.mrb[40].mxu1  ;;  %6692 = vmatprep.mubr.msk.bf16.mxu0 %vm3443_vm1, %v9614_v56  ;;  %6694 = vmatprep.mubr.msk.bf16.mxu1 %vm3443_vm1, %v9614_v56 }
 0x1c6   :  { %v4196_v57 = vadd.f32 %v4195_v54, %v8713_v62  ;;  %v4249_v58 = vadd.f32 %v4248_v55, %v8713_v62  ;;  %v4197_v59 = vpop.f32.mrb[41].mxu0  ;;  %v4250_v60 = vpop.f32.mrb[41].mxu1  ;;  %v7649_v54 = vld [vmem:[%s10479_s1 + $0xf7c] ss:$236 sps:$4 sm:$0xff]   ;;  %v6634_v55 = vcombine.high %v581_v46, %v581_v46 }
 0x1c7   :  { %v4198_v63 = vadd.f32 %v4197_v59, %v8713_v62  ;;  %v4251_v3 = vadd.f32 %v4250_v60, %v8713_v62  ;;  %v4199_v4 = vpop.f32.mrb[42].mxu0  ;;  %v4252_v5 = vpop.f32.mrb[42].mxu1  ;;  %4804 = vmatpush1.bf16.msra.mxu0 %v7614_v51  ;;  %4857 = vmatpush1.bf16.msra.mxu1 %v7617_v32  ;;  %v7641_v51 = vld [vmem:[%s10479_s1 + $0xda0] ss:$236 sps:$4 sm:$0xff]   ;;  %v7647_v59 = vld [vmem:[%s10479_s1 + $0xf78] ss:$236 sps:$4 sm:$0xff]   ;;  %v6633_v60 = vcombine.low %v581_v46, %v581_v46 }
 0x1c8   :  { %v4200_v13 = vadd.f32 %v4199_v4, %v8729_v6  ;;  %v4253_v14 = vadd.f32 %v4252_v5, %v8729_v6  ;;  %v4201_v16 = vpop.f32.mrb[43].mxu0  ;;  %v4254_v17 = vpop.f32.mrb[43].mxu1  ;;  %4805 = vmatprep.subr.bf16.mxu0 %v7622_v52  ;;  %4858 = vmatprep.subr.bf16.mxu1 %v7625_v15  ;;  %v7646_v15 = vld [vmem:[%s10479_s1 + $0xf74] ss:$236 sps:$4 sm:$0xff]  }
 0x1c9   :  { %v6838_v21 = vpack.c.bf16 %v4198_v63, %v4196_v57  ;;  %v6839_v22 = vpack.c.bf16 %v4251_v3, %v4249_v58  ;;  %v4202_v23 = vadd.f32 %v4201_v16, %v8729_v6  ;;  %v4255_v33 = vadd.f32 %v4254_v17, %v8729_v6  ;;  %v7644_v58 = vld [vmem:[%s10479_s1 + $0xf70] ss:$236 sps:$4 sm:$0xff]   ;;  %v7657_v16 = vld [vmem:[%s10479_s1 + $0xc8] ss:$236 sps:$4 sm:$0xff]  }
 0x1ca   :  { %v6636_v57 = vcombine.high %v582_v47, %v582_v47  ;;  %v6635_v63 = vcombine.low %v582_v47, %v582_v47  ;;  %v3590_v3 = vand.u32 %v6634_v55, %v7962_v42  ;;  %v3587_v5 = vand.u32 %v6633_v60, %v7962_v42  ;;  %v7662_v17 = vld [vmem:[%s10479_s1 + $0x29c] ss:$236 sps:$4 sm:$0xff]   ;;  %v7692_v55 = vld [vmem:[%s10479_s1 + $0xbd4] ss:$236 sps:$4 sm:$0xff]  }
 0x1cb   :  { %5939 = vst [vmem:[%s10482_s3 + $0x50] sm:$0xff] %v6838_v21  ;;  %5940 = vst [vmem:[%s10482_s3 + $0x58] sm:$0xff] %v6839_v22  ;;  %v6868_v24 = vpack.c.bf16 %v4202_v23, %v4200_v13  ;;  %v6869_v53 = vpack.c.bf16 %v4255_v33, %v4253_v14  ;;  %4806 = vmatpush1.bf16.msra.mxu0 %v7620_v9  ;;  %4859 = vmatpush1.bf16.msra.mxu1 %v7623_v11  ;;  %v7656_v11 = vld [vmem:[%s10479_s1 + $0xc4] ss:$236 sps:$4 sm:$0xff]   ;;  %v7659_v13 = vld [vmem:[%s10479_s1 + $0xcc] ss:$236 sps:$4 sm:$0xff]  }
 0x1cc   :  { %4807 = vmatprep.subr.bf16.mxu0 %v7628_v18  ;;  %4860 = vmatprep.subr.bf16.mxu1 %v7631_v20  ;;  %v3596_v4 = vand.u32 %v6636_v57, %v7962_v42  ;;  %v3593_v9 = vand.u32 %v6635_v63, %v7962_v42  ;;  %v7654_v14 = vld [vmem:[%s10479_s1 + $0xc0] ss:$236 sps:$4 sm:$0xff]   ;;  %v7665_v18 = vld [vmem:[%s10479_s1 + $0x2a4] ss:$236 sps:$4 sm:$0xff]   ;;  %v7671_v33 = vld [vmem:[%s10479_s1 + $0x47c] ss:$236 sps:$4 sm:$0xff]  }
 0x1cd   :  { %5970 = vst [vmem:[%s10482_s3 + $0x13c] sm:$0xff] %v6868_v24  ;;  %5971 = vst [vmem:[%s10482_s3 + $0x144] sm:$0xff] %v6869_v53  ;;  %v4205_v28 = vpop.f32.mrb[44].mxu0  ;;  %v4258_v29 = vpop.f32.mrb[44].mxu1  ;;  %v9745_v20 = vld [vmem:[%s10480_s0] ss:$8 sps:$4 sm:$0xff]  }
 0x1ce   :  { %v4206_v30 = vadd.f32 %v4205_v28, %v8737_v10  ;;  %v4207_v31 = vpop.f32.mrb[45].mxu0  ;;  %v4259_v1 = vadd.f32 %v4258_v29, %v8737_v10  ;;  %v4260_v34 = vpop.f32.mrb[45].mxu1  ;;  %v7660_v21 = vld [vmem:[%s10479_s1 + $0x298] ss:$236 sps:$4 sm:$0xff]   ;;  %v7663_v22 = vld [vmem:[%s10479_s1 + $0x2a0] ss:$236 sps:$4 sm:$0xff]  }
 0x1cf   :  { %4808 = vmatpush1.bf16.msra.mxu0 %v7626_v25  ;;  %4861 = vmatpush1.bf16.msra.mxu1 %v7629_v26  ;;  %v4208_v36 = vadd.f32 %v4207_v31, %v8737_v10  ;;  %v4209_v44 = vpop.f32.mrb[46].mxu0  ;;  %v4261_v37 = vadd.f32 %v4260_v34, %v8737_v10  ;;  %v4262_v12 = vpop.f32.mrb[46].mxu1  ;;  %v7668_v23 = vld [vmem:[%s10479_s1 + $0x474] ss:$236 sps:$4 sm:$0xff]   ;;  %v7666_v53 = vld [vmem:[%s10479_s1 + $0x470] ss:$236 sps:$4 sm:$0xff]  }
 0x1d0   :  { %4809 = vmatprep.subr.bf16.mxu0 %v7634_v27  ;;  %4862 = vmatprep.subr.bf16.mxu1 %v7637_v0  ;;  %v4210_v41 = vadd.f32 %v4209_v44, %v8781_v39  ;;  %v4211_v43 = vpop.f32.mrb[47].mxu0  ;;  %v4263_v19 = vadd.f32 %v4262_v12, %v8781_v39  ;;  %v4264_v45 = vpop.f32.mrb[47].mxu1  ;;  %v9764_v24 = vld [vmem:[%s10480_s0 + $0x14] ss:$8 sps:$4 sm:$0xff]   ;;  %v7669_v25 = vld [vmem:[%s10479_s1 + $0x478] ss:$236 sps:$4 sm:$0xff]  }
 0x1d1   :  { %v6898_v61 = vpack.c.bf16 %v4208_v36, %v4206_v30  ;;  %v6899_v48 = vpack.c.bf16 %v4261_v37, %v4259_v1  ;;  %v4212_v49 = vadd.f32 %v4211_v43, %v8781_v39  ;;  %v4265_v50 = vadd.f32 %v4264_v45, %v8781_v39  ;;  %v7674_v26 = vld [vmem:[%s10479_s1 + $0x64c] ss:$236 sps:$4 sm:$0xff]   ;;  %v7677_v27 = vld [vmem:[%s10479_s1 + $0x654] ss:$236 sps:$4 sm:$0xff]   ;;  %v7675_v29 = vld [vmem:[%s10479_s1 + $0x650] ss:$236 sps:$4 sm:$0xff]  }
 0x1d2   :  { %v9785_v0 = vld [vmem:[%s10480_s0 + $0x10] ss:$8 sps:$4 sm:$0xff]   ;;  %v7672_v28 = vld [vmem:[%s10479_s1 + $0x648] ss:$236 sps:$4 sm:$0xff]  }
 0x1d3   :  { %4810 = vmatpush1.bf16.msra.mxu0 %v7632_v7  ;;  %4863 = vmatpush1.bf16.msra.mxu1 %v7635_v35  ;;  %6000 = vst [vmem:[%s10482_s3 + $0x228] sm:$0xff] %v6898_v61  ;;  %6001 = vst [vmem:[%s10482_s3 + $0x230] sm:$0xff] %v6899_v48  ;;  %v6928_v32 = vpack.c.bf16 %v4212_v49, %v4210_v41  ;;  %v6929_v52 = vpack.c.bf16 %v4265_v50, %v4263_v19  ;;  %v7680_v30 = vld [vmem:[%s10479_s1 + $0x824] ss:$236 sps:$4 sm:$0xff]   ;;  %v7683_v31 = vld [vmem:[%s10479_s1 + $0x82c] ss:$236 sps:$4 sm:$0xff]  }
 0x1d4   :  { %4811 = vmatprep.subr.bf16.mxu0 %v7640_v38  ;;  %4864 = vmatprep.subr.bf16.mxu1 %v7643_v40  ;;  %v7678_v41 = vld [vmem:[%s10479_s1 + $0x820] ss:$236 sps:$4 sm:$0xff]   ;;  %v7681_v43 = vld [vmem:[%s10479_s1 + $0x828] ss:$236 sps:$4 sm:$0xff]   ;;  %v7689_v48 = vld [vmem:[%s10479_s1 + $0xa04] ss:$236 sps:$4 sm:$0xff]  }
 0x1d5   :  { %6030 = vst [vmem:[%s10482_s3 + $0x314] sm:$0xff] %v6928_v32  ;;  %6031 = vst [vmem:[%s10482_s3 + $0x31c] sm:$0xff] %v6929_v52  ;;  %v7686_v61 = vld [vmem:[%s10479_s1 + $0x9fc] ss:$236 sps:$4 sm:$0xff]  }
 0x1d6   :  { %v7695_v57 = vld [vmem:[%s10479_s1 + $0xbdc] ss:$236 sps:$4 sm:$0xff]  }
 0x1d7   :  { %4812 = vmatpush1.bf16.msra.mxu0 %v7638_v8  ;;  %4865 = vmatpush1.bf16.msra.mxu1 %v7641_v51 }
 0x1d8   :  { %4813 = vmatprep.subr.bf16.mxu0 %v7646_v15  ;;  %4866 = vmatprep.subr.bf16.mxu1 %v7649_v54  ;;  %v7684_v15 = vld [vmem:[%s10479_s1 + $0x9f8] ss:$236 sps:$4 sm:$0xff]   ;;  %v7687_v54 = vld [vmem:[%s10479_s1 + $0xa00] ss:$236 sps:$4 sm:$0xff]  }
 0x1db   :  { %4814 = vmatpush1.bf16.msra.mxu0 %v7644_v58  ;;  %4867 = vmatpush1.bf16.msra.mxu1 %v7647_v59 }
 0x1dc   :  { %4815 = vmatprep.subr.bf16.mxu0 %v3590_v3  ;;  %4868 = vmatprep.subr.bf16.mxu1 %v3596_v4 }
 0x1df   :  { %4816 = vmatpush1.bf16.msra.mxu0 %v3587_v5  ;;  %4869 = vmatpush1.bf16.msra.mxu1 %v3593_v9  ;;  %v7690_v5 = vld [vmem:[%s10479_s1 + $0xbd0] ss:$236 sps:$4 sm:$0xff]   ;;  %v7693_v9 = vld [vmem:[%s10479_s1 + $0xbd8] ss:$236 sps:$4 sm:$0xff]  }
 0x1e0   :  { %4903 = vmatprep.subr.bf16.mxu0 %v7656_v11  ;;  %4956 = vmatprep.subr.bf16.mxu1 %v7659_v13 }
 0x1e2   :  { %4830 = vmatmul.mubr.bf16.vlgmr.msra.gmra.mrb[88].mxu0 %v9745_v20  ;;  %4883 = vmatmul.mubr.bf16.vlgmr.msra.gmra.mrb[88].mxu1 %v9745_v20 }
 0x1e3   :  { %4904 = vmatpush1.bf16.msra.mxu0 %v7654_v14  ;;  %4957 = vmatpush1.bf16.msra.mxu1 %v7657_v16 }
 0x1e4   :  { %4905 = vmatprep.subr.bf16.mxu0 %v7662_v17  ;;  %4958 = vmatprep.subr.bf16.mxu1 %v7665_v18  ;;  %v7698_v17 = vld [vmem:[%s10479_s1 + $0xdac] ss:$236 sps:$4 sm:$0xff]   ;;  %v7701_v18 = vld [vmem:[%s10479_s1 + $0xdb4] ss:$236 sps:$4 sm:$0xff]  }
 0x1e5   :  { %6693 = vmatprep.mubr.msk.bf16.mxu0 %vm3443_vm1, %v9764_v24  ;;  %6695 = vmatprep.mubr.msk.bf16.mxu1 %vm3443_vm1, %v9764_v24 }
 0x1e7   :  { %4906 = vmatpush1.bf16.msra.mxu0 %v7660_v21  ;;  %4959 = vmatpush1.bf16.msra.mxu1 %v7663_v22 }
 0x1e8   :  { %4907 = vmatprep.subr.bf16.mxu0 %v7668_v23  ;;  %4960 = vmatprep.subr.bf16.mxu1 %v7671_v33 }
 0x1ea   :  { %4840 = vmatmul.mubr.bf16.gmra.mrb[92].mxu0 %v9785_v0  ;;  %4893 = vmatmul.mubr.bf16.gmra.mrb[92].mxu1 %v9785_v0 }
 0x1eb   :  { %4908 = vmatpush1.bf16.msra.mxu0 %v7666_v53  ;;  %4961 = vmatpush1.bf16.msra.mxu1 %v7669_v25  ;;  %v583_v53 = vld [vmem:[%s10479_s1 + $0x1158] sm:$0x33]  ;;  %v584_v25 = vld [vmem:[%s10479_s1 + $0x1160] sm:$0x33] }
 0x1ec   :  { %4909 = vmatprep.subr.bf16.mxu0 %v7674_v26  ;;  %4962 = vmatprep.subr.bf16.mxu1 %v7677_v27 }
 0x1ed   :  { %v4301_v1 = vpop.f32.mrb[48].mxu0  ;;  %v4354_v34 = vpop.f32.mrb[48].mxu1  ;;  %6696 = vmatprep.mubr.msk.bf16.mxu0 %vm3443_vm1, %v9614_v56  ;;  %6698 = vmatprep.mubr.msk.bf16.mxu1 %vm3443_vm1, %v9614_v56 }
 0x1ee   :  { %v4302_v7 = vadd.f32 %v4301_v1, %v8713_v62  ;;  %v4355_v35 = vadd.f32 %v4354_v34, %v8713_v62  ;;  %v4303_v36 = vpop.f32.mrb[49].mxu0  ;;  %v4356_v44 = vpop.f32.mrb[49].mxu1 }
 0x1ef   :  { %v4304_v37 = vadd.f32 %v4303_v36, %v8713_v62  ;;  %v4357_v12 = vadd.f32 %v4356_v44, %v8713_v62  ;;  %v4305_v38 = vpop.f32.mrb[50].mxu0  ;;  %v4358_v40 = vpop.f32.mrb[50].mxu1  ;;  %4910 = vmatpush1.bf16.msra.mxu0 %v7672_v28  ;;  %4963 = vmatpush1.bf16.msra.mxu1 %v7675_v29  ;;  %v6638_v36 = vcombine.high %v583_v53, %v583_v53 }
 0x1f0   :  { %v4306_v19 = vadd.f32 %v4305_v38, %v8729_v6  ;;  %v4359_v45 = vadd.f32 %v4358_v40, %v8729_v6  ;;  %v4307_v46 = vpop.f32.mrb[51].mxu0  ;;  %v4360_v47 = vpop.f32.mrb[51].mxu1  ;;  %4911 = vmatprep.subr.bf16.mxu0 %v7680_v30  ;;  %4964 = vmatprep.subr.bf16.mxu1 %v7683_v31  ;;  %v7696_v30 = vld [vmem:[%s10479_s1 + $0xda8] ss:$236 sps:$4 sm:$0xff]   ;;  %v7699_v31 = vld [vmem:[%s10479_s1 + $0xdb0] ss:$236 sps:$4 sm:$0xff]   ;;  %v6640_v44 = vcombine.high %v584_v25, %v584_v25 }
 0x1f1   :  { %v6840_v49 = vpack.c.bf16 %v4304_v37, %v4302_v7  ;;  %v6841_v50 = vpack.c.bf16 %v4357_v12, %v4355_v35  ;;  %v4308_v8 = vadd.f32 %v4307_v46, %v8729_v6  ;;  %v4361_v51 = vadd.f32 %v4360_v47, %v8729_v6  ;;  %v7704_v7 = vld [vmem:[%s10479_s1 + $0xf84] ss:$236 sps:$4 sm:$0xff]   ;;  %v7707_v35 = vld [vmem:[%s10479_s1 + $0xf8c] ss:$236 sps:$4 sm:$0xff]   ;;  %v7705_v12 = vld [vmem:[%s10479_s1 + $0xf88] ss:$236 sps:$4 sm:$0xff]  }
 0x1f2   :  { %v7702_v37 = vld [vmem:[%s10479_s1 + $0xf80] ss:$236 sps:$4 sm:$0xff]   ;;  %v6637_v38 = vcombine.low %v583_v53, %v583_v53  ;;  %v6639_v40 = vcombine.low %v584_v25, %v584_v25  ;;  %v7717_v47 = vld [vmem:[%s10479_s1 + $0xdc] ss:$236 sps:$4 sm:$0xff]  }
 0x1f3   :  { %5941 = vst [vmem:[%s10482_s3 + $0x60] sm:$0xff] %v6840_v49  ;;  %5942 = vst [vmem:[%s10482_s3 + $0x68] sm:$0xff] %v6841_v50  ;;  %v6870_v32 = vpack.c.bf16 %v4308_v8, %v4306_v19  ;;  %v6871_v52 = vpack.c.bf16 %v4361_v51, %v4359_v45  ;;  %4912 = vmatpush1.bf16.msra.mxu0 %v7678_v41  ;;  %4965 = vmatpush1.bf16.msra.mxu1 %v7681_v43  ;;  %v7714_v46 = vld [vmem:[%s10479_s1 + $0xd4] ss:$236 sps:$4 sm:$0xff]   ;;  %v7720_v49 = vld [vmem:[%s10479_s1 + $0x2ac] ss:$236 sps:$4 sm:$0xff]  }
 0x1f4   :  { %4913 = vmatprep.subr.bf16.mxu0 %v7686_v61  ;;  %4966 = vmatprep.subr.bf16.mxu1 %v7689_v48  ;;  %v3602_v41 = vand.u32 %v6638_v36, %v7962_v42  ;;  %v3608_v43 = vand.u32 %v6640_v44, %v7962_v42  ;;  %v3599_v19 = vand.u32 %v6637_v38, %v7962_v42  ;;  %v7712_v61 = vld [vmem:[%s10479_s1 + $0xd0] ss:$236 sps:$4 sm:$0xff]   ;;  %v7715_v48 = vld [vmem:[%s10479_s1 + $0xd8] ss:$236 sps:$4 sm:$0xff]   ;;  %v7723_v50 = vld [vmem:[%s10479_s1 + $0x2b4] ss:$236 sps:$4 sm:$0xff]  }
 0x1f5   :  { %5972 = vst [vmem:[%s10482_s3 + $0x14c] sm:$0xff] %v6870_v32  ;;  %5973 = vst [vmem:[%s10482_s3 + $0x154] sm:$0xff] %v6871_v52  ;;  %v4311_v58 = vpop.f32.mrb[52].mxu0  ;;  %v4364_v59 = vpop.f32.mrb[52].mxu1  ;;  %v3605_v45 = vand.u32 %v6639_v40, %v7962_v42  ;;  %v7718_v8 = vld [vmem:[%s10479_s1 + $0x2a8] ss:$236 sps:$4 sm:$0xff]  }
 0x1f6   :  { %v4312_v60 = vadd.f32 %v4311_v58, %v8737_v10  ;;  %v4313_v63 = vpop.f32.mrb[53].mxu0  ;;  %v4365_v3 = vadd.f32 %v4364_v59, %v8737_v10  ;;  %v4366_v4 = vpop.f32.mrb[53].mxu1  ;;  %v7721_v51 = vld [vmem:[%s10479_s1 + $0x2b0] ss:$236 sps:$4 sm:$0xff]   ;;  %v7729_v52 = vld [vmem:[%s10479_s1 + $0x48c] ss:$236 sps:$4 sm:$0xff]  }
 0x1f7   :  { %4914 = vmatpush1.bf16.msra.mxu0 %v7684_v15  ;;  %4967 = vmatpush1.bf16.msra.mxu1 %v7687_v54  ;;  %v4314_v11 = vadd.f32 %v4313_v63, %v8737_v10  ;;  %v4315_v13 = vpop.f32.mrb[54].mxu0  ;;  %v4367_v14 = vadd.f32 %v4366_v4, %v8737_v10  ;;  %v4368_v16 = vpop.f32.mrb[54].mxu1  ;;  %v7726_v32 = vld [vmem:[%s10479_s1 + $0x484] ss:$236 sps:$4 sm:$0xff]   ;;  %v7724_v15 = vld [vmem:[%s10479_s1 + $0x480] ss:$236 sps:$4 sm:$0xff]  }
 0x1f8   :  { %4915 = vmatprep.subr.bf16.mxu0 %v7692_v55  ;;  %4968 = vmatprep.subr.bf16.mxu1 %v7695_v57  ;;  %v4316_v21 = vadd.f32 %v4315_v13, %v8781_v39  ;;  %v4317_v22 = vpop.f32.mrb[55].mxu0  ;;  %v4369_v23 = vadd.f32 %v4368_v16, %v8781_v39  ;;  %v4370_v33 = vpop.f32.mrb[55].mxu1  ;;  %v7727_v54 = vld [vmem:[%s10479_s1 + $0x488] ss:$236 sps:$4 sm:$0xff]   ;;  %v7735_v57 = vld [vmem:[%s10479_s1 + $0x664] ss:$236 sps:$4 sm:$0xff]  }
 0x1f9   :  { %v6900_v26 = vpack.c.bf16 %v4314_v11, %v4312_v60  ;;  %v6901_v27 = vpack.c.bf16 %v4367_v14, %v4365_v3  ;;  %v4318_v28 = vadd.f32 %v4317_v22, %v8781_v39  ;;  %v4371_v29 = vadd.f32 %v4370_v33, %v8781_v39  ;;  %v7732_v55 = vld [vmem:[%s10479_s1 + $0x65c] ss:$236 sps:$4 sm:$0xff]   ;;  %v7730_v58 = vld [vmem:[%s10479_s1 + $0x658] ss:$236 sps:$4 sm:$0xff]   ;;  %v7733_v59 = vld [vmem:[%s10479_s1 + $0x660] ss:$236 sps:$4 sm:$0xff]  }
 0x1fa   :  { %v7738_v60 = vld [vmem:[%s10479_s1 + $0x834] ss:$236 sps:$4 sm:$0xff]   ;;  %v7741_v63 = vld [vmem:[%s10479_s1 + $0x83c] ss:$236 sps:$4 sm:$0xff]   ;;  %v7739_v22 = vld [vmem:[%s10479_s1 + $0x838] ss:$236 sps:$4 sm:$0xff]  }
 0x1fb   :  { %4916 = vmatpush1.bf16.msra.mxu0 %v7690_v5  ;;  %4969 = vmatpush1.bf16.msra.mxu1 %v7693_v9  ;;  %6002 = vst [vmem:[%s10482_s3 + $0x238] sm:$0xff] %v6900_v26  ;;  %6003 = vst [vmem:[%s10482_s3 + $0x240] sm:$0xff] %v6901_v27  ;;  %v6930_v1 = vpack.c.bf16 %v4318_v28, %v4316_v21  ;;  %v6931_v34 = vpack.c.bf16 %v4371_v29, %v4369_v23  ;;  %v7736_v21 = vld [vmem:[%s10479_s1 + $0x830] ss:$236 sps:$4 sm:$0xff]   ;;  %v7744_v26 = vld [vmem:[%s10479_s1 + $0xa0c] ss:$236 sps:$4 sm:$0xff]  }
 0x1fc   :  { %4917 = vmatprep.subr.bf16.mxu0 %v7698_v17  ;;  %4970 = vmatprep.subr.bf16.mxu1 %v7701_v18  ;;  %v7747_v27 = vld [vmem:[%s10479_s1 + $0xa14] ss:$236 sps:$4 sm:$0xff]   ;;  %v7750_v36 = vld [vmem:[%s10479_s1 + $0xbe4] ss:$236 sps:$4 sm:$0xff]   ;;  %v7753_v44 = vld [vmem:[%s10479_s1 + $0xbec] ss:$236 sps:$4 sm:$0xff]  }
 0x1fd   :  { %6032 = vst [vmem:[%s10482_s3 + $0x324] sm:$0xff] %v6930_v1  ;;  %6033 = vst [vmem:[%s10482_s3 + $0x32c] sm:$0xff] %v6931_v34 }
 0x1ff   :  { %4918 = vmatpush1.bf16.msra.mxu0 %v7696_v30  ;;  %4971 = vmatpush1.bf16.msra.mxu1 %v7699_v31 }
 0x200   :  { %4919 = vmatprep.subr.bf16.mxu0 %v7704_v7  ;;  %4972 = vmatprep.subr.bf16.mxu1 %v7707_v35  ;;  %v7742_v7 = vld [vmem:[%s10479_s1 + $0xa08] ss:$236 sps:$4 sm:$0xff]   ;;  %v7745_v35 = vld [vmem:[%s10479_s1 + $0xa10] ss:$236 sps:$4 sm:$0xff]  }
 0x203   :  { %4920 = vmatpush1.bf16.msra.mxu0 %v7702_v37  ;;  %4973 = vmatpush1.bf16.msra.mxu1 %v7705_v12 }
 0x204   :  { %4921 = vmatprep.subr.bf16.mxu0 %v3602_v41  ;;  %4974 = vmatprep.subr.bf16.mxu1 %v3608_v43 }
 0x207   :  { %4922 = vmatpush1.bf16.msra.mxu0 %v3599_v19  ;;  %4975 = vmatpush1.bf16.msra.mxu1 %v3605_v45  ;;  %v7748_v19 = vld [vmem:[%s10479_s1 + $0xbe0] ss:$236 sps:$4 sm:$0xff]   ;;  %v7751_v45 = vld [vmem:[%s10479_s1 + $0xbe8] ss:$236 sps:$4 sm:$0xff]  }
 0x208   :  { %5009 = vmatprep.subr.bf16.mxu0 %v7714_v46  ;;  %5062 = vmatprep.subr.bf16.mxu1 %v7717_v47 }
 0x20a   :  { %4936 = vmatmul.mubr.bf16.vlgmr.msra.gmra.mrb[96].mxu0 %v9745_v20  ;;  %4989 = vmatmul.mubr.bf16.vlgmr.msra.gmra.mrb[96].mxu1 %v9745_v20 }
 0x20b   :  { %5010 = vmatpush1.bf16.msra.mxu0 %v7712_v61  ;;  %5063 = vmatpush1.bf16.msra.mxu1 %v7715_v48 }
 0x20c   :  { %5011 = vmatprep.subr.bf16.mxu0 %v7720_v49  ;;  %5064 = vmatprep.subr.bf16.mxu1 %v7723_v50  ;;  %v7756_v49 = vld [vmem:[%s10479_s1 + $0xdbc] ss:$236 sps:$4 sm:$0xff]   ;;  %v7759_v50 = vld [vmem:[%s10479_s1 + $0xdc4] ss:$236 sps:$4 sm:$0xff]  }
 0x20d   :  { %6697 = vmatprep.mubr.msk.bf16.mxu0 %vm3443_vm1, %v9764_v24  ;;  %6699 = vmatprep.mubr.msk.bf16.mxu1 %vm3443_vm1, %v9764_v24 }
 0x20f   :  { %5012 = vmatpush1.bf16.msra.mxu0 %v7718_v8  ;;  %5065 = vmatpush1.bf16.msra.mxu1 %v7721_v51 }
 0x210   :  { %5013 = vmatprep.subr.bf16.mxu0 %v7726_v32  ;;  %5066 = vmatprep.subr.bf16.mxu1 %v7729_v52 }
 0x212   :  { %4946 = vmatmul.mubr.bf16.gmra.mrb[100].mxu0 %v9785_v0  ;;  %4999 = vmatmul.mubr.bf16.gmra.mrb[100].mxu1 %v9785_v0 }
 0x213   :  { %5014 = vmatpush1.bf16.msra.mxu0 %v7724_v15  ;;  %5067 = vmatpush1.bf16.msra.mxu1 %v7727_v54  ;;  %v585_v15 = vld [vmem:[%s10479_s1 + $0x1168] sm:$0x33]  ;;  %v586_v54 = vld [vmem:[%s10479_s1 + $0x1170] sm:$0x33] }
 0x214   :  { %5015 = vmatprep.subr.bf16.mxu0 %v7732_v55  ;;  %5068 = vmatprep.subr.bf16.mxu1 %v7735_v57 }
 0x215   :  { %v4407_v3 = vpop.f32.mrb[56].mxu0  ;;  %v4460_v4 = vpop.f32.mrb[56].mxu1  ;;  %6700 = vmatprep.mubr.msk.bf16.mxu0 %vm3443_vm1, %v9614_v56  ;;  %6702 = vmatprep.mubr.msk.bf16.mxu1 %vm3443_vm1, %v9614_v56 }
 0x216   :  { %v4408_v5 = vadd.f32 %v4407_v3, %v8713_v62  ;;  %v4461_v9 = vadd.f32 %v4460_v4, %v8713_v62  ;;  %v4409_v11 = vpop.f32.mrb[57].mxu0  ;;  %v4462_v13 = vpop.f32.mrb[57].mxu1 }
 0x217   :  { %v4410_v14 = vadd.f32 %v4409_v11, %v8713_v62  ;;  %v4463_v16 = vadd.f32 %v4462_v13, %v8713_v62  ;;  %v4411_v17 = vpop.f32.mrb[58].mxu0  ;;  %v4464_v18 = vpop.f32.mrb[58].mxu1  ;;  %5016 = vmatpush1.bf16.msra.mxu0 %v7730_v58  ;;  %5069 = vmatpush1.bf16.msra.mxu1 %v7733_v59  ;;  %v6642_v11 = vcombine.high %v585_v15, %v585_v15 }
 0x218   :  { %v4412_v23 = vadd.f32 %v4411_v17, %v8729_v6  ;;  %v4465_v33 = vadd.f32 %v4464_v18, %v8729_v6  ;;  %v4413_v53 = vpop.f32.mrb[59].mxu0  ;;  %v4466_v25 = vpop.f32.mrb[59].mxu1  ;;  %5017 = vmatprep.subr.bf16.mxu0 %v7738_v60  ;;  %5070 = vmatprep.subr.bf16.mxu1 %v7741_v63  ;;  %v7754_v60 = vld [vmem:[%s10479_s1 + $0xdb8] ss:$236 sps:$4 sm:$0xff]   ;;  %v7757_v63 = vld [vmem:[%s10479_s1 + $0xdc0] ss:$236 sps:$4 sm:$0xff]   ;;  %v6644_v13 = vcombine.high %v586_v54, %v586_v54 }
 0x219   :  { %v6842_v28 = vpack.c.bf16 %v4410_v14, %v4408_v5  ;;  %v6843_v29 = vpack.c.bf16 %v4463_v16, %v4461_v9  ;;  %v4414_v30 = vadd.f32 %v4413_v53, %v8729_v6  ;;  %v4467_v31 = vadd.f32 %v4466_v25, %v8729_v6  ;;  %v7762_v5 = vld [vmem:[%s10479_s1 + $0xf94] ss:$236 sps:$4 sm:$0xff]   ;;  %v7765_v9 = vld [vmem:[%s10479_s1 + $0xf9c] ss:$236 sps:$4 sm:$0xff]   ;;  %v7763_v16 = vld [vmem:[%s10479_s1 + $0xf98] ss:$236 sps:$4 sm:$0xff]  }
 0x21a   :  { %v7760_v14 = vld [vmem:[%s10479_s1 + $0xf90] ss:$236 sps:$4 sm:$0xff]   ;;  %v6641_v17 = vcombine.low %v585_v15, %v585_v15  ;;  %v6643_v18 = vcombine.low %v586_v54, %v586_v54  ;;  %v7770_v25 = vld [vmem:[%s10479_s1 + $0xe0] ss:$236 sps:$4 sm:$0xff]  }
 0x21b   :  { %5943 = vst [vmem:[%s10482_s3 + $0x70] sm:$0xff] %v6842_v28  ;;  %5944 = vst [vmem:[%s10482_s3 + $0x78] sm:$0xff] %v6843_v29  ;;  %v6872_v1 = vpack.c.bf16 %v4414_v30, %v4412_v23  ;;  %v6873_v34 = vpack.c.bf16 %v4467_v31, %v4465_v33  ;;  %5018 = vmatpush1.bf16.msra.mxu0 %v7736_v21  ;;  %5071 = vmatpush1.bf16.msra.mxu1 %v7739_v22  ;;  %v7772_v53 = vld [vmem:[%s10479_s1 + $0xe4] ss:$236 sps:$4 sm:$0xff]   ;;  %v7777_v29 = vld [vmem:[%s10479_s1 + $0x2c0] ss:$236 sps:$4 sm:$0xff]  }
 0x21c   :  { %5019 = vmatprep.subr.bf16.mxu0 %v7744_v26  ;;  %5072 = vmatprep.subr.bf16.mxu1 %v7747_v27  ;;  %v3614_v21 = vand.u32 %v6642_v11, %v7962_v42  ;;  %v3620_v22 = vand.u32 %v6644_v13, %v7962_v42  ;;  %v3611_v23 = vand.u32 %v6641_v17, %v7962_v42  ;;  %v7773_v26 = vld [vmem:[%s10479_s1 + $0xe8] ss:$236 sps:$4 sm:$0xff]   ;;  %v7774_v28 = vld [vmem:[%s10479_s1 + $0x2b8] ss:$236 sps:$4 sm:$0xff]   ;;  %v7778_v31 = vld [vmem:[%s10479_s1 + $0x490] ss:$236 sps:$4 sm:$0xff]  }
 0x21d   :  { %5974 = vst [vmem:[%s10482_s3 + $0x15c] sm:$0xff] %v6872_v1  ;;  %5975 = vst [vmem:[%s10482_s3 + $0x164] sm:$0xff] %v6873_v34  ;;  %v4417_v37 = vpop.f32.mrb[60].mxu0  ;;  %v4470_v12 = vpop.f32.mrb[60].mxu1  ;;  %v3617_v33 = vand.u32 %v6643_v18, %v7962_v42  ;;  %v7776_v27 = vld [vmem:[%s10479_s1 + $0x2bc] ss:$236 sps:$4 sm:$0xff]  }
 0x21e   :  { %v4418_v38 = vadd.f32 %v4417_v37, %v8737_v10  ;;  %v4419_v40 = vpop.f32.mrb[61].mxu0  ;;  %v4471_v41 = vadd.f32 %v4470_v12, %v8737_v10  ;;  %v4472_v43 = vpop.f32.mrb[61].mxu1  ;;  %v7780_v30 = vld [vmem:[%s10479_s1 + $0x494] ss:$236 sps:$4 sm:$0xff]   ;;  %v7781_v1 = vld [vmem:[%s10479_s1 + $0x498] ss:$236 sps:$4 sm:$0xff]  }
 0x21f   :  { %5020 = vmatpush1.bf16.msra.mxu0 %v7742_v7  ;;  %5073 = vmatpush1.bf16.msra.mxu1 %v7745_v35  ;;  %v4420_v46 = vadd.f32 %v4419_v40, %v8737_v10  ;;  %v4421_v47 = vpop.f32.mrb[62].mxu0  ;;  %v4473_v61 = vadd.f32 %v4472_v43, %v8737_v10  ;;  %v4474_v48 = vpop.f32.mrb[62].mxu1  ;;  %v7784_v34 = vld [vmem:[%s10479_s1 + $0x66c] ss:$236 sps:$4 sm:$0xff]   ;;  %v7782_v7 = vld [vmem:[%s10479_s1 + $0x668] ss:$236 sps:$4 sm:$0xff]  }
 0x220   :  { %5021 = vmatprep.subr.bf16.mxu0 %v7750_v36  ;;  %5074 = vmatprep.subr.bf16.mxu1 %v7753_v44  ;;  %v4422_v8 = vadd.f32 %v4421_v47, %v8781_v39  ;;  %v4423_v51 = vpop.f32.mrb[63].mxu0  ;;  %v4475_v32 = vadd.f32 %v4474_v48, %v8781_v39  ;;  %v4476_v52 = vpop.f32.mrb[63].mxu1  ;;  %v7785_v35 = vld [vmem:[%s10479_s1 + $0x670] ss:$236 sps:$4 sm:$0xff]   ;;  %v7786_v47 = vld [vmem:[%s10479_s1 + $0x840] ss:$236 sps:$4 sm:$0xff]  }
 0x221   :  { %v6902_v55 = vpack.c.bf16 %v4420_v46, %v4418_v38  ;;  %v6903_v57 = vpack.c.bf16 %v4473_v61, %v4471_v41  ;;  %v4424_v58 = vadd.f32 %v4423_v51, %v8781_v39  ;;  %v4477_v59 = vadd.f32 %v4476_v52, %v8781_v39  ;;  %v7788_v36 = vld [vmem:[%s10479_s1 + $0x844] ss:$236 sps:$4 sm:$0xff]  }
 0x222   :  { %v7794_v11 = vld [vmem:[%s10479_s1 + $0xbf0] ss:$236 sps:$4 sm:$0xff]   ;;  %v7797_v13 = vld [vmem:[%s10479_s1 + $0xbf8] ss:$236 sps:$4 sm:$0xff]  }
 0x223   :  { %5022 = vmatpush1.bf16.msra.mxu0 %v7748_v19  ;;  %5075 = vmatpush1.bf16.msra.mxu1 %v7751_v45  ;;  %6004 = vst [vmem:[%s10482_s3 + $0x248] sm:$0xff] %v6902_v55  ;;  %6005 = vst [vmem:[%s10482_s3 + $0x250] sm:$0xff] %v6903_v57  ;;  %v6932_v3 = vpack.c.bf16 %v4424_v58, %v4422_v8  ;;  %v6933_v4 = vpack.c.bf16 %v4477_v59, %v4475_v32  ;;  %v7792_v8 = vld [vmem:[%s10479_s1 + $0xa1c] ss:$236 sps:$4 sm:$0xff]   ;;  %v7790_v57 = vld [vmem:[%s10479_s1 + $0xa18] ss:$236 sps:$4 sm:$0xff]  }
 0x224   :  { %5023 = vmatprep.subr.bf16.mxu0 %v7756_v49  ;;  %5076 = vmatprep.subr.bf16.mxu1 %v7759_v50  ;;  %v7793_v58 = vld [vmem:[%s10479_s1 + $0xa20] ss:$236 sps:$4 sm:$0xff]  }
 0x225   :  { %6034 = vst [vmem:[%s10482_s3 + $0x334] sm:$0xff] %v6932_v3  ;;  %6035 = vst [vmem:[%s10482_s3 + $0x33c] sm:$0xff] %v6933_v4  ;;  %v7796_v59 = vld [vmem:[%s10479_s1 + $0xbf4] ss:$236 sps:$4 sm:$0xff]  }
 0x227   :  { %5024 = vmatpush1.bf16.msra.mxu0 %v7754_v60  ;;  %5077 = vmatpush1.bf16.msra.mxu1 %v7757_v63 }
 0x228   :  { %5025 = vmatprep.subr.bf16.mxu0 %v7762_v5  ;;  %5078 = vmatprep.subr.bf16.mxu1 %v7765_v9 }
 0x22b   :  { %5026 = vmatpush1.bf16.msra.mxu0 %v7760_v14  ;;  %5079 = vmatpush1.bf16.msra.mxu1 %v7763_v16 }
 0x22c   :  { %5027 = vmatprep.subr.bf16.mxu0 %v3614_v21  ;;  %5080 = vmatprep.subr.bf16.mxu1 %v3620_v22  ;;  %v7800_v21 = vld [vmem:[%s10479_s1 + $0xdcc] ss:$236 sps:$4 sm:$0xff]  }
 0x22f   :  { %5028 = vmatpush1.bf16.msra.mxu0 %v3611_v23  ;;  %5081 = vmatpush1.bf16.msra.mxu1 %v3617_v33 }
 0x230   :  { %5115 = vmatprep.subr.bf16.mxu0 %v7772_v53  ;;  %5168 = vmatprep.subr.bf16.mxu1 %v7821_v2 }
 0x232   :  { %5042 = vmatmul.mubr.bf16.vlgmr.msra.gmra.mrb[104].mxu0 %v9745_v20  ;;  %5095 = vmatmul.mubr.bf16.vlgmr.msra.gmra.mrb[104].mxu1 %v9745_v20 }
 0x233   :  { %5116 = vmatpush1.bf16.msra.mxu0 %v7770_v25  ;;  %5169 = vmatpush1.bf16.msra.mxu1 %v7773_v26  ;;  %v587_v25 = vld [vmem:[%s10479_s1 + $0x1178] sm:$0x33] }
 0x234   :  { %5117 = vmatprep.subr.bf16.mxu0 %v7776_v27  ;;  %5170 = vmatprep.subr.bf16.mxu1 %v7821_v2 }
 0x235   :  { %6701 = vmatprep.mubr.msk.bf16.mxu0 %vm3443_vm1, %v9764_v24  ;;  %6703 = vmatprep.mubr.msk.bf16.mxu1 %vm3443_vm1, %v9764_v24 }
 0x237   :  { %5118 = vmatpush1.bf16.msra.mxu0 %v7774_v28  ;;  %5171 = vmatpush1.bf16.msra.mxu1 %v7777_v29 }
 0x238   :  { %5119 = vmatprep.subr.bf16.mxu0 %v7780_v30  ;;  %5172 = vmatprep.subr.bf16.mxu1 %v7821_v2  ;;  %v7798_v30 = vld [vmem:[%s10479_s1 + $0xdc8] ss:$236 sps:$4 sm:$0xff]  }
 0x23a   :  { %5052 = vmatmul.mubr.bf16.gmra.mrb[108].mxu0 %v9785_v0  ;;  %5105 = vmatmul.mubr.bf16.gmra.mrb[108].mxu1 %v9785_v0 }
 0x23b   :  { %5120 = vmatpush1.bf16.msra.mxu0 %v7778_v31  ;;  %5173 = vmatpush1.bf16.msra.mxu1 %v7781_v1  ;;  %v7801_v31 = vld [vmem:[%s10479_s1 + $0xdd0] ss:$236 sps:$4 sm:$0xff]  }
 0x23c   :  { %5121 = vmatprep.subr.bf16.mxu0 %v7784_v34  ;;  %5174 = vmatprep.subr.bf16.mxu1 %v7821_v2 }
 0x23d   :  { %v4513_v44 = vpop.f32.mrb[64].mxu0  ;;  %v4566_v37 = vpop.f32.mrb[64].mxu1  ;;  %6704 = vmatprep.mubr.msk.bf16.mxu0 %vm3443_vm1, %v9614_v56  ;;  %6706 = vmatprep.mubr.msk.bf16.mxu1 %vm3443_vm1, %v9614_v56  ;;  %v7789_v56 = vld [vmem:[%s10479_s1 + $0x848] ss:$236 sps:$4 sm:$0xff]  }
 0x23e   :  { %v4514_v12 = vadd.f32 %v4513_v44, %v8713_v62  ;;  %v4567_v38 = vadd.f32 %v4566_v37, %v8713_v62  ;;  %v4515_v40 = vpop.f32.mrb[65].mxu0  ;;  %v4568_v41 = vpop.f32.mrb[65].mxu1  ;;  %v7805_v44 = vld [vmem:[%s10479_s1 + $0xfa8] ss:$236 sps:$4 sm:$0xff]   ;;  %v6645_v37 = vcombine.low %v587_v25, %v587_v25 }
 0x23f   :  { %v4516_v43 = vadd.f32 %v4515_v40, %v8713_v62  ;;  %v4569_v19 = vadd.f32 %v4568_v41, %v8713_v62  ;;  %v4517_v45 = vpop.f32.mrb[66].mxu0  ;;  %v4570_v46 = vpop.f32.mrb[66].mxu1  ;;  %5122 = vmatpush1.bf16.msra.mxu0 %v7782_v7  ;;  %5175 = vmatpush1.bf16.msra.mxu1 %v7785_v35  ;;  %v7804_v7 = vld [vmem:[%s10479_s1 + $0xfa4] ss:$236 sps:$4 sm:$0xff]   ;;  %v6646_v35 = vcombine.high %v587_v25, %v587_v25 }
 0x240   :  { %v4518_v61 = vadd.f32 %v4517_v45, %v8729_v6  ;;  %v4571_v48 = vadd.f32 %v4570_v46, %v8729_v6  ;;  %v4519_v49 = vpop.f32.mrb[67].mxu0  ;;  %v4572_v50 = vpop.f32.mrb[67].mxu1  ;;  %5123 = vmatprep.subr.bf16.mxu0 %v7788_v36  ;;  %5176 = vmatprep.subr.bf16.mxu1 %v7821_v2  ;;  %v7802_v36 = vld [vmem:[%s10479_s1 + $0xfa0] ss:$236 sps:$4 sm:$0xff]   ;;  %v3623_v40 = vand.u32 %v6645_v37, %v7962_v42 }
 0x241   :  { %v6844_v51 = vpack.c.bf16 %v4516_v43, %v4514_v12  ;;  %v6845_v32 = vpack.c.bf16 %v4569_v19, %v4567_v38  ;;  %v4520_v52 = vadd.f32 %v4519_v49, %v8729_v6  ;;  %v4573_v15 = vadd.f32 %v4572_v50, %v8729_v6  ;;  %v7808_v12 = vld [vmem:[%s10479_s1 + $0x1180] ss:$0 sps:$4 sm:$0x33]  }
 0x242   :  { %v3626_v38 = vand.u32 %v6646_v35, %v7962_v42  ;;  %v3629_v41 = vand.u32 %v7808_v12, %v7962_v42 }
 0x243   :  { %5945 = vst [vmem:[%s10482_s3 + $0x80] sm:$0xff] %v6844_v51  ;;  %5946 = vst [vmem:[%s10482_s3 + $0x88] sm:$0xff] %v6845_v32  ;;  %v6874_v54 = vpack.c.bf16 %v4520_v52, %v4518_v61  ;;  %v6875_v55 = vpack.c.bf16 %v4573_v15, %v4571_v48  ;;  %5124 = vmatpush1.bf16.msra.mxu0 %v7786_v47  ;;  %5177 = vmatpush1.bf16.msra.mxu1 %v7789_v56 }
 0x244   :  { %5125 = vmatprep.subr.bf16.mxu0 %v7792_v8  ;;  %5178 = vmatprep.subr.bf16.mxu1 %v7821_v2 }
 0x245   :  { %5976 = vst [vmem:[%s10482_s3 + $0x16c] sm:$0xff] %v6874_v54  ;;  %5977 = vst [vmem:[%s10482_s3 + $0x174] sm:$0xff] %v6875_v55  ;;  %v4523_v60 = vpop.f32.mrb[68].mxu0  ;;  %v4576_v63 = vpop.f32.mrb[68].mxu1 }
 0x246   :  { %v4524_v3 = vadd.f32 %v4523_v60, %v8737_v10  ;;  %v4525_v4 = vpop.f32.mrb[69].mxu0  ;;  %v4577_v5 = vadd.f32 %v4576_v63, %v8737_v10  ;;  %v4578_v9 = vpop.f32.mrb[69].mxu1 }
 0x247   :  { %5126 = vmatpush1.bf16.msra.mxu0 %v7790_v57  ;;  %5179 = vmatpush1.bf16.msra.mxu1 %v7793_v58  ;;  %v4526_v14 = vadd.f32 %v4525_v4, %v8737_v10  ;;  %v4527_v16 = vpop.f32.mrb[70].mxu0  ;;  %v4579_v17 = vadd.f32 %v4578_v9, %v8737_v10  ;;  %v4580_v18 = vpop.f32.mrb[70].mxu1 }
 0x248   :  { %5127 = vmatprep.subr.bf16.mxu0 %v7796_v59  ;;  %5180 = vmatprep.subr.bf16.mxu1 %v7821_v2  ;;  %v4528_v22 = vadd.f32 %v4527_v16, %v8781_v39  ;;  %v4529_v23 = vpop.f32.mrb[71].mxu0  ;;  %v4581_v33 = vadd.f32 %v4580_v18, %v8781_v39  ;;  %v4582_v53 = vpop.f32.mrb[71].mxu1 }
 0x249   :  { %v6904_v26 = vpack.c.bf16 %v4526_v14, %v4524_v3  ;;  %v6905_v27 = vpack.c.bf16 %v4579_v17, %v4577_v5  ;;  %v4530_v28 = vadd.f32 %v4529_v23, %v8781_v39  ;;  %v4583_v29 = vadd.f32 %v4582_v53, %v8781_v39 }
 0x24b   :  { %5128 = vmatpush1.bf16.msra.mxu0 %v7794_v11  ;;  %5181 = vmatpush1.bf16.msra.mxu1 %v7797_v13  ;;  %6006 = vst [vmem:[%s10482_s3 + $0x258] sm:$0xff] %v6904_v26  ;;  %6007 = vst [vmem:[%s10482_s3 + $0x260] sm:$0xff] %v6905_v27  ;;  %v6934_v1 = vpack.c.bf16 %v4530_v28, %v4528_v22  ;;  %v6935_v34 = vpack.c.bf16 %v4583_v29, %v4581_v33 }
 0x24c   :  { %5129 = vmatprep.subr.bf16.mxu0 %v7800_v21  ;;  %5182 = vmatprep.subr.bf16.mxu1 %v7821_v2 }
 0x24d   :  { %6036 = vst [vmem:[%s10482_s3 + $0x344] sm:$0xff] %v6934_v1  ;;  %6037 = vst [vmem:[%s10482_s3 + $0x34c] sm:$0xff] %v6935_v34 }
 0x24f   :  { %5130 = vmatpush1.bf16.msra.mxu0 %v7798_v30  ;;  %5183 = vmatpush1.bf16.msra.mxu1 %v7801_v31 }
 0x250   :  { %5131 = vmatprep.subr.bf16.mxu0 %v7804_v7  ;;  %5184 = vmatprep.subr.bf16.mxu1 %v7821_v2 }
 0x253   :  { %5132 = vmatpush1.bf16.msra.mxu0 %v7802_v36  ;;  %5185 = vmatpush1.bf16.msra.mxu1 %v7805_v44 }
 0x254   :  { %5133 = vmatprep.subr.bf16.mxu0 %v3626_v38  ;;  %5186 = vmatprep.subr.bf16.mxu1 %v7821_v2 }
 0x257   :  { %5134 = vmatpush1.bf16.msra.mxu0 %v3623_v40  ;;  %5187 = vmatpush1.bf16.msra.mxu1 %v3629_v41 }
 0x25a   :  { %5148 = vmatmul.mubr.bf16.vlgmr.msra.gmra.mrb[112].mxu0 %v9745_v20  ;;  %5201 = vmatmul.mubr.bf16.vlgmr.msra.gmra.mrb[112].mxu1 %v9745_v20 }
 0x25b   :  { %6705 = vmatprep.mubr.msk.bf16.mxu0 %vm3443_vm1, %v9764_v24  ;;  %6707 = vmatprep.mubr.msk.bf16.mxu1 %vm3443_vm1, %v9764_v24 }
 0x262   :  { %5158 = vmatmul.mubr.bf16.gmra.mrb[116].mxu0 %v9785_v0  ;;  %5209 = vmatmul.mubr.bf16.gmra.mrb[116].mxu1 %v9785_v0 }
 0x265   :  { %v4619_v42 = vpop.f32.mrb[72].mxu0  ;;  %v4672_v43 = vpop.f32.mrb[72].mxu1 }
 0x266   :  { %v4620_v2 = vadd.f32 %v4619_v42, %v8713_v62  ;;  %v4673_v19 = vadd.f32 %v4672_v43, %v8713_v62  ;;  %v4621_v45 = vpop.f32.mrb[73].mxu0  ;;  %v4674_v46 = vpop.f32.mrb[73].mxu1 }
 0x267   :  { %v4622_v20 = vadd.f32 %v4621_v45, %v8713_v62  ;;  %v4675_v47 = vadd.f32 %v4674_v46, %v8713_v62  ;;  %v4623_v56 = vpop.f32.mrb[74].mxu0  ;;  %v4676_v61 = vpop.f32.mrb[74].mxu1 }
 0x268   :  { %v4624_v24 = vadd.f32 %v4623_v56, %v8729_v6  ;;  %v4677_v48 = vadd.f32 %v4676_v61, %v8729_v6  ;;  %v4625_v49 = vpop.f32.mrb[75].mxu0  ;;  %v4678_v0 = vpop.f32.mrb[75].mxu1 }
 0x269   :  { %v6846_v50 = vpack.c.bf16 %v4622_v20, %v4620_v2  ;;  %v6847_v8 = vpack.c.bf16 %v4675_v47, %v4673_v19  ;;  %v4626_v51 = vadd.f32 %v4625_v49, %v8729_v6  ;;  %v4679_v32 = vadd.f32 %v4678_v0, %v8729_v6 }
 0x26b   :  { %5947 = vst [vmem:[%s10482_s3 + $0x90] sm:$0xff] %v6846_v50  ;;  %5948 = vst [vmem:[%s10482_s3 + $0x98] sm:$0xff] %v6847_v8  ;;  %v6876_v52 = vpack.c.bf16 %v4626_v51, %v4624_v24  ;;  %v6877_v15 = vpack.c.bf16 %v4679_v32, %v4677_v48 }
 0x26d   :  { %5978 = vst [vmem:[%s10482_s3 + $0x17c] sm:$0xff] %v6876_v52  ;;  %5979 = vst [vmem:[%s10482_s3 + $0x184] sm:$0xff] %v6877_v15  ;;  %v4629_v54 = vpop.f32.mrb[76].mxu0  ;;  %v4682_v55 = vpop.f32.mrb[76].mxu1 }
 0x26e   :  { %v4630_v57 = vadd.f32 %v4629_v54, %v8737_v10  ;;  %v4631_v58 = vpop.f32.mrb[77].mxu0  ;;  %v4683_v59 = vadd.f32 %v4682_v55, %v8737_v10  ;;  %v4684_v60 = vpop.f32.mrb[77].mxu1 }
 0x26f   :  { %v4632_v63 = vadd.f32 %v4631_v58, %v8737_v10  ;;  %v4633_v3 = vpop.f32.mrb[78].mxu0  ;;  %v4685_v4 = vadd.f32 %v4684_v60, %v8737_v10  ;;  %v4686_v5 = vpop.f32.mrb[78].mxu1 }
 0x270   :  { %v4634_v9 = vadd.f32 %v4633_v3, %v8781_v39  ;;  %v4635_v11 = vpop.f32.mrb[79].mxu0  ;;  %v4687_v13 = vadd.f32 %v4686_v5, %v8781_v39  ;;  %v4688_v14 = vpop.f32.mrb[79].mxu1 }
 0x271   :  { %v6906_v16 = vpack.c.bf16 %v4632_v63, %v4630_v57  ;;  %v6907_v17 = vpack.c.bf16 %v4685_v4, %v4683_v59  ;;  %v4636_v18 = vadd.f32 %v4635_v11, %v8781_v39  ;;  %v4689_v21 = vadd.f32 %v4688_v14, %v8781_v39 }
 0x273   :  { %6008 = vst [vmem:[%s10482_s3 + $0x268] sm:$0xff] %v6906_v16  ;;  %6009 = vst [vmem:[%s10482_s3 + $0x270] sm:$0xff] %v6907_v17  ;;  %v6936_v22 = vpack.c.bf16 %v4636_v18, %v4634_v9  ;;  %v6937_v23 = vpack.c.bf16 %v4689_v21, %v4687_v13 }
 0x275   :  { %6038 = vst [vmem:[%s10482_s3 + $0x354] sm:$0xff] %v6936_v22  ;;  %6039 = vst [vmem:[%s10482_s3 + $0x35c] sm:$0xff] %v6937_v23 }
 0x28d   :  { %v4725_v33 = vpop.f32.mrb[80].mxu0  ;;  %v4778_v53 = vpop.f32.mrb[80].mxu1 }
 0x28e   :  { %v4726_v25 = vadd.f32 %v4725_v33, %v8713_v62  ;;  %v4779_v26 = vadd.f32 %v4778_v53, %v8713_v62  ;;  %v4727_v27 = vpop.f32.mrb[81].mxu0  ;;  %v4780_v28 = vpop.f32.mrb[81].mxu1 }
 0x28f   :  { %v4728_v29 = vadd.f32 %v4727_v27, %v8713_v62  ;;  %v4781_v30 = vadd.f32 %v4780_v28, %v8713_v62  ;;  %v4729_v31 = vpop.f32.mrb[82].mxu0  ;;  %v4782_v1 = vpop.f32.mrb[82].mxu1 }
 0x290   :  { %v4730_v34 = vadd.f32 %v4729_v31, %v8729_v6  ;;  %v4783_v7 = vadd.f32 %v4782_v1, %v8729_v6  ;;  %v4731_v35 = vpop.f32.mrb[83].mxu0  ;;  %v4784_v36 = vpop.f32.mrb[83].mxu1 }
 0x291   :  { %v6848_v44 = vpack.c.bf16 %v4728_v29, %v4726_v25  ;;  %v6849_v37 = vpack.c.bf16 %v4781_v30, %v4779_v26  ;;  %v4732_v12 = vadd.f32 %v4731_v35, %v8729_v6  ;;  %v4785_v38 = vadd.f32 %v4784_v36, %v8729_v6 }
 0x293   :  { %5949 = vst [vmem:[%s10482_s3 + $0xa0] sm:$0xff] %v6848_v44  ;;  %5950 = vst [vmem:[%s10482_s3 + $0xa8] sm:$0xff] %v6849_v37  ;;  %v6878_v40 = vpack.c.bf16 %v4732_v12, %v4730_v34  ;;  %v6879_v41 = vpack.c.bf16 %v4785_v38, %v4783_v7 }
 0x295   :  { %5980 = vst [vmem:[%s10482_s3 + $0x18c] sm:$0xff] %v6878_v40  ;;  %5981 = vst [vmem:[%s10482_s3 + $0x194] sm:$0xff] %v6879_v41  ;;  %v4735_v42 = vpop.f32.mrb[84].mxu0  ;;  %v4788_v43 = vpop.f32.mrb[84].mxu1 }
 0x296   :  { %v4736_v2 = vadd.f32 %v4735_v42, %v8737_v10  ;;  %v4737_v19 = vpop.f32.mrb[85].mxu0  ;;  %v4789_v45 = vadd.f32 %v4788_v43, %v8737_v10  ;;  %v4790_v46 = vpop.f32.mrb[85].mxu1 }
 0x297   :  { %v4738_v20 = vadd.f32 %v4737_v19, %v8737_v10  ;;  %v4739_v47 = vpop.f32.mrb[86].mxu0  ;;  %v4791_v56 = vadd.f32 %v4790_v46, %v8737_v10  ;;  %v4792_v61 = vpop.f32.mrb[86].mxu1 }
 0x298   :  { %v4740_v24 = vadd.f32 %v4739_v47, %v8781_v39  ;;  %v4741_v48 = vpop.f32.mrb[87].mxu0  ;;  %v4793_v49 = vadd.f32 %v4792_v61, %v8781_v39  ;;  %v4794_v0 = vpop.f32.mrb[87].mxu1 }
 0x299   :  { %v6908_v50 = vpack.c.bf16 %v4738_v20, %v4736_v2  ;;  %v6909_v8 = vpack.c.bf16 %v4791_v56, %v4789_v45  ;;  %v4742_v51 = vadd.f32 %v4741_v48, %v8781_v39  ;;  %v4795_v32 = vadd.f32 %v4794_v0, %v8781_v39 }
 0x29b   :  { %6010 = vst [vmem:[%s10482_s3 + $0x278] sm:$0xff] %v6908_v50  ;;  %6011 = vst [vmem:[%s10482_s3 + $0x280] sm:$0xff] %v6909_v8  ;;  %v6938_v52 = vpack.c.bf16 %v4742_v51, %v4740_v24  ;;  %v6939_v15 = vpack.c.bf16 %v4795_v32, %v4793_v49 }
 0x29d   :  { %6040 = vst [vmem:[%s10482_s3 + $0x364] sm:$0xff] %v6938_v52  ;;  %6041 = vst [vmem:[%s10482_s3 + $0x36c] sm:$0xff] %v6939_v15 }
 0x2b5   :  { %v4831_v54 = vpop.f32.mrb[88].mxu0  ;;  %v4884_v55 = vpop.f32.mrb[88].mxu1 }
 0x2b6   :  { %v4832_v57 = vadd.f32 %v4831_v54, %v8713_v62  ;;  %v4885_v58 = vadd.f32 %v4884_v55, %v8713_v62  ;;  %v4833_v59 = vpop.f32.mrb[89].mxu0  ;;  %v4886_v60 = vpop.f32.mrb[89].mxu1 }
 0x2b7   :  { %v4834_v63 = vadd.f32 %v4833_v59, %v8713_v62  ;;  %v4887_v3 = vadd.f32 %v4886_v60, %v8713_v62  ;;  %v4835_v4 = vpop.f32.mrb[90].mxu0  ;;  %v4888_v5 = vpop.f32.mrb[90].mxu1 }
 0x2b8   :  { %v4836_v9 = vadd.f32 %v4835_v4, %v8729_v6  ;;  %v4889_v11 = vadd.f32 %v4888_v5, %v8729_v6  ;;  %v4837_v13 = vpop.f32.mrb[91].mxu0  ;;  %v4890_v14 = vpop.f32.mrb[91].mxu1 }
 0x2b9   :  { %v6850_v16 = vpack.c.bf16 %v4834_v63, %v4832_v57  ;;  %v6851_v17 = vpack.c.bf16 %v4887_v3, %v4885_v58  ;;  %v4838_v18 = vadd.f32 %v4837_v13, %v8729_v6  ;;  %v4891_v21 = vadd.f32 %v4890_v14, %v8729_v6 }
 0x2bb   :  { %5951 = vst [vmem:[%s10482_s3 + $0xb0] sm:$0xff] %v6850_v16  ;;  %5952 = vst [vmem:[%s10482_s3 + $0xb8] sm:$0xff] %v6851_v17  ;;  %v6880_v22 = vpack.c.bf16 %v4838_v18, %v4836_v9  ;;  %v6881_v23 = vpack.c.bf16 %v4891_v21, %v4889_v11 }
 0x2bd   :  { %5982 = vst [vmem:[%s10482_s3 + $0x19c] sm:$0xff] %v6880_v22  ;;  %5983 = vst [vmem:[%s10482_s3 + $0x1a4] sm:$0xff] %v6881_v23  ;;  %v4841_v33 = vpop.f32.mrb[92].mxu0  ;;  %v4894_v53 = vpop.f32.mrb[92].mxu1 }
 0x2be   :  { %v4842_v25 = vadd.f32 %v4841_v33, %v8737_v10  ;;  %v4843_v26 = vpop.f32.mrb[93].mxu0  ;;  %v4895_v27 = vadd.f32 %v4894_v53, %v8737_v10  ;;  %v4896_v28 = vpop.f32.mrb[93].mxu1 }
 0x2bf   :  { %v4844_v29 = vadd.f32 %v4843_v26, %v8737_v10  ;;  %v4845_v30 = vpop.f32.mrb[94].mxu0  ;;  %v4897_v31 = vadd.f32 %v4896_v28, %v8737_v10  ;;  %v4898_v1 = vpop.f32.mrb[94].mxu1 }
 0x2c0   :  { %v4846_v34 = vadd.f32 %v4845_v30, %v8781_v39  ;;  %v4847_v7 = vpop.f32.mrb[95].mxu0  ;;  %v4899_v35 = vadd.f32 %v4898_v1, %v8781_v39  ;;  %v4900_v36 = vpop.f32.mrb[95].mxu1 }
 0x2c1   :  { %v6910_v44 = vpack.c.bf16 %v4844_v29, %v4842_v25  ;;  %v6911_v37 = vpack.c.bf16 %v4897_v31, %v4895_v27  ;;  %v4848_v12 = vadd.f32 %v4847_v7, %v8781_v39  ;;  %v4901_v38 = vadd.f32 %v4900_v36, %v8781_v39 }
 0x2c3   :  { %6012 = vst [vmem:[%s10482_s3 + $0x288] sm:$0xff] %v6910_v44  ;;  %6013 = vst [vmem:[%s10482_s3 + $0x290] sm:$0xff] %v6911_v37  ;;  %v6940_v40 = vpack.c.bf16 %v4848_v12, %v4846_v34  ;;  %v6941_v41 = vpack.c.bf16 %v4901_v38, %v4899_v35 }
 0x2c5   :  { %6042 = vst [vmem:[%s10482_s3 + $0x374] sm:$0xff] %v6940_v40  ;;  %6043 = vst [vmem:[%s10482_s3 + $0x37c] sm:$0xff] %v6941_v41 }
 0x2dd   :  { %v4937_v42 = vpop.f32.mrb[96].mxu0  ;;  %v4990_v43 = vpop.f32.mrb[96].mxu1 }
 0x2de   :  { %v4938_v2 = vadd.f32 %v4937_v42, %v8713_v62  ;;  %v4991_v19 = vadd.f32 %v4990_v43, %v8713_v62  ;;  %v4939_v45 = vpop.f32.mrb[97].mxu0  ;;  %v4992_v46 = vpop.f32.mrb[97].mxu1 }
 0x2df   :  { %v4940_v20 = vadd.f32 %v4939_v45, %v8713_v62  ;;  %v4993_v47 = vadd.f32 %v4992_v46, %v8713_v62  ;;  %v4941_v56 = vpop.f32.mrb[98].mxu0  ;;  %v4994_v61 = vpop.f32.mrb[98].mxu1 }
 0x2e0   :  { %v4942_v24 = vadd.f32 %v4941_v56, %v8729_v6  ;;  %v4995_v48 = vadd.f32 %v4994_v61, %v8729_v6  ;;  %v4943_v49 = vpop.f32.mrb[99].mxu0  ;;  %v4996_v0 = vpop.f32.mrb[99].mxu1 }
 0x2e1   :  { %v6852_v50 = vpack.c.bf16 %v4940_v20, %v4938_v2  ;;  %v6853_v8 = vpack.c.bf16 %v4993_v47, %v4991_v19  ;;  %v4944_v51 = vadd.f32 %v4943_v49, %v8729_v6  ;;  %v4997_v32 = vadd.f32 %v4996_v0, %v8729_v6 }
 0x2e3   :  { %5953 = vst [vmem:[%s10482_s3 + $0xc0] sm:$0xff] %v6852_v50  ;;  %5954 = vst [vmem:[%s10482_s3 + $0xc8] sm:$0xff] %v6853_v8  ;;  %v6882_v52 = vpack.c.bf16 %v4944_v51, %v4942_v24  ;;  %v6883_v15 = vpack.c.bf16 %v4997_v32, %v4995_v48 }
 0x2e5   :  { %5984 = vst [vmem:[%s10482_s3 + $0x1ac] sm:$0xff] %v6882_v52  ;;  %5985 = vst [vmem:[%s10482_s3 + $0x1b4] sm:$0xff] %v6883_v15  ;;  %v4947_v54 = vpop.f32.mrb[100].mxu0  ;;  %v5000_v55 = vpop.f32.mrb[100].mxu1 }
 0x2e6   :  { %v4948_v57 = vadd.f32 %v4947_v54, %v8737_v10  ;;  %v4949_v58 = vpop.f32.mrb[101].mxu0  ;;  %v5001_v59 = vadd.f32 %v5000_v55, %v8737_v10  ;;  %v5002_v60 = vpop.f32.mrb[101].mxu1 }
 0x2e7   :  { %v4950_v63 = vadd.f32 %v4949_v58, %v8737_v10  ;;  %v4951_v3 = vpop.f32.mrb[102].mxu0  ;;  %v5003_v4 = vadd.f32 %v5002_v60, %v8737_v10  ;;  %v5004_v5 = vpop.f32.mrb[102].mxu1 }
 0x2e8   :  { %v4952_v9 = vadd.f32 %v4951_v3, %v8781_v39  ;;  %v4953_v11 = vpop.f32.mrb[103].mxu0  ;;  %v5005_v13 = vadd.f32 %v5004_v5, %v8781_v39  ;;  %v5006_v14 = vpop.f32.mrb[103].mxu1 }
 0x2e9   :  { %v6912_v16 = vpack.c.bf16 %v4950_v63, %v4948_v57  ;;  %v6913_v17 = vpack.c.bf16 %v5003_v4, %v5001_v59  ;;  %v4954_v18 = vadd.f32 %v4953_v11, %v8781_v39  ;;  %v5007_v21 = vadd.f32 %v5006_v14, %v8781_v39 }
 0x2eb   :  { %6014 = vst [vmem:[%s10482_s3 + $0x298] sm:$0xff] %v6912_v16  ;;  %6015 = vst [vmem:[%s10482_s3 + $0x2a0] sm:$0xff] %v6913_v17  ;;  %v6942_v22 = vpack.c.bf16 %v4954_v18, %v4952_v9  ;;  %v6943_v23 = vpack.c.bf16 %v5007_v21, %v5005_v13 }
 0x2ed   :  { %6044 = vst [vmem:[%s10482_s3 + $0x384] sm:$0xff] %v6942_v22  ;;  %6045 = vst [vmem:[%s10482_s3 + $0x38c] sm:$0xff] %v6943_v23 }
 0x305   :  { %v5043_v33 = vpop.f32.mrb[104].mxu0  ;;  %v5096_v53 = vpop.f32.mrb[104].mxu1 }
 0x306   :  { %v5044_v25 = vadd.f32 %v5043_v33, %v8713_v62  ;;  %v5097_v26 = vadd.f32 %v5096_v53, %v8713_v62  ;;  %v5045_v27 = vpop.f32.mrb[105].mxu0  ;;  %v5098_v28 = vpop.f32.mrb[105].mxu1 }
 0x307   :  { %v5046_v29 = vadd.f32 %v5045_v27, %v8713_v62  ;;  %v5099_v30 = vadd.f32 %v5098_v28, %v8713_v62  ;;  %v5047_v31 = vpop.f32.mrb[106].mxu0  ;;  %v5100_v1 = vpop.f32.mrb[106].mxu1 }
 0x308   :  { %v5048_v34 = vadd.f32 %v5047_v31, %v8729_v6  ;;  %v5101_v7 = vadd.f32 %v5100_v1, %v8729_v6  ;;  %v5049_v35 = vpop.f32.mrb[107].mxu0  ;;  %v5102_v36 = vpop.f32.mrb[107].mxu1 }
 0x309   :  { %v6854_v44 = vpack.c.bf16 %v5046_v29, %v5044_v25  ;;  %v6855_v37 = vpack.c.bf16 %v5099_v30, %v5097_v26  ;;  %v5050_v12 = vadd.f32 %v5049_v35, %v8729_v6  ;;  %v5103_v38 = vadd.f32 %v5102_v36, %v8729_v6 }
 0x30b   :  { %5955 = vst [vmem:[%s10482_s3 + $0xd0] sm:$0xff] %v6854_v44  ;;  %5956 = vst [vmem:[%s10482_s3 + $0xd8] sm:$0xff] %v6855_v37  ;;  %v6884_v40 = vpack.c.bf16 %v5050_v12, %v5048_v34  ;;  %v6885_v41 = vpack.c.bf16 %v5103_v38, %v5101_v7 }
 0x30d   :  { %5986 = vst [vmem:[%s10482_s3 + $0x1bc] sm:$0xff] %v6884_v40  ;;  %5987 = vst [vmem:[%s10482_s3 + $0x1c4] sm:$0xff] %v6885_v41  ;;  %v5053_v42 = vpop.f32.mrb[108].mxu0  ;;  %v5106_v43 = vpop.f32.mrb[108].mxu1 }
 0x30e   :  { %v5054_v2 = vadd.f32 %v5053_v42, %v8737_v10  ;;  %v5055_v19 = vpop.f32.mrb[109].mxu0  ;;  %v5107_v45 = vadd.f32 %v5106_v43, %v8737_v10  ;;  %v5108_v46 = vpop.f32.mrb[109].mxu1 }
 0x30f   :  { %v5056_v20 = vadd.f32 %v5055_v19, %v8737_v10  ;;  %v5057_v47 = vpop.f32.mrb[110].mxu0  ;;  %v5109_v56 = vadd.f32 %v5108_v46, %v8737_v10  ;;  %v5110_v61 = vpop.f32.mrb[110].mxu1 }
 0x310   :  { %v5058_v24 = vadd.f32 %v5057_v47, %v8781_v39  ;;  %v5059_v48 = vpop.f32.mrb[111].mxu0  ;;  %v5111_v49 = vadd.f32 %v5110_v61, %v8781_v39  ;;  %v5112_v0 = vpop.f32.mrb[111].mxu1 }
 0x311   :  { %v6914_v50 = vpack.c.bf16 %v5056_v20, %v5054_v2  ;;  %v6915_v8 = vpack.c.bf16 %v5109_v56, %v5107_v45  ;;  %v5060_v51 = vadd.f32 %v5059_v48, %v8781_v39  ;;  %v5113_v32 = vadd.f32 %v5112_v0, %v8781_v39 }
 0x313   :  { %6016 = vst [vmem:[%s10482_s3 + $0x2a8] sm:$0xff] %v6914_v50  ;;  %6017 = vst [vmem:[%s10482_s3 + $0x2b0] sm:$0xff] %v6915_v8  ;;  %v6944_v52 = vpack.c.bf16 %v5060_v51, %v5058_v24  ;;  %v6945_v15 = vpack.c.bf16 %v5113_v32, %v5111_v49 }
 0x315   :  { %6046 = vst [vmem:[%s10482_s3 + $0x394] sm:$0xff] %v6944_v52  ;;  %6047 = vst [vmem:[%s10482_s3 + $0x39c] sm:$0xff] %v6945_v15 }
 0x32d   :  { %v5149_v54 = vpop.f32.mrb[112].mxu0  ;;  %v5202_v55 = vpop.f32.mrb[112].mxu1 }
 0x32e   :  { %v5150_v57 = vadd.f32 %v5149_v54, %v8713_v62  ;;  %v5203_v58 = vadd.f32 %v5202_v55, %v8713_v62  ;;  %v5151_v59 = vpop.f32.mrb[113].mxu0  ;;  %v5204_v60 = vpop.f32.mrb[113].mxu1 }
 0x32f   :  { %v5152_v63 = vadd.f32 %v5151_v59, %v8713_v62  ;;  %v5153_v3 = vpop.f32.mrb[114].mxu0  ;;  %v5205_v4 = vpop.f32.mrb[114].mxu1 }
 0x330   :  { %v6857_v5 = vpack.c.bf16 %v5203_v58, %v5203_v58  ;;  %v5154_v9 = vadd.f32 %v5153_v3, %v8729_v6  ;;  %v5206_v11 = vadd.f32 %v5205_v4, %v8729_v6  ;;  %v5155_v13 = vpop.f32.mrb[115].mxu0  ;;  %v5207_v14 = vpop.f32.mrb[115].mxu1 }
 0x331   :  { %v6856_v16 = vpack.c.bf16 %v5152_v63, %v5150_v57  ;;  %v5156_v17 = vadd.f32 %v5155_v13, %v8729_v6 }
 0x332   :  { %5959 = vst.msk [vmem:[%s10482_s3 + $0xe8] sm:$0xf] %vm5958_vm3, %v6857_v5  ;;  %v6887_v18 = vpack.c.bf16 %v5206_v11, %v5206_v11 }
 0x333   :  { %5957 = vst [vmem:[%s10482_s3 + $0xe0] sm:$0xff] %v6856_v16  ;;  %v6886_v62 = vpack.c.bf16 %v5156_v17, %v5154_v9 }
 0x334   :  { %5989 = vst.msk [vmem:[%s10482_s3 + $0x1d4] sm:$0xf] %vm5958_vm3, %v6887_v18 }
 0x335   :  { %5988 = vst [vmem:[%s10482_s3 + $0x1cc] sm:$0xff] %v6886_v62  ;;  %v5159_v6 = vpop.f32.mrb[116].mxu0  ;;  %v5210_v21 = vpop.f32.mrb[116].mxu1 }
 0x336   :  { %v5160_v22 = vadd.f32 %v5159_v6, %v8737_v10  ;;  %v5211_v23 = vadd.f32 %v5210_v21, %v8737_v10  ;;  %v5161_v33 = vpop.f32.mrb[117].mxu0  ;;  %v5212_v53 = vpop.f32.mrb[117].mxu1 }
 0x337   :  { %v5162_v25 = vadd.f32 %v5161_v33, %v8737_v10  ;;  %v5163_v26 = vpop.f32.mrb[118].mxu0  ;;  %v5213_v27 = vpop.f32.mrb[118].mxu1 }
 0x338   :  { %v6917_v28 = vpack.c.bf16 %v5211_v23, %v5211_v23  ;;  %v5164_v29 = vadd.f32 %v5163_v26, %v8781_v39  ;;  %v5214_v30 = vadd.f32 %v5213_v27, %v8781_v39  ;;  %v5165_v31 = vpop.f32.mrb[119].mxu0  ;;  %v5215_v1 = vpop.f32.mrb[119].mxu1 }
 0x339   :  { %v6916_v34 = vpack.c.bf16 %v5162_v25, %v5160_v22  ;;  %v5166_v7 = vadd.f32 %v5165_v31, %v8781_v39 }
 0x33a   :  { %6019 = vst.msk [vmem:[%s10482_s3 + $0x2c0] sm:$0xf] %vm5958_vm3, %v6917_v28  ;;  %v6947_v35 = vpack.c.bf16 %v5214_v30, %v5214_v30 }
 0x33b   :  { %6018 = vst [vmem:[%s10482_s3 + $0x2b8] sm:$0xff] %v6916_v34  ;;  %v6946_v10 = vpack.c.bf16 %v5166_v7, %v5164_v29 }
 0x33c   :  { %6049 = vst.msk [vmem:[%s10482_s3 + $0x3ac] sm:$0xf] %vm5958_vm3, %v6947_v35 }
 0x33d   :  { %6048 = vst [vmem:[%s10482_s3 + $0x3a4] sm:$0xff] %v6946_v10 }

// kernel: discriminator_forward.3
= control target key start
LH: loop header
LB: loop body
LE: loop exit
PB: predicated region body
PF: predicated region fallthrough
CT: control target
= control target key end

     0   :  { %vm5286_vm0 = vmmov 0   ;;  %vm1346_vm1 = vcmask 261120   ;;  %vm2037_vm2 = vcmask 257024   ;;  %vm2050_vm3 = vcmask 253952   ;;  %s5288_s25 = smov 32   ;;  %s5289_s28 = smov 64   ;;  %s6521_s1 = inlined_call_operand.vmem [shape: bf16[1568,32], index: 1, kind: input, shape index: {}]   ;;  %s6522_s0 = inlined_call_operand.vmem [shape: bf16[98,1568], index: 0, kind: input, shape index: {}]   ;;  %s6523_s2 = inlined_call_operand.vmem [shape: f32[1,32], index: 2, kind: input, shape index: {}]   ;;  %s6524_s3 = inlined_call_operand.vmem [shape: bf16[1568,32], index: 3, kind: input, shape index: {}]   ;;  %s6525_s6 = inlined_call_operand.<no memory space> [shape: f32[1,1], index: 6, kind: input, shape index: {}]   ;;  %s6526_s4 = inlined_call_operand.vmem [shape: f32[1,32], index: 4, kind: input, shape index: {}]   ;;  %s6527_s5 = inlined_call_operand.vmem [shape: f32[1,32], index: 5, kind: input, shape index: {}]   ;;  %s6528_s7 = inlined_call_operand.vmem [shape: f32[2,1], index: 7, kind: output, shape index: {}]  }
   0x1   :  { %v4957_v0 = vld [vmem:[%s6521_s1 + $0x40] sm:$0xff]   ;;  %v4961_v4 = vld [vmem:[%s6521_s1 + $0x48] sm:$0xff]   ;;  %v4965_v8 = vld [vmem:[%s6521_s1 + $0x50] sm:$0xff]   ;;  %s5290_s29 = smov 96   ;;  %vm2074_vm4 = vcmask 516352   ;;  %vm2096_vm5 = vcmask 778752  }
   0x2   :  { %v4958_v1 = vld [vmem:[%s6521_s1] sm:$0xff]   ;;  %4419 = vmatprep.subr.bf16.mxu0 %v4957_v0  ;;  %v4962_v5 = vld [vmem:[%s6521_s1 + $0x8] sm:$0xff]   ;;  %v4966_v9 = vld [vmem:[%s6521_s1 + $0x10] sm:$0xff]   ;;  %vm2119_vm6 = vcmask 1041152   ;;  %vm4035_vm7 = vcmask 254976   ;;  %vm4052_vm8 = vcmask 1024  }
   0x3   :  { %v4959_v2 = vld [vmem:[%s6521_s1 + $0xc0] sm:$0xff]   ;;  %4420 = vmatpush3.bf16.msra.mxu0 %v4958_v1  ;;  %v4963_v6 = vld [vmem:[%s6521_s1 + $0xc8] sm:$0xff]   ;;  %v4967_v10 = vld [vmem:[%s6521_s1 + $0xd0] sm:$0xff]  }
   0x4   :  { %v4960_v3 = vld [vmem:[%s6521_s1 + $0x80] sm:$0xff]   ;;  %4477 = vmatprep.subr.bf16.mxu1 %v4959_v2  ;;  %4421 = vmatprep.subr.bf16.mxu0 %v4961_v4  ;;  %v4964_v7 = vld [vmem:[%s6521_s1 + $0x88] sm:$0xff]   ;;  %v4968_v11 = vld [vmem:[%s6521_s1 + $0x90] sm:$0xff]  }
   0x5   :  { %4478 = vmatpush3.bf16.msra.mxu1 %v4960_v3  ;;  %v4969_v12 = vld [vmem:[%s6521_s1 + $0x58] sm:$0xff]   ;;  %v4973_v16 = vld [vmem:[%s6521_s1 + $0x60] sm:$0xff]   ;;  %v4977_v20 = vld [vmem:[%s6521_s1 + $0x68] sm:$0xff]  }
   0x6   :  { %4479 = vmatprep.subr.bf16.mxu1 %v4963_v6  ;;  %v4970_v13 = vld [vmem:[%s6521_s1 + $0x18] sm:$0xff]   ;;  %v4974_v17 = vld [vmem:[%s6521_s1 + $0x20] sm:$0xff]   ;;  %v4978_v21 = vld [vmem:[%s6521_s1 + $0x28] sm:$0xff]  }
   0x7   :  { %4422 = vmatpush3.bf16.msra.mxu0 %v4962_v5  ;;  %v4971_v14 = vld [vmem:[%s6521_s1 + $0xd8] sm:$0xff]   ;;  %v4975_v18 = vld [vmem:[%s6521_s1 + $0xe0] sm:$0xff]   ;;  %v4979_v22 = vld [vmem:[%s6521_s1 + $0xe8] sm:$0xff]  }
   0x8   :  { %4423 = vmatprep.subr.bf16.mxu0 %v4965_v8  ;;  %v4972_v15 = vld [vmem:[%s6521_s1 + $0x98] sm:$0xff]   ;;  %v4976_v19 = vld [vmem:[%s6521_s1 + $0xa0] sm:$0xff]   ;;  %v4980_v23 = vld [vmem:[%s6521_s1 + $0xa8] sm:$0xff]  }
   0x9   :  { %4480 = vmatpush3.bf16.msra.mxu1 %v4964_v7  ;;  %v4981_v24 = vld [vmem:[%s6521_s1 + $0x70] sm:$0xff]   ;;  %v4985_v28 = vld [vmem:[%s6521_s1 + $0x78] sm:$0xff]   ;;  %v4992_v34 = vld [vmem:[%s6521_s1 + $0x140] sm:$0xff]  }
   0xa   :  { %4481 = vmatprep.subr.bf16.mxu1 %v4967_v10  ;;  %v4982_v25 = vld [vmem:[%s6521_s1 + $0x30] sm:$0xff]   ;;  %v4986_v29 = vld [vmem:[%s6521_s1 + $0x38] sm:$0xff]   ;;  %v4995_v36 = vld [vmem:[%s6522_s0 + $0xc] ss:$52 sps:$4 sm:$0xff]  }
   0xb   :  { %4424 = vmatpush3.bf16.msra.mxu0 %v4966_v9  ;;  %v4983_v26 = vld [vmem:[%s6521_s1 + $0xf0] sm:$0xff]   ;;  %v4987_v30 = vld [vmem:[%s6521_s1 + $0xf8] sm:$0xff]   ;;  %v4996_v37 = vld [vmem:[%s6521_s1 + $0x100] sm:$0xff]   ;;  %1488 = vmatprep.mubr.bf16.mxu1 %v4995_v36 }
   0xc   :  { %4425 = vmatprep.subr.bf16.mxu0 %v4969_v12  ;;  %v4984_v27 = vld [vmem:[%s6521_s1 + $0xb0] sm:$0xff]   ;;  %v4990_v32 = vld [vmem:[%s6522_s0 + $0x4] ss:$52 sps:$4 sm:$0xff]   ;;  %v4993_v35 = vld [vmem:[%s6522_s0 + $0x8] ss:$52 sps:$4 sm:$0xff]  }
   0xd   :  { %4482 = vmatpush3.bf16.msra.mxu1 %v4968_v11  ;;  %v4988_v31 = vld [vmem:[%s6522_s0] ss:$52 sps:$4 sm:$0xff]   ;;  %v4991_v33 = vld [vmem:[%s6521_s1 + $0xb8] sm:$0xff]   ;;  %1400 = vmatprep.mubr.bf16.mxu0 %v4990_v32  ;;  %v4999_v39 = vld [vmem:[%s6521_s1 + $0x148] sm:$0xff]  }
   0xe   :  { %4483 = vmatprep.subr.bf16.mxu1 %v4971_v14  ;;  %v4997_v38 = vld [vmem:[%s6522_s0 + $0x6c] ss:$52 sps:$4 sm:$0xff]   ;;  %v5000_v40 = vld [vmem:[%s6522_s0 + $0x68] ss:$52 sps:$4 sm:$0xff]   ;;  %v5004_v43 = vld [vmem:[%s6522_s0 + $0x70] ss:$52 sps:$4 sm:$0xff]  }
   0xf   :  { %4426 = vmatpush3.bf16.msra.mxu0 %v4970_v13  ;;  %v5001_v41 = vld [vmem:[%s6521_s1 + $0x108] sm:$0xff]   ;;  %v5005_v44 = vld [vmem:[%s6521_s1 + $0x150] sm:$0xff]   ;;  %v5013_v49 = vld [vmem:[%s6521_s1 + $0x158] sm:$0xff]  }
  0x10   :  { %4427 = vmatprep.subr.bf16.mxu0 %v4973_v16  ;;  %v5002_v42 = vld [vmem:[%s6522_s0 + $0x74] ss:$52 sps:$4 sm:$0xff]   ;;  %v5009_v47 = vld [vmem:[%s6522_s0 + $0xd0] ss:$52 sps:$4 sm:$0xff]   ;;  %v5014_v50 = vld [vmem:[%s6521_s1 + $0x118] sm:$0xff]  }
  0x11   :  { %4484 = vmatpush3.bf16.msra.mxu1 %v4972_v15  ;;  %v5006_v45 = vld [vmem:[%s6522_s0 + $0xd4] ss:$52 sps:$4 sm:$0xff]   ;;  %v5010_v48 = vld [vmem:[%s6522_s0 + $0xdc] ss:$52 sps:$4 sm:$0xff]   ;;  %v5012_v52 = vld [vmem:[%s6522_s0 + $0xd8] ss:$52 sps:$4 sm:$0xff]  }
  0x12   :  { %4485 = vmatprep.subr.bf16.mxu1 %v4975_v18  ;;  %v5008_v46 = vld [vmem:[%s6521_s1 + $0x110] sm:$0xff]   ;;  %v5018_v53 = vld [vmem:[%s6522_s0 + $0x144] ss:$52 sps:$4 sm:$0xff]   ;;  %v5025_v59 = vld [vmem:[%s6521_s1 + $0x1c8] sm:$0xff]  }
  0x13   :  { %4428 = vmatpush3.bf16.msra.mxu0 %v4974_v17  ;;  %v5015_v51 = vld [vmem:[%s6522_s0 + $0x13c] ss:$52 sps:$4 sm:$0xff]   ;;  %v5021_v54 = vld [vmem:[%s6521_s1 + $0x1c0] sm:$0xff]   ;;  %v5017_v56 = vld [vmem:[%s6522_s0 + $0x138] ss:$52 sps:$4 sm:$0xff]  }
  0x14   :  { %4429 = vmatprep.subr.bf16.mxu0 %v4977_v20  ;;  %v5022_v55 = vld [vmem:[%s6521_s1 + $0x180] sm:$0xff]   ;;  %v5028_v61 = vld [vmem:[%s6521_s1 + $0x188] sm:$0xff]   ;;  %v5033_v0 = vld [vmem:[%s6521_s1 + $0x1d0] sm:$0xff]  }
  0x15   :  { %4486 = vmatpush3.bf16.msra.mxu1 %v4976_v19  ;;  %v5023_v57 = vld [vmem:[%s6521_s1 + $0x160] sm:$0xff]   ;;  %v5034_v2 = vld [vmem:[%s6521_s1 + $0x168] sm:$0xff]   ;;  %v5035_v3 = vld [vmem:[%s6521_s1 + $0x190] sm:$0xff]  }
  0x16   :  { %4487 = vmatprep.subr.bf16.mxu1 %v4979_v22  ;;  %v5024_v58 = vld [vmem:[%s6521_s1 + $0x120] sm:$0xff]   ;;  %v5036_v4 = vld [vmem:[%s6521_s1 + $0x128] sm:$0xff]   ;;  %v5037_v5 = vld [vmem:[%s6521_s1 + $0x1d8] sm:$0xff]  }
  0x17   :  { %4430 = vmatpush3.bf16.msra.mxu0 %v4978_v21  ;;  %v5026_v60 = vld [vmem:[%s6522_s0 + $0x1a4] ss:$52 sps:$4 sm:$0xff]   ;;  %v5020_v62 = vld [vmem:[%s6522_s0 + $0x140] ss:$52 sps:$4 sm:$0xff]   ;;  %v5032_v7 = vld [vmem:[%s6522_s0 + $0x1a8] ss:$52 sps:$4 sm:$0xff]  }
  0x18   :  { %4431 = vmatprep.subr.bf16.mxu0 %v4981_v24  ;;  %v5030_v63 = vld [vmem:[%s6522_s0 + $0x1ac] ss:$52 sps:$4 sm:$0xff]   ;;  %v5040_v8 = vld [vmem:[%s6521_s1 + $0x198] sm:$0xff]   ;;  %v5042_v9 = vld [vmem:[%s6522_s0 + $0x214] ss:$52 sps:$4 sm:$0xff]  }
  0x19   :  { %4488 = vmatpush3.bf16.msra.mxu1 %v4980_v23  ;;  %v5029_v1 = vld [vmem:[%s6522_s0 + $0x1a0] ss:$52 sps:$4 sm:$0xff]   ;;  %v5041_v11 = vld [vmem:[%s6522_s0 + $0x208] ss:$52 sps:$4 sm:$0xff]   ;;  %v5044_v15 = vld [vmem:[%s6522_s0 + $0x210] ss:$52 sps:$4 sm:$0xff]  }
  0x1a   :  { %4489 = vmatprep.subr.bf16.mxu1 %v4983_v26  ;;  %v5038_v6 = vld [vmem:[%s6522_s0 + $0x20c] ss:$52 sps:$4 sm:$0xff]   ;;  %v5045_v10 = vld [vmem:[%s6521_s1 + $0x170] sm:$0xff]   ;;  %v114_v20 = vld [vmem:[%s6522_s0 + $0x278] sm:$0x11] }
  0x1b   :  { %4432 = vmatpush3.bf16.msra.mxu0 %v4982_v25  ;;  %v5046_v12 = vld [vmem:[%s6521_s1 + $0x1e0] sm:$0xff]   ;;  %v5047_v13 = vld [vmem:[%s6521_s1 + $0x130] sm:$0xff]   ;;  %v5049_v16 = vld [vmem:[%s6521_s1 + $0x1e8] sm:$0xff]   ;;  %v4140_v21 = vcombine.high %v114_v20, %v114_v20 }
  0x1c   :  { %4433 = vmatprep.subr.bf16.mxu0 %v4985_v28  ;;  %v5048_v14 = vld [vmem:[%s6521_s1 + $0x1a0] sm:$0xff]   ;;  %v113_v17 = vld [vmem:[%s6522_s0 + $0x270] sm:$0x11]  ;;  %v5051_v19 = vld [vmem:[%s6521_s1 + $0x1a8] sm:$0xff]  }
  0x1d   :  { %4490 = vmatpush3.bf16.msra.mxu1 %v4984_v27  ;;  %v4138_v18 = vcombine.high %v113_v17, %v113_v17  ;;  %v5054_v22 = vld [vmem:[%s6521_s1 + $0x178] sm:$0xff]   ;;  %v5057_v24 = vld [vmem:[%s6521_s1 + $0x1f0] sm:$0xff]   ;;  %v4137_v26 = vcombine.low %v113_v17, %v113_v17  ;;  %v5071_v36 = vld [vmem:[%s6521_s1 + $0x248] sm:$0xff]  }
  0x1e   :  { %4491 = vmatprep.subr.bf16.mxu1 %v4987_v30  ;;  %v5056_v23 = vld [vmem:[%s6521_s1 + $0x138] sm:$0xff]   ;;  %v5058_v25 = vld [vmem:[%s6521_s1 + $0x1b0] sm:$0xff]   ;;  %v4139_v30 = vcombine.low %v114_v20, %v114_v20 }
  0x1f   :  { %4434 = vmatpush3.bf16.msra.mxu0 %v4986_v29  ;;  %v5059_v27 = vld [vmem:[%s6521_s1 + $0x1f8] sm:$0xff]   ;;  %v5062_v28 = vld [vmem:[%s6522_s0 + $0x14] ss:$52 sps:$4 sm:$0xff]  }
  0x20   :  { %4535 = vmatprep.subr.bf16.mxu0 %v4992_v34  ;;  %v5063_v29 = vld [vmem:[%s6521_s1 + $0x1b8] sm:$0xff]   ;;  %v5068_v34 = vld [vmem:[%s6521_s1 + $0x200] sm:$0xff]   ;;  %v5130_v20 = vld [vmem:[%s6521_s1 + $0x2b0] sm:$0xff]  }
  0x21   :  { %4492 = vmatpush3.bf16.msra.mxu1 %v4991_v33  ;;  %v5067_v32 = vld [vmem:[%s6522_s0 + $0x1c] ss:$52 sps:$4 sm:$0xff]  }
  0x22   :  { %1401 = vmatmul.mubr.bf16.vlgmr.msra.gmra.mrb[0].mxu0 %v4988_v31  ;;  %4593 = vmatprep.subr.bf16.mxu1 %v5021_v54  ;;  %v5064_v31 = vld [vmem:[%s6521_s1 + $0x240] sm:$0xff]   ;;  %v5097_v54 = vld [vmem:[%s6521_s1 + $0x2c8] sm:$0xff]   ;;  %v5128_v17 = vld [vmem:[%s6521_s1 + $0x238] sm:$0xff]  }
  0x23   :  { %4536 = vmatpush3.bf16.msra.mxu0 %v4996_v37  ;;  %1408 = vmatprep.mubr.bf16.mxu0 %v4997_v38  ;;  %v5060_v33 = vld [vmem:[%s6522_s0 + $0x10] ss:$52 sps:$4 sm:$0xff]   ;;  %v5065_v37 = vld [vmem:[%s6522_s0 + $0x18] ss:$52 sps:$4 sm:$0xff]  }
  0x24   :  { %1489 = vmatmul.mubr.bf16.vlgmr.msra.gmra.mrb[0].mxu1 %v4993_v35  ;;  %4537 = vmatprep.subr.bf16.mxu0 %v4999_v39  ;;  %v5069_v35 = vld [vmem:[%s6522_s0 + $0x7c] ss:$52 sps:$4 sm:$0xff]   ;;  %v5074_v38 = vld [vmem:[%s6522_s0 + $0x84] ss:$52 sps:$4 sm:$0xff]   ;;  %v5073_v39 = vld [vmem:[%s6521_s1 + $0x208] sm:$0xff]  }
  0x25   :  { %1496 = vmatprep.mubr.bf16.mxu1 %v5002_v42  ;;  %4594 = vmatpush3.bf16.msra.mxu1 %v5022_v55  ;;  %v5078_v42 = vld [vmem:[%s6522_s0 + $0xe4] ss:$52 sps:$4 sm:$0xff]   ;;  %v5084_v55 = vld [vmem:[%s6522_s0 + $0xe8] ss:$52 sps:$4 sm:$0xff]  }
  0x26   :  { %4595 = vmatprep.subr.bf16.mxu1 %v5025_v59  ;;  %v5089_v59 = vld [vmem:[%s6522_s0 + $0x148] ss:$52 sps:$4 sm:$0xff]  }
  0x27   :  { %4538 = vmatpush3.bf16.msra.mxu0 %v5001_v41  ;;  %v5072_v41 = vld [vmem:[%s6522_s0 + $0x78] ss:$52 sps:$4 sm:$0xff]  }
  0x28   :  { %4539 = vmatprep.subr.bf16.mxu0 %v5005_v44  ;;  %v5076_v44 = vld [vmem:[%s6522_s0 + $0x80] ss:$52 sps:$4 sm:$0xff]  }
  0x29   :  { %4596 = vmatpush3.bf16.msra.mxu1 %v5028_v61  ;;  %v5098_v61 = vld [vmem:[%s6522_s0 + $0x1b4] ss:$52 sps:$4 sm:$0xff]  }
  0x2a   :  { %1409 = vmatmul.mubr.bf16.gmra.mrb[4].mxu0 %v5000_v40  ;;  %4597 = vmatprep.subr.bf16.mxu1 %v5033_v0  ;;  %v5077_v40 = vld [vmem:[%s6521_s1 + $0x250] sm:$0xff]   ;;  %v5109_v0 = vld [vmem:[%s6521_s1 + $0x2d8] sm:$0xff]  }
  0x2b   :  { %1416 = vmatprep.mubr.bf16.mxu0 %v5006_v45  ;;  %4540 = vmatpush3.bf16.msra.mxu0 %v5008_v46  ;;  %v5085_v45 = vld [vmem:[%s6521_s1 + $0x258] sm:$0xff]   ;;  %v5082_v46 = vld [vmem:[%s6522_s0 + $0xec] ss:$52 sps:$4 sm:$0xff]  }
  0x2c   :  { %1497 = vmatmul.mubr.bf16.gmra.mrb[4].mxu1 %v5004_v43  ;;  %4541 = vmatprep.subr.bf16.mxu0 %v5013_v49  ;;  %v5080_v43 = vld [vmem:[%s6521_s1 + $0x210] sm:$0xff]  }
  0x2d   :  { %1504 = vmatprep.mubr.bf16.mxu1 %v5010_v48  ;;  %4598 = vmatpush3.bf16.msra.mxu1 %v5035_v3  ;;  %v5093_v48 = vld [vmem:[%s6521_s1 + $0x2c0] sm:$0xff]   ;;  %v5102_v3 = vld [vmem:[%s6522_s0 + $0x1bc] ss:$52 sps:$4 sm:$0xff]  }
  0x2e   :  { %4599 = vmatprep.subr.bf16.mxu1 %v5037_v5  ;;  %v5081_v49 = vld [vmem:[%s6522_s0 + $0xe0] ss:$52 sps:$4 sm:$0xff]  }
  0x2f   :  { %4542 = vmatpush3.bf16.msra.mxu0 %v5014_v50  ;;  %v5094_v50 = vld [vmem:[%s6521_s1 + $0x280] sm:$0xff]   ;;  %v5117_v5 = vld [vmem:[%s6521_s1 + $0x270] sm:$0xff]  }
  0x30   :  { %4543 = vmatprep.subr.bf16.mxu0 %v5023_v57  ;;  %v5090_v57 = vld [vmem:[%s6522_s0 + $0x154] ss:$52 sps:$4 sm:$0xff]  }
  0x31   :  { %4600 = vmatpush3.bf16.msra.mxu1 %v5040_v8  ;;  %v5119_v8 = vld [vmem:[%s6521_s1 + $0x230] sm:$0xff]  }
  0x32   :  { %1417 = vmatmul.mubr.bf16.gmra.mrb[8].mxu0 %v5009_v47  ;;  %4601 = vmatprep.subr.bf16.mxu1 %v5046_v12  ;;  %v5086_v47 = vld [vmem:[%s6521_s1 + $0x218] sm:$0xff]  }
  0x33   :  { %1424 = vmatprep.mubr.bf16.mxu0 %v5015_v51  ;;  %4544 = vmatpush3.bf16.msra.mxu0 %v5024_v58  ;;  %v5087_v51 = vld [vmem:[%s6522_s0 + $0x14c] ss:$52 sps:$4 sm:$0xff]   ;;  %v5105_v58 = vld [vmem:[%s6521_s1 + $0x2d0] sm:$0xff]   ;;  %v5114_v12 = vld [vmem:[%s6522_s0 + $0x224] ss:$52 sps:$4 sm:$0xff]  }
  0x34   :  { %1505 = vmatmul.mubr.bf16.gmra.mrb[8].mxu1 %v5012_v52  ;;  %4545 = vmatprep.subr.bf16.mxu0 %v5034_v2  ;;  %v5095_v52 = vld [vmem:[%s6521_s1 + $0x260] sm:$0xff]   ;;  %v5112_v2 = vld [vmem:[%s6521_s1 + $0x298] sm:$0xff]  }
  0x35   :  { %1512 = vmatprep.mubr.bf16.mxu1 %v5018_v53  ;;  %4602 = vmatpush3.bf16.msra.mxu1 %v5048_v14  ;;  %v5096_v53 = vld [vmem:[%s6521_s1 + $0x220] sm:$0xff]   ;;  %v5123_v14 = vld [vmem:[%s6521_s1 + $0x2a8] sm:$0xff]  }
  0x36   :  { %4603 = vmatprep.subr.bf16.mxu1 %v5049_v16  ;;  %v5113_v16 = vld [vmem:[%s6522_s0 + $0x218] ss:$52 sps:$4 sm:$0xff]  }
  0x37   :  { %4546 = vmatpush3.bf16.msra.mxu0 %v5036_v4  ;;  %v5101_v4 = vld [vmem:[%s6522_s0 + $0x1b0] ss:$52 sps:$4 sm:$0xff]  }
  0x38   :  { %4547 = vmatprep.subr.bf16.mxu0 %v5045_v10  ;;  %v5104_v10 = vld [vmem:[%s6522_s0 + $0x1b8] ss:$52 sps:$4 sm:$0xff]  }
  0x39   :  { %4604 = vmatpush3.bf16.msra.mxu1 %v5051_v19  ;;  %v5129_v19 = vld [vmem:[%s6521_s1 + $0x2f0] sm:$0xff]  }
  0x3a   :  { %1425 = vmatmul.mubr.bf16.gmra.mrb[12].mxu0 %v5017_v56  ;;  %4605 = vmatprep.subr.bf16.mxu1 %v5057_v24  ;;  %v5100_v56 = vld [vmem:[%s6521_s1 + $0x288] sm:$0xff]   ;;  %v5116_v24 = vld [vmem:[%s6522_s0 + $0x220] ss:$52 sps:$4 sm:$0xff]  }
  0x3b   :  { %1432 = vmatprep.mubr.bf16.mxu0 %v5026_v60  ;;  %4548 = vmatpush3.bf16.msra.mxu0 %v5047_v13  ;;  %v5106_v60 = vld [vmem:[%s6521_s1 + $0x268] sm:$0xff]   ;;  %v115_v13 = vld [vmem:[%s6522_s0 + $0x280] sm:$0x11] }
  0x3c   :  { %1513 = vmatmul.mubr.bf16.gmra.mrb[12].mxu1 %v5020_v62  ;;  %4549 = vmatprep.subr.bf16.mxu0 %v5054_v22  ;;  %v5107_v62 = vld [vmem:[%s6521_s1 + $0x290] sm:$0xff]   ;;  %v5131_v22 = vld [vmem:[%s6521_s1 + $0x2f8] sm:$0xff]  }
  0x3d   :  { %1520 = vmatprep.mubr.bf16.mxu1 %v5030_v63  ;;  %4606 = vmatpush3.bf16.msra.mxu1 %v5058_v25  ;;  %v5108_v63 = vld [vmem:[%s6521_s1 + $0x228] sm:$0xff]  }
  0x3e   :  { %4607 = vmatprep.subr.bf16.mxu1 %v5059_v27  ;;  %v4141_v27 = vcombine.low %v115_v13, %v115_v13 }
  0x3f   :  { %4550 = vmatpush3.bf16.msra.mxu0 %v5056_v23  ;;  %v5285_v23 = vmov 0.0  }
  0x40   :  { %4651 = vmatprep.subr.bf16.mxu0 %v5064_v31  ;;  %v5132_v31 = vld [vmem:[%s6522_s0 + $0x20] ss:$52 sps:$4 sm:$0xff]  }
  0x41   :  { %4608 = vmatpush3.bf16.msra.mxu1 %v5063_v29 }
  0x42   :  { %1433 = vmatmul.mubr.bf16.gmra.mrb[16].mxu0 %v5029_v1  ;;  %4709 = vmatprep.subr.bf16.mxu1 %v5093_v48  ;;  %v5092_v1 = vld [vmem:[%s6522_s0 + $0x150] ss:$52 sps:$4 sm:$0xff]   ;;  %v5162_v48 = vld [vmem:[%s6522_s0 + $0x1cc] ss:$52 sps:$4 sm:$0xff]  }
  0x43   :  { %1440 = vmatprep.mubr.bf16.mxu0 %v5038_v6  ;;  %v5110_v6 = vld [vmem:[%s6522_s0 + $0x21c] ss:$52 sps:$4 sm:$0xff]  }
  0x44   :  { %1521 = vmatmul.mubr.bf16.gmra.mrb[16].mxu1 %v5032_v7  ;;  %v5118_v7 = vld [vmem:[%s6521_s1 + $0x2e0] sm:$0xff]  }
  0x45   :  { %1528 = vmatprep.mubr.bf16.mxu1 %v5042_v9  ;;  %v5120_v9 = vld [vmem:[%s6521_s1 + $0x2a0] sm:$0xff]  }
  0x4a   :  { %1441 = vmatmul.mubr.bf16.gmra.mrb[20].mxu0 %v5041_v11  ;;  %v5121_v11 = vld [vmem:[%s6521_s1 + $0x2e8] sm:$0xff]  }
  0x4b   :  { %1448 = vmatprep.mubr.bf16.mxu0 %v4138_v18  ;;  %v116_v18 = vld [vmem:[%s6522_s0 + $0x288] sm:$0x11] }
  0x4c   :  { %1529 = vmatmul.mubr.bf16.gmra.mrb[20].mxu1 %v5044_v15  ;;  %v5126_v15 = vld [vmem:[%s6521_s1 + $0x278] sm:$0xff]   ;;  %v4144_v25 = vcombine.high %v116_v18, %v116_v18  ;;  %v4143_v29 = vcombine.low %v116_v18, %v116_v18 }
  0x4d   :  { %1536 = vmatprep.mubr.bf16.mxu1 %v4140_v21  ;;  %v4142_v21 = vcombine.high %v115_v13, %v115_v13 }
  0x52   :  { %1449 = vmatmul.mubr.bf16.gmra.mrb[24].mxu0 %v4137_v26  ;;  %v5135_v26 = vld [vmem:[%s6521_s1 + $0x2b8] sm:$0xff]  }
  0x53   :  { %1576 = vmatprep.mubr.bf16.mxu0 %v5062_v28  ;;  %v5134_v28 = vld [vmem:[%s6522_s0 + $0x24] ss:$52 sps:$4 sm:$0xff]  }
  0x54   :  { %1537 = vmatmul.mubr.bf16.gmra.mrb[24].mxu1 %v4139_v30  ;;  %v5138_v30 = vld [vmem:[%s6522_s0 + $0x2c] ss:$52 sps:$4 sm:$0xff]  }
  0x55   :  { %1664 = vmatprep.mubr.bf16.mxu1 %v5067_v32  ;;  %v5139_v32 = vld [vmem:[%s6521_s1 + $0x300] sm:$0xff]  }
  0x5a   :  { %1577 = vmatmul.mubr.bf16.vlgmr.msra.gmra.mrb[28].mxu0 %v5060_v33  ;;  %v5140_v33 = vld [vmem:[%s6522_s0 + $0x8c] ss:$52 sps:$4 sm:$0xff]  }
  0x5b   :  { %4652 = vmatpush3.bf16.msra.mxu0 %v5068_v34  ;;  %1584 = vmatprep.mubr.bf16.mxu0 %v5069_v35  ;;  %v5136_v34 = vld [vmem:[%s6522_s0 + $0x28] ss:$52 sps:$4 sm:$0xff]  }
  0x5c   :  { %4653 = vmatprep.subr.bf16.mxu0 %v5071_v36  ;;  %1665 = vmatmul.mubr.bf16.vlgmr.msra.gmra.mrb[28].mxu1 %v5065_v37  ;;  %v5143_v35 = vld [vmem:[%s6522_s0 + $0x94] ss:$52 sps:$4 sm:$0xff]  }
  0x5d   :  { %1672 = vmatprep.mubr.bf16.mxu1 %v5074_v38  ;;  %4710 = vmatpush3.bf16.msra.mxu1 %v5094_v50  ;;  %v5158_v36 = vld [vmem:[%s6521_s1 + $0x308] sm:$0xff]  }
  0x5e   :  { %4711 = vmatprep.subr.bf16.mxu1 %v5097_v54  ;;  %v5142_v37 = vld [vmem:[%s6522_s0 + $0x88] ss:$52 sps:$4 sm:$0xff]   ;;  %v5165_v50 = vld [vmem:[%s6522_s0 + $0x22c] ss:$52 sps:$4 sm:$0xff]  }
  0x5f   :  { %4654 = vmatpush3.bf16.msra.mxu0 %v5073_v39  ;;  %v5146_v38 = vld [vmem:[%s6522_s0 + $0xf4] ss:$52 sps:$4 sm:$0xff]   ;;  %v5145_v39 = vld [vmem:[%s6522_s0 + $0x90] ss:$52 sps:$4 sm:$0xff]  }
  0x60   :  { %4655 = vmatprep.subr.bf16.mxu0 %v5077_v40  ;;  %v5149_v40 = vld [vmem:[%s6522_s0 + $0xfc] ss:$52 sps:$4 sm:$0xff]  }
  0x61   :  { %4712 = vmatpush3.bf16.msra.mxu1 %v5100_v56  ;;  %v5167_v54 = vld [vmem:[%s6522_s0 + $0x228] ss:$52 sps:$4 sm:$0xff]  }
  0x62   :  { %1585 = vmatmul.mubr.bf16.gmra.mrb[32].mxu0 %v5072_v41  ;;  %4713 = vmatprep.subr.bf16.mxu1 %v5105_v58  ;;  %v5148_v41 = vld [vmem:[%s6522_s0 + $0xf0] ss:$52 sps:$4 sm:$0xff]   ;;  %v118_v56 = vld [vmem:[%s6522_s0 + $0x298] sm:$0x11] }
  0x63   :  { %1592 = vmatprep.mubr.bf16.mxu0 %v5078_v42  ;;  %4656 = vmatpush3.bf16.msra.mxu0 %v5080_v43  ;;  %v5152_v42 = vld [vmem:[%s6522_s0 + $0x15c] ss:$52 sps:$4 sm:$0xff]   ;;  %v5151_v43 = vld [vmem:[%s6522_s0 + $0xf8] ss:$52 sps:$4 sm:$0xff]   ;;  %v4148_v58 = vcombine.high %v118_v56, %v118_v56 }
  0x64   :  { %4657 = vmatprep.subr.bf16.mxu0 %v5085_v45  ;;  %1673 = vmatmul.mubr.bf16.gmra.mrb[32].mxu1 %v5076_v44  ;;  %v5155_v44 = vld [vmem:[%s6522_s0 + $0x164] ss:$52 sps:$4 sm:$0xff]  }
  0x65   :  { %1680 = vmatprep.mubr.bf16.mxu1 %v5082_v46  ;;  %4714 = vmatpush3.bf16.msra.mxu1 %v5107_v62  ;;  %v5154_v45 = vld [vmem:[%s6522_s0 + $0x158] ss:$52 sps:$4 sm:$0xff]  }
  0x66   :  { %4715 = vmatprep.subr.bf16.mxu1 %v5109_v0  ;;  %v5159_v46 = vld [vmem:[%s6522_s0 + $0x1c4] ss:$52 sps:$4 sm:$0xff]   ;;  %v5178_v0 = vld [vmem:[%s6522_s0 + $0x168] ss:$52 sps:$4 sm:$0xff]  }
  0x67   :  { %4658 = vmatpush3.bf16.msra.mxu0 %v5086_v47  ;;  %v5157_v47 = vld [vmem:[%s6522_s0 + $0x160] ss:$52 sps:$4 sm:$0xff]   ;;  %v5176_v62 = vld [vmem:[%s6522_s0 + $0x98] ss:$52 sps:$4 sm:$0xff]  }
  0x68   :  { %4659 = vmatprep.subr.bf16.mxu0 %v5095_v52  ;;  %v5168_v52 = vld [vmem:[%s6522_s0 + $0x234] ss:$52 sps:$4 sm:$0xff]  }
  0x69   :  { %4716 = vmatpush3.bf16.msra.mxu1 %v5112_v2  ;;  %v5180_v2 = vld [vmem:[%s6522_s0 + $0x238] ss:$52 sps:$4 sm:$0xff]  }
  0x6a   :  { %1593 = vmatmul.mubr.bf16.gmra.mrb[36].mxu0 %v5081_v49  ;;  %4717 = vmatprep.subr.bf16.mxu1 %v5118_v7  ;;  %v5161_v49 = vld [vmem:[%s6522_s0 + $0x1c0] ss:$52 sps:$4 sm:$0xff]  }
  0x6b   :  { %1600 = vmatprep.mubr.bf16.mxu0 %v5087_v51  ;;  %4660 = vmatpush3.bf16.msra.mxu0 %v5096_v53  ;;  %v5164_v51 = vld [vmem:[%s6522_s0 + $0x1c8] ss:$52 sps:$4 sm:$0xff]   ;;  %v117_v53 = vld [vmem:[%s6522_s0 + $0x290] sm:$0x11] }
  0x6c   :  { %1681 = vmatmul.mubr.bf16.gmra.mrb[36].mxu1 %v5084_v55  ;;  %4661 = vmatprep.subr.bf16.mxu0 %v5106_v60  ;;  %v4146_v55 = vcombine.high %v117_v53, %v117_v53  ;;  %v4147_v60 = vcombine.low %v118_v56, %v118_v56 }
  0x6d   :  { %1688 = vmatprep.mubr.bf16.mxu1 %v5090_v57  ;;  %4718 = vmatpush3.bf16.msra.mxu1 %v5120_v9  ;;  %v5170_v57 = vld [vmem:[%s6522_s0 + $0x230] ss:$52 sps:$4 sm:$0xff]  }
  0x6e   :  { %4719 = vmatprep.subr.bf16.mxu1 %v5121_v11 }
  0x6f   :  { %4662 = vmatpush3.bf16.msra.mxu0 %v5108_v63  ;;  %v5177_v63 = vld [vmem:[%s6522_s0 + $0x100] ss:$52 sps:$4 sm:$0xff]  }
  0x70   :  { %4663 = vmatprep.subr.bf16.mxu0 %v5117_v5 }
  0x71   :  { %4720 = vmatpush3.bf16.msra.mxu1 %v5123_v14 }
  0x72   :  { %1601 = vmatmul.mubr.bf16.gmra.mrb[40].mxu0 %v5089_v59  ;;  %4721 = vmatprep.subr.bf16.mxu1 %v5129_v19  ;;  %v4145_v59 = vcombine.low %v117_v53, %v117_v53 }
  0x73   :  { %1608 = vmatprep.mubr.bf16.mxu0 %v5098_v61  ;;  %4664 = vmatpush3.bf16.msra.mxu0 %v5119_v8  ;;  %v5175_v61 = vld [vmem:[%s6522_s0 + $0x30] ss:$52 sps:$4 sm:$0xff]  }
  0x74   :  { %1689 = vmatmul.mubr.bf16.gmra.mrb[40].mxu1 %v5092_v1  ;;  %4665 = vmatprep.subr.bf16.mxu0 %v5126_v15  ;;  %v5179_v1 = vld [vmem:[%s6522_s0 + $0x1d0] ss:$52 sps:$4 sm:$0xff]  }
  0x75   :  { %1696 = vmatprep.mubr.bf16.mxu1 %v5102_v3  ;;  %4722 = vmatpush3.bf16.msra.mxu1 %v5130_v20 }
  0x76   :  { %4723 = vmatprep.subr.bf16.mxu1 %v5131_v22 }
  0x77   :  { %4666 = vmatpush3.bf16.msra.mxu0 %v5128_v17 }
  0x78   :  { %4911 = vmatprep.subr.bf16.mxu0 %v5285_v23 }
  0x79   :  { %4724 = vmatpush3.bf16.msra.mxu1 %v5135_v26 }
  0x7a   :  { %1609 = vmatmul.mubr.bf16.gmra.mrb[44].mxu0 %v5101_v4  ;;  %v5902_v4 = vld [vmem:[%s6523_s2] ss:$0 sm:$0xff] }
  0x7b   :  { %1616 = vmatprep.mubr.bf16.mxu0 %v5110_v6  ;;  %v5181_v6 = vld [vmem:[%s6522_s0 + $0x2a0] ss:$0 sps:$4 sm:$0x11]  }
  0x7c   :  { %1697 = vmatmul.mubr.bf16.gmra.mrb[44].mxu1 %v5104_v10 }
  0x7d   :  { %1704 = vmatprep.mubr.bf16.mxu1 %v5114_v12 }
  0x82   :  { %1617 = vmatmul.mubr.bf16.gmra.mrb[48].mxu0 %v5113_v16 }
  0x83   :  { %1624 = vmatprep.mubr.bf16.mxu0 %v4142_v21 }
  0x84   :  { %1705 = vmatmul.mubr.bf16.gmra.mrb[48].mxu1 %v5116_v24 }
  0x85   :  { %1712 = vmatprep.mubr.bf16.mxu1 %v4144_v25 }
  0x8a   :  { %1625 = vmatmul.mubr.bf16.gmra.mrb[52].mxu0 %v4141_v27 }
  0x8b   :  { %1752 = vmatprep.mubr.bf16.mxu0 %v5134_v28 }
  0x8c   :  { %1713 = vmatmul.mubr.bf16.gmra.mrb[52].mxu1 %v4143_v29 }
  0x8d   :  { %1840 = vmatprep.mubr.bf16.mxu1 %v5138_v30 }
  0x92   :  { %1753 = vmatmul.mubr.bf16.vlgmr.msra.gmra.mrb[56].mxu0 %v5132_v31 }
  0x93   :  { %4912 = vmatpush3.bf16.msra.mxu0 %v5139_v32  ;;  %1760 = vmatprep.mubr.bf16.mxu0 %v5140_v33 }
  0x94   :  { %4913 = vmatprep.subr.bf16.mxu0 %v5285_v23  ;;  %1841 = vmatmul.mubr.bf16.vlgmr.msra.gmra.mrb[56].mxu1 %v5136_v34 }
  0x95   :  { %1848 = vmatprep.mubr.bf16.mxu1 %v5143_v35 }
  0x97   :  { %4914 = vmatpush3.bf16.msra.mxu0 %v5158_v36 }
  0x9a   :  { %1761 = vmatmul.mubr.bf16.gmra.mrb[60].mxu0 %v5142_v37 }
  0x9b   :  { %1768 = vmatprep.mubr.bf16.mxu0 %v5146_v38 }
  0x9c   :  { %1849 = vmatmul.mubr.bf16.gmra.mrb[60].mxu1 %v5145_v39 }
  0x9d   :  { %1856 = vmatprep.mubr.bf16.mxu1 %v5149_v40 }
  0xa2   :  { %1769 = vmatmul.mubr.bf16.gmra.mrb[64].mxu0 %v5148_v41 }
  0xa3   :  { %1776 = vmatprep.mubr.bf16.mxu0 %v5152_v42 }
  0xa4   :  { %1857 = vmatmul.mubr.bf16.gmra.mrb[64].mxu1 %v5151_v43 }
  0xa5   :  { %1864 = vmatprep.mubr.bf16.mxu1 %v5155_v44 }
  0xaa   :  { %1777 = vmatmul.mubr.bf16.gmra.mrb[68].mxu0 %v5154_v45 }
  0xab   :  { %1784 = vmatprep.mubr.bf16.mxu0 %v5159_v46 }
  0xac   :  { %1865 = vmatmul.mubr.bf16.gmra.mrb[68].mxu1 %v5157_v47 }
  0xad   :  { %1872 = vmatprep.mubr.bf16.mxu1 %v5162_v48 }
  0xb2   :  { %1785 = vmatmul.mubr.bf16.gmra.mrb[72].mxu0 %v5161_v49 }
  0xb3   :  { %1792 = vmatprep.mubr.bf16.mxu0 %v5165_v50 }
  0xb4   :  { %1873 = vmatmul.mubr.bf16.gmra.mrb[72].mxu1 %v5164_v51 }
  0xb5   :  { %1880 = vmatprep.mubr.bf16.mxu1 %v5168_v52 }
  0xba   :  { %1793 = vmatmul.mubr.bf16.gmra.mrb[76].mxu0 %v5167_v54 }
  0xbb   :  { %1800 = vmatprep.mubr.bf16.mxu0 %v4146_v55 }
  0xbc   :  { %1881 = vmatmul.mubr.bf16.gmra.mrb[76].mxu1 %v5170_v57 }
  0xbd   :  { %1888 = vmatprep.mubr.bf16.mxu1 %v4148_v58 }
  0xc2   :  { %1801 = vmatmul.mubr.bf16.gmra.mrb[80].mxu0 %v4145_v59 }
  0xc3   :  { %4915 = vmatprep.mubr.msk.bf16.mxu0 %vm5286_vm0, %v5285_v23 }
  0xc4   :  { %1889 = vmatmul.mubr.bf16.gmra.mrb[80].mxu1 %v4147_v60 }
  0xca   :  { %4916 = vmatmul.mubr.msk.bf16.vlgmr.msra.gmra.mrb[84].mxu0 %vm1346_vm1, %v5175_v61 }
  0xcb   :  { %4919 = vmatprep.mubr.msk.bf16.mxu0 %vm5286_vm0, %v5285_v23 }
  0xd2   :  { %4920 = vmatmul.mubr.msk.bf16.gmra.mrb[88].mxu0 %vm1346_vm1, %v5176_v62 }
  0xd3   :  { %4923 = vmatprep.mubr.msk.bf16.mxu0 %vm5286_vm0, %v5285_v23 }
  0xda   :  { %4924 = vmatmul.mubr.msk.bf16.gmra.mrb[92].mxu0 %vm1346_vm1, %v5177_v63 }
  0xdb   :  { %4927 = vmatprep.mubr.msk.bf16.mxu0 %vm5286_vm0, %v5285_v23 }
  0xe2   :  { %4928 = vmatmul.mubr.msk.bf16.gmra.mrb[96].mxu0 %vm1346_vm1, %v5178_v0 }
  0xe3   :  { %4931 = vmatprep.mubr.msk.bf16.mxu0 %vm5286_vm0, %v5285_v23 }
  0xea   :  { %4932 = vmatmul.mubr.msk.bf16.gmra.mrb[100].mxu0 %vm1346_vm1, %v5179_v1 }
  0xeb   :  { %4935 = vmatprep.mubr.msk.bf16.mxu0 %vm5286_vm0, %v5285_v23 }
  0xf2   :  { %4936 = vmatmul.mubr.msk.bf16.gmra.mrb[104].mxu0 %vm1346_vm1, %v5180_v2 }
  0xf3   :  { %4939 = vmatprep.mubr.msk.bf16.mxu0 %vm5286_vm0, %v5285_v23 }
  0xf5   :  { %v4435_v3 = vpop.f32.mrb[0].mxu0 }
  0xf6   :  { %v4436_v5 = vpop.f32.mrb[1].mxu0 }
  0xf7   :  { %v4437_v7 = vadd.f32 %v4436_v5, %v4435_v3  ;;  %v4438_v8 = vpop.f32.mrb[2].mxu0  ;;  %v4493_v9 = vpop.f32.mrb[0].mxu1 }
  0xf8   :  { %v4439_v10 = vpop.f32.mrb[3].mxu0  ;;  %v4494_v13 = vpop.f32.mrb[1].mxu1 }
  0xf9   :  { %v1403_v11 = vadd.f32 %v4437_v7, %v5902_v4  ;;  %v4440_v12 = vadd.f32 %v4439_v10, %v4438_v8  ;;  %v4495_v14 = vadd.f32 %v4494_v13, %v4493_v9  ;;  %v4496_v15 = vpop.f32.mrb[2].mxu1 }
  0xfa   :  { %4940 = vmatmul.mubr.msk.bf16.gmra.mrb[108].mxu0 %vm1346_vm1, %v5181_v6  ;;  %v4497_v17 = vpop.f32.mrb[3].mxu1 }
  0xfb   :  { %v1406_v16 = vadd.f32 %v4440_v12, %v5902_v4  ;;  %v5910_v18 = vadd.f32 %v4495_v14, %v1403_v11  ;;  %v4498_v19 = vadd.f32 %v4497_v17, %v4496_v15 }
  0xfd   :  { %v4441_v20 = vpop.f32.mrb[4].mxu0  ;;  %v5912_v21 = vadd.f32 %v4498_v19, %v1406_v16 }
  0xfe   :  { %v4442_v22 = vpop.f32.mrb[5].mxu0 }
  0xff   :  { %v4443_v24 = vadd.f32 %v4442_v22, %v4441_v20  ;;  %v4444_v25 = vpop.f32.mrb[6].mxu0  ;;  %v4499_v26 = vpop.f32.mrb[4].mxu1 }
 0x100   :  { %v4445_v27 = vpop.f32.mrb[7].mxu0  ;;  %v4500_v30 = vpop.f32.mrb[5].mxu1 }
 0x101   :  { %v1411_v28 = vadd.f32 %v4443_v24, %v5902_v4  ;;  %v4446_v29 = vadd.f32 %v4445_v27, %v4444_v25  ;;  %v4501_v31 = vadd.f32 %v4500_v30, %v4499_v26  ;;  %v4502_v32 = vpop.f32.mrb[6].mxu1 }
 0x102   :  { %v4503_v34 = vpop.f32.mrb[7].mxu1 }
 0x103   :  { %v1414_v33 = vadd.f32 %v4446_v29, %v5902_v4  ;;  %v5916_v35 = vadd.f32 %v4501_v31, %v1411_v28  ;;  %v4504_v36 = vadd.f32 %v4503_v34, %v4502_v32 }
 0x105   :  { %v4447_v37 = vpop.f32.mrb[8].mxu0  ;;  %v5918_v38 = vadd.f32 %v4504_v36, %v1414_v33 }
 0x106   :  { %v4448_v39 = vpop.f32.mrb[9].mxu0 }
 0x107   :  { %v4449_v40 = vadd.f32 %v4448_v39, %v4447_v37  ;;  %v4450_v41 = vpop.f32.mrb[10].mxu0  ;;  %v4505_v42 = vpop.f32.mrb[8].mxu1 }
 0x108   :  { %v4451_v43 = vpop.f32.mrb[11].mxu0  ;;  %v4506_v46 = vpop.f32.mrb[9].mxu1 }
 0x109   :  { %v1419_v44 = vadd.f32 %v4449_v40, %v5902_v4  ;;  %v4452_v45 = vadd.f32 %v4451_v43, %v4450_v41  ;;  %v4507_v47 = vadd.f32 %v4506_v46, %v4505_v42  ;;  %v4508_v48 = vpop.f32.mrb[10].mxu1 }
 0x10a   :  { %v4509_v50 = vpop.f32.mrb[11].mxu1 }
 0x10b   :  { %v1422_v49 = vadd.f32 %v4452_v45, %v5902_v4  ;;  %v5922_v51 = vadd.f32 %v4507_v47, %v1419_v44  ;;  %v4510_v52 = vadd.f32 %v4509_v50, %v4508_v48 }
 0x10d   :  { %v4453_v53 = vpop.f32.mrb[12].mxu0  ;;  %v5924_v54 = vadd.f32 %v4510_v52, %v1422_v49 }
 0x10e   :  { %v4454_v55 = vpop.f32.mrb[13].mxu0 }
 0x10f   :  { %v4455_v56 = vadd.f32 %v4454_v55, %v4453_v53  ;;  %v4456_v57 = vpop.f32.mrb[14].mxu0  ;;  %v4511_v58 = vpop.f32.mrb[12].mxu1 }
 0x110   :  { %v4457_v59 = vpop.f32.mrb[15].mxu0  ;;  %v4512_v62 = vpop.f32.mrb[13].mxu1 }
 0x111   :  { %v1427_v60 = vadd.f32 %v4455_v56, %v5902_v4  ;;  %v4458_v61 = vadd.f32 %v4457_v59, %v4456_v57  ;;  %v4513_v63 = vadd.f32 %v4512_v62, %v4511_v58  ;;  %v4514_v0 = vpop.f32.mrb[14].mxu1 }
 0x112   :  { %v4515_v2 = vpop.f32.mrb[15].mxu1 }
 0x113   :  { %v1430_v1 = vadd.f32 %v4458_v61, %v5902_v4  ;;  %v5928_v3 = vadd.f32 %v4513_v63, %v1427_v60  ;;  %v4516_v5 = vadd.f32 %v4515_v2, %v4514_v0 }
 0x115   :  { %v4459_v6 = vpop.f32.mrb[16].mxu0  ;;  %v5930_v7 = vadd.f32 %v4516_v5, %v1430_v1 }
 0x116   :  { %v4460_v8 = vpop.f32.mrb[17].mxu0 }
 0x117   :  { %v4461_v9 = vadd.f32 %v4460_v8, %v4459_v6  ;;  %v4462_v10 = vpop.f32.mrb[18].mxu0  ;;  %v4517_v11 = vpop.f32.mrb[16].mxu1 }
 0x118   :  { %v4463_v12 = vpop.f32.mrb[19].mxu0  ;;  %v4518_v15 = vpop.f32.mrb[17].mxu1 }
 0x119   :  { %v1435_v13 = vadd.f32 %v4461_v9, %v5902_v4  ;;  %v4464_v14 = vadd.f32 %v4463_v12, %v4462_v10  ;;  %v4519_v16 = vadd.f32 %v4518_v15, %v4517_v11  ;;  %v4520_v17 = vpop.f32.mrb[18].mxu1 }
 0x11a   :  { %v4521_v20 = vpop.f32.mrb[19].mxu1 }
 0x11b   :  { %v1438_v19 = vadd.f32 %v4464_v14, %v5902_v4  ;;  %v5934_v22 = vadd.f32 %v4519_v16, %v1435_v13  ;;  %v4522_v24 = vadd.f32 %v4521_v20, %v4520_v17 }
 0x11d   :  { %v4465_v25 = vpop.f32.mrb[20].mxu0  ;;  %v5936_v26 = vadd.f32 %v4522_v24, %v1438_v19 }
 0x11e   :  { %v4466_v27 = vpop.f32.mrb[21].mxu0 }
 0x11f   :  { %v4467_v28 = vadd.f32 %v4466_v27, %v4465_v25  ;;  %v4468_v29 = vpop.f32.mrb[22].mxu0  ;;  %v4523_v30 = vpop.f32.mrb[20].mxu1 }
 0x120   :  { %v4469_v31 = vpop.f32.mrb[23].mxu0  ;;  %v4524_v34 = vpop.f32.mrb[21].mxu1 }
 0x121   :  { %v1443_v32 = vadd.f32 %v4467_v28, %v5902_v4  ;;  %v4470_v33 = vadd.f32 %v4469_v31, %v4468_v29  ;;  %v4525_v36 = vadd.f32 %v4524_v34, %v4523_v30  ;;  %v4526_v37 = vpop.f32.mrb[22].mxu1 }
 0x122   :  { %v4527_v40 = vpop.f32.mrb[23].mxu1 }
 0x123   :  { %v1446_v39 = vadd.f32 %v4470_v33, %v5902_v4  ;;  %v5940_v41 = vadd.f32 %v4525_v36, %v1443_v32  ;;  %v4528_v42 = vadd.f32 %v4527_v40, %v4526_v37 }
 0x125   :  { %v4471_v43 = vpop.f32.mrb[24].mxu0  ;;  %v5942_v44 = vadd.f32 %v4528_v42, %v1446_v39 }
 0x126   :  { %v4472_v45 = vpop.f32.mrb[25].mxu0 }
 0x127   :  { %v4473_v46 = vadd.f32 %v4472_v45, %v4471_v43  ;;  %v4474_v47 = vpop.f32.mrb[26].mxu0  ;;  %v4529_v48 = vpop.f32.mrb[24].mxu1 }
 0x128   :  { %v4475_v49 = vpop.f32.mrb[27].mxu0  ;;  %v4530_v52 = vpop.f32.mrb[25].mxu1 }
 0x129   :  { %v1451_v50 = vadd.f32 %v4473_v46, %v5902_v4  ;;  %v4531_v53 = vadd.f32 %v4530_v52, %v4529_v48  ;;  %v4532_v55 = vpop.f32.mrb[26].mxu1 }
 0x12a   :  { %v4533_v56 = vpop.f32.mrb[27].mxu1 }
 0x12b   :  { %v5945_v57 = vadd.f32 %v4531_v53, %v1451_v50 }
 0x12d   :  { %v4551_v58 = vpop.f32.mrb[28].mxu0 }
 0x12e   :  { %v4552_v59 = vpop.f32.mrb[29].mxu0 }
 0x12f   :  { %v4553_v60 = vadd.f32 %v4552_v59, %v4551_v58  ;;  %v4554_v61 = vpop.f32.mrb[30].mxu0  ;;  %v4609_v62 = vpop.f32.mrb[28].mxu1 }
 0x130   :  { %v4555_v63 = vpop.f32.mrb[31].mxu0  ;;  %v4610_v2 = vpop.f32.mrb[29].mxu1 }
 0x131   :  { %v1579_v0 = vadd.f32 %v4553_v60, %v5910_v18  ;;  %v4556_v1 = vadd.f32 %v4555_v63, %v4554_v61  ;;  %v4611_v5 = vadd.f32 %v4610_v2, %v4609_v62  ;;  %v4612_v6 = vpop.f32.mrb[30].mxu1 }
 0x132   :  { %v4613_v8 = vpop.f32.mrb[31].mxu1 }
 0x133   :  { %v1582_v4 = vadd.f32 %v4556_v1, %v5912_v21  ;;  %v5949_v9 = vadd.f32 %v4611_v5, %v1579_v0  ;;  %v4614_v10 = vadd.f32 %v4613_v8, %v4612_v6 }
 0x135   :  { %v4557_v11 = vpop.f32.mrb[32].mxu0  ;;  %v5951_v12 = vadd.f32 %v4614_v10, %v1582_v4 }
 0x136   :  { %v4558_v13 = vpop.f32.mrb[33].mxu0 }
 0x137   :  { %v4559_v14 = vadd.f32 %v4558_v13, %v4557_v11  ;;  %v4560_v15 = vpop.f32.mrb[34].mxu0  ;;  %v4615_v16 = vpop.f32.mrb[32].mxu1 }
 0x138   :  { %v4561_v17 = vpop.f32.mrb[35].mxu0  ;;  %v4616_v20 = vpop.f32.mrb[33].mxu1 }
 0x139   :  { %v1587_v18 = vadd.f32 %v4559_v14, %v5916_v35  ;;  %v4562_v19 = vadd.f32 %v4561_v17, %v4560_v15  ;;  %v4617_v24 = vadd.f32 %v4616_v20, %v4615_v16  ;;  %v4618_v25 = vpop.f32.mrb[34].mxu1 }
 0x13a   :  { %v4619_v27 = vpop.f32.mrb[35].mxu1 }
 0x13b   :  { %v1590_v21 = vadd.f32 %v4562_v19, %v5918_v38  ;;  %v5955_v28 = vadd.f32 %v4617_v24, %v1587_v18  ;;  %v4620_v29 = vadd.f32 %v4619_v27, %v4618_v25 }
 0x13d   :  { %v4563_v30 = vpop.f32.mrb[36].mxu0  ;;  %v5957_v31 = vadd.f32 %v4620_v29, %v1590_v21 }
 0x13e   :  { %v4564_v32 = vpop.f32.mrb[37].mxu0 }
 0x13f   :  { %v4565_v33 = vadd.f32 %v4564_v32, %v4563_v30  ;;  %v4566_v34 = vpop.f32.mrb[38].mxu0  ;;  %v4621_v36 = vpop.f32.mrb[36].mxu1 }
 0x140   :  { %v4567_v37 = vpop.f32.mrb[39].mxu0  ;;  %v4622_v40 = vpop.f32.mrb[37].mxu1 }
 0x141   :  { %v1595_v35 = vadd.f32 %v4565_v33, %v5922_v51  ;;  %v4568_v39 = vadd.f32 %v4567_v37, %v4566_v34  ;;  %v4623_v42 = vadd.f32 %v4622_v40, %v4621_v36  ;;  %v4624_v43 = vpop.f32.mrb[38].mxu1 }
 0x142   :  { %v4625_v45 = vpop.f32.mrb[39].mxu1 }
 0x143   :  { %v1598_v38 = vadd.f32 %v4568_v39, %v5924_v54  ;;  %v5961_v46 = vadd.f32 %v4623_v42, %v1595_v35  ;;  %v4626_v47 = vadd.f32 %v4625_v45, %v4624_v43 }
 0x145   :  { %v4569_v48 = vpop.f32.mrb[40].mxu0  ;;  %v5963_v49 = vadd.f32 %v4626_v47, %v1598_v38 }
 0x146   :  { %v4570_v50 = vpop.f32.mrb[41].mxu0 }
 0x147   :  { %v4571_v52 = vadd.f32 %v4570_v50, %v4569_v48  ;;  %v4572_v53 = vpop.f32.mrb[42].mxu0  ;;  %v4627_v55 = vpop.f32.mrb[40].mxu1 }
 0x148   :  { %v4573_v56 = vpop.f32.mrb[43].mxu0  ;;  %v4628_v59 = vpop.f32.mrb[41].mxu1 }
 0x149   :  { %v1603_v51 = vadd.f32 %v4571_v52, %v5928_v3  ;;  %v4574_v58 = vadd.f32 %v4573_v56, %v4572_v53  ;;  %v4629_v60 = vadd.f32 %v4628_v59, %v4627_v55  ;;  %v4630_v61 = vpop.f32.mrb[42].mxu1 }
 0x14a   :  { %v4631_v62 = vpop.f32.mrb[43].mxu1 }
 0x14b   :  { %v1606_v54 = vadd.f32 %v4574_v58, %v5930_v7  ;;  %v5967_v63 = vadd.f32 %v4629_v60, %v1603_v51  ;;  %v4632_v0 = vadd.f32 %v4631_v62, %v4630_v61 }
 0x14d   :  { %v4575_v1 = vpop.f32.mrb[44].mxu0  ;;  %v5969_v2 = vadd.f32 %v4632_v0, %v1606_v54 }
 0x14e   :  { %v4576_v5 = vpop.f32.mrb[45].mxu0 }
 0x14f   :  { %v4577_v6 = vadd.f32 %v4576_v5, %v4575_v1  ;;  %v4578_v4 = vpop.f32.mrb[46].mxu0  ;;  %v4633_v8 = vpop.f32.mrb[44].mxu1 }
 0x150   :  { %v4579_v10 = vpop.f32.mrb[47].mxu0  ;;  %v4634_v13 = vpop.f32.mrb[45].mxu1 }
 0x151   :  { %v1611_v3 = vadd.f32 %v4577_v6, %v5934_v22  ;;  %v4580_v11 = vadd.f32 %v4579_v10, %v4578_v4  ;;  %v4635_v14 = vadd.f32 %v4634_v13, %v4633_v8  ;;  %v4636_v15 = vpop.f32.mrb[46].mxu1 }
 0x152   :  { %v4637_v16 = vpop.f32.mrb[47].mxu1 }
 0x153   :  { %v1614_v7 = vadd.f32 %v4580_v11, %v5936_v26  ;;  %v5973_v17 = vadd.f32 %v4635_v14, %v1611_v3  ;;  %v4638_v18 = vadd.f32 %v4637_v16, %v4636_v15 }
 0x155   :  { %v4581_v19 = vpop.f32.mrb[48].mxu0  ;;  %v5975_v20 = vadd.f32 %v4638_v18, %v1614_v7 }
 0x156   :  { %v4582_v24 = vpop.f32.mrb[49].mxu0 }
 0x157   :  { %v4583_v25 = vadd.f32 %v4582_v24, %v4581_v19  ;;  %v4584_v21 = vpop.f32.mrb[50].mxu0  ;;  %v4639_v27 = vpop.f32.mrb[48].mxu1 }
 0x158   :  { %v4585_v29 = vpop.f32.mrb[51].mxu0  ;;  %v4640_v32 = vpop.f32.mrb[49].mxu1 }
 0x159   :  { %v1619_v22 = vadd.f32 %v4583_v25, %v5940_v41  ;;  %v4586_v30 = vadd.f32 %v4585_v29, %v4584_v21  ;;  %v4641_v33 = vadd.f32 %v4640_v32, %v4639_v27  ;;  %v4642_v34 = vpop.f32.mrb[50].mxu1 }
 0x15a   :  { %v4643_v36 = vpop.f32.mrb[51].mxu1 }
 0x15b   :  { %v1622_v26 = vadd.f32 %v4586_v30, %v5942_v44  ;;  %v5979_v37 = vadd.f32 %v4641_v33, %v1619_v22  ;;  %v4644_v35 = vadd.f32 %v4643_v36, %v4642_v34 }
 0x15d   :  { %v4587_v39 = vpop.f32.mrb[52].mxu0  ;;  %v5981_v40 = vadd.f32 %v4644_v35, %v1622_v26 }
 0x15e   :  { %v4588_v42 = vpop.f32.mrb[53].mxu0 }
 0x15f   :  { %v4589_v43 = vadd.f32 %v4588_v42, %v4587_v39  ;;  %v4590_v38 = vpop.f32.mrb[54].mxu0  ;;  %v4645_v45 = vpop.f32.mrb[52].mxu1 }
 0x160   :  { %v4591_v47 = vpop.f32.mrb[55].mxu0  ;;  %v4646_v48 = vpop.f32.mrb[53].mxu1 }
 0x161   :  { %v1627_v41 = vadd.f32 %v4589_v43, %v5945_v57  ;;  %v4647_v50 = vadd.f32 %v4646_v48, %v4645_v45  ;;  %v4648_v52 = vpop.f32.mrb[54].mxu1 }
 0x162   :  { %v4649_v53 = vpop.f32.mrb[55].mxu1 }
 0x163   :  { %v5984_v55 = vadd.f32 %v4647_v50, %v1627_v41 }
 0x165   :  { %v4667_v44 = vpop.f32.mrb[56].mxu0 }
 0x166   :  { %v4668_v56 = vpop.f32.mrb[57].mxu0 }
 0x167   :  { %v4669_v51 = vadd.f32 %v4668_v56, %v4667_v44  ;;  %v4670_v58 = vpop.f32.mrb[58].mxu0  ;;  %v4725_v59 = vpop.f32.mrb[56].mxu1 }
 0x168   :  { %v4671_v60 = vpop.f32.mrb[59].mxu0  ;;  %v4726_v62 = vpop.f32.mrb[57].mxu1 }
 0x169   :  { %v1755_v61 = vadd.f32 %v4669_v51, %v5949_v9  ;;  %v4672_v54 = vadd.f32 %v4671_v60, %v4670_v58  ;;  %v4727_v0 = vadd.f32 %v4726_v62, %v4725_v59  ;;  %v4728_v1 = vpop.f32.mrb[58].mxu1 }
 0x16a   :  { %v4729_v5 = vpop.f32.mrb[59].mxu1 }
 0x16b   :  { %v1758_v57 = vadd.f32 %v4672_v54, %v5951_v12  ;;  %v4730_v6 = vadd.f32 %v4729_v5, %v4728_v1  ;;  %v5988_v4 = vadd.f32 %v4727_v0, %v1755_v61 }
 0x16d   :  { %v4673_v8 = vpop.f32.mrb[60].mxu0  ;;  %v5990_v3 = vadd.f32 %v4730_v6, %v1758_v57 }
 0x16e   :  { %v4674_v10 = vpop.f32.mrb[61].mxu0 }
 0x16f   :  { %v4675_v11 = vadd.f32 %v4674_v10, %v4673_v8  ;;  %v4676_v13 = vpop.f32.mrb[62].mxu0  ;;  %v4731_v14 = vpop.f32.mrb[60].mxu1 }
 0x170   :  { %v4677_v15 = vpop.f32.mrb[63].mxu0  ;;  %v4732_v16 = vpop.f32.mrb[61].mxu1 }
 0x171   :  { %v1763_v9 = vadd.f32 %v4675_v11, %v5955_v28  ;;  %v4678_v7 = vadd.f32 %v4677_v15, %v4676_v13  ;;  %v4733_v18 = vadd.f32 %v4732_v16, %v4731_v14  ;;  %v4734_v19 = vpop.f32.mrb[62].mxu1 }
 0x172   :  { %v4735_v24 = vpop.f32.mrb[63].mxu1 }
 0x173   :  { %v1766_v12 = vadd.f32 %v4678_v7, %v5957_v31  ;;  %v4736_v25 = vadd.f32 %v4735_v24, %v4734_v19  ;;  %v5994_v21 = vadd.f32 %v4733_v18, %v1763_v9 }
 0x175   :  { %v4679_v27 = vpop.f32.mrb[64].mxu0  ;;  %v5996_v22 = vadd.f32 %v4736_v25, %v1766_v12 }
 0x176   :  { %v4680_v29 = vpop.f32.mrb[65].mxu0 }
 0x177   :  { %v4681_v30 = vadd.f32 %v4680_v29, %v4679_v27  ;;  %v4682_v32 = vpop.f32.mrb[66].mxu0  ;;  %v4737_v33 = vpop.f32.mrb[64].mxu1 }
 0x178   :  { %v4683_v34 = vpop.f32.mrb[67].mxu0  ;;  %v4738_v36 = vpop.f32.mrb[65].mxu1 }
 0x179   :  { %v1771_v28 = vadd.f32 %v4681_v30, %v5961_v46  ;;  %v4684_v26 = vadd.f32 %v4683_v34, %v4682_v32  ;;  %v4739_v35 = vadd.f32 %v4738_v36, %v4737_v33  ;;  %v4740_v39 = vpop.f32.mrb[66].mxu1 }
 0x17a   :  { %v4741_v42 = vpop.f32.mrb[67].mxu1 }
 0x17b   :  { %v1774_v31 = vadd.f32 %v4684_v26, %v5963_v49  ;;  %v4742_v43 = vadd.f32 %v4741_v42, %v4740_v39  ;;  %v6000_v38 = vadd.f32 %v4739_v35, %v1771_v28 }
 0x17d   :  { %v4685_v45 = vpop.f32.mrb[68].mxu0  ;;  %v6002_v41 = vadd.f32 %v4742_v43, %v1774_v31 }
 0x17e   :  { %v4686_v47 = vpop.f32.mrb[69].mxu0 }
 0x17f   :  { %v4687_v48 = vadd.f32 %v4686_v47, %v4685_v45  ;;  %v4688_v50 = vpop.f32.mrb[70].mxu0  ;;  %v4743_v52 = vpop.f32.mrb[68].mxu1 }
 0x180   :  { %v4689_v53 = vpop.f32.mrb[71].mxu0  ;;  %v4744_v56 = vpop.f32.mrb[69].mxu1 }
 0x181   :  { %v1779_v46 = vadd.f32 %v4687_v48, %v5967_v63  ;;  %v4690_v44 = vadd.f32 %v4689_v53, %v4688_v50  ;;  %v4745_v51 = vadd.f32 %v4744_v56, %v4743_v52  ;;  %v4746_v58 = vpop.f32.mrb[70].mxu1  ;;  %v5287_v56 = vmov 1966171168  }
 0x182   :  { %v4747_v59 = vpop.f32.mrb[71].mxu1 }
 0x183   :  { %v1782_v49 = vadd.f32 %v4690_v44, %v5969_v2  ;;  %v4748_v60 = vadd.f32 %v4747_v59, %v4746_v58  ;;  %v6006_v61 = vadd.f32 %v4745_v51, %v1779_v46  ;;  %v2065_v51 = vunpack.c.l.s4 %v5287_v56 }
 0x184   :  { %v2067_v58 = vlaneseq }
 0x185   :  { %v4691_v54 = vpop.f32.mrb[72].mxu0  ;;  %v6008_v0 = vadd.f32 %v4748_v60, %v1782_v49 }
 0x186   :  { %v4692_v62 = vpop.f32.mrb[73].mxu0 }
 0x187   :  { %v4693_v1 = vadd.f32 %v4692_v62, %v4691_v54  ;;  %v4694_v57 = vpop.f32.mrb[74].mxu0  ;;  %v4749_v5 = vpop.f32.mrb[72].mxu1  ;;  %v2066_v54 = vunpack.c.0.s8 %v2065_v51  ;;  %v2068_v62 = vshrl.u32 %v2067_v58, 7  ;;  %v5186_v51 = vld [vmem:[%s6524_s3 + $0x50] sm:$0xff]  }
 0x188   :  { %v4695_v6 = vpop.f32.mrb[75].mxu0  ;;  %v4750_v10 = vpop.f32.mrb[73].mxu1 }
 0x189   :  { %v1787_v63 = vadd.f32 %v4693_v1, %v5973_v17  ;;  %v4696_v8 = vadd.f32 %v4695_v6, %v4694_v57  ;;  %v4751_v11 = vadd.f32 %v4750_v10, %v4749_v5  ;;  %v4752_v13 = vpop.f32.mrb[74].mxu1  ;;  %v5182_v5 = vld [vmem:[%s6524_s3 + $0x40] sm:$0xff]  }
 0x18a   :  { %v4753_v14 = vpop.f32.mrb[75].mxu1  ;;  %4776 = vmatprep.subr.bf16.mxu1 %v5182_v5 }
 0x18b   :  { %v1790_v2 = vadd.f32 %v4696_v8, %v5975_v20  ;;  %v4754_v15 = vadd.f32 %v4753_v14, %v4752_v13  ;;  %v6012_v9 = vadd.f32 %v4751_v11, %v1787_v63  ;;  %v6033_v63 = vsub.s32 %v2066_v54, %v2068_v62 }
 0x18d   :  { %v4697_v7 = vpop.f32.mrb[76].mxu0  ;;  %v6014_v18 = vadd.f32 %v4754_v15, %v1790_v2 }
 0x18e   :  { %v4698_v16 = vpop.f32.mrb[77].mxu0 }
 0x18f   :  { %v4699_v19 = vadd.f32 %v4698_v16, %v4697_v7  ;;  %v4700_v12 = vpop.f32.mrb[78].mxu0  ;;  %v4755_v24 = vpop.f32.mrb[76].mxu1 }
 0x190   :  { %v4701_v25 = vpop.f32.mrb[79].mxu0  ;;  %v4756_v29 = vpop.f32.mrb[77].mxu1 }
 0x191   :  { %v1795_v17 = vadd.f32 %v4699_v19, %v5979_v37  ;;  %v4702_v27 = vadd.f32 %v4701_v25, %v4700_v12  ;;  %v4757_v30 = vadd.f32 %v4756_v29, %v4755_v24  ;;  %v4758_v32 = vpop.f32.mrb[78].mxu1  ;;  %v5184_v29 = vld [vmem:[%s6524_s3 + $0x48] sm:$0xff]  }
 0x192   :  { %v4759_v33 = vpop.f32.mrb[79].mxu1 }
 0x193   :  { %v1798_v20 = vadd.f32 %v4702_v27, %v5981_v40  ;;  %v4760_v34 = vadd.f32 %v4759_v33, %v4758_v32  ;;  %v6018_v28 = vadd.f32 %v4757_v30, %v1795_v17 }
 0x195   :  { %v4703_v26 = vpop.f32.mrb[80].mxu0  ;;  %v6020_v35 = vadd.f32 %v4760_v34, %v1798_v20  ;;  %v5185_v34 = vld [vmem:[%s6524_s3 + $0x8] sm:$0xff]  }
 0x196   :  { %v4704_v36 = vpop.f32.mrb[81].mxu0 }
 0x197   :  { %v4705_v39 = vadd.f32 %v4704_v36, %v4703_v26  ;;  %v4706_v31 = vpop.f32.mrb[82].mxu0  ;;  %v4761_v42 = vpop.f32.mrb[80].mxu1 }
 0x198   :  { %v4707_v43 = vpop.f32.mrb[83].mxu0  ;;  %v4762_v45 = vpop.f32.mrb[81].mxu1 }
 0x199   :  { %v1803_v37 = vadd.f32 %v4705_v39, %v5984_v55  ;;  %v4763_v47 = vadd.f32 %v4762_v45, %v4761_v42  ;;  %v4764_v48 = vpop.f32.mrb[82].mxu1 }
 0x19a   :  { %v4765_v50 = vpop.f32.mrb[83].mxu1 }
 0x19b   :  { %v6023_v52 = vadd.f32 %v4763_v47, %v1803_v37 }
 0x19d   :  { %v1930_v40 = vpop.f32.mrb[84].mxu0 }
 0x19e   :  { %v1931_v53 = vadd.f32 %v1930_v40, %v5988_v4  ;;  %v4917_v46 = vpop.f32.mrb[85].mxu0 }
 0x19f   :  { %v1933_v44 = vpop.f32.mrb[86].mxu0 }
 0x1a0   :  { %v4406_v49 = vpack.c.bf16 %v1931_v53, %v1931_v53  ;;  %v1934_v59 = vadd.f32 %v1933_v44, %v5990_v3  ;;  %v4918_v60 = vpop.f32.mrb[87].mxu0  ;;  %v5183_v3 = vld [vmem:[%s6524_s3] sm:$0xff]  }
 0x1a1   :  { %4777 = vmatpush3.bf16.msra.mxu1 %v5183_v3  ;;  %v5187_v60 = vld [vmem:[%s6524_s3 + $0x10] sm:$0xff]  }
 0x1a2   :  { %2038 = vst.msk [vmem:[#allocation2] sm:$0xf] %vm2037_vm2, %v4406_v49  ;;  %v4407_v55 = vpack.c.bf16 %v1934_v59, %v1934_v59  ;;  %4778 = vmatprep.subr.bf16.mxu1 %v5184_v29 }
 0x1a4   :  { %2039 = vst.msk [vmem:[#allocation2 + $0x4] sm:$0xf] %vm2037_vm2, %v4407_v55 }
 0x1a5   :  { %v1938_v1 = vpop.f32.mrb[88].mxu0  ;;  %4779 = vmatpush3.bf16.msra.mxu1 %v5185_v34 }
 0x1a6   :  { %v1939_v4 = vadd.f32 %v1938_v1, %v5994_v21  ;;  %v4921_v57 = vpop.f32.mrb[89].mxu0  ;;  %4780 = vmatprep.subr.bf16.mxu1 %v5186_v51 }
 0x1a7   :  { %v1941_v6 = vpop.f32.mrb[90].mxu0 }
 0x1a8   :  { %v4408_v8 = vpack.c.bf16 %v1939_v4, %v1939_v4  ;;  %v1942_v10 = vadd.f32 %v1941_v6, %v5996_v22  ;;  %v4922_v11 = vpop.f32.mrb[91].mxu0 }
 0x1a9   :  { %v4268_v13 = vld.sshfl [vmem:[#allocation2] sm:$0x10 pattern:$0x75316420]  ;;  %v2052_v2 = vld [vmem:[#allocation2] sm:$0x1]  ;;  %4781 = vmatpush3.bf16.msra.mxu1 %v5187_v60 }
 0x1aa   :  { %2040 = vst.msk [vmem:[#allocation2 + $0x8] sm:$0xf] %vm2037_vm2, %v4408_v8  ;;  %v4409_v21 = vpack.c.bf16 %v1942_v10, %v1942_v10  ;;  %v2063_v14 = vcombine.high %v4268_v13, %v4268_v13  ;;  %v4269_v15 = vld.sshfl [vmem:[#allocation2] sm:$0x2 pattern:$0x75316420] }
 0x1ab   :  { %2053 = vst.msk [vmem:[#allocation3] sm:$0x1] %vm2050_vm3, %v2052_v2  ;;  %v4272_v7 = vld.sshfl [vmem:[#allocation2 + $0x4] sm:$0x2 pattern:$0x75316420]  ;;  %v2091_v16 = vrot.slane %v4269_v15, %v6033_v63 }
 0x1ac   :  { %v2121_v19 = vld [vmem:[#allocation2 + $0x4] sm:$0x1]  ;;  %2041 = vst.msk [vmem:[#allocation2 + $0xc] sm:$0xf] %vm2037_vm2, %v4409_v21  ;;  %v2070_v22 = vrot.slane %v2063_v14, %v6033_v63  ;;  %v2159_v12 = vrot.slane %v4272_v7, %v6033_v63 }
 0x1ad   :  { %v4273_v24 = vld.sshfl [vmem:[#allocation2 + $0x4] sm:$0x20 pattern:$0x75316420]  ;;  %2122 = vst.msk [vmem:[#allocation3 + $0x1] sm:$0x1] %vm2050_vm3, %v2121_v19  ;;  %v2092_v36 = vcombine.high %v2091_v16, %v2091_v16 }
 0x1ae   :  { %v1946_v25 = vpop.f32.mrb[92].mxu0  ;;  %v2174_v17 = vcombine.high %v4273_v24, %v4273_v24  ;;  %v4271_v27 = vld.sshfl [vmem:[#allocation2 + $0x4] sm:$0x10 pattern:$0x75316420]  ;;  %2071 = vrot.lane.b32.xlu0 %v2070_v22, %s5288_s25  ;;  %v2160_v20 = vcombine.high %v2159_v12, %v2159_v12  ;;  %v5188_v16 = vld [vmem:[%s6524_s3 + $0x58] sm:$0xff]  }
 0x1af   :  { %v1947_v30 = vadd.f32 %v1946_v25, %v6000_v38  ;;  %v4925_v32 = vpop.f32.mrb[93].mxu0  ;;  %v4270_v33 = vld.sshfl [vmem:[#allocation2] sm:$0x20 pattern:$0x75316420]  ;;  %v2132_v37 = vcombine.high %v4271_v27, %v4271_v27  ;;  %v5189_v19 = vld [vmem:[%s6524_s3 + $0x18] sm:$0xff]   ;;  %4782 = vmatprep.subr.bf16.mxu1 %v5188_v16 }
 0x1b0   :  { %v1949_v26 = vpop.f32.mrb[94].mxu0  ;;  %v2181_v39 = vrot.slane %v2174_v17, %v6033_v63  ;;  %v2107_v31 = vcombine.high %v4270_v33, %v4270_v33  ;;  %2161 = vrot.lane.b32.xlu1 %v2160_v20, %s5289_s28  ;;  %4783 = vmatpush3.bf16.msra.mxu1 %v5189_v19  ;;  %v5190_v20 = vld [vmem:[%s6524_s3 + $0x140] sm:$0xff]  }
 0x1b1   :  { %v4410_v42 = vpack.c.bf16 %v1947_v30, %v1947_v30  ;;  %v1950_v43 = vadd.f32 %v1949_v26, %v6002_v41  ;;  %v4926_v38 = vpop.f32.mrb[95].mxu0  ;;  %v4274_v45 = vld.sshfl [vmem:[#allocation2 + $0x8] sm:$0x10 pattern:$0x75316420]  ;;  %v2139_v44 = vrot.slane %v2132_v37, %v6033_v63  ;;  %4820 = vmatprep.subr.bf16.mxu0 %v5190_v20  ;;  %v5201_v20 = vld [vmem:[%s6524_s3 + $0x118] sm:$0xff]  }
 0x1b2   :  { %v2187_v47 = vld [vmem:[#allocation2 + $0x8] sm:$0x1]  ;;  %2093 = vrot.lane.b32.xlu0 %v2092_v36, %s5289_s28  ;;  %v2182_v50 = vcombine.high %v2181_v39, %v2181_v39  ;;  %v2198_v40 = vcombine.high %v4274_v45, %v4274_v45  ;;  %v2114_v53 = vrot.slane %v2107_v31, %v6033_v63  ;;  %v4275_v56 = vld.sshfl [vmem:[#allocation2 + $0x8] sm:$0x2 pattern:$0x75316420] }
 0x1b3   :  { %2042 = vst.msk [vmem:[#allocation2 + $0x10] sm:$0xf] %vm2037_vm2, %v4410_v42  ;;  %v4411_v48 = vpack.c.bf16 %v1950_v43, %v1950_v43  ;;  %v4277_v41 = vld.sshfl [vmem:[#allocation2 + $0xc] sm:$0x10 pattern:$0x75316420]  ;;  %v2225_v10 = vrot.slane %v4275_v56, %v6033_v63 }
 0x1b4   :  { %2188 = vst.msk [vmem:[#allocation3 + $0x2] sm:$0x1] %vm2050_vm3, %v2187_v47  ;;  %v2253_v46 = vld [vmem:[#allocation2 + $0xc] sm:$0x1]  ;;  %2183 = vrot.lane.b32.xlu1 %v2182_v50, %s5290_s29  ;;  %v2205_v62 = vrot.slane %v2198_v40, %v6033_v63  ;;  %v2264_v1 = vcombine.high %v4277_v41, %v4277_v41  ;;  %v2115_v5 = vcombine.high %v2114_v53, %v2114_v53  ;;  %v5191_v39 = vld [vmem:[%s6524_s3 + $0x100] sm:$0xff]  }
 0x1b5   :  { %2043 = vst.msk [vmem:[#allocation2 + $0x14] sm:$0xf] %vm2037_vm2, %v4411_v48  ;;  %v1954_v58 = vpop.f32.mrb[96].mxu0  ;;  %v2226_v15 = vcombine.high %v2225_v10, %v2225_v10  ;;  %v5192_v42 = vld [vmem:[%s6524_s3 + $0x60] sm:$0xff]   ;;  %4821 = vmatpush3.bf16.msra.mxu0 %v5191_v39  ;;  %v5194_v53 = vld [vmem:[%s6524_s3 + $0x148] sm:$0xff]  }
 0x1b6   :  { %2254 = vst.msk [vmem:[#allocation3 + $0x3] sm:$0x1] %vm2050_vm3, %v2253_v46  ;;  %v4278_v49 = vld.sshfl [vmem:[#allocation2 + $0xc] sm:$0x2 pattern:$0x75316420]  ;;  %v1955_v55 = vadd.f32 %v1954_v58, %v6006_v61  ;;  %2140 = vrot.lane.b32.xlu0 %v2139_v44, %s5288_s25  ;;  %v2271_v2 = vrot.slane %v2264_v1, %v6033_v63  ;;  %4784 = vmatprep.subr.bf16.mxu1 %v5192_v42 }
 0x1b7   :  { %v4276_v59 = vld.sshfl [vmem:[#allocation2 + $0x8] sm:$0x20 pattern:$0x75316420]  ;;  %v4929_v54 = vpop.f32.mrb[97].mxu0  ;;  %v2291_v21 = vrot.slane %v4278_v49, %v6033_v63  ;;  %v5193_v40 = vld [vmem:[%s6524_s3 + $0x20] sm:$0xff]   ;;  %4822 = vmatprep.subr.bf16.mxu0 %v5194_v53 }
 0x1b8   :  { %v4279_v4 = vld.sshfl [vmem:[#allocation2 + $0xc] sm:$0x20 pattern:$0x75316420]  ;;  %v1957_v57 = vpop.f32.mrb[98].mxu0  ;;  %v4412_v6 = vpack.c.bf16 %v1955_v55, %v1955_v55  ;;  %2206 = vrot.lane.b32.xlu1 %v2205_v62, %s5288_s25  ;;  %v2240_v61 = vcombine.high %v4276_v59, %v4276_v59  ;;  %4785 = vmatpush3.bf16.msra.mxu1 %v5193_v40  ;;  %v5196_v55 = vld [vmem:[%s6524_s3 + $0x150] sm:$0xff]  }
 0x1b9   :  { %v1958_v3 = vadd.f32 %v1957_v57, %v6008_v0  ;;  %v4930_v8 = vpop.f32.mrb[99].mxu0  ;;  %v2306_v14 = vcombine.high %v4279_v4, %v4279_v4  ;;  %v2292_v17 = vcombine.high %v2291_v21, %v2291_v21  ;;  %v5195_v44 = vld [vmem:[%s6524_s3 + $0x108] sm:$0xff]   ;;  %v5197_v4 = vld [vmem:[%s6524_s3 + $0x110] sm:$0xff]   ;;  %v5204_v53 = vld [vmem:[%s6524_s3 + $0x120] sm:$0xff]  }
 0x1ba   :  { %v2319_v11 = vld [vmem:[#allocation2 + $0x10] sm:$0x1]  ;;  %2044 = vst.msk [vmem:[#allocation2 + $0x18] sm:$0xf] %vm2037_vm2, %v4412_v6  ;;  %2116 = vrot.lane.b32.xlu0 %v2115_v5, %s5290_s29  ;;  %v2247_v7 = vrot.slane %v2240_v61, %v6033_v63  ;;  %4823 = vmatpush3.bf16.msra.mxu0 %v5195_v44 }
 0x1bb   :  { %v4413_v13 = vpack.c.bf16 %v1958_v3, %v1958_v3  ;;  %2320 = vst.msk [vmem:[#allocation3 + $0x4] sm:$0x1] %vm2050_vm3, %v2319_v11  ;;  %v4280_v12 = vld.sshfl [vmem:[#allocation2 + $0x10] sm:$0x10 pattern:$0x75316420]  ;;  %v2313_v27 = vrot.slane %v2306_v14, %v6033_v63  ;;  %4824 = vmatprep.subr.bf16.mxu0 %v5196_v55 }
 0x1bc   :  { %v2385_v0 = vld [vmem:[#allocation2 + $0x14] sm:$0x1]  ;;  %2272 = vrot.lane.b32.xlu1 %v2271_v2, %s5288_s25  ;;  %v4283_v29 = vld.sshfl [vmem:[#allocation2 + $0x14] sm:$0x10 pattern:$0x75316420]  ;;  %v2330_v36 = vcombine.high %v4280_v12, %v4280_v12 }
 0x1bd   :  { %2045 = vst.msk [vmem:[#allocation2 + $0x1c] sm:$0xf] %vm2037_vm2, %v4413_v13  ;;  %v1962_v22 = vpop.f32.mrb[100].mxu0  ;;  %v2396_v38 = vcombine.high %v4283_v29, %v4283_v29  ;;  %v5207_v55 = vld [vmem:[%s6524_s3 + $0x128] sm:$0xff]  }
 0x1be   :  { %2386 = vst.msk [vmem:[#allocation3 + $0x5] sm:$0x1] %vm2050_vm3, %v2385_v0  ;;  %v1963_v24 = vadd.f32 %v1962_v22, %v6012_v9  ;;  %v4933_v25 = vpop.f32.mrb[101].mxu0  ;;  %2227 = vrot.lane.b32.xlu0 %v2226_v15, %s5289_s28  ;;  %v2248_v9 = vcombine.high %v2247_v7, %v2247_v7  ;;  %v2337_v48 = vrot.slane %v2330_v36, %v6033_v63  ;;  %v5198_v0 = vld [vmem:[%s6524_s3 + $0x68] sm:$0xff]  }
 0x1bf   :  { %v4281_v30 = vld.sshfl [vmem:[#allocation2 + $0x10] sm:$0x2 pattern:$0x75316420]  ;;  %v1965_v32 = vpop.f32.mrb[102].mxu0  ;;  %v2403_v58 = vrot.slane %v2396_v38, %v6033_v63  ;;  %4825 = vmatpush3.bf16.msra.mxu0 %v5197_v4  ;;  %4786 = vmatprep.subr.bf16.mxu1 %v5198_v0 }
 0x1c0   :  { %v4414_v33 = vpack.c.bf16 %v1963_v24, %v1963_v24  ;;  %v1966_v34 = vadd.f32 %v1965_v32, %v6014_v18  ;;  %2293 = vrot.lane.b32.xlu1 %v2292_v17, %s5289_s28  ;;  %v4934_v26 = vpop.f32.mrb[103].mxu0  ;;  %v4282_v31 = vld.sshfl [vmem:[#allocation2 + $0x10] sm:$0x20 pattern:$0x75316420]  ;;  %v2314_v18 = vcombine.high %v2313_v27, %v2313_v27  ;;  %v2357_v45 = vrot.slane %v4281_v30, %v6033_v63  ;;  %v5199_v17 = vld [vmem:[%s6524_s3 + $0x28] sm:$0xff]  }
 0x1c1   :  { %v4284_v37 = vld.sshfl [vmem:[#allocation2 + $0x14] sm:$0x2 pattern:$0x75316420]  ;;  %v2372_v50 = vcombine.high %v4282_v31, %v4282_v31  ;;  %v2451_v5 = vld [vmem:[#allocation2 + $0x18] sm:$0x1]  ;;  %4787 = vmatpush3.bf16.msra.mxu1 %v5199_v17 }
 0x1c2   :  { %2046 = vst.msk [vmem:[#allocation2 + $0x20] sm:$0xf] %vm2037_vm2, %v4414_v33  ;;  %v4415_v43 = vpack.c.bf16 %v1966_v34, %v1966_v34  ;;  %2249 = vrot.lane.b32.xlu0 %v2248_v9, %s5290_s29  ;;  %v4285_v47 = vld.sshfl [vmem:[#allocation2 + $0x14] sm:$0x20 pattern:$0x75316420]  ;;  %v2423_v46 = vrot.slane %v4284_v37, %v6033_v63  ;;  %v2358_v60 = vcombine.high %v2357_v45, %v2357_v45 }
 0x1c3   :  { %v2438_v49 = vcombine.high %v4285_v47, %v4285_v47  ;;  %v2379_v1 = vrot.slane %v2372_v50, %v6033_v63  ;;  %v4286_v57 = vld.sshfl [vmem:[#allocation2 + $0x18] sm:$0x10 pattern:$0x75316420]  ;;  %2452 = vst.msk [vmem:[#allocation3 + $0x6] sm:$0x1] %vm2050_vm3, %v2451_v5 }
 0x1c4   :  { %2047 = vst.msk [vmem:[#allocation2 + $0x24] sm:$0xf] %vm2037_vm2, %v4415_v43  ;;  %2315 = vrot.lane.b32.xlu1 %v2314_v18, %s5290_s29  ;;  %v2424_v3 = vcombine.high %v2423_v46, %v2423_v46  ;;  %v2517_v8 = vld [vmem:[#allocation2 + $0x1c] sm:$0x1]  ;;  %v2462_v11 = vcombine.high %v4286_v57, %v4286_v57  ;;  %v5202_v43 = vld [vmem:[%s6524_s3 + $0x160] sm:$0xff]   ;;  %v5203_v45 = vld [vmem:[%s6524_s3 + $0x70] sm:$0xff]  }
 0x1c5   :  { %v1970_v41 = vpop.f32.mrb[104].mxu0  ;;  %v4289_v10 = vld.sshfl [vmem:[#allocation2 + $0x1c] sm:$0x10 pattern:$0x75316420]  ;;  %v2380_v61 = vcombine.high %v2379_v1, %v2379_v1  ;;  %4788 = vmatprep.subr.bf16.mxu1 %v5203_v45  ;;  %v5209_v57 = vld [vmem:[%s6524_s3 + $0x170] sm:$0xff]  }
 0x1c6   :  { %v1971_v56 = vadd.f32 %v1970_v41, %v6018_v28  ;;  %v4937_v51 = vpop.f32.mrb[105].mxu0  ;;  %2338 = vrot.lane.b32.xlu0 %v2337_v48, %s5288_s25  ;;  %2518 = vst.msk [vmem:[#allocation3 + $0x7] sm:$0x1] %vm2050_vm3, %v2517_v8  ;;  %v2528_v16 = vcombine.high %v4289_v10, %v4289_v10  ;;  %v2469_v12 = vrot.slane %v2462_v11, %v6033_v63  ;;  %v5200_v32 = vld [vmem:[%s6524_s3 + $0x158] sm:$0xff]   ;;  %v5211_v8 = vld [vmem:[%s6524_s3 + $0x130] sm:$0xff]  }
 0x1c7   :  { %v1973_v59 = vpop.f32.mrb[106].mxu0  ;;  %v4287_v13 = vld.sshfl [vmem:[#allocation2 + $0x18] sm:$0x2 pattern:$0x75316420]  ;;  %4826 = vmatprep.subr.bf16.mxu0 %v5200_v32 }
 0x1c8   :  { %v4416_v54 = vpack.c.bf16 %v1971_v56, %v1971_v56  ;;  %v1974_v62 = vadd.f32 %v1973_v59, %v6020_v35  ;;  %2404 = vrot.lane.b32.xlu1 %v2403_v58, %s5288_s25  ;;  %v4938_v28 = vpop.f32.mrb[107].mxu0  ;;  %v2445_v35 = vrot.slane %v2438_v49, %v6033_v63  ;;  %v4290_v21 = vld.sshfl [vmem:[#allocation2 + $0x1c] sm:$0x2 pattern:$0x75316420]  ;;  %v2489_v24 = vrot.slane %v4287_v13, %v6033_v63  ;;  %v5205_v56 = vld [vmem:[%s6524_s3 + $0x30] sm:$0xff]  }
 0x1c9   :  { %v4288_v14 = vld.sshfl [vmem:[#allocation2 + $0x18] sm:$0x20 pattern:$0x75316420]  ;;  %v2555_v29 = vrot.slane %v4290_v21, %v6033_v63  ;;  %4827 = vmatpush3.bf16.msra.mxu0 %v5201_v20  ;;  %v2583_v44 = vld [vmem:[#allocation2 + $0x20] sm:$0x1]  ;;  %4789 = vmatpush3.bf16.msra.mxu1 %v5205_v56 }
 0x1ca   :  { %2048 = vst.msk [vmem:[#allocation2 + $0x28] sm:$0xf] %vm2037_vm2, %v4416_v54  ;;  %v4417_v6 = vpack.c.bf16 %v1974_v62, %v1974_v62  ;;  %2359 = vrot.lane.b32.xlu0 %v2358_v60, %s5289_s28  ;;  %v2446_v7 = vcombine.high %v2445_v35, %v2445_v35  ;;  %v4291_v19 = vld.sshfl [vmem:[#allocation2 + $0x1c] sm:$0x20 pattern:$0x75316420]  ;;  %v2504_v25 = vcombine.high %v4288_v14, %v4288_v14 }
 0x1cb   :  { %v2570_v30 = vcombine.high %v4291_v19, %v4291_v19  ;;  %v2490_v33 = vcombine.high %v2489_v24, %v2489_v24  ;;  %v4292_v9 = vld.sshfl [vmem:[#allocation2 + $0x20] sm:$0x10 pattern:$0x75316420]  ;;  %v2556_v26 = vcombine.high %v2555_v29, %v2555_v29  ;;  %4828 = vmatprep.subr.bf16.mxu0 %v5202_v43  ;;  %2584 = vst.msk [vmem:[#allocation3 + $0x8] sm:$0x1] %vm2050_vm3, %v2583_v44 }
 0x1cc   :  { %2049 = vst.msk [vmem:[#allocation2 + $0x2c] sm:$0xf] %vm2037_vm2, %v4417_v6  ;;  %2425 = vrot.lane.b32.xlu1 %v2424_v3, %s5289_s28  ;;  %v2511_v34 = vrot.slane %v2504_v25, %v6033_v63  ;;  %v4295_v39 = vld.sshfl [vmem:[#allocation2 + $0x24] sm:$0x10 pattern:$0x75316420]  ;;  %v2594_v37 = vcombine.high %v4292_v9, %v4292_v9 }
 0x1cd   :  { %v1978_v2 = vpop.f32.mrb[108].mxu0  ;;  %v2577_v36 = vrot.slane %v2570_v30, %v6033_v63  ;;  %v4293_v31 = vld.sshfl [vmem:[#allocation2 + $0x20] sm:$0x2 pattern:$0x75316420]  ;;  %v2660_v46 = vcombine.high %v4295_v39, %v4295_v39  ;;  %4829 = vmatpush3.bf16.msra.mxu0 %v5204_v53  ;;  %v5206_v60 = vld [vmem:[%s6524_s3 + $0x168] sm:$0xff]  }
 0x1ce   :  { %v1979_v15 = vadd.f32 %v1978_v2, %v6023_v52  ;;  %2381 = vrot.lane.b32.xlu0 %v2380_v61, %s5290_s29  ;;  %v4941_v27 = vpop.f32.mrb[109].mxu0  ;;  %v2535_v52 = vrot.slane %v2528_v16, %v6033_v63  ;;  %v4294_v42 = vld.sshfl [vmem:[#allocation2 + $0x20] sm:$0x20 pattern:$0x75316420]  ;;  %v2512_v38 = vcombine.high %v2511_v34, %v2511_v34  ;;  %v2601_v58 = vrot.slane %v2594_v37, %v6033_v63  ;;  %v5208_v1 = vld [vmem:[%s6524_s3 + $0x78] sm:$0xff]  }
 0x1cf   :  { %v1981_v18 = vpop.f32.mrb[110].mxu0  ;;  %v4296_v50 = vld.sshfl [vmem:[#allocation2 + $0x24] sm:$0x2 pattern:$0x75316420]  ;;  %v2578_v41 = vcombine.high %v2577_v36, %v2577_v36  ;;  %v2621_v49 = vrot.slane %v4293_v31, %v6033_v63  ;;  %v2636_v59 = vcombine.high %v4294_v42, %v4294_v42  ;;  %v2667_v54 = vrot.slane %v2660_v46, %v6033_v63  ;;  %4830 = vmatprep.subr.bf16.mxu0 %v5206_v60  ;;  %v5210_v3 = vld [vmem:[%s6524_s3 + $0x38] sm:$0xff]  }
 0x1d0   :  { %v4418_v22 = vpack.c.bf16 %v1979_v15, %v1979_v15  ;;  %2447 = vrot.lane.b32.xlu1 %v2446_v7, %s5290_s29  ;;  %v4942_v47 = vpop.f32.mrb[111].mxu0  ;;  %v4297_v40 = vld.sshfl [vmem:[#allocation2 + $0x24] sm:$0x20 pattern:$0x75316420]  ;;  %v2687_v62 = vrot.slane %v4296_v50, %v6033_v63  ;;  %4790 = vmatprep.subr.bf16.mxu1 %v5208_v1  ;;  %v5212_v11 = vld [vmem:[%s6524_s3 + $0x178] sm:$0xff]  }
 0x1d1   :  { %v2649_v51 = vld [vmem:[#allocation2 + $0x24] sm:$0x1]  ;;  %v2702_v28 = vcombine.high %v4297_v40, %v4297_v40  ;;  %v4298_v4 = vld.sshfl [vmem:[#allocation2 + $0x28] sm:$0x10 pattern:$0x75316420]  ;;  %4831 = vmatpush3.bf16.msra.mxu0 %v5207_v55  ;;  %v2622_v5 = vcombine.high %v2621_v49, %v2621_v49  ;;  %v2643_v6 = vrot.slane %v2636_v59, %v6033_v63  ;;  %4791 = vmatpush3.bf16.msra.mxu1 %v5210_v3 }
 0x1d2   :  { %2051 = vst.msk [vmem:[#allocation2 + $0x30] sm:$0x1] %vm2050_vm3, %v4418_v22  ;;  %2470 = vrot.lane.b32.xlu0 %v2469_v12, %s5288_s25  ;;  %2650 = vst.msk [vmem:[#allocation3 + $0x9] sm:$0x1] %vm2050_vm3, %v2649_v51  ;;  %4832 = vmatprep.subr.bf16.mxu0 %v5209_v57  ;;  %v2688_v10 = vcombine.high %v2687_v62, %v2687_v62  ;;  %v5213_v21 = vld [vmem:[%s6524_s3 + $0x138] sm:$0xff]   ;;  %v2726_v15 = vcombine.high %v4298_v4, %v4298_v4  ;;  %v5214_v7 = vld [vmem:[%s6524_s3 + $0xc0] sm:$0xff]  }
 0x1d3   :  { %v4301_v35 = vld.sshfl [vmem:[#allocation2 + $0x2c] sm:$0x10 pattern:$0x75316420]  ;;  %v2709_v61 = vrot.slane %v2702_v28, %v6033_v63  ;;  %v2715_v14 = vld [vmem:[#allocation2 + $0x28] sm:$0x1]  ;;  %v2644_v0 = vcombine.high %v2643_v6, %v2643_v6  ;;  %4798 = vmatprep.subr.bf16.mxu1 %v5214_v7 }
 0x1d4   :  { %2536 = vrot.lane.b32.xlu1 %v2535_v52, %s5288_s25  ;;  %v4299_v13 = vld.sshfl [vmem:[#allocation2 + $0x28] sm:$0x2 pattern:$0x75316420]  ;;  %2716 = vst.msk [vmem:[#allocation3 + $0xa] sm:$0x1] %vm2050_vm3, %v2715_v14  ;;  %v2792_v24 = vcombine.high %v4301_v35, %v4301_v35  ;;  %v2733_v17 = vrot.slane %v2726_v15, %v6033_v63 }
 0x1d5   :  { %v4300_v2 = vld.sshfl [vmem:[#allocation2 + $0x28] sm:$0x20 pattern:$0x75316420]  ;;  %4833 = vmatpush3.bf16.msra.mxu0 %v5211_v8  ;;  %v2781_v22 = vld [vmem:[#allocation2 + $0x2c] sm:$0x1]  ;;  %v2710_v12 = vcombine.high %v2709_v61, %v2709_v61  ;;  %v2753_v27 = vrot.slane %v4299_v13, %v6033_v63 }
 0x1d6   :  { %2491 = vrot.lane.b32.xlu0 %v2490_v33, %s5289_s28  ;;  %4834 = vmatprep.subr.bf16.mxu0 %v5212_v11  ;;  %v4302_v16 = vld.sshfl [vmem:[#allocation2 + $0x2c] sm:$0x2 pattern:$0x75316420]  ;;  %2782 = vst.msk [vmem:[#allocation3 + $0xb] sm:$0x1] %vm2050_vm3, %v2781_v22  ;;  %v2768_v52 = vcombine.high %v4300_v2, %v4300_v2  ;;  %v2799_v29 = vrot.slane %v2792_v24, %v6033_v63 }
 0x1d7   :  { %v4303_v19 = vld.sshfl [vmem:[#allocation2 + $0x2c] sm:$0x20 pattern:$0x75316420]  ;;  %v5216_v25 = vld [vmem:[%s6524_s3 + $0x240] sm:$0xff]   ;;  %v2819_v30 = vrot.slane %v4302_v16, %v6033_v63  ;;  %v2754_v20 = vcombine.high %v2753_v27, %v2753_v27 }
 0x1d8   :  { %2557 = vrot.lane.b32.xlu1 %v2556_v26, %s5289_s28  ;;  %v2834_v32 = vcombine.high %v4303_v19, %v4303_v19  ;;  %v2775_v33 = vrot.slane %v2768_v52, %v6033_v63  ;;  %v5215_v11 = vld [vmem:[%s6524_s3 + $0x80] sm:$0xff]   ;;  %v5218_v14 = vld [vmem:[%s6524_s3 + $0xc8] sm:$0xff]   ;;  %v5223_v52 = vld [vmem:[%s6524_s3 + $0x90] sm:$0xff]  }
 0x1d9   :  { %v2847_v48 = vld [vmem:[#allocation2 + $0x30] sm:$0x1]  ;;  %4835 = vmatpush3.bf16.msra.mxu0 %v5213_v21  ;;  %v2820_v34 = vcombine.high %v2819_v30, %v2819_v30  ;;  %v5217_v16 = vld [vmem:[%s6524_s3 + $0x200] sm:$0xff]   ;;  %v5219_v22 = vld [vmem:[%s6524_s3 + $0x88] sm:$0xff]  }
 0x1da   :  { %2848 = vst.msk [vmem:[#allocation3 + $0xc] sm:$0x1] %vm2050_vm3, %v2847_v48  ;;  %2513 = vrot.lane.b32.xlu0 %v2512_v38, %s5290_s29  ;;  %4864 = vmatprep.subr.bf16.mxu0 %v5216_v25  ;;  %v2841_v9 = vrot.slane %v2834_v32, %v6033_v63  ;;  %v2776_v26 = vcombine.high %v2775_v33, %v2775_v33  ;;  %v5222_v25 = vld [vmem:[%s6524_s3 + $0xd0] sm:$0xff]   ;;  %v5221_v27 = vld [vmem:[%s6524_s3 + $0x208] sm:$0xff]   ;;  %v5226_v32 = vld [vmem:[%s6524_s3 + $0xd8] sm:$0xff]  }
 0x1db   :  { %v5225_v33 = vld [vmem:[%s6524_s3 + $0x210] sm:$0xff]  }
 0x1dc   :  { %2579 = vrot.lane.b32.xlu1 %v2578_v41, %s5290_s29  ;;  %v2842_v36 = vcombine.high %v2841_v9, %v2841_v9  ;;  %v5228_v9 = vld [vmem:[%s6524_s3 + $0x258] sm:$0xff]  }
 0x1de   :  { %2602 = vrot.lane.b32.xlu0 %v2601_v58, %s5288_s25 }
 0x1e0   :  { %2668 = vrot.lane.b32.xlu1 %v2667_v54, %s5288_s25 }
 0x1e2   :  { %2623 = vrot.lane.b32.xlu0 %v2622_v5, %s5289_s28 }
 0x1e4   :  { %2689 = vrot.lane.b32.xlu1 %v2688_v10, %s5289_s28 }
 0x1e6   :  { %2645 = vrot.lane.b32.xlu0 %v2644_v0, %s5290_s29 }
 0x1e8   :  { %2711 = vrot.lane.b32.xlu1 %v2710_v12, %s5290_s29  ;;  %v5220_v12 = vld [vmem:[%s6524_s3 + $0x248] sm:$0xff]  }
 0x1ea   :  { %2734 = vrot.lane.b32.xlu0 %v2733_v17, %s5288_s25 }
 0x1ec   :  { %2800 = vrot.lane.b32.xlu1 %v2799_v29, %s5288_s25  ;;  %v5224_v29 = vld [vmem:[%s6524_s3 + $0x250] sm:$0xff]  }
 0x1ee   :  { %2755 = vrot.lane.b32.xlu0 %v2754_v20, %s5289_s28 }
 0x1f0   :  { %2821 = vrot.lane.b32.xlu1 %v2820_v34, %s5289_s28  ;;  %v5227_v34 = vld [vmem:[%s6524_s3 + $0x98] sm:$0xff]  }
 0x1f2   :  { %2777 = vrot.lane.b32.xlu0 %v2776_v26, %s5290_s29  ;;  %v5230_v26 = vld [vmem:[%s6524_s3 + $0xe0] sm:$0xff]  }
 0x1f4   :  { %2843 = vrot.lane.b32.xlu1 %v2842_v36, %s5290_s29  ;;  %v5229_v36 = vld [vmem:[%s6524_s3 + $0x218] sm:$0xff]  }
 0x220   :  { %v2072_v39 = vpop.permute.xlu0 %2071 }
 0x221   :  { %2075 = vst.msk [vmem:[#allocation3] sm:$0x1] %vm2074_vm4, %v2072_v39  ;;  %v5231_v39 = vld [vmem:[%s6524_s3 + $0xa0] sm:$0xff]  }
 0x222   :  { %v2162_v31 = vpop.permute.xlu1 %2161 }
 0x224   :  { %v2094_v42 = vpop.permute.xlu0 %2093 }
 0x225   :  { %2097 = vst.msk [vmem:[#allocation3] sm:$0x1] %vm2096_vm5, %v2094_v42  ;;  %v5234_v42 = vld [vmem:[%s6524_s3 + $0xe8] sm:$0xff]  }
 0x226   :  { %v2184_v43 = vpop.permute.xlu1 %2183 }
 0x228   :  { %v2141_v18 = vpop.permute.xlu0 %2140 }
 0x229   :  { %2143 = vst.msk [vmem:[#allocation3 + $0x1] sm:$0x1] %vm2074_vm4, %v2141_v18 }
 0x22a   :  { %2164 = vst.msk [vmem:[#allocation3 + $0x1] sm:$0x1] %vm2096_vm5, %v2162_v31  ;;  %v2207_v38 = vpop.permute.xlu1 %2206  ;;  %v5232_v31 = vld [vmem:[%s6524_s3 + $0x260] sm:$0xff]  }
 0x22b   :  { %2186 = vst.msk [vmem:[#allocation3 + $0x1] sm:$0x1] %vm2119_vm6, %v2184_v43  ;;  %v5233_v43 = vld [vmem:[%s6524_s3 + $0x220] sm:$0xff]  }
 0x22c   :  { %2209 = vst.msk [vmem:[#allocation3 + $0x2] sm:$0x1] %vm2074_vm4, %v2207_v38  ;;  %v2117_v37 = vpop.permute.xlu0 %2116  ;;  %v5235_v38 = vld [vmem:[%s6524_s3 + $0xa8] sm:$0xff]  }
 0x22d   :  { %2120 = vst.msk [vmem:[#allocation3] sm:$0x1] %vm2119_vm6, %v2117_v37  ;;  %v5236_v37 = vld [vmem:[%s6524_s3 + $0x268] sm:$0xff]  }
 0x22e   :  { %v2273_v45 = vpop.permute.xlu1 %2272 }
 0x22f   :  { %2275 = vst.msk [vmem:[#allocation3 + $0x3] sm:$0x1] %vm2074_vm4, %v2273_v45 }
 0x230   :  { %v2228_v47 = vpop.permute.xlu0 %2227 }
 0x231   :  { %2230 = vst.msk [vmem:[#allocation3 + $0x2] sm:$0x1] %vm2096_vm5, %v2228_v47  ;;  %v5238_v47 = vld [vmem:[%s6524_s3 + $0xf0] sm:$0xff]  }
 0x232   :  { %v2294_v48 = vpop.permute.xlu1 %2293 }
 0x233   :  { %2296 = vst.msk [vmem:[#allocation3 + $0x3] sm:$0x1] %vm2096_vm5, %v2294_v48 }
 0x234   :  { %v2250_v50 = vpop.permute.xlu0 %2249 }
 0x235   :  { %2252 = vst.msk [vmem:[#allocation3 + $0x2] sm:$0x1] %vm2119_vm6, %v2250_v50  ;;  %v5237_v50 = vld [vmem:[%s6524_s3 + $0x228] sm:$0xff]  }
 0x236   :  { %v2316_v40 = vpop.permute.xlu1 %2315 }
 0x237   :  { %2318 = vst.msk [vmem:[#allocation3 + $0x3] sm:$0x1] %vm2119_vm6, %v2316_v40 }
 0x238   :  { %v2339_v53 = vpop.permute.xlu0 %2338 }
 0x239   :  { %2341 = vst.msk [vmem:[#allocation3 + $0x4] sm:$0x1] %vm2074_vm4, %v2339_v53  ;;  %v5240_v53 = vld [vmem:[%s6524_s3 + $0xb0] sm:$0xff]  }
 0x23a   :  { %v2405_v41 = vpop.permute.xlu1 %2404 }
 0x23b   :  { %2407 = vst.msk [vmem:[#allocation3 + $0x5] sm:$0x1] %vm2074_vm4, %v2405_v41  ;;  %v5241_v41 = vld [vmem:[%s6524_s3 + $0x270] sm:$0xff]  }
 0x23c   :  { %v2360_v46 = vpop.permute.xlu0 %2359 }
 0x23d   :  { %2362 = vst.msk [vmem:[#allocation3 + $0x4] sm:$0x1] %vm2096_vm5, %v2360_v46  ;;  %v5243_v46 = vld [vmem:[%s6524_s3 + $0xf8] sm:$0xff]  }
 0x23e   :  { %v2426_v44 = vpop.permute.xlu1 %2425 }
 0x23f   :  { %2428 = vst.msk [vmem:[#allocation3 + $0x5] sm:$0x1] %vm2096_vm5, %v2426_v44  ;;  %v5242_v44 = vld [vmem:[%s6524_s3 + $0x230] sm:$0xff]  }
 0x240   :  { %v2382_v56 = vpop.permute.xlu0 %2381 }
 0x241   :  { %2384 = vst.msk [vmem:[#allocation3 + $0x4] sm:$0x1] %vm2119_vm6, %v2382_v56  ;;  %v5244_v56 = vld [vmem:[%s6524_s3 + $0xb8] sm:$0xff]  }
 0x242   :  { %v2448_v51 = vpop.permute.xlu1 %2447 }
 0x243   :  { %2450 = vst.msk [vmem:[#allocation3 + $0x5] sm:$0x1] %vm2119_vm6, %v2448_v51  ;;  %v5245_v51 = vld [vmem:[%s6524_s3 + $0x278] sm:$0xff]  }
 0x244   :  { %v2471_v58 = vpop.permute.xlu0 %2470 }
 0x245   :  { %2473 = vst.msk [vmem:[#allocation3 + $0x6] sm:$0x1] %vm2074_vm4, %v2471_v58  ;;  %v5247_v58 = vld [vmem:[%s6524_s3 + $0x1c0] sm:$0xff]  }
 0x246   :  { %v2537_v49 = vpop.permute.xlu1 %2536 }
 0x247   :  { %2539 = vst.msk [vmem:[#allocation3 + $0x7] sm:$0x1] %vm2074_vm4, %v2537_v49  ;;  %v5246_v49 = vld [vmem:[%s6524_s3 + $0x238] sm:$0xff]  }
 0x248   :  { %v2492_v59 = vpop.permute.xlu0 %2491 }
 0x249   :  { %2494 = vst.msk [vmem:[#allocation3 + $0x6] sm:$0x1] %vm2096_vm5, %v2492_v59  ;;  %v5248_v59 = vld [vmem:[%s6524_s3 + $0x180] sm:$0xff]  }
 0x24a   :  { %v2558_v60 = vpop.permute.xlu1 %2557 }
 0x24b   :  { %2560 = vst.msk [vmem:[#allocation3 + $0x7] sm:$0x1] %vm2096_vm5, %v2558_v60 }
 0x24c   :  { %v2514_v55 = vpop.permute.xlu0 %2513 }
 0x24d   :  { %2516 = vst.msk [vmem:[#allocation3 + $0x6] sm:$0x1] %vm2119_vm6, %v2514_v55  ;;  %v5250_v55 = vld [vmem:[%s6524_s3 + $0x1c8] sm:$0xff]  }
 0x24e   :  { %v2580_v54 = vpop.permute.xlu1 %2579 }
 0x24f   :  { %2582 = vst.msk [vmem:[#allocation3 + $0x7] sm:$0x1] %vm2119_vm6, %v2580_v54 }
 0x250   :  { %v2603_v62 = vpop.permute.xlu0 %2602 }
 0x251   :  { %2605 = vst.msk [vmem:[#allocation3 + $0x8] sm:$0x1] %vm2074_vm4, %v2603_v62  ;;  %v5249_v62 = vld [vmem:[%s6524_s3 + $0x300] sm:$0xff]  }
 0x252   :  { %v2669_v28 = vpop.permute.xlu1 %2668 }
 0x253   :  { %2671 = vst.msk [vmem:[#allocation3 + $0x9] sm:$0x1] %vm2074_vm4, %v2669_v28 }
 0x254   :  { %v2624_v1 = vpop.permute.xlu0 %2623 }
 0x255   :  { %2626 = vst.msk [vmem:[#allocation3 + $0x8] sm:$0x1] %vm2096_vm5, %v2624_v1 }
 0x256   :  { %v2690_v4 = vpop.permute.xlu1 %2689  ;;  %v2849_v57 = vld [vmem:[#allocation3] sm:$0xff] }
 0x257   :  { %2692 = vst.msk [vmem:[#allocation3 + $0x9] sm:$0x1] %vm2096_vm5, %v2690_v4  ;;  %v3063_v5 = vrot.slane %v2849_v57, %v6033_v63  ;;  %v3056_v6 = vcombine.high %v2849_v57, %v2849_v57  ;;  %v5251_v4 = vld [vmem:[%s6524_s3 + $0x188] sm:$0xff]   ;;  %v5253_v57 = vld [vmem:[%s6524_s3 + $0x1d0] sm:$0xff]  }
 0x258   :  { %v2646_v3 = vpop.permute.xlu0 %2645 }
 0x259   :  { %2648 = vst.msk [vmem:[#allocation3 + $0x8] sm:$0x1] %vm2119_vm6, %v2646_v3  ;;  %v3071_v35 = vcombine.high %v3063_v5, %v3063_v5  ;;  %v3070_v8 = vrot.slane %v3056_v6, %v6033_v63  ;;  %v6277_v21 = vrot.slane %v3063_v5, %v6033_v63  ;;  %v5252_v5 = vld [vmem:[%s6524_s3 + $0x308] sm:$0xff]   ;;  %v5254_v3 = vld [vmem:[%s6524_s3 + $0x190] sm:$0xff]  }
 0x25a   :  { %v2712_v10 = vpop.permute.xlu1 %2711 }
 0x25b   :  { %2714 = vst.msk [vmem:[#allocation3 + $0x9] sm:$0x1] %vm2119_vm6, %v2712_v10  ;;  %v3093_v61 = vrot.slane %v3071_v35, %v6033_v63  ;;  %v3072_v13 = vcombine.high %v3070_v8, %v3070_v8  ;;  %v6292_v19 = vrot.slane %v3070_v8, %v6033_v63  ;;  %v3101_v60 = vcombine.high %v6277_v21, %v6277_v21  ;;  %v5255_v35 = vld [vmem:[%s6524_s3 + $0x1d8] sm:$0xff]  }
 0x25c   :  { %v2735_v2 = vpop.permute.xlu0 %2734  ;;  %v5256_v10 = vld [vmem:[%s6524_s3 + $0x198] sm:$0xff]  }
 0x25d   :  { %2737 = vst.msk [vmem:[#allocation3 + $0xa] sm:$0x1] %vm2074_vm4, %v2735_v2  ;;  %3779 = vmatprep.mubr.bf16.mxu1 %v3093_v61  ;;  %v3103_v0 = vcombine.high %v3093_v61, %v3093_v61  ;;  %v6284_v15 = vrot.slane %v3072_v13, %v6033_v63  ;;  %v5258_v61 = vld [vmem:[%s6524_s3 + $0x1a0] sm:$0xff]   ;;  %v5261_v13 = vld [vmem:[%s6524_s3 + $0x1f0] sm:$0xff]  }
 0x25e   :  { %v2801_v7 = vpop.permute.xlu1 %2800  ;;  %3780 = vmatmul.mubr.bf16.vlgmr.msra.gmra.mrb[84].mxu1 %v6277_v21  ;;  %v5262_v2 = vld [vmem:[%s6524_s3 + $0x1b0] sm:$0xff]   ;;  %v5263_v21 = vld [vmem:[%s6524_s3 + $0x1f8] sm:$0xff]  }
 0x25f   :  { %2803 = vst.msk [vmem:[#allocation3 + $0xb] sm:$0x1] %vm2074_vm4, %v2801_v7  ;;  %4799 = vmatpush3.bf16.msra.mxu1 %v5215_v11  ;;  %3819 = vmatprep.mubr.bf16.mxu1 %v3103_v0  ;;  %v3104_v54 = vcombine.high %v6284_v15, %v6284_v15  ;;  %v5260_v11 = vld [vmem:[%s6524_s3 + $0x1a8] sm:$0xff]   ;;  %v5265_v0 = vld [vmem:[%s6524_s3 + $0x2c0] sm:$0xff]   ;;  %v3102_v7 = vcombine.high %v6292_v19, %v6292_v19 }
 0x260   :  { %3859 = vmatprep.mubr.bf16.mxu0 %v6284_v15  ;;  %v2756_v24 = vpop.permute.xlu0 %2755  ;;  %4800 = vmatprep.subr.bf16.mxu1 %v5218_v14  ;;  %v5264_v14 = vld [vmem:[%s6524_s3 + $0x1b8] sm:$0xff]   ;;  %v5266_v15 = vld [vmem:[%s6524_s3 + $0x280] sm:$0xff]  }
 0x261   :  { %2758 = vst.msk [vmem:[#allocation3 + $0xa] sm:$0x1] %vm2096_vm5, %v2756_v24  ;;  %3860 = vmatmul.mubr.bf16.vlgmr.msra.gmra.mrb[112].mxu0 %v6292_v19  ;;  %v5269_v19 = vld [vmem:[%s6524_s3 + $0x2d0] sm:$0xff]  }
 0x262   :  { %4865 = vmatpush3.bf16.msra.mxu0 %v5217_v16  ;;  %v2822_v17 = vpop.permute.xlu1 %2821  ;;  %v5267_v16 = vld [vmem:[%s6524_s3 + $0x2c8] sm:$0xff]   ;;  %v5270_v24 = vld [vmem:[%s6524_s3 + $0x290] sm:$0xff]  }
 0x263   :  { %2824 = vst.msk [vmem:[#allocation3 + $0xb] sm:$0x1] %vm2096_vm5, %v2822_v17  ;;  %4801 = vmatpush3.bf16.msra.mxu1 %v5219_v22  ;;  %4866 = vmatprep.subr.bf16.mxu0 %v5220_v12  ;;  %v5268_v12 = vld [vmem:[%s6524_s3 + $0x288] sm:$0xff]   ;;  %v5272_v17 = vld [vmem:[%s6524_s3 + $0x298] sm:$0xff]  }
 0x264   :  { %v2778_v30 = vpop.permute.xlu0 %2777  ;;  %4802 = vmatprep.subr.bf16.mxu1 %v5222_v25  ;;  %v5271_v25 = vld [vmem:[%s6524_s3 + $0x2d8] sm:$0xff]  }
 0x265   :  { %2780 = vst.msk [vmem:[#allocation3 + $0xa] sm:$0x1] %vm2119_vm6, %v2778_v30  ;;  %v5276_v30 = vld [vmem:[%s6524_s3 + $0x2a8] sm:$0xff]  }
 0x266   :  { %4867 = vmatpush3.bf16.msra.mxu0 %v5221_v27  ;;  %v2844_v20 = vpop.permute.xlu1 %2843  ;;  %v5273_v27 = vld [vmem:[%s6524_s3 + $0x2e0] sm:$0xff]  }
 0x267   :  { %2846 = vst.msk [vmem:[#allocation3 + $0xb] sm:$0x1] %vm2119_vm6, %v2844_v20  ;;  %4803 = vmatpush3.bf16.msra.mxu1 %v5223_v52  ;;  %4868 = vmatprep.subr.bf16.mxu0 %v5224_v29  ;;  %v5274_v52 = vld [vmem:[%s6524_s3 + $0x2a0] sm:$0xff]   ;;  %v5275_v29 = vld [vmem:[%s6524_s3 + $0x2e8] sm:$0xff]   ;;  %v5278_v20 = vld [vmem:[%s6524_s3 + $0x2b0] sm:$0xff]  }
 0x268   :  { %4804 = vmatprep.subr.bf16.mxu1 %v5226_v32  ;;  %v5277_v32 = vld [vmem:[%s6524_s3 + $0x2f0] sm:$0xff]  }
 0x26a   :  { %4869 = vmatpush3.bf16.msra.mxu0 %v5225_v33  ;;  %v5279_v33 = vld [vmem:[%s6524_s3 + $0x2f8] sm:$0xff]  }
 0x26b   :  { %4805 = vmatpush3.bf16.msra.mxu1 %v5227_v34  ;;  %4870 = vmatprep.subr.bf16.mxu0 %v5228_v9  ;;  %v5280_v34 = vld [vmem:[%s6524_s3 + $0x2b8] sm:$0xff]  }
 0x26c   :  { %4806 = vmatprep.subr.bf16.mxu1 %v5230_v26  ;;  %v12_v26 = vstv %s6525_s6 }
 0x26d   :  { %13 = vst [vmem:[#allocation4] sm:$0x1] %v12_v26 }
 0x26e   :  { %4871 = vmatpush3.bf16.msra.mxu0 %v5229_v36  ;;  %v2850_v18 = vld [vmem:[#allocation3 + $0x8] sm:$0x1f] }
 0x26f   :  { %4807 = vmatpush3.bf16.msra.mxu1 %v5231_v39  ;;  %4872 = vmatprep.subr.bf16.mxu0 %v5232_v31  ;;  %v3112_v45 = vrot.slane %v2850_v18, %v6033_v63  ;;  %v3105_v28 = vcombine.high %v2850_v18, %v2850_v18 }
 0x270   :  { %4808 = vmatprep.subr.bf16.mxu1 %v5234_v42 }
 0x271   :  { %v3120_v48 = vcombine.high %v3112_v45, %v3112_v45  ;;  %v6403_v1 = vrot.slane %v3112_v45, %v6033_v63  ;;  %v3119_v6 = vrot.slane %v3105_v28, %v6033_v63 }
 0x272   :  { %4873 = vmatpush3.bf16.msra.mxu0 %v5233_v43 }
 0x273   :  { %4809 = vmatpush3.bf16.msra.mxu1 %v5235_v38  ;;  %4874 = vmatprep.subr.bf16.mxu0 %v5236_v37  ;;  %v6362_v40 = vrot.slane %v3120_v48, %v6033_v63  ;;  %v3134_v8 = vrot.slane %v3119_v6, %v6033_v63  ;;  %v5259_v63 = vld [vmem:[%s6524_s3 + $0x1e8] sm:$0xff]   ;;  %v3142_v9 = vcombine.high %v6403_v1, %v6403_v1  ;;  %v4304_v48 = vld [vmem:[%s6526_s4] ss:$0 sm:$0xff] }
 0x274   :  { %4810 = vmatprep.subr.bf16.mxu1 %v5238_v47 }
 0x275   :  { %3939 = vmatprep.mubr.bf16.mxu0 %v6362_v40  ;;  %v3143_v22 = vcombine.high %v6362_v40, %v6362_v40 }
 0x276   :  { %4875 = vmatpush3.bf16.msra.mxu0 %v5237_v50 }
 0x277   :  { %4811 = vmatpush3.bf16.msra.mxu1 %v5240_v53  ;;  %4876 = vmatprep.subr.bf16.mxu0 %v5241_v41 }
 0x278   :  { %4812 = vmatprep.subr.bf16.mxu1 %v5243_v46 }
 0x27a   :  { %4877 = vmatpush3.bf16.msra.mxu0 %v5242_v44 }
 0x27b   :  { %4813 = vmatpush3.bf16.msra.mxu1 %v5244_v56  ;;  %4878 = vmatprep.subr.bf16.mxu0 %v5245_v51 }
 0x27c   :  { %4842 = vmatprep.subr.bf16.mxu1 %v5247_v58 }
 0x27e   :  { %4879 = vmatpush3.bf16.msra.mxu0 %v5246_v49  ;;  %3820 = vmatmul.mubr.bf16.vlgmr.msra.gmra.mrb[88].mxu1 %v3101_v60 }
 0x27f   :  { %4843 = vmatpush3.bf16.msra.mxu1 %v5248_v59  ;;  %3899 = vmatprep.mubr.bf16.mxu1 %v3104_v54 }
 0x280   :  { %4943 = vmatprep.subr.bf16.mxu0 %v5285_v23  ;;  %4844 = vmatprep.subr.bf16.mxu1 %v5250_v55 }
 0x281   :  { %3940 = vmatmul.mubr.bf16.vlgmr.msra.gmra.mrb[116].mxu0 %v6403_v1 }
 0x282   :  { %4944 = vmatpush3.bf16.msra.mxu0 %v5249_v62  ;;  %4947 = vmatprep.mubr.msk.bf16.mxu0 %vm5286_vm0, %v5285_v23 }
 0x283   :  { %4845 = vmatpush3.bf16.msra.mxu1 %v5251_v4  ;;  %4945 = vmatprep.subr.bf16.mxu0 %v5285_v23  ;;  %v5257_v23 = vld [vmem:[%s6524_s3 + $0x1e0] sm:$0xff]  }
 0x284   :  { %4846 = vmatprep.subr.bf16.mxu1 %v5253_v57 }
 0x286   :  { %4946 = vmatpush3.bf16.msra.mxu0 %v5252_v5 }
 0x287   :  { %4847 = vmatpush3.bf16.msra.mxu1 %v5254_v3 }
 0x288   :  { %4848 = vmatprep.subr.bf16.mxu1 %v5255_v35 }
 0x289   :  { %4948 = vmatmul.mubr.msk.bf16.vlgmr.msra.gmra.mrb[120].mxu0 %vm1346_vm1, %v3134_v8 }
 0x28b   :  { %4849 = vmatpush3.bf16.msra.mxu1 %v5256_v10 }
 0x28c   :  { %4850 = vmatprep.subr.bf16.mxu1 %v5257_v23 }
 0x28f   :  { %4851 = vmatpush3.bf16.msra.mxu1 %v5258_v61 }
 0x290   :  { %4852 = vmatprep.subr.bf16.mxu1 %v5259_v63 }
 0x293   :  { %4853 = vmatpush3.bf16.msra.mxu1 %v5260_v11 }
 0x294   :  { %4854 = vmatprep.subr.bf16.mxu1 %v5261_v13 }
 0x297   :  { %4855 = vmatpush3.bf16.msra.mxu1 %v5262_v2  ;;  %v4404_v2 = vld [vmem:[%s6527_s5] ss:$0 sm:$0xff] }
 0x298   :  { %4856 = vmatprep.subr.bf16.mxu1 %v5263_v21 }
 0x29b   :  { %4857 = vmatpush3.bf16.msra.mxu1 %v5264_v14 }
 0x29c   :  { %4886 = vmatprep.subr.bf16.mxu1 %v5265_v0 }
 0x29e   :  { %3900 = vmatmul.mubr.bf16.vlgmr.msra.gmra.mrb[92].mxu1 %v3102_v7 }
 0x29f   :  { %4887 = vmatpush3.bf16.msra.mxu1 %v5266_v15  ;;  %3979 = vmatprep.mubr.bf16.mxu1 %v3143_v22  ;;  %v4405_v15 = vld [vmem:[#allocation4] ss:$0 sm:$0xff] }
 0x2a0   :  { %4888 = vmatprep.subr.bf16.mxu1 %v5267_v16 }
 0x2a3   :  { %4889 = vmatpush3.bf16.msra.mxu1 %v5268_v12 }
 0x2a4   :  { %4890 = vmatprep.subr.bf16.mxu1 %v5269_v19 }
 0x2a7   :  { %4891 = vmatpush3.bf16.msra.mxu1 %v5270_v24 }
 0x2a8   :  { %4892 = vmatprep.subr.bf16.mxu1 %v5271_v25 }
 0x2ab   :  { %4893 = vmatpush3.bf16.msra.mxu1 %v5272_v17 }
 0x2ac   :  { %4894 = vmatprep.subr.bf16.mxu1 %v5273_v27 }
 0x2af   :  { %4895 = vmatpush3.bf16.msra.mxu1 %v5274_v52 }
 0x2b0   :  { %4896 = vmatprep.subr.bf16.mxu1 %v5275_v29 }
 0x2b3   :  { %4897 = vmatpush3.bf16.msra.mxu1 %v5276_v30 }
 0x2b4   :  { %4898 = vmatprep.subr.bf16.mxu1 %v5277_v32 }
 0x2b7   :  { %4899 = vmatpush3.bf16.msra.mxu1 %v5278_v20 }
 0x2b8   :  { %4900 = vmatprep.subr.bf16.mxu1 %v5279_v33 }
 0x2bb   :  { %4901 = vmatpush3.bf16.msra.mxu1 %v5280_v34 }
 0x2be   :  { %3980 = vmatmul.mubr.bf16.vlgmr.msra.gmra.mrb[96].mxu1 %v3142_v9 }
 0x331   :  { %v4792_v36 = vpop.f32.mrb[84].mxu1 }
 0x332   :  { %v4793_v39 = vpop.f32.mrb[85].mxu1 }
 0x333   :  { %v4794_v31 = vadd.f32 %v4793_v39, %v4792_v36  ;;  %v4795_v42 = vpop.f32.mrb[86].mxu1 }
 0x334   :  { %v4836_v43 = vpop.f32.mrb[112].mxu0  ;;  %v4796_v18 = vpop.f32.mrb[87].mxu1 }
 0x335   :  { %v4837_v38 = vpop.f32.mrb[113].mxu0  ;;  %v3782_v53 = vadd.f32 %v4794_v31, %v4304_v48 }
 0x336   :  { %v4838_v37 = vadd.f32 %v4837_v38, %v4836_v43  ;;  %v4839_v45 = vpop.f32.mrb[114].mxu0 }
 0x337   :  { %v4840_v47 = vpop.f32.mrb[115].mxu0 }
 0x351   :  { %v4814_v50 = vpop.f32.mrb[88].mxu1 }
 0x352   :  { %v4815_v40 = vpop.f32.mrb[89].mxu1 }
 0x353   :  { %v4816_v41 = vadd.f32 %v4815_v40, %v4814_v50  ;;  %v4817_v46 = vpop.f32.mrb[90].mxu1 }
 0x354   :  { %v4880_v44 = vpop.f32.mrb[116].mxu0  ;;  %v4818_v56 = vpop.f32.mrb[91].mxu1 }
 0x355   :  { %v3822_v51 = vadd.f32 %v4816_v41, %v3782_v53  ;;  %v4881_v58 = vpop.f32.mrb[117].mxu0 }
 0x356   :  { %v4882_v49 = vadd.f32 %v4881_v58, %v4880_v44  ;;  %v4883_v59 = vpop.f32.mrb[118].mxu0 }
 0x357   :  { %v4884_v60 = vpop.f32.mrb[119].mxu0  ;;  %v3862_v55 = vadd.f32 %v4838_v37, %v3822_v51 }
 0x35c   :  { %v4021_v54 = vpop.f32.mrb[120].mxu0 }
 0x35d   :  { %v4949_v62 = vpop.f32.mrb[121].mxu0 }
 0x35e   :  { %v4024_v28 = vpop.f32.mrb[122].mxu0 }
 0x35f   :  { %v4950_v1 = vpop.f32.mrb[123].mxu0 }
 0x371   :  { %v4858_v4 = vpop.f32.mrb[92].mxu1 }
 0x372   :  { %v4859_v57 = vpop.f32.mrb[93].mxu1 }
 0x373   :  { %v4860_v5 = vadd.f32 %v4859_v57, %v4858_v4  ;;  %v4861_v6 = vpop.f32.mrb[94].mxu1 }
 0x374   :  { %v4862_v3 = vpop.f32.mrb[95].mxu1 }
 0x375   :  { %v3902_v35 = vadd.f32 %v4860_v5, %v3862_v55 }
 0x377   :  { %v3942_v8 = vadd.f32 %v4882_v49, %v3902_v35 }
 0x391   :  { %v4902_v10 = vpop.f32.mrb[96].mxu1 }
 0x392   :  { %v4903_v23 = vpop.f32.mrb[97].mxu1 }
 0x393   :  { %v4904_v61 = vadd.f32 %v4903_v23, %v4902_v10  ;;  %v4905_v63 = vpop.f32.mrb[98].mxu1 }
 0x394   :  { %v4906_v11 = vpop.f32.mrb[99].mxu1 }
 0x395   :  { %v3982_v13 = vadd.f32 %v4904_v61, %v3942_v8 }
 0x397   :  { %v4022_v21 = vadd.f32 %v4021_v54, %v3982_v13 }
 0x399   :  { %v4034_v14 = vmul.f32 %v4404_v2, %v4022_v21 }
 0x39b   :  { %v4036_v0 = vsel %vm4035_vm7, %v4034_v14, 0.0 }
 0x39c   :  { %4037 = vadd.xlane.f32.xlu0 %v4036_v0 }
 0x429   :  { %v4038_v7 = vpop.xlane.xlu0 %4037 }
 0x42a   :  { %v4046_v16 = vadd.f32 %v4405_v15, %v4038_v7 }
 0x42c   :  { %v4047_v22 = vsub.f32 0.0, %v4046_v16 }
 0x42e   :  { %v4048_v12 = vmul.f32 1.442695, %v4047_v22 }
 0x430   :  { %5281 = vpow2.f32 %v4048_v12 }
 0x43a   :  { %v5282_v19 = vpop.eup %5281 }
 0x43b   :  { %v4050_v24 = vadd.f32 1.0, %v5282_v19 }
 0x43d   :  { %5283 = vrcp.f32 %v4050_v24 }
 0x447   :  { %v5284_v25 = vpop.eup %5283 }
 0x448   :  { %4053 = vst.msk [vmem:[%s6528_s7] sm:$0x3] %vm4052_vm8, %v5284_v25 }

</bundles_post_ra>
